<compile_context>
chip_gen: v7x
topology: tpu7x:2x2x1
jax: 0.10.0
libtpu: 0.0.40
codegen_flags: <defaults>
</compile_context>

<pallas_src>
import functools

import jax
import jax.numpy as jnp
from jax.experimental import pallas as pl
from jax.experimental.pallas import tpu as pltpu


def _round_up(x, m):
    return ((x + m - 1) // m) * m


_VMEM_LIMIT = 48 * 1024 * 1024  # headroom on v7x's 64 MiB VMEM per TensorCore


# ----------------------------- Pallas kernels ------------------------------ #

def _mm_kernel(a_ref, b_ref, t_ref, o_ref, acc_ref, *, relu):
    """out = A @ B + bias [+ ReLU], accumulated over the K grid axis."""

    @pl.when(pl.program_id(2) == 0)
    def _():
        acc_ref[...] = jnp.zeros_like(acc_ref)

    acc_ref[...] += jnp.dot(a_ref[...], b_ref[...],
                            preferred_element_type=jnp.float32)

    @pl.when(pl.program_id(2) == pl.num_programs(2) - 1)
    def _():
        out = acc_ref[...] + t_ref[...]
        if relu:
            out = jnp.maximum(out, 0.0)
        o_ref[...] = out


def _mm_res_kernel(a_ref, b_ref, t_ref, r_ref, o_ref, acc_ref, *, relu):
    """out = A @ B + bias + residual [+ ReLU] (bottleneck final conv)."""

    @pl.when(pl.program_id(2) == 0)
    def _():
        acc_ref[...] = jnp.zeros_like(acc_ref)

    acc_ref[...] += jnp.dot(a_ref[...], b_ref[...],
                            preferred_element_type=jnp.float32)

    @pl.when(pl.program_id(2) == pl.num_programs(2) - 1)
    def _():
        out = acc_ref[...] + t_ref[...] + r_ref[...]
        if relu:
            out = jnp.maximum(out, 0.0)
        o_ref[...] = out


def _head_kernel(h_ref, w1_ref, b1_ref, w2_ref, b2_ref, fc1_ref, fc2n_ref):
    """Fused AdaptiveAvgPool2d(1) + fc_1(+ReLU) + fc_2 + L2-normalize tail."""
    feat = jnp.mean(h_ref[...], axis=1)                      # (N, 2048), f32
    x1 = jnp.dot(feat.astype(jnp.bfloat16), w1_ref[...],
                 preferred_element_type=jnp.float32) + b1_ref[...]
    x1 = jnp.maximum(x1, 0.0)
    fc1_ref[...] = x1
    x2 = jnp.dot(x1.astype(jnp.bfloat16), w2_ref[...],
                 preferred_element_type=jnp.float32) + b2_ref[...]
    ss = jnp.sum(x2 * x2, axis=1, keepdims=True)
    # F.normalize(p=2, dim=1): x / max(||x||, 1e-12) == x * rsqrt(max(ss, 1e-24))
    fc2n_ref[...] = x2 * jax.lax.rsqrt(jnp.maximum(ss, 1e-24))


# --------------------------- tiled fused matmul ----------------------------- #

_DEF_TM, _DEF_TN, _DEF_TK = 256, 256, 256


def fused_matmul(a, b, bias, *, relu, res=None,
                 tm=_DEF_TM, tn=_DEF_TN, tk=_DEF_TK):
    """out[:m, :n] = act(A @ B + bias [+ res]); bf16 MXU operands, f32 epilogue."""
    m, k = a.shape
    n = b.shape[1]

    tile_m = min(tm, _round_up(m, 8))
    mp = _round_up(m, tile_m)

    np_ = _round_up(n, 128)
    tile_n = min(tn, np_)
    if np_ % tile_n:
        tile_n = 128
    np_ = _round_up(np_, tile_n)

    kp = _round_up(k, 128)
    tile_k = min(tk, kp)
    if kp % tile_k:
        tile_k = 128
    kp = _round_up(kp, tile_k)

    a_p = jnp.pad(a.astype(jnp.bfloat16), ((0, mp - m), (0, kp - k)))
    b_p = jnp.pad(b.astype(jnp.bfloat16), ((0, kp - k), (0, np_ - n)))
    t_p = jnp.pad(bias.astype(jnp.float32), (0, np_ - n)).reshape(1, np_)

    in_specs = [
        pl.BlockSpec((tile_m, tile_k), lambda i, j, kk: (i, kk)),
        pl.BlockSpec((tile_k, tile_n), lambda i, j, kk: (kk, j)),
        pl.BlockSpec((1, tile_n), lambda i, j, kk: (0, j)),
    ]
    operands = [a_p, b_p, t_p]
    if res is None:
        kernel = functools.partial(_mm_kernel, relu=relu)
    else:
        kernel = functools.partial(_mm_res_kernel, relu=relu)
        r_p = jnp.pad(res.astype(jnp.float32), ((0, mp - m), (0, np_ - n)))
        in_specs.append(pl.BlockSpec((tile_m, tile_n), lambda i, j, kk: (i, j)))
        operands.append(r_p)

    bytes_accessed = (mp * kp + kp * np_) * 2 + mp * np_ * 4 + np_ * 4
    if res is not None:
        bytes_accessed += mp * np_ * 4
    cost = pl.CostEstimate(flops=2 * mp * np_ * kp, transcendentals=0,
                           bytes_accessed=bytes_accessed)

    out = pl.pallas_call(
        kernel,
        out_shape=jax.ShapeDtypeStruct((mp, np_), jnp.float32),
        grid_spec=pltpu.PrefetchScalarGridSpec(
            num_scalar_prefetch=0,
            grid=(mp // tile_m, np_ // tile_n, kp // tile_k),
            in_specs=in_specs,
            out_specs=pl.BlockSpec((tile_m, tile_n), lambda i, j, kk: (i, j)),
            scratch_shapes=[pltpu.VMEM((tile_m, tile_n), jnp.float32)],
        ),
        compiler_params=pltpu.CompilerParams(
            dimension_semantics=("parallel", "parallel", "arbitrary"),
            vmem_limit_bytes=_VMEM_LIMIT),
        cost_estimate=cost,
    )(*operands)
    return out[:m, :n]


def head_fc(h, fc1_w, fc1_b, fc2_w, fc2_b):
    """Fused avgpool + fc_1 + fc_2 + L2-normalize (single pallas_call)."""
    n, hh, ww, c = h.shape
    embed, fea = fc1_w.shape[0], fc2_w.shape[0]
    ep, fp = _round_up(embed, 128), _round_up(fea, 128)

    hf = h.reshape(n, hh * ww, c)
    w1 = jnp.pad(fc1_w.T, ((0, 0), (0, ep - embed))).astype(jnp.bfloat16)
    b1 = jnp.pad(fc1_b, (0, ep - embed)).reshape(1, ep).astype(jnp.float32)
    w2 = jnp.pad(fc2_w.T, ((0, ep - embed), (0, fp - fea))).astype(jnp.bfloat16)
    b2 = jnp.pad(fc2_b, (0, fp - fea)).reshape(1, fp).astype(jnp.float32)

    fc1_p, fc2n_p = pl.pallas_call(
        _head_kernel,
        out_shape=(jax.ShapeDtypeStruct((n, ep), jnp.float32),
                   jax.ShapeDtypeStruct((n, fp), jnp.float32)),
        compiler_params=pltpu.CompilerParams(vmem_limit_bytes=_VMEM_LIMIT),
    )(hf, w1, b1, w2, b2)
    return fc1_p[:, :embed], fc2n_p[:, :fea]


# ------------------------------- JAX glue ---------------------------------- #

def _im2col_nhwc(x, kh, kw, stride, pad):
    """NHWC -> (N*Ho*Wo, kh*kw*C) patches; feature order = (kh, kw, C)."""
    n, h, w, c = x.shape
    ho = (h + 2 * pad - kh) // stride + 1
    wo = (w + 2 * pad - kw) // stride + 1
    xp = jnp.pad(x, ((0, 0), (pad, pad), (pad, pad), (0, 0)))
    cols = []
    for i in range(kh):
        for j in range(kw):
            cols.append(xp[:, i:i + stride * ho:stride,
                           j:j + stride * wo:stride, :])
    patches = jnp.concatenate(cols, axis=3)
    return patches.reshape(n * ho * wo, kh * kw * c), ho, wo


def conv_bn(x, w, bn, *, stride, pad, relu, res=None):
    """Conv2d(bias=False) + BN(eval) [+ residual] [+ ReLU], NHWC activations."""
    n = x.shape[0]
    cout, cin, kh, kw = w.shape
    if kh == 1 and kw == 1:
        xs = x[:, ::stride, ::stride, :] if stride > 1 else x
        ho, wo = xs.shape[1], xs.shape[2]
        a = xs.reshape(n * ho * wo, cin)
        wmat = w.reshape(cout, cin).T                         # (cin, cout)
    else:
        # TODO(synk): 3x3/7x7 patches are still materialized in HBM via im2col;
        # an in-kernel tap accumulation (grid axis over kh*kw shifted windows)
        # would keep the kh*kw blow-up in VMEM only.
        a, ho, wo = _im2col_nhwc(x, kh, kw, stride, pad)
        wmat = w.transpose(2, 3, 1, 0).reshape(kh * kw * cin, cout)
    # Eval-mode BN folded into the matmul: scale into weights, bias kept.
    inv = bn["gamma"] * jax.lax.rsqrt(bn["var"] + 1e-5)
    bias = bn["beta"] - bn["mean"] * inv
    wmat = wmat * inv[None, :]
    res2 = None if res is None else res.reshape(n * ho * wo, cout)
    out = fused_matmul(a, wmat, bias, relu=relu, res=res2)
    return out.reshape(n, ho, wo, cout)


def maxpool_3x3_s2(x):
    # TODO(synk): maxpool kept in plain JAX (single cheap op; lax.reduce_window).
    return jax.lax.reduce_window(
        x, -jnp.inf, jax.lax.max,
        window_dimensions=(1, 3, 3, 1),
        window_strides=(1, 2, 2, 1),
        padding=((0, 0), (1, 1), (1, 1), (0, 0)))


# --------------------------- parameter creation ----------------------------- #

_LAYER_CFG = [(64, 3, 1), (128, 4, 2), (256, 6, 2), (512, 3, 2)]  # ResNet-50


def _conv_w(key, cout, cin, kh, kw):
    fan_in = cin * kh * kw
    return jax.random.normal(key, (cout, cin, kh, kw), jnp.float32) / jnp.sqrt(
        jnp.float32(fan_in))


def _bn_params(key, c):
    k1, k2 = jax.random.split(key)
    return dict(
        gamma=1.0 + 0.05 * jax.random.normal(k1, (c,), jnp.float32),
        beta=0.05 * jax.random.normal(k2, (c,), jnp.float32),
        mean=jnp.zeros((c,), jnp.float32),
        var=jnp.ones((c,), jnp.float32),
    )


def init_params(key, embed_size, fea_size):
    keys = iter(jax.random.split(key, 512))
    params = {}
    params["conv1_w"] = _conv_w(next(keys), 64, 3, 7, 7)
    params["bn1"] = _bn_params(next(keys), 64)
    layers = []
    inplanes = 64
    for planes, nblocks, stride in _LAYER_CFG:
        blocks = []
        for bi in range(nblocks):
            s = stride if bi == 0 else 1
            blk = {
                "conv1_w": _conv_w(next(keys), planes, inplanes, 1, 1),
                "bn1": _bn_params(next(keys), planes),
                "conv2_w": _conv_w(next(keys), planes, planes, 3, 3),
                "bn2": _bn_params(next(keys), planes),
                "conv3_w": _conv_w(next(keys), planes * 4, planes, 1, 1),
                "bn3": _bn_params(next(keys), planes * 4),
            }
            if s != 1 or inplanes != planes * 4:
                blk["ds_w"] = _conv_w(next(keys), planes * 4, inplanes, 1, 1)
                blk["ds_bn"] = _bn_params(next(keys), planes * 4)
            blocks.append(blk)
            inplanes = planes * 4
        layers.append(blocks)
    params["layers"] = layers
    # Linear layers: nn.init.normal_(w, 0, 0.01), bias = 0 (as in the module).
    params["fc1_w"] = 0.01 * jax.random.normal(next(keys), (embed_size, 2048), jnp.float32)
    params["fc1_b"] = jnp.zeros((embed_size,), jnp.float32)
    params["fc2_w"] = 0.01 * jax.random.normal(next(keys), (fea_size, embed_size), jnp.float32)
    params["fc2_b"] = jnp.zeros((fea_size,), jnp.float32)
    return params


# ------------------------------ forward pass -------------------------------- #

def multicom_res50_forward(params, x):
    # x: NCHW f32 (PyTorch convention). Transpose ONCE to NHWC, then NHWC
    # end-to-end (no per-layer layout shuffles).
    h = jnp.transpose(x, (0, 2, 3, 1))
    h = conv_bn(h, params["conv1_w"], params["bn1"], stride=2, pad=3, relu=True)
    h = maxpool_3x3_s2(h)
    for li, (planes, nblocks, stride) in enumerate(_LAYER_CFG):
        for bi in range(nblocks):
            blk = params["layers"][li][bi]
            s = stride if bi == 0 else 1
            if "ds_w" in blk:
                identity = conv_bn(h, blk["ds_w"], blk["ds_bn"],
                                   stride=s, pad=0, relu=False)
            else:
                identity = h
            o = conv_bn(h, blk["conv1_w"], blk["bn1"], stride=1, pad=0, relu=True)
            o = conv_bn(o, blk["conv2_w"], blk["bn2"], stride=s, pad=1, relu=True)
            h = conv_bn(o, blk["conv3_w"], blk["bn3"], stride=1, pad=0,
                        relu=True, res=identity)
    # Fused tail: AdaptiveAvgPool2d(1) + Flatten + fc_1(+ReLU) + fc_2 + L2 norm.
    fc1, fc2_norm = head_fc(h, params["fc1_w"], params["fc1_b"],
                            params["fc2_w"], params["fc2_b"])
    return fc1, fc2_norm


# ---------------------------------- main ------------------------------------ #

if __name__ == "__main__":
    key = jax.random.PRNGKey(0)
    k_params, k_x = jax.random.split(key)

    embed_size = 64
    fea_size = 128
    # Small input that flows through the full ResNet-50 stride-32 encoder.
    x = jax.random.normal(k_x, (2, 3, 32, 32), jnp.float32)

    params = init_params(k_params, embed_size, fea_size)

    fwd = jax.jit(multicom_res50_forward)
    fc1, fc2_norm = fwd(params, x)
    jax.block_until_ready((fc1, fc2_norm))

    assert fc1.shape == (2, embed_size)
    assert fc2_norm.shape == (2, fea_size)
    assert bool(jnp.all(jnp.isfinite(fc1))) and bool(jnp.all(jnp.isfinite(fc2_norm)))
    print("KERNEL_OK")
</pallas_src>

<mosaic_0001>
module attributes {stable_mosaic.version = 11 : i64} {
  func.func @_mm_kernel(%arg0: i32, %arg1: i32, %arg2: i32, %arg3: memref<256x256xbf16, #tpu.memory_space<vmem>>, %arg4: memref<256x128xbf16, #tpu.memory_space<vmem>>, %arg5: memref<1x128xf32, #tpu.memory_space<vmem>>, %arg6: memref<256x128xf32, #tpu.memory_space<vmem>>, %arg7: memref<256x128xf32, #tpu.memory_space<vmem>>) attributes {dimension_semantics = [#tpu.dimension_semantics<parallel>, #tpu.dimension_semantics<parallel>, #tpu.dimension_semantics<arbitrary>], iteration_bounds = array<i64: 2, 1, 1>, scalar_prefetch = 0 : i64, scratch_operands = 1 : i64, tpu.core_type = #tpu.core_type<tc>, window_params = [{transform_indices = @transform_0, window_bounds = array<i64: 256, 256>}, {transform_indices = @transform_1, window_bounds = array<i64: 256, 128>}, {transform_indices = @transform_2, window_bounds = array<i64: 1, 128>}, {transform_indices = @transform_3, window_bounds = array<i64: 256, 128>}]} {
    %c0_i32 = arith.constant 0 : i32
    %0 = arith.cmpi eq, %arg2, %c0_i32 : i32
    %1 = arith.extui %0 : i1 to i32
    %c0_i32_0 = arith.constant 0 : i32
    %2 = arith.cmpi ne, %1, %c0_i32_0 : i32
    scf.if %2 {
      %cst_10 = arith.constant 0.000000e+00 : f32
      %12 = vector.broadcast %cst_10 : f32 to vector<256x128xf32>
      %c0_11 = arith.constant 0 : index
      %c0_12 = arith.constant 0 : index
      %13 = vector.load %arg7[%c0_11, %c0_12] : memref<256x128xf32, #tpu.memory_space<vmem>>, vector<256x128xf32>
      tpu.vector_store %arg7[%c0_11, %c0_12], %12 {strides = array<i32>} : memref<256x128xf32, #tpu.memory_space<vmem>>, vector<256x128xf32>,
    } else {
    }
    %c0 = arith.constant 0 : index
    %c0_1 = arith.constant 0 : index
    %3 = vector.load %arg7[%c0, %c0_1] : memref<256x128xf32, #tpu.memory_space<vmem>>, vector<256x128xf32>
    %c0_2 = arith.constant 0 : index
    %c0_3 = arith.constant 0 : index
    %4 = vector.load %arg3[%c0_2, %c0_3] : memref<256x256xbf16, #tpu.memory_space<vmem>>, vector<256x256xbf16>
    %c0_4 = arith.constant 0 : index
    %c0_5 = arith.constant 0 : index
    %5 = vector.load %arg4[%c0_4, %c0_5] : memref<256x128xbf16, #tpu.memory_space<vmem>>, vector<256x128xbf16>
    %cst = arith.constant dense<0.000000e+00> : vector<256x128xf32>
    %6 = tpu.matmul %4, %5, %cst {dimension_numbers = #tpu.dot_dimension_numbers<[1], [0], [0], [1], [0, 0, 1, 1], [], []>} : vector<256x256xbf16>, vector<256x128xbf16>, vector<256x128xf32> -> vector<256x128xf32>
    %7 = arith.addf %3, %6 : vector<256x128xf32>
    %c0_6 = arith.constant 0 : index
    %c0_7 = arith.constant 0 : index
    %8 = vector.load %arg7[%c0_6, %c0_7] : memref<256x128xf32, #tpu.memory_space<vmem>>, vector<256x128xf32>
    tpu.vector_store %arg7[%c0_6, %c0_7], %7 {strides = array<i32>} : memref<256x128xf32, #tpu.memory_space<vmem>>, vector<256x128xf32>,
    %c0_i32_8 = arith.constant 0 : i32
    %9 = arith.cmpi eq, %arg2, %c0_i32_8 : i32
    %10 = arith.extui %9 : i1 to i32
    %c0_i32_9 = arith.constant 0 : i32
    %11 = arith.cmpi ne, %10, %c0_i32_9 : i32
    scf.if %11 {
      %c0_10 = arith.constant 0 : index
      %c0_11 = arith.constant 0 : index
      %12 = vector.load %arg7[%c0_10, %c0_11] : memref<256x128xf32, #tpu.memory_space<vmem>>, vector<256x128xf32>
      %c0_12 = arith.constant 0 : index
      %c0_13 = arith.constant 0 : index
      %13 = vector.load %arg5[%c0_12, %c0_13] : memref<1x128xf32, #tpu.memory_space<vmem>>, vector<1x128xf32>
      %14 = vector.broadcast %13 : vector<1x128xf32> to vector<256x128xf32>
      %15 = arith.addf %12, %14 : vector<256x128xf32>
      %cst_14 = arith.constant 0.000000e+00 : f32
      %16 = vector.broadcast %cst_14 : f32 to vector<256x128xf32>
      %17 = arith.maximumf %15, %16 : vector<256x128xf32>
      %c0_15 = arith.constant 0 : index
      %c0_16 = arith.constant 0 : index
      %18 = vector.load %arg6[%c0_15, %c0_16] : memref<256x128xf32, #tpu.memory_space<vmem>>, vector<256x128xf32>
      tpu.vector_store %arg6[%c0_15, %c0_16], %17 {strides = array<i32>} : memref<256x128xf32, #tpu.memory_space<vmem>>, vector<256x128xf32>,
    } else {
    }
    return
  }
  func.func @transform_0(%arg0: i32, %arg1: i32, %arg2: i32) -> (i32, i32) {
    %c0_i32 = arith.constant 0 : i32
    return %arg0, %arg2 : i32, i32
  }
  func.func @transform_1(%arg0: i32, %arg1: i32, %arg2: i32) -> (i32, i32) {
    %c0_i32 = arith.constant 0 : i32
    return %arg2, %arg1 : i32, i32
  }
  func.func @transform_2(%arg0: i32, %arg1: i32, %arg2: i32) -> (i32, i32) {
    %c0_i32 = arith.constant 0 : i32
    %c0_i32_0 = arith.constant 0 : i32
    return %c0_i32, %arg1 : i32, i32
  }
  func.func @transform_3(%arg0: i32, %arg1: i32, %arg2: i32) -> (i32, i32) {
    %c0_i32 = arith.constant 0 : i32
    return %arg0, %arg1 : i32, i32
  }
}

module attributes {stable_mosaic.version = 11 : i64} {
  func.func @_mm_kernel(%arg0: i32, %arg1: i32, %arg2: i32, %arg3: memref<128x128xbf16, #tpu.memory_space<vmem>>, %arg4: memref<128x128xbf16, #tpu.memory_space<vmem>>, %arg5: memref<1x128xf32, #tpu.memory_space<vmem>>, %arg6: memref<128x128xf32, #tpu.memory_space<vmem>>, %arg7: memref<128x128xf32, #tpu.memory_space<vmem>>) attributes {dimension_semantics = [#tpu.dimension_semantics<parallel>, #tpu.dimension_semantics<parallel>, #tpu.dimension_semantics<arbitrary>], iteration_bounds = array<i64: 1, 1, 1>, scalar_prefetch = 0 : i64, scratch_operands = 1 : i64, tpu.core_type = #tpu.core_type<tc>, window_params = [{transform_indices = @transform_0, window_bounds = array<i64: 128, 128>}, {transform_indices = @transform_1, window_bounds = array<i64: 128, 128>}, {transform_indices = @transform_2, window_bounds = array<i64: 1, 128>}, {transform_indices = @transform_3, window_bounds = array<i64: 128, 128>}]} {
    %c0_i32 = arith.constant 0 : i32
    %0 = arith.cmpi eq, %arg2, %c0_i32 : i32
    %1 = arith.extui %0 : i1 to i32
    %c0_i32_0 = arith.constant 0 : i32
    %2 = arith.cmpi ne, %1, %c0_i32_0 : i32
    scf.if %2 {
      %cst_10 = arith.constant 0.000000e+00 : f32
      %12 = vector.broadcast %cst_10 : f32 to vector<128x128xf32>
      %c0_11 = arith.constant 0 : index
      %c0_12 = arith.constant 0 : index
      %13 = vector.load %arg7[%c0_11, %c0_12] : memref<128x128xf32, #tpu.memory_space<vmem>>, vector<128x128xf32>
      tpu.vector_store %arg7[%c0_11, %c0_12], %12 {strides = array<i32>} : memref<128x128xf32, #tpu.memory_space<vmem>>, vector<128x128xf32>,
    } else {
    }
    %c0 = arith.constant 0 : index
    %c0_1 = arith.constant 0 : index
    %3 = vector.load %arg7[%c0, %c0_1] : memref<128x128xf32, #tpu.memory_space<vmem>>, vector<128x128xf32>
    %c0_2 = arith.constant 0 : index
    %c0_3 = arith.constant 0 : index
    %4 = vector.load %arg3[%c0_2, %c0_3] : memref<128x128xbf16, #tpu.memory_space<vmem>>, vector<128x128xbf16>
    %c0_4 = arith.constant 0 : index
    %c0_5 = arith.constant 0 : index
    %5 = vector.load %arg4[%c0_4, %c0_5] : memref<128x128xbf16, #tpu.memory_space<vmem>>, vector<128x128xbf16>
    %cst = arith.constant dense<0.000000e+00> : vector<128x128xf32>
    %6 = tpu.matmul %4, %5, %cst {dimension_numbers = #tpu.dot_dimension_numbers<[1], [0], [0], [1], [0, 0, 1, 1], [], []>} : vector<128x128xbf16>, vector<128x128xbf16>, vector<128x128xf32> -> vector<128x128xf32>
    %7 = arith.addf %3, %6 : vector<128x128xf32>
    %c0_6 = arith.constant 0 : index
    %c0_7 = arith.constant 0 : index
    %8 = vector.load %arg7[%c0_6, %c0_7] : memref<128x128xf32, #tpu.memory_space<vmem>>, vector<128x128xf32>
    tpu.vector_store %arg7[%c0_6, %c0_7], %7 {strides = array<i32>} : memref<128x128xf32, #tpu.memory_space<vmem>>, vector<128x128xf32>,
    %c0_i32_8 = arith.constant 0 : i32
    %9 = arith.cmpi eq, %arg2, %c0_i32_8 : i32
    %10 = arith.extui %9 : i1 to i32
    %c0_i32_9 = arith.constant 0 : i32
    %11 = arith.cmpi ne, %10, %c0_i32_9 : i32
    scf.if %11 {
      %c0_10 = arith.constant 0 : index
      %c0_11 = arith.constant 0 : index
      %12 = vector.load %arg7[%c0_10, %c0_11] : memref<128x128xf32, #tpu.memory_space<vmem>>, vector<128x128xf32>
      %c0_12 = arith.constant 0 : index
      %c0_13 = arith.constant 0 : index
      %13 = vector.load %arg5[%c0_12, %c0_13] : memref<1x128xf32, #tpu.memory_space<vmem>>, vector<1x128xf32>
      %14 = vector.broadcast %13 : vector<1x128xf32> to vector<128x128xf32>
      %15 = arith.addf %12, %14 : vector<128x128xf32>
      %cst_14 = arith.constant 0.000000e+00 : f32
      %16 = vector.broadcast %cst_14 : f32 to vector<128x128xf32>
      %17 = arith.maximumf %15, %16 : vector<128x128xf32>
      %c0_15 = arith.constant 0 : index
      %c0_16 = arith.constant 0 : index
      %18 = vector.load %arg6[%c0_15, %c0_16] : memref<128x128xf32, #tpu.memory_space<vmem>>, vector<128x128xf32>
      tpu.vector_store %arg6[%c0_15, %c0_16], %17 {strides = array<i32>} : memref<128x128xf32, #tpu.memory_space<vmem>>, vector<128x128xf32>,
    } else {
    }
    return
  }
  func.func @transform_0(%arg0: i32, %arg1: i32, %arg2: i32) -> (i32, i32) {
    %c0_i32 = arith.constant 0 : i32
    return %arg0, %arg2 : i32, i32
  }
  func.func @transform_1(%arg0: i32, %arg1: i32, %arg2: i32) -> (i32, i32) {
    %c0_i32 = arith.constant 0 : i32
    return %arg2, %arg1 : i32, i32
  }
  func.func @transform_2(%arg0: i32, %arg1: i32, %arg2: i32) -> (i32, i32) {
    %c0_i32 = arith.constant 0 : i32
    %c0_i32_0 = arith.constant 0 : i32
    return %c0_i32, %arg1 : i32, i32
  }
  func.func @transform_3(%arg0: i32, %arg1: i32, %arg2: i32) -> (i32, i32) {
    %c0_i32 = arith.constant 0 : i32
    return %arg0, %arg1 : i32, i32
  }
}

module attributes {stable_mosaic.version = 11 : i64} {
  func.func @_mm_kernel(%arg0: i32, %arg1: i32, %arg2: i32, %arg3: memref<128x128xbf16, #tpu.memory_space<vmem>>, %arg4: memref<128x128xbf16, #tpu.memory_space<vmem>>, %arg5: memref<1x128xf32, #tpu.memory_space<vmem>>, %arg6: memref<128x128xf32, #tpu.memory_space<vmem>>, %arg7: memref<128x128xf32, #tpu.memory_space<vmem>>) attributes {dimension_semantics = [#tpu.dimension_semantics<parallel>, #tpu.dimension_semantics<parallel>, #tpu.dimension_semantics<arbitrary>], iteration_bounds = array<i64: 1, 1, 5>, scalar_prefetch = 0 : i64, scratch_operands = 1 : i64, tpu.core_type = #tpu.core_type<tc>, window_params = [{transform_indices = @transform_0, window_bounds = array<i64: 128, 128>}, {transform_indices = @transform_1, window_bounds = array<i64: 128, 128>}, {transform_indices = @transform_2, window_bounds = array<i64: 1, 128>}, {transform_indices = @transform_3, window_bounds = array<i64: 128, 128>}]} {
    %c0_i32 = arith.constant 0 : i32
    %0 = arith.cmpi eq, %arg2, %c0_i32 : i32
    %1 = arith.extui %0 : i1 to i32
    %c0_i32_0 = arith.constant 0 : i32
    %2 = arith.cmpi ne, %1, %c0_i32_0 : i32
    scf.if %2 {
      %cst_9 = arith.constant 0.000000e+00 : f32
      %12 = vector.broadcast %cst_9 : f32 to vector<128x128xf32>
      %c0_10 = arith.constant 0 : index
      %c0_11 = arith.constant 0 : index
      %13 = vector.load %arg7[%c0_10, %c0_11] : memref<128x128xf32, #tpu.memory_space<vmem>>, vector<128x128xf32>
      tpu.vector_store %arg7[%c0_10, %c0_11], %12 {strides = array<i32>} : memref<128x128xf32, #tpu.memory_space<vmem>>, vector<128x128xf32>,
    } else {
    }
    %c0 = arith.constant 0 : index
    %c0_1 = arith.constant 0 : index
    %3 = vector.load %arg7[%c0, %c0_1] : memref<128x128xf32, #tpu.memory_space<vmem>>, vector<128x128xf32>
    %c0_2 = arith.constant 0 : index
    %c0_3 = arith.constant 0 : index
    %4 = vector.load %arg3[%c0_2, %c0_3] : memref<128x128xbf16, #tpu.memory_space<vmem>>, vector<128x128xbf16>
    %c0_4 = arith.constant 0 : index
    %c0_5 = arith.constant 0 : index
    %5 = vector.load %arg4[%c0_4, %c0_5] : memref<128x128xbf16, #tpu.memory_space<vmem>>, vector<128x128xbf16>
    %cst = arith.constant dense<0.000000e+00> : vector<128x128xf32>
    %6 = tpu.matmul %4, %5, %cst {dimension_numbers = #tpu.dot_dimension_numbers<[1], [0], [0], [1], [0, 0, 1, 1], [], []>} : vector<128x128xbf16>, vector<128x128xbf16>, vector<128x128xf32> -> vector<128x128xf32>
    %7 = arith.addf %3, %6 : vector<128x128xf32>
    %c0_6 = arith.constant 0 : index
    %c0_7 = arith.constant 0 : index
    %8 = vector.load %arg7[%c0_6, %c0_7] : memref<128x128xf32, #tpu.memory_space<vmem>>, vector<128x128xf32>
    tpu.vector_store %arg7[%c0_6, %c0_7], %7 {strides = array<i32>} : memref<128x128xf32, #tpu.memory_space<vmem>>, vector<128x128xf32>,
    %c4_i32 = arith.constant 4 : i32
    %9 = arith.cmpi eq, %arg2, %c4_i32 : i32
    %10 = arith.extui %9 : i1 to i32
    %c0_i32_8 = arith.constant 0 : i32
    %11 = arith.cmpi ne, %10, %c0_i32_8 : i32
    scf.if %11 {
      %c0_9 = arith.constant 0 : index
      %c0_10 = arith.constant 0 : index
      %12 = vector.load %arg7[%c0_9, %c0_10] : memref<128x128xf32, #tpu.memory_space<vmem>>, vector<128x128xf32>
      %c0_11 = arith.constant 0 : index
      %c0_12 = arith.constant 0 : index
      %13 = vector.load %arg5[%c0_11, %c0_12] : memref<1x128xf32, #tpu.memory_space<vmem>>, vector<1x128xf32>
      %14 = vector.broadcast %13 : vector<1x128xf32> to vector<128x128xf32>
      %15 = arith.addf %12, %14 : vector<128x128xf32>
      %cst_13 = arith.constant 0.000000e+00 : f32
      %16 = vector.broadcast %cst_13 : f32 to vector<128x128xf32>
      %17 = arith.maximumf %15, %16 : vector<128x128xf32>
      %c0_14 = arith.constant 0 : index
      %c0_15 = arith.constant 0 : index
      %18 = vector.load %arg6[%c0_14, %c0_15] : memref<128x128xf32, #tpu.memory_space<vmem>>, vector<128x128xf32>
      tpu.vector_store %arg6[%c0_14, %c0_15], %17 {strides = array<i32>} : memref<128x128xf32, #tpu.memory_space<vmem>>, vector<128x128xf32>,
    } else {
    }
    return
  }
  func.func @transform_0(%arg0: i32, %arg1: i32, %arg2: i32) -> (i32, i32) {
    %c0_i32 = arith.constant 0 : i32
    return %arg0, %arg2 : i32, i32
  }
  func.func @transform_1(%arg0: i32, %arg1: i32, %arg2: i32) -> (i32, i32) {
    %c0_i32 = arith.constant 0 : i32
    return %arg2, %arg1 : i32, i32
  }
  func.func @transform_2(%arg0: i32, %arg1: i32, %arg2: i32) -> (i32, i32) {
    %c0_i32 = arith.constant 0 : i32
    %c0_i32_0 = arith.constant 0 : i32
    return %c0_i32, %arg1 : i32, i32
  }
  func.func @transform_3(%arg0: i32, %arg1: i32, %arg2: i32) -> (i32, i32) {
    %c0_i32 = arith.constant 0 : i32
    return %arg0, %arg1 : i32, i32
  }
}

module attributes {stable_mosaic.version = 11 : i64} {
  func.func @_mm_kernel(%arg0: i32, %arg1: i32, %arg2: i32, %arg3: memref<128x128xbf16, #tpu.memory_space<vmem>>, %arg4: memref<128x256xbf16, #tpu.memory_space<vmem>>, %arg5: memref<1x256xf32, #tpu.memory_space<vmem>>, %arg6: memref<128x256xf32, #tpu.memory_space<vmem>>, %arg7: memref<128x256xf32, #tpu.memory_space<vmem>>) attributes {dimension_semantics = [#tpu.dimension_semantics<parallel>, #tpu.dimension_semantics<parallel>, #tpu.dimension_semantics<arbitrary>], iteration_bounds = array<i64: 1, 1, 1>, scalar_prefetch = 0 : i64, scratch_operands = 1 : i64, tpu.core_type = #tpu.core_type<tc>, window_params = [{transform_indices = @transform_0, window_bounds = array<i64: 128, 128>}, {transform_indices = @transform_1, window_bounds = array<i64: 128, 256>}, {transform_indices = @transform_2, window_bounds = array<i64: 1, 256>}, {transform_indices = @transform_3, window_bounds = array<i64: 128, 256>}]} {
    %c0_i32 = arith.constant 0 : i32
    %0 = arith.cmpi eq, %arg2, %c0_i32 : i32
    %1 = arith.extui %0 : i1 to i32
    %c0_i32_0 = arith.constant 0 : i32
    %2 = arith.cmpi ne, %1, %c0_i32_0 : i32
    scf.if %2 {
      %cst_10 = arith.constant 0.000000e+00 : f32
      %12 = vector.broadcast %cst_10 : f32 to vector<128x256xf32>
      %c0_11 = arith.constant 0 : index
      %c0_12 = arith.constant 0 : index
      %13 = vector.load %arg7[%c0_11, %c0_12] : memref<128x256xf32, #tpu.memory_space<vmem>>, vector<128x256xf32>
      tpu.vector_store %arg7[%c0_11, %c0_12], %12 {strides = array<i32>} : memref<128x256xf32, #tpu.memory_space<vmem>>, vector<128x256xf32>,
    } else {
    }
    %c0 = arith.constant 0 : index
    %c0_1 = arith.constant 0 : index
    %3 = vector.load %arg7[%c0, %c0_1] : memref<128x256xf32, #tpu.memory_space<vmem>>, vector<128x256xf32>
    %c0_2 = arith.constant 0 : index
    %c0_3 = arith.constant 0 : index
    %4 = vector.load %arg3[%c0_2, %c0_3] : memref<128x128xbf16, #tpu.memory_space<vmem>>, vector<128x128xbf16>
    %c0_4 = arith.constant 0 : index
    %c0_5 = arith.constant 0 : index
    %5 = vector.load %arg4[%c0_4, %c0_5] : memref<128x256xbf16, #tpu.memory_space<vmem>>, vector<128x256xbf16>
    %cst = arith.constant dense<0.000000e+00> : vector<128x256xf32>
    %6 = tpu.matmul %4, %5, %cst {dimension_numbers = #tpu.dot_dimension_numbers<[1], [0], [0], [1], [0, 0, 1, 1], [], []>} : vector<128x128xbf16>, vector<128x256xbf16>, vector<128x256xf32> -> vector<128x256xf32>
    %7 = arith.addf %3, %6 : vector<128x256xf32>
    %c0_6 = arith.constant 0 : index
    %c0_7 = arith.constant 0 : index
    %8 = vector.load %arg7[%c0_6, %c0_7] : memref<128x256xf32, #tpu.memory_space<vmem>>, vector<128x256xf32>
    tpu.vector_store %arg7[%c0_6, %c0_7], %7 {strides = array<i32>} : memref<128x256xf32, #tpu.memory_space<vmem>>, vector<128x256xf32>,
    %c0_i32_8 = arith.constant 0 : i32
    %9 = arith.cmpi eq, %arg2, %c0_i32_8 : i32
    %10 = arith.extui %9 : i1 to i32
    %c0_i32_9 = arith.constant 0 : i32
    %11 = arith.cmpi ne, %10, %c0_i32_9 : i32
    scf.if %11 {
      %c0_10 = arith.constant 0 : index
      %c0_11 = arith.constant 0 : index
      %12 = vector.load %arg7[%c0_10, %c0_11] : memref<128x256xf32, #tpu.memory_space<vmem>>, vector<128x256xf32>
      %c0_12 = arith.constant 0 : index
      %c0_13 = arith.constant 0 : index
      %13 = vector.load %arg5[%c0_12, %c0_13] : memref<1x256xf32, #tpu.memory_space<vmem>>, vector<1x256xf32>
      %14 = vector.broadcast %13 : vector<1x256xf32> to vector<128x256xf32>
      %15 = arith.addf %12, %14 : vector<128x256xf32>
      %c0_14 = arith.constant 0 : index
      %c0_15 = arith.constant 0 : index
      %16 = vector.load %arg6[%c0_14, %c0_15] : memref<128x256xf32, #tpu.memory_space<vmem>>, vector<128x256xf32>
      tpu.vector_store %arg6[%c0_14, %c0_15], %15 {strides = array<i32>} : memref<128x256xf32, #tpu.memory_space<vmem>>, vector<128x256xf32>,
    } else {
    }
    return
  }
  func.func @transform_0(%arg0: i32, %arg1: i32, %arg2: i32) -> (i32, i32) {
    %c0_i32 = arith.constant 0 : i32
    return %arg0, %arg2 : i32, i32
  }
  func.func @transform_1(%arg0: i32, %arg1: i32, %arg2: i32) -> (i32, i32) {
    %c0_i32 = arith.constant 0 : i32
    return %arg2, %arg1 : i32, i32
  }
  func.func @transform_2(%arg0: i32, %arg1: i32, %arg2: i32) -> (i32, i32) {
    %c0_i32 = arith.constant 0 : i32
    %c0_i32_0 = arith.constant 0 : i32
    return %c0_i32, %arg1 : i32, i32
  }
  func.func @transform_3(%arg0: i32, %arg1: i32, %arg2: i32) -> (i32, i32) {
    %c0_i32 = arith.constant 0 : i32
    return %arg0, %arg1 : i32, i32
  }
}

module attributes {stable_mosaic.version = 11 : i64} {
  func.func @_mm_res_kernel(%arg0: i32, %arg1: i32, %arg2: i32, %arg3: memref<128x128xbf16, #tpu.memory_space<vmem>>, %arg4: memref<128x256xbf16, #tpu.memory_space<vmem>>, %arg5: memref<1x256xf32, #tpu.memory_space<vmem>>, %arg6: memref<128x256xf32, #tpu.memory_space<vmem>>, %arg7: memref<128x256xf32, #tpu.memory_space<vmem>>, %arg8: memref<128x256xf32, #tpu.memory_space<vmem>>) attributes {dimension_semantics = [#tpu.dimension_semantics<parallel>, #tpu.dimension_semantics<parallel>, #tpu.dimension_semantics<arbitrary>], iteration_bounds = array<i64: 1, 1, 1>, scalar_prefetch = 0 : i64, scratch_operands = 1 : i64, tpu.core_type = #tpu.core_type<tc>, window_params = [{transform_indices = @transform_0, window_bounds = array<i64: 128, 128>}, {transform_indices = @transform_1, window_bounds = array<i64: 128, 256>}, {transform_indices = @transform_2, window_bounds = array<i64: 1, 256>}, {transform_indices = @transform_3, window_bounds = array<i64: 128, 256>}, {transform_indices = @transform_4, window_bounds = array<i64: 128, 256>}]} {
    %c0_i32 = arith.constant 0 : i32
    %0 = arith.cmpi eq, %arg2, %c0_i32 : i32
    %1 = arith.extui %0 : i1 to i32
    %c0_i32_0 = arith.constant 0 : i32
    %2 = arith.cmpi ne, %1, %c0_i32_0 : i32
    scf.if %2 {
      %cst_10 = arith.constant 0.000000e+00 : f32
      %12 = vector.broadcast %cst_10 : f32 to vector<128x256xf32>
      %c0_11 = arith.constant 0 : index
      %c0_12 = arith.constant 0 : index
      %13 = vector.load %arg8[%c0_11, %c0_12] : memref<128x256xf32, #tpu.memory_space<vmem>>, vector<128x256xf32>
      tpu.vector_store %arg8[%c0_11, %c0_12], %12 {strides = array<i32>} : memref<128x256xf32, #tpu.memory_space<vmem>>, vector<128x256xf32>,
    } else {
    }
    %c0 = arith.constant 0 : index
    %c0_1 = arith.constant 0 : index
    %3 = vector.load %arg8[%c0, %c0_1] : memref<128x256xf32, #tpu.memory_space<vmem>>, vector<128x256xf32>
    %c0_2 = arith.constant 0 : index
    %c0_3 = arith.constant 0 : index
    %4 = vector.load %arg3[%c0_2, %c0_3] : memref<128x128xbf16, #tpu.memory_space<vmem>>, vector<128x128xbf16>
    %c0_4 = arith.constant 0 : index
    %c0_5 = arith.constant 0 : index
    %5 = vector.load %arg4[%c0_4, %c0_5] : memref<128x256xbf16, #tpu.memory_space<vmem>>, vector<128x256xbf16>
    %cst = arith.constant dense<0.000000e+00> : vector<128x256xf32>
    %6 = tpu.matmul %4, %5, %cst {dimension_numbers = #tpu.dot_dimension_numbers<[1], [0], [0], [1], [0, 0, 1, 1], [], []>} : vector<128x128xbf16>, vector<128x256xbf16>, vector<128x256xf32> -> vector<128x256xf32>
    %7 = arith.addf %3, %6 : vector<128x256xf32>
    %c0_6 = arith.constant 0 : index
    %c0_7 = arith.constant 0 : index
    %8 = vector.load %arg8[%c0_6, %c0_7] : memref<128x256xf32, #tpu.memory_space<vmem>>, vector<128x256xf32>
    tpu.vector_store %arg8[%c0_6, %c0_7], %7 {strides = array<i32>} : memref<128x256xf32, #tpu.memory_space<vmem>>, vector<128x256xf32>,
    %c0_i32_8 = arith.constant 0 : i32
    %9 = arith.cmpi eq, %arg2, %c0_i32_8 : i32
    %10 = arith.extui %9 : i1 to i32
    %c0_i32_9 = arith.constant 0 : i32
    %11 = arith.cmpi ne, %10, %c0_i32_9 : i32
    scf.if %11 {
      %c0_10 = arith.constant 0 : index
      %c0_11 = arith.constant 0 : index
      %12 = vector.load %arg8[%c0_10, %c0_11] : memref<128x256xf32, #tpu.memory_space<vmem>>, vector<128x256xf32>
      %c0_12 = arith.constant 0 : index
      %c0_13 = arith.constant 0 : index
      %13 = vector.load %arg5[%c0_12, %c0_13] : memref<1x256xf32, #tpu.memory_space<vmem>>, vector<1x256xf32>
      %14 = vector.broadcast %13 : vector<1x256xf32> to vector<128x256xf32>
      %15 = arith.addf %12, %14 : vector<128x256xf32>
      %c0_14 = arith.constant 0 : index
      %c0_15 = arith.constant 0 : index
      %16 = vector.load %arg6[%c0_14, %c0_15] : memref<128x256xf32, #tpu.memory_space<vmem>>, vector<128x256xf32>
      %17 = arith.addf %15, %16 : vector<128x256xf32>
      %cst_16 = arith.constant 0.000000e+00 : f32
      %18 = vector.broadcast %cst_16 : f32 to vector<128x256xf32>
      %19 = arith.maximumf %17, %18 : vector<128x256xf32>
      %c0_17 = arith.constant 0 : index
      %c0_18 = arith.constant 0 : index
      %20 = vector.load %arg7[%c0_17, %c0_18] : memref<128x256xf32, #tpu.memory_space<vmem>>, vector<128x256xf32>
      tpu.vector_store %arg7[%c0_17, %c0_18], %19 {strides = array<i32>} : memref<128x256xf32, #tpu.memory_space<vmem>>, vector<128x256xf32>,
    } else {
    }
    return
  }
  func.func @transform_0(%arg0: i32, %arg1: i32, %arg2: i32) -> (i32, i32) {
    %c0_i32 = arith.constant 0 : i32
    return %arg0, %arg2 : i32, i32
  }
  func.func @transform_1(%arg0: i32, %arg1: i32, %arg2: i32) -> (i32, i32) {
    %c0_i32 = arith.constant 0 : i32
    return %arg2, %arg1 : i32, i32
  }
  func.func @transform_2(%arg0: i32, %arg1: i32, %arg2: i32) -> (i32, i32) {
    %c0_i32 = arith.constant 0 : i32
    %c0_i32_0 = arith.constant 0 : i32
    return %c0_i32, %arg1 : i32, i32
  }
  func.func @transform_3(%arg0: i32, %arg1: i32, %arg2: i32) -> (i32, i32) {
    %c0_i32 = arith.constant 0 : i32
    return %arg0, %arg1 : i32, i32
  }
  func.func @transform_4(%arg0: i32, %arg1: i32, %arg2: i32) -> (i32, i32) {
    %c0_i32 = arith.constant 0 : i32
    return %arg0, %arg1 : i32, i32
  }
}

module attributes {stable_mosaic.version = 11 : i64} {
  func.func @_mm_kernel(%arg0: i32, %arg1: i32, %arg2: i32, %arg3: memref<128x256xbf16, #tpu.memory_space<vmem>>, %arg4: memref<256x128xbf16, #tpu.memory_space<vmem>>, %arg5: memref<1x128xf32, #tpu.memory_space<vmem>>, %arg6: memref<128x128xf32, #tpu.memory_space<vmem>>, %arg7: memref<128x128xf32, #tpu.memory_space<vmem>>) attributes {dimension_semantics = [#tpu.dimension_semantics<parallel>, #tpu.dimension_semantics<parallel>, #tpu.dimension_semantics<arbitrary>], iteration_bounds = array<i64: 1, 1, 1>, scalar_prefetch = 0 : i64, scratch_operands = 1 : i64, tpu.core_type = #tpu.core_type<tc>, window_params = [{transform_indices = @transform_0, window_bounds = array<i64: 128, 256>}, {transform_indices = @transform_1, window_bounds = array<i64: 256, 128>}, {transform_indices = @transform_2, window_bounds = array<i64: 1, 128>}, {transform_indices = @transform_3, window_bounds = array<i64: 128, 128>}]} {
    %c0_i32 = arith.constant 0 : i32
    %0 = arith.cmpi eq, %arg2, %c0_i32 : i32
    %1 = arith.extui %0 : i1 to i32
    %c0_i32_0 = arith.constant 0 : i32
    %2 = arith.cmpi ne, %1, %c0_i32_0 : i32
    scf.if %2 {
      %cst_10 = arith.constant 0.000000e+00 : f32
      %12 = vector.broadcast %cst_10 : f32 to vector<128x128xf32>
      %c0_11 = arith.constant 0 : index
      %c0_12 = arith.constant 0 : index
      %13 = vector.load %arg7[%c0_11, %c0_12] : memref<128x128xf32, #tpu.memory_space<vmem>>, vector<128x128xf32>
      tpu.vector_store %arg7[%c0_11, %c0_12], %12 {strides = array<i32>} : memref<128x128xf32, #tpu.memory_space<vmem>>, vector<128x128xf32>,
    } else {
    }
    %c0 = arith.constant 0 : index
    %c0_1 = arith.constant 0 : index
    %3 = vector.load %arg7[%c0, %c0_1] : memref<128x128xf32, #tpu.memory_space<vmem>>, vector<128x128xf32>
    %c0_2 = arith.constant 0 : index
    %c0_3 = arith.constant 0 : index
    %4 = vector.load %arg3[%c0_2, %c0_3] : memref<128x256xbf16, #tpu.memory_space<vmem>>, vector<128x256xbf16>
    %c0_4 = arith.constant 0 : index
    %c0_5 = arith.constant 0 : index
    %5 = vector.load %arg4[%c0_4, %c0_5] : memref<256x128xbf16, #tpu.memory_space<vmem>>, vector<256x128xbf16>
    %cst = arith.constant dense<0.000000e+00> : vector<128x128xf32>
    %6 = tpu.matmul %4, %5, %cst {dimension_numbers = #tpu.dot_dimension_numbers<[1], [0], [0], [1], [0, 0, 1, 1], [], []>} : vector<128x256xbf16>, vector<256x128xbf16>, vector<128x128xf32> -> vector<128x128xf32>
    %7 = arith.addf %3, %6 : vector<128x128xf32>
    %c0_6 = arith.constant 0 : index
    %c0_7 = arith.constant 0 : index
    %8 = vector.load %arg7[%c0_6, %c0_7] : memref<128x128xf32, #tpu.memory_space<vmem>>, vector<128x128xf32>
    tpu.vector_store %arg7[%c0_6, %c0_7], %7 {strides = array<i32>} : memref<128x128xf32, #tpu.memory_space<vmem>>, vector<128x128xf32>,
    %c0_i32_8 = arith.constant 0 : i32
    %9 = arith.cmpi eq, %arg2, %c0_i32_8 : i32
    %10 = arith.extui %9 : i1 to i32
    %c0_i32_9 = arith.constant 0 : i32
    %11 = arith.cmpi ne, %10, %c0_i32_9 : i32
    scf.if %11 {
      %c0_10 = arith.constant 0 : index
      %c0_11 = arith.constant 0 : index
      %12 = vector.load %arg7[%c0_10, %c0_11] : memref<128x128xf32, #tpu.memory_space<vmem>>, vector<128x128xf32>
      %c0_12 = arith.constant 0 : index
      %c0_13 = arith.constant 0 : index
      %13 = vector.load %arg5[%c0_12, %c0_13] : memref<1x128xf32, #tpu.memory_space<vmem>>, vector<1x128xf32>
      %14 = vector.broadcast %13 : vector<1x128xf32> to vector<128x128xf32>
      %15 = arith.addf %12, %14 : vector<128x128xf32>
      %cst_14 = arith.constant 0.000000e+00 : f32
      %16 = vector.broadcast %cst_14 : f32 to vector<128x128xf32>
      %17 = arith.maximumf %15, %16 : vector<128x128xf32>
      %c0_15 = arith.constant 0 : index
      %c0_16 = arith.constant 0 : index
      %18 = vector.load %arg6[%c0_15, %c0_16] : memref<128x128xf32, #tpu.memory_space<vmem>>, vector<128x128xf32>
      tpu.vector_store %arg6[%c0_15, %c0_16], %17 {strides = array<i32>} : memref<128x128xf32, #tpu.memory_space<vmem>>, vector<128x128xf32>,
    } else {
    }
    return
  }
  func.func @transform_0(%arg0: i32, %arg1: i32, %arg2: i32) -> (i32, i32) {
    %c0_i32 = arith.constant 0 : i32
    return %arg0, %arg2 : i32, i32
  }
  func.func @transform_1(%arg0: i32, %arg1: i32, %arg2: i32) -> (i32, i32) {
    %c0_i32 = arith.constant 0 : i32
    return %arg2, %arg1 : i32, i32
  }
  func.func @transform_2(%arg0: i32, %arg1: i32, %arg2: i32) -> (i32, i32) {
    %c0_i32 = arith.constant 0 : i32
    %c0_i32_0 = arith.constant 0 : i32
    return %c0_i32, %arg1 : i32, i32
  }
  func.func @transform_3(%arg0: i32, %arg1: i32, %arg2: i32) -> (i32, i32) {
    %c0_i32 = arith.constant 0 : i32
    return %arg0, %arg1 : i32, i32
  }
}

module attributes {stable_mosaic.version = 11 : i64} {
  func.func @_mm_kernel(%arg0: i32, %arg1: i32, %arg2: i32, %arg3: memref<32x128xbf16, #tpu.memory_space<vmem>>, %arg4: memref<128x128xbf16, #tpu.memory_space<vmem>>, %arg5: memref<1x128xf32, #tpu.memory_space<vmem>>, %arg6: memref<32x128xf32, #tpu.memory_space<vmem>>, %arg7: memref<32x128xf32, #tpu.memory_space<vmem>>) attributes {dimension_semantics = [#tpu.dimension_semantics<parallel>, #tpu.dimension_semantics<parallel>, #tpu.dimension_semantics<arbitrary>], iteration_bounds = array<i64: 1, 1, 9>, scalar_prefetch = 0 : i64, scratch_operands = 1 : i64, tpu.core_type = #tpu.core_type<tc>, window_params = [{transform_indices = @transform_0, window_bounds = array<i64: 32, 128>}, {transform_indices = @transform_1, window_bounds = array<i64: 128, 128>}, {transform_indices = @transform_2, window_bounds = array<i64: 1, 128>}, {transform_indices = @transform_3, window_bounds = array<i64: 32, 128>}]} {
    %c0_i32 = arith.constant 0 : i32
    %0 = arith.cmpi eq, %arg2, %c0_i32 : i32
    %1 = arith.extui %0 : i1 to i32
    %c0_i32_0 = arith.constant 0 : i32
    %2 = arith.cmpi ne, %1, %c0_i32_0 : i32
    scf.if %2 {
      %cst_9 = arith.constant 0.000000e+00 : f32
      %12 = vector.broadcast %cst_9 : f32 to vector<32x128xf32>
      %c0_10 = arith.constant 0 : index
      %c0_11 = arith.constant 0 : index
      %13 = vector.load %arg7[%c0_10, %c0_11] : memref<32x128xf32, #tpu.memory_space<vmem>>, vector<32x128xf32>
      tpu.vector_store %arg7[%c0_10, %c0_11], %12 {strides = array<i32>} : memref<32x128xf32, #tpu.memory_space<vmem>>, vector<32x128xf32>,
    } else {
    }
    %c0 = arith.constant 0 : index
    %c0_1 = arith.constant 0 : index
    %3 = vector.load %arg7[%c0, %c0_1] : memref<32x128xf32, #tpu.memory_space<vmem>>, vector<32x128xf32>
    %c0_2 = arith.constant 0 : index
    %c0_3 = arith.constant 0 : index
    %4 = vector.load %arg3[%c0_2, %c0_3] : memref<32x128xbf16, #tpu.memory_space<vmem>>, vector<32x128xbf16>
    %c0_4 = arith.constant 0 : index
    %c0_5 = arith.constant 0 : index
    %5 = vector.load %arg4[%c0_4, %c0_5] : memref<128x128xbf16, #tpu.memory_space<vmem>>, vector<128x128xbf16>
    %cst = arith.constant dense<0.000000e+00> : vector<32x128xf32>
    %6 = tpu.matmul %4, %5, %cst {dimension_numbers = #tpu.dot_dimension_numbers<[1], [0], [0], [1], [0, 0, 1, 1], [], []>} : vector<32x128xbf16>, vector<128x128xbf16>, vector<32x128xf32> -> vector<32x128xf32>
    %7 = arith.addf %3, %6 : vector<32x128xf32>
    %c0_6 = arith.constant 0 : index
    %c0_7 = arith.constant 0 : index
    %8 = vector.load %arg7[%c0_6, %c0_7] : memref<32x128xf32, #tpu.memory_space<vmem>>, vector<32x128xf32>
    tpu.vector_store %arg7[%c0_6, %c0_7], %7 {strides = array<i32>} : memref<32x128xf32, #tpu.memory_space<vmem>>, vector<32x128xf32>,
    %c8_i32 = arith.constant 8 : i32
    %9 = arith.cmpi eq, %arg2, %c8_i32 : i32
    %10 = arith.extui %9 : i1 to i32
    %c0_i32_8 = arith.constant 0 : i32
    %11 = arith.cmpi ne, %10, %c0_i32_8 : i32
    scf.if %11 {
      %c0_9 = arith.constant 0 : index
      %c0_10 = arith.constant 0 : index
      %12 = vector.load %arg7[%c0_9, %c0_10] : memref<32x128xf32, #tpu.memory_space<vmem>>, vector<32x128xf32>
      %c0_11 = arith.constant 0 : index
      %c0_12 = arith.constant 0 : index
      %13 = vector.load %arg5[%c0_11, %c0_12] : memref<1x128xf32, #tpu.memory_space<vmem>>, vector<1x128xf32>
      %14 = vector.broadcast %13 : vector<1x128xf32> to vector<32x128xf32>
      %15 = arith.addf %12, %14 : vector<32x128xf32>
      %cst_13 = arith.constant 0.000000e+00 : f32
      %16 = vector.broadcast %cst_13 : f32 to vector<32x128xf32>
      %17 = arith.maximumf %15, %16 : vector<32x128xf32>
      %c0_14 = arith.constant 0 : index
      %c0_15 = arith.constant 0 : index
      %18 = vector.load %arg6[%c0_14, %c0_15] : memref<32x128xf32, #tpu.memory_space<vmem>>, vector<32x128xf32>
      tpu.vector_store %arg6[%c0_14, %c0_15], %17 {strides = array<i32>} : memref<32x128xf32, #tpu.memory_space<vmem>>, vector<32x128xf32>,
    } else {
    }
    return
  }
  func.func @transform_0(%arg0: i32, %arg1: i32, %arg2: i32) -> (i32, i32) {
    %c0_i32 = arith.constant 0 : i32
    return %arg0, %arg2 : i32, i32
  }
  func.func @transform_1(%arg0: i32, %arg1: i32, %arg2: i32) -> (i32, i32) {
    %c0_i32 = arith.constant 0 : i32
    return %arg2, %arg1 : i32, i32
  }
  func.func @transform_2(%arg0: i32, %arg1: i32, %arg2: i32) -> (i32, i32) {
    %c0_i32 = arith.constant 0 : i32
    %c0_i32_0 = arith.constant 0 : i32
    return %c0_i32, %arg1 : i32, i32
  }
  func.func @transform_3(%arg0: i32, %arg1: i32, %arg2: i32) -> (i32, i32) {
    %c0_i32 = arith.constant 0 : i32
    return %arg0, %arg1 : i32, i32
  }
}

module attributes {stable_mosaic.version = 11 : i64} {
  func.func @_mm_kernel(%arg0: i32, %arg1: i32, %arg2: i32, %arg3: memref<32x256xbf16, #tpu.memory_space<vmem>>, %arg4: memref<256x256xbf16, #tpu.memory_space<vmem>>, %arg5: memref<1x256xf32, #tpu.memory_space<vmem>>, %arg6: memref<32x256xf32, #tpu.memory_space<vmem>>, %arg7: memref<32x256xf32, #tpu.memory_space<vmem>>) attributes {dimension_semantics = [#tpu.dimension_semantics<parallel>, #tpu.dimension_semantics<parallel>, #tpu.dimension_semantics<arbitrary>], iteration_bounds = array<i64: 1, 2, 1>, scalar_prefetch = 0 : i64, scratch_operands = 1 : i64, tpu.core_type = #tpu.core_type<tc>, window_params = [{transform_indices = @transform_0, window_bounds = array<i64: 32, 256>}, {transform_indices = @transform_1, window_bounds = array<i64: 256, 256>}, {transform_indices = @transform_2, window_bounds = array<i64: 1, 256>}, {transform_indices = @transform_3, window_bounds = array<i64: 32, 256>}]} {
    %c0_i32 = arith.constant 0 : i32
    %0 = arith.cmpi eq, %arg2, %c0_i32 : i32
    %1 = arith.extui %0 : i1 to i32
    %c0_i32_0 = arith.constant 0 : i32
    %2 = arith.cmpi ne, %1, %c0_i32_0 : i32
    scf.if %2 {
      %cst_10 = arith.constant 0.000000e+00 : f32
      %12 = vector.broadcast %cst_10 : f32 to vector<32x256xf32>
      %c0_11 = arith.constant 0 : index
      %c0_12 = arith.constant 0 : index
      %13 = vector.load %arg7[%c0_11, %c0_12] : memref<32x256xf32, #tpu.memory_space<vmem>>, vector<32x256xf32>
      tpu.vector_store %arg7[%c0_11, %c0_12], %12 {strides = array<i32>} : memref<32x256xf32, #tpu.memory_space<vmem>>, vector<32x256xf32>,
    } else {
    }
    %c0 = arith.constant 0 : index
    %c0_1 = arith.constant 0 : index
    %3 = vector.load %arg7[%c0, %c0_1] : memref<32x256xf32, #tpu.memory_space<vmem>>, vector<32x256xf32>
    %c0_2 = arith.constant 0 : index
    %c0_3 = arith.constant 0 : index
    %4 = vector.load %arg3[%c0_2, %c0_3] : memref<32x256xbf16, #tpu.memory_space<vmem>>, vector<32x256xbf16>
    %c0_4 = arith.constant 0 : index
    %c0_5 = arith.constant 0 : index
    %5 = vector.load %arg4[%c0_4, %c0_5] : memref<256x256xbf16, #tpu.memory_space<vmem>>, vector<256x256xbf16>
    %cst = arith.constant dense<0.000000e+00> : vector<32x256xf32>
    %6 = tpu.matmul %4, %5, %cst {dimension_numbers = #tpu.dot_dimension_numbers<[1], [0], [0], [1], [0, 0, 1, 1], [], []>} : vector<32x256xbf16>, vector<256x256xbf16>, vector<32x256xf32> -> vector<32x256xf32>
    %7 = arith.addf %3, %6 : vector<32x256xf32>
    %c0_6 = arith.constant 0 : index
    %c0_7 = arith.constant 0 : index
    %8 = vector.load %arg7[%c0_6, %c0_7] : memref<32x256xf32, #tpu.memory_space<vmem>>, vector<32x256xf32>
    tpu.vector_store %arg7[%c0_6, %c0_7], %7 {strides = array<i32>} : memref<32x256xf32, #tpu.memory_space<vmem>>, vector<32x256xf32>,
    %c0_i32_8 = arith.constant 0 : i32
    %9 = arith.cmpi eq, %arg2, %c0_i32_8 : i32
    %10 = arith.extui %9 : i1 to i32
    %c0_i32_9 = arith.constant 0 : i32
    %11 = arith.cmpi ne, %10, %c0_i32_9 : i32
    scf.if %11 {
      %c0_10 = arith.constant 0 : index
      %c0_11 = arith.constant 0 : index
      %12 = vector.load %arg7[%c0_10, %c0_11] : memref<32x256xf32, #tpu.memory_space<vmem>>, vector<32x256xf32>
      %c0_12 = arith.constant 0 : index
      %c0_13 = arith.constant 0 : index
      %13 = vector.load %arg5[%c0_12, %c0_13] : memref<1x256xf32, #tpu.memory_space<vmem>>, vector<1x256xf32>
      %14 = vector.broadcast %13 : vector<1x256xf32> to vector<32x256xf32>
      %15 = arith.addf %12, %14 : vector<32x256xf32>
      %c0_14 = arith.constant 0 : index
      %c0_15 = arith.constant 0 : index
      %16 = vector.load %arg6[%c0_14, %c0_15] : memref<32x256xf32, #tpu.memory_space<vmem>>, vector<32x256xf32>
      tpu.vector_store %arg6[%c0_14, %c0_15], %15 {strides = array<i32>} : memref<32x256xf32, #tpu.memory_space<vmem>>, vector<32x256xf32>,
    } else {
    }
    return
  }
  func.func @transform_0(%arg0: i32, %arg1: i32, %arg2: i32) -> (i32, i32) {
    %c0_i32 = arith.constant 0 : i32
    return %arg0, %arg2 : i32, i32
  }
  func.func @transform_1(%arg0: i32, %arg1: i32, %arg2: i32) -> (i32, i32) {
    %c0_i32 = arith.constant 0 : i32
    return %arg2, %arg1 : i32, i32
  }
  func.func @transform_2(%arg0: i32, %arg1: i32, %arg2: i32) -> (i32, i32) {
    %c0_i32 = arith.constant 0 : i32
    %c0_i32_0 = arith.constant 0 : i32
    return %c0_i32, %arg1 : i32, i32
  }
  func.func @transform_3(%arg0: i32, %arg1: i32, %arg2: i32) -> (i32, i32) {
    %c0_i32 = arith.constant 0 : i32
    return %arg0, %arg1 : i32, i32
  }
}

module attributes {stable_mosaic.version = 11 : i64} {
  func.func @_mm_res_kernel(%arg0: i32, %arg1: i32, %arg2: i32, %arg3: memref<32x128xbf16, #tpu.memory_space<vmem>>, %arg4: memref<128x256xbf16, #tpu.memory_space<vmem>>, %arg5: memref<1x256xf32, #tpu.memory_space<vmem>>, %arg6: memref<32x256xf32, #tpu.memory_space<vmem>>, %arg7: memref<32x256xf32, #tpu.memory_space<vmem>>, %arg8: memref<32x256xf32, #tpu.memory_space<vmem>>) attributes {dimension_semantics = [#tpu.dimension_semantics<parallel>, #tpu.dimension_semantics<parallel>, #tpu.dimension_semantics<arbitrary>], iteration_bounds = array<i64: 1, 2, 1>, scalar_prefetch = 0 : i64, scratch_operands = 1 : i64, tpu.core_type = #tpu.core_type<tc>, window_params = [{transform_indices = @transform_0, window_bounds = array<i64: 32, 128>}, {transform_indices = @transform_1, window_bounds = array<i64: 128, 256>}, {transform_indices = @transform_2, window_bounds = array<i64: 1, 256>}, {transform_indices = @transform_3, window_bounds = array<i64: 32, 256>}, {transform_indices = @transform_4, window_bounds = array<i64: 32, 256>}]} {
    %c0_i32 = arith.constant 0 : i32
    %0 = arith.cmpi eq, %arg2, %c0_i32 : i32
    %1 = arith.extui %0 : i1 to i32
    %c0_i32_0 = arith.constant 0 : i32
    %2 = arith.cmpi ne, %1, %c0_i32_0 : i32
    scf.if %2 {
      %cst_10 = arith.constant 0.000000e+00 : f32
      %12 = vector.broadcast %cst_10 : f32 to vector<32x256xf32>
      %c0_11 = arith.constant 0 : index
      %c0_12 = arith.constant 0 : index
      %13 = vector.load %arg8[%c0_11, %c0_12] : memref<32x256xf32, #tpu.memory_space<vmem>>, vector<32x256xf32>
      tpu.vector_store %arg8[%c0_11, %c0_12], %12 {strides = array<i32>} : memref<32x256xf32, #tpu.memory_space<vmem>>, vector<32x256xf32>,
    } else {
    }
    %c0 = arith.constant 0 : index
    %c0_1 = arith.constant 0 : index
    %3 = vector.load %arg8[%c0, %c0_1] : memref<32x256xf32, #tpu.memory_space<vmem>>, vector<32x256xf32>
    %c0_2 = arith.constant 0 : index
    %c0_3 = arith.constant 0 : index
    %4 = vector.load %arg3[%c0_2, %c0_3] : memref<32x128xbf16, #tpu.memory_space<vmem>>, vector<32x128xbf16>
    %c0_4 = arith.constant 0 : index
    %c0_5 = arith.constant 0 : index
    %5 = vector.load %arg4[%c0_4, %c0_5] : memref<128x256xbf16, #tpu.memory_space<vmem>>, vector<128x256xbf16>
    %cst = arith.constant dense<0.000000e+00> : vector<32x256xf32>
    %6 = tpu.matmul %4, %5, %cst {dimension_numbers = #tpu.dot_dimension_numbers<[1], [0], [0], [1], [0, 0, 1, 1], [], []>} : vector<32x128xbf16>, vector<128x256xbf16>, vector<32x256xf32> -> vector<32x256xf32>
    %7 = arith.addf %3, %6 : vector<32x256xf32>
    %c0_6 = arith.constant 0 : index
    %c0_7 = arith.constant 0 : index
    %8 = vector.load %arg8[%c0_6, %c0_7] : memref<32x256xf32, #tpu.memory_space<vmem>>, vector<32x256xf32>
    tpu.vector_store %arg8[%c0_6, %c0_7], %7 {strides = array<i32>} : memref<32x256xf32, #tpu.memory_space<vmem>>, vector<32x256xf32>,
    %c0_i32_8 = arith.constant 0 : i32
    %9 = arith.cmpi eq, %arg2, %c0_i32_8 : i32
    %10 = arith.extui %9 : i1 to i32
    %c0_i32_9 = arith.constant 0 : i32
    %11 = arith.cmpi ne, %10, %c0_i32_9 : i32
    scf.if %11 {
      %c0_10 = arith.constant 0 : index
      %c0_11 = arith.constant 0 : index
      %12 = vector.load %arg8[%c0_10, %c0_11] : memref<32x256xf32, #tpu.memory_space<vmem>>, vector<32x256xf32>
      %c0_12 = arith.constant 0 : index
      %c0_13 = arith.constant 0 : index
      %13 = vector.load %arg5[%c0_12, %c0_13] : memref<1x256xf32, #tpu.memory_space<vmem>>, vector<1x256xf32>
      %14 = vector.broadcast %13 : vector<1x256xf32> to vector<32x256xf32>
      %15 = arith.addf %12, %14 : vector<32x256xf32>
      %c0_14 = arith.constant 0 : index
      %c0_15 = arith.constant 0 : index
      %16 = vector.load %arg6[%c0_14, %c0_15] : memref<32x256xf32, #tpu.memory_space<vmem>>, vector<32x256xf32>
      %17 = arith.addf %15, %16 : vector<32x256xf32>
      %cst_16 = arith.constant 0.000000e+00 : f32
      %18 = vector.broadcast %cst_16 : f32 to vector<32x256xf32>
      %19 = arith.maximumf %17, %18 : vector<32x256xf32>
      %c0_17 = arith.constant 0 : index
      %c0_18 = arith.constant 0 : index
      %20 = vector.load %arg7[%c0_17, %c0_18] : memref<32x256xf32, #tpu.memory_space<vmem>>, vector<32x256xf32>
      tpu.vector_store %arg7[%c0_17, %c0_18], %19 {strides = array<i32>} : memref<32x256xf32, #tpu.memory_space<vmem>>, vector<32x256xf32>,
    } else {
    }
    return
  }
  func.func @transform_0(%arg0: i32, %arg1: i32, %arg2: i32) -> (i32, i32) {
    %c0_i32 = arith.constant 0 : i32
    return %arg0, %arg2 : i32, i32
  }
  func.func @transform_1(%arg0: i32, %arg1: i32, %arg2: i32) -> (i32, i32) {
    %c0_i32 = arith.constant 0 : i32
    return %arg2, %arg1 : i32, i32
  }
  func.func @transform_2(%arg0: i32, %arg1: i32, %arg2: i32) -> (i32, i32) {
    %c0_i32 = arith.constant 0 : i32
    %c0_i32_0 = arith.constant 0 : i32
    return %c0_i32, %arg1 : i32, i32
  }
  func.func @transform_3(%arg0: i32, %arg1: i32, %arg2: i32) -> (i32, i32) {
    %c0_i32 = arith.constant 0 : i32
    return %arg0, %arg1 : i32, i32
  }
  func.func @transform_4(%arg0: i32, %arg1: i32, %arg2: i32) -> (i32, i32) {
    %c0_i32 = arith.constant 0 : i32
    return %arg0, %arg1 : i32, i32
  }
}

module attributes {stable_mosaic.version = 11 : i64} {
  func.func @_mm_kernel(%arg0: i32, %arg1: i32, %arg2: i32, %arg3: memref<32x256xbf16, #tpu.memory_space<vmem>>, %arg4: memref<256x128xbf16, #tpu.memory_space<vmem>>, %arg5: memref<1x128xf32, #tpu.memory_space<vmem>>, %arg6: memref<32x128xf32, #tpu.memory_space<vmem>>, %arg7: memref<32x128xf32, #tpu.memory_space<vmem>>) attributes {dimension_semantics = [#tpu.dimension_semantics<parallel>, #tpu.dimension_semantics<parallel>, #tpu.dimension_semantics<arbitrary>], iteration_bounds = array<i64: 1, 1, 2>, scalar_prefetch = 0 : i64, scratch_operands = 1 : i64, tpu.core_type = #tpu.core_type<tc>, window_params = [{transform_indices = @transform_0, window_bounds = array<i64: 32, 256>}, {transform_indices = @transform_1, window_bounds = array<i64: 256, 128>}, {transform_indices = @transform_2, window_bounds = array<i64: 1, 128>}, {transform_indices = @transform_3, window_bounds = array<i64: 32, 128>}]} {
    %c0_i32 = arith.constant 0 : i32
    %0 = arith.cmpi eq, %arg2, %c0_i32 : i32
    %1 = arith.extui %0 : i1 to i32
    %c0_i32_0 = arith.constant 0 : i32
    %2 = arith.cmpi ne, %1, %c0_i32_0 : i32
    scf.if %2 {
      %cst_9 = arith.constant 0.000000e+00 : f32
      %12 = vector.broadcast %cst_9 : f32 to vector<32x128xf32>
      %c0_10 = arith.constant 0 : index
      %c0_11 = arith.constant 0 : index
      %13 = vector.load %arg7[%c0_10, %c0_11] : memref<32x128xf32, #tpu.memory_space<vmem>>, vector<32x128xf32>
      tpu.vector_store %arg7[%c0_10, %c0_11], %12 {strides = array<i32>} : memref<32x128xf32, #tpu.memory_space<vmem>>, vector<32x128xf32>,
    } else {
    }
    %c0 = arith.constant 0 : index
    %c0_1 = arith.constant 0 : index
    %3 = vector.load %arg7[%c0, %c0_1] : memref<32x128xf32, #tpu.memory_space<vmem>>, vector<32x128xf32>
    %c0_2 = arith.constant 0 : index
    %c0_3 = arith.constant 0 : index
    %4 = vector.load %arg3[%c0_2, %c0_3] : memref<32x256xbf16, #tpu.memory_space<vmem>>, vector<32x256xbf16>
    %c0_4 = arith.constant 0 : index
    %c0_5 = arith.constant 0 : index
    %5 = vector.load %arg4[%c0_4, %c0_5] : memref<256x128xbf16, #tpu.memory_space<vmem>>, vector<256x128xbf16>
    %cst = arith.constant dense<0.000000e+00> : vector<32x128xf32>
    %6 = tpu.matmul %4, %5, %cst {dimension_numbers = #tpu.dot_dimension_numbers<[1], [0], [0], [1], [0, 0, 1, 1], [], []>} : vector<32x256xbf16>, vector<256x128xbf16>, vector<32x128xf32> -> vector<32x128xf32>
    %7 = arith.addf %3, %6 : vector<32x128xf32>
    %c0_6 = arith.constant 0 : index
    %c0_7 = arith.constant 0 : index
    %8 = vector.load %arg7[%c0_6, %c0_7] : memref<32x128xf32, #tpu.memory_space<vmem>>, vector<32x128xf32>
    tpu.vector_store %arg7[%c0_6, %c0_7], %7 {strides = array<i32>} : memref<32x128xf32, #tpu.memory_space<vmem>>, vector<32x128xf32>,
    %c1_i32 = arith.constant 1 : i32
    %9 = arith.cmpi eq, %arg2, %c1_i32 : i32
    %10 = arith.extui %9 : i1 to i32
    %c0_i32_8 = arith.constant 0 : i32
    %11 = arith.cmpi ne, %10, %c0_i32_8 : i32
    scf.if %11 {
      %c0_9 = arith.constant 0 : index
      %c0_10 = arith.constant 0 : index
      %12 = vector.load %arg7[%c0_9, %c0_10] : memref<32x128xf32, #tpu.memory_space<vmem>>, vector<32x128xf32>
      %c0_11 = arith.constant 0 : index
      %c0_12 = arith.constant 0 : index
      %13 = vector.load %arg5[%c0_11, %c0_12] : memref<1x128xf32, #tpu.memory_space<vmem>>, vector<1x128xf32>
      %14 = vector.broadcast %13 : vector<1x128xf32> to vector<32x128xf32>
      %15 = arith.addf %12, %14 : vector<32x128xf32>
      %cst_13 = arith.constant 0.000000e+00 : f32
      %16 = vector.broadcast %cst_13 : f32 to vector<32x128xf32>
      %17 = arith.maximumf %15, %16 : vector<32x128xf32>
      %c0_14 = arith.constant 0 : index
      %c0_15 = arith.constant 0 : index
      %18 = vector.load %arg6[%c0_14, %c0_15] : memref<32x128xf32, #tpu.memory_space<vmem>>, vector<32x128xf32>
      tpu.vector_store %arg6[%c0_14, %c0_15], %17 {strides = array<i32>} : memref<32x128xf32, #tpu.memory_space<vmem>>, vector<32x128xf32>,
    } else {
    }
    return
  }
  func.func @transform_0(%arg0: i32, %arg1: i32, %arg2: i32) -> (i32, i32) {
    %c0_i32 = arith.constant 0 : i32
    return %arg0, %arg2 : i32, i32
  }
  func.func @transform_1(%arg0: i32, %arg1: i32, %arg2: i32) -> (i32, i32) {
    %c0_i32 = arith.constant 0 : i32
    return %arg2, %arg1 : i32, i32
  }
  func.func @transform_2(%arg0: i32, %arg1: i32, %arg2: i32) -> (i32, i32) {
    %c0_i32 = arith.constant 0 : i32
    %c0_i32_0 = arith.constant 0 : i32
    return %c0_i32, %arg1 : i32, i32
  }
  func.func @transform_3(%arg0: i32, %arg1: i32, %arg2: i32) -> (i32, i32) {
    %c0_i32 = arith.constant 0 : i32
    return %arg0, %arg1 : i32, i32
  }
}

module attributes {stable_mosaic.version = 11 : i64} {
  func.func @_mm_kernel(%arg0: i32, %arg1: i32, %arg2: i32, %arg3: memref<32x256xbf16, #tpu.memory_space<vmem>>, %arg4: memref<256x256xbf16, #tpu.memory_space<vmem>>, %arg5: memref<1x256xf32, #tpu.memory_space<vmem>>, %arg6: memref<32x256xf32, #tpu.memory_space<vmem>>, %arg7: memref<32x256xf32, #tpu.memory_space<vmem>>) attributes {dimension_semantics = [#tpu.dimension_semantics<parallel>, #tpu.dimension_semantics<parallel>, #tpu.dimension_semantics<arbitrary>], iteration_bounds = array<i64: 1, 1, 2>, scalar_prefetch = 0 : i64, scratch_operands = 1 : i64, tpu.core_type = #tpu.core_type<tc>, window_params = [{transform_indices = @transform_0, window_bounds = array<i64: 32, 256>}, {transform_indices = @transform_1, window_bounds = array<i64: 256, 256>}, {transform_indices = @transform_2, window_bounds = array<i64: 1, 256>}, {transform_indices = @transform_3, window_bounds = array<i64: 32, 256>}]} {
    %c0_i32 = arith.constant 0 : i32
    %0 = arith.cmpi eq, %arg2, %c0_i32 : i32
    %1 = arith.extui %0 : i1 to i32
    %c0_i32_0 = arith.constant 0 : i32
    %2 = arith.cmpi ne, %1, %c0_i32_0 : i32
    scf.if %2 {
      %cst_9 = arith.constant 0.000000e+00 : f32
      %12 = vector.broadcast %cst_9 : f32 to vector<32x256xf32>
      %c0_10 = arith.constant 0 : index
      %c0_11 = arith.constant 0 : index
      %13 = vector.load %arg7[%c0_10, %c0_11] : memref<32x256xf32, #tpu.memory_space<vmem>>, vector<32x256xf32>
      tpu.vector_store %arg7[%c0_10, %c0_11], %12 {strides = array<i32>} : memref<32x256xf32, #tpu.memory_space<vmem>>, vector<32x256xf32>,
    } else {
    }
    %c0 = arith.constant 0 : index
    %c0_1 = arith.constant 0 : index
    %3 = vector.load %arg7[%c0, %c0_1] : memref<32x256xf32, #tpu.memory_space<vmem>>, vector<32x256xf32>
    %c0_2 = arith.constant 0 : index
    %c0_3 = arith.constant 0 : index
    %4 = vector.load %arg3[%c0_2, %c0_3] : memref<32x256xbf16, #tpu.memory_space<vmem>>, vector<32x256xbf16>
    %c0_4 = arith.constant 0 : index
    %c0_5 = arith.constant 0 : index
    %5 = vector.load %arg4[%c0_4, %c0_5] : memref<256x256xbf16, #tpu.memory_space<vmem>>, vector<256x256xbf16>
    %cst = arith.constant dense<0.000000e+00> : vector<32x256xf32>
    %6 = tpu.matmul %4, %5, %cst {dimension_numbers = #tpu.dot_dimension_numbers<[1], [0], [0], [1], [0, 0, 1, 1], [], []>} : vector<32x256xbf16>, vector<256x256xbf16>, vector<32x256xf32> -> vector<32x256xf32>
    %7 = arith.addf %3, %6 : vector<32x256xf32>
    %c0_6 = arith.constant 0 : index
    %c0_7 = arith.constant 0 : index
    %8 = vector.load %arg7[%c0_6, %c0_7] : memref<32x256xf32, #tpu.memory_space<vmem>>, vector<32x256xf32>
    tpu.vector_store %arg7[%c0_6, %c0_7], %7 {strides = array<i32>} : memref<32x256xf32, #tpu.memory_space<vmem>>, vector<32x256xf32>,
    %c1_i32 = arith.constant 1 : i32
    %9 = arith.cmpi eq, %arg2, %c1_i32 : i32
    %10 = arith.extui %9 : i1 to i32
    %c0_i32_8 = arith.constant 0 : i32
    %11 = arith.cmpi ne, %10, %c0_i32_8 : i32
    scf.if %11 {
      %c0_9 = arith.constant 0 : index
      %c0_10 = arith.constant 0 : index
      %12 = vector.load %arg7[%c0_9, %c0_10] : memref<32x256xf32, #tpu.memory_space<vmem>>, vector<32x256xf32>
      %c0_11 = arith.constant 0 : index
      %c0_12 = arith.constant 0 : index
      %13 = vector.load %arg5[%c0_11, %c0_12] : memref<1x256xf32, #tpu.memory_space<vmem>>, vector<1x256xf32>
      %14 = vector.broadcast %13 : vector<1x256xf32> to vector<32x256xf32>
      %15 = arith.addf %12, %14 : vector<32x256xf32>
      %cst_13 = arith.constant 0.000000e+00 : f32
      %16 = vector.broadcast %cst_13 : f32 to vector<32x256xf32>
      %17 = arith.maximumf %15, %16 : vector<32x256xf32>
      %c0_14 = arith.constant 0 : index
      %c0_15 = arith.constant 0 : index
      %18 = vector.load %arg6[%c0_14, %c0_15] : memref<32x256xf32, #tpu.memory_space<vmem>>, vector<32x256xf32>
      tpu.vector_store %arg6[%c0_14, %c0_15], %17 {strides = array<i32>} : memref<32x256xf32, #tpu.memory_space<vmem>>, vector<32x256xf32>,
    } else {
    }
    return
  }
  func.func @transform_0(%arg0: i32, %arg1: i32, %arg2: i32) -> (i32, i32) {
    %c0_i32 = arith.constant 0 : i32
    return %arg0, %arg2 : i32, i32
  }
  func.func @transform_1(%arg0: i32, %arg1: i32, %arg2: i32) -> (i32, i32) {
    %c0_i32 = arith.constant 0 : i32
    return %arg2, %arg1 : i32, i32
  }
  func.func @transform_2(%arg0: i32, %arg1: i32, %arg2: i32) -> (i32, i32) {
    %c0_i32 = arith.constant 0 : i32
    %c0_i32_0 = arith.constant 0 : i32
    return %c0_i32, %arg1 : i32, i32
  }
  func.func @transform_3(%arg0: i32, %arg1: i32, %arg2: i32) -> (i32, i32) {
    %c0_i32 = arith.constant 0 : i32
    return %arg0, %arg1 : i32, i32
  }
}

module attributes {stable_mosaic.version = 11 : i64} {
  func.func @_mm_kernel(%arg0: i32, %arg1: i32, %arg2: i32, %arg3: memref<8x256xbf16, #tpu.memory_space<vmem>>, %arg4: memref<256x256xbf16, #tpu.memory_space<vmem>>, %arg5: memref<1x256xf32, #tpu.memory_space<vmem>>, %arg6: memref<8x256xf32, #tpu.memory_space<vmem>>, %arg7: memref<8x256xf32, #tpu.memory_space<vmem>>) attributes {dimension_semantics = [#tpu.dimension_semantics<parallel>, #tpu.dimension_semantics<parallel>, #tpu.dimension_semantics<arbitrary>], iteration_bounds = array<i64: 1, 1, 9>, scalar_prefetch = 0 : i64, scratch_operands = 1 : i64, tpu.core_type = #tpu.core_type<tc>, window_params = [{transform_indices = @transform_0, window_bounds = array<i64: 8, 256>}, {transform_indices = @transform_1, window_bounds = array<i64: 256, 256>}, {transform_indices = @transform_2, window_bounds = array<i64: 1, 256>}, {transform_indices = @transform_3, window_bounds = array<i64: 8, 256>}]} {
    %c0_i32 = arith.constant 0 : i32
    %0 = arith.cmpi eq, %arg2, %c0_i32 : i32
    %1 = arith.extui %0 : i1 to i32
    %c0_i32_0 = arith.constant 0 : i32
    %2 = arith.cmpi ne, %1, %c0_i32_0 : i32
    scf.if %2 {
      %cst_9 = arith.constant 0.000000e+00 : f32
      %12 = vector.broadcast %cst_9 : f32 to vector<8x256xf32>
      %c0_10 = arith.constant 0 : index
      %c0_11 = arith.constant 0 : index
      %13 = vector.load %arg7[%c0_10, %c0_11] : memref<8x256xf32, #tpu.memory_space<vmem>>, vector<8x256xf32>
      tpu.vector_store %arg7[%c0_10, %c0_11], %12 {strides = array<i32>} : memref<8x256xf32, #tpu.memory_space<vmem>>, vector<8x256xf32>,
    } else {
    }
    %c0 = arith.constant 0 : index
    %c0_1 = arith.constant 0 : index
    %3 = vector.load %arg7[%c0, %c0_1] : memref<8x256xf32, #tpu.memory_space<vmem>>, vector<8x256xf32>
    %c0_2 = arith.constant 0 : index
    %c0_3 = arith.constant 0 : index
    %4 = vector.load %arg3[%c0_2, %c0_3] : memref<8x256xbf16, #tpu.memory_space<vmem>>, vector<8x256xbf16>
    %c0_4 = arith.constant 0 : index
    %c0_5 = arith.constant 0 : index
    %5 = vector.load %arg4[%c0_4, %c0_5] : memref<256x256xbf16, #tpu.memory_space<vmem>>, vector<256x256xbf16>
    %cst = arith.constant dense<0.000000e+00> : vector<8x256xf32>
    %6 = tpu.matmul %4, %5, %cst {dimension_numbers = #tpu.dot_dimension_numbers<[1], [0], [0], [1], [0, 0, 1, 1], [], []>} : vector<8x256xbf16>, vector<256x256xbf16>, vector<8x256xf32> -> vector<8x256xf32>
    %7 = arith.addf %3, %6 : vector<8x256xf32>
    %c0_6 = arith.constant 0 : index
    %c0_7 = arith.constant 0 : index
    %8 = vector.load %arg7[%c0_6, %c0_7] : memref<8x256xf32, #tpu.memory_space<vmem>>, vector<8x256xf32>
    tpu.vector_store %arg7[%c0_6, %c0_7], %7 {strides = array<i32>} : memref<8x256xf32, #tpu.memory_space<vmem>>, vector<8x256xf32>,
    %c8_i32 = arith.constant 8 : i32
    %9 = arith.cmpi eq, %arg2, %c8_i32 : i32
    %10 = arith.extui %9 : i1 to i32
    %c0_i32_8 = arith.constant 0 : i32
    %11 = arith.cmpi ne, %10, %c0_i32_8 : i32
    scf.if %11 {
      %c0_9 = arith.constant 0 : index
      %c0_10 = arith.constant 0 : index
      %12 = vector.load %arg7[%c0_9, %c0_10] : memref<8x256xf32, #tpu.memory_space<vmem>>, vector<8x256xf32>
      %c0_11 = arith.constant 0 : index
      %c0_12 = arith.constant 0 : index
      %13 = vector.load %arg5[%c0_11, %c0_12] : memref<1x256xf32, #tpu.memory_space<vmem>>, vector<1x256xf32>
      %14 = vector.broadcast %13 : vector<1x256xf32> to vector<8x256xf32>
      %15 = arith.addf %12, %14 : vector<8x256xf32>
      %cst_13 = arith.constant 0.000000e+00 : f32
      %16 = vector.broadcast %cst_13 : f32 to vector<8x256xf32>
      %17 = arith.maximumf %15, %16 : vector<8x256xf32>
      %c0_14 = arith.constant 0 : index
      %c0_15 = arith.constant 0 : index
      %18 = vector.load %arg6[%c0_14, %c0_15] : memref<8x256xf32, #tpu.memory_space<vmem>>, vector<8x256xf32>
      tpu.vector_store %arg6[%c0_14, %c0_15], %17 {strides = array<i32>} : memref<8x256xf32, #tpu.memory_space<vmem>>, vector<8x256xf32>,
    } else {
    }
    return
  }
  func.func @transform_0(%arg0: i32, %arg1: i32, %arg2: i32) -> (i32, i32) {
    %c0_i32 = arith.constant 0 : i32
    return %arg0, %arg2 : i32, i32
  }
  func.func @transform_1(%arg0: i32, %arg1: i32, %arg2: i32) -> (i32, i32) {
    %c0_i32 = arith.constant 0 : i32
    return %arg2, %arg1 : i32, i32
  }
  func.func @transform_2(%arg0: i32, %arg1: i32, %arg2: i32) -> (i32, i32) {
    %c0_i32 = arith.constant 0 : i32
    %c0_i32_0 = arith.constant 0 : i32
    return %c0_i32, %arg1 : i32, i32
  }
  func.func @transform_3(%arg0: i32, %arg1: i32, %arg2: i32) -> (i32, i32) {
    %c0_i32 = arith.constant 0 : i32
    return %arg0, %arg1 : i32, i32
  }
}

module attributes {stable_mosaic.version = 11 : i64} {
  func.func @_mm_kernel(%arg0: i32, %arg1: i32, %arg2: i32, %arg3: memref<8x256xbf16, #tpu.memory_space<vmem>>, %arg4: memref<256x256xbf16, #tpu.memory_space<vmem>>, %arg5: memref<1x256xf32, #tpu.memory_space<vmem>>, %arg6: memref<8x256xf32, #tpu.memory_space<vmem>>, %arg7: memref<8x256xf32, #tpu.memory_space<vmem>>) attributes {dimension_semantics = [#tpu.dimension_semantics<parallel>, #tpu.dimension_semantics<parallel>, #tpu.dimension_semantics<arbitrary>], iteration_bounds = array<i64: 1, 4, 2>, scalar_prefetch = 0 : i64, scratch_operands = 1 : i64, tpu.core_type = #tpu.core_type<tc>, window_params = [{transform_indices = @transform_0, window_bounds = array<i64: 8, 256>}, {transform_indices = @transform_1, window_bounds = array<i64: 256, 256>}, {transform_indices = @transform_2, window_bounds = array<i64: 1, 256>}, {transform_indices = @transform_3, window_bounds = array<i64: 8, 256>}]} {
    %c0_i32 = arith.constant 0 : i32
    %0 = arith.cmpi eq, %arg2, %c0_i32 : i32
    %1 = arith.extui %0 : i1 to i32
    %c0_i32_0 = arith.constant 0 : i32
    %2 = arith.cmpi ne, %1, %c0_i32_0 : i32
    scf.if %2 {
      %cst_9 = arith.constant 0.000000e+00 : f32
      %12 = vector.broadcast %cst_9 : f32 to vector<8x256xf32>
      %c0_10 = arith.constant 0 : index
      %c0_11 = arith.constant 0 : index
      %13 = vector.load %arg7[%c0_10, %c0_11] : memref<8x256xf32, #tpu.memory_space<vmem>>, vector<8x256xf32>
      tpu.vector_store %arg7[%c0_10, %c0_11], %12 {strides = array<i32>} : memref<8x256xf32, #tpu.memory_space<vmem>>, vector<8x256xf32>,
    } else {
    }
    %c0 = arith.constant 0 : index
    %c0_1 = arith.constant 0 : index
    %3 = vector.load %arg7[%c0, %c0_1] : memref<8x256xf32, #tpu.memory_space<vmem>>, vector<8x256xf32>
    %c0_2 = arith.constant 0 : index
    %c0_3 = arith.constant 0 : index
    %4 = vector.load %arg3[%c0_2, %c0_3] : memref<8x256xbf16, #tpu.memory_space<vmem>>, vector<8x256xbf16>
    %c0_4 = arith.constant 0 : index
    %c0_5 = arith.constant 0 : index
    %5 = vector.load %arg4[%c0_4, %c0_5] : memref<256x256xbf16, #tpu.memory_space<vmem>>, vector<256x256xbf16>
    %cst = arith.constant dense<0.000000e+00> : vector<8x256xf32>
    %6 = tpu.matmul %4, %5, %cst {dimension_numbers = #tpu.dot_dimension_numbers<[1], [0], [0], [1], [0, 0, 1, 1], [], []>} : vector<8x256xbf16>, vector<256x256xbf16>, vector<8x256xf32> -> vector<8x256xf32>
    %7 = arith.addf %3, %6 : vector<8x256xf32>
    %c0_6 = arith.constant 0 : index
    %c0_7 = arith.constant 0 : index
    %8 = vector.load %arg7[%c0_6, %c0_7] : memref<8x256xf32, #tpu.memory_space<vmem>>, vector<8x256xf32>
    tpu.vector_store %arg7[%c0_6, %c0_7], %7 {strides = array<i32>} : memref<8x256xf32, #tpu.memory_space<vmem>>, vector<8x256xf32>,
    %c1_i32 = arith.constant 1 : i32
    %9 = arith.cmpi eq, %arg2, %c1_i32 : i32
    %10 = arith.extui %9 : i1 to i32
    %c0_i32_8 = arith.constant 0 : i32
    %11 = arith.cmpi ne, %10, %c0_i32_8 : i32
    scf.if %11 {
      %c0_9 = arith.constant 0 : index
      %c0_10 = arith.constant 0 : index
      %12 = vector.load %arg7[%c0_9, %c0_10] : memref<8x256xf32, #tpu.memory_space<vmem>>, vector<8x256xf32>
      %c0_11 = arith.constant 0 : index
      %c0_12 = arith.constant 0 : index
      %13 = vector.load %arg5[%c0_11, %c0_12] : memref<1x256xf32, #tpu.memory_space<vmem>>, vector<1x256xf32>
      %14 = vector.broadcast %13 : vector<1x256xf32> to vector<8x256xf32>
      %15 = arith.addf %12, %14 : vector<8x256xf32>
      %c0_13 = arith.constant 0 : index
      %c0_14 = arith.constant 0 : index
      %16 = vector.load %arg6[%c0_13, %c0_14] : memref<8x256xf32, #tpu.memory_space<vmem>>, vector<8x256xf32>
      tpu.vector_store %arg6[%c0_13, %c0_14], %15 {strides = array<i32>} : memref<8x256xf32, #tpu.memory_space<vmem>>, vector<8x256xf32>,
    } else {
    }
    return
  }
  func.func @transform_0(%arg0: i32, %arg1: i32, %arg2: i32) -> (i32, i32) {
    %c0_i32 = arith.constant 0 : i32
    return %arg0, %arg2 : i32, i32
  }
  func.func @transform_1(%arg0: i32, %arg1: i32, %arg2: i32) -> (i32, i32) {
    %c0_i32 = arith.constant 0 : i32
    return %arg2, %arg1 : i32, i32
  }
  func.func @transform_2(%arg0: i32, %arg1: i32, %arg2: i32) -> (i32, i32) {
    %c0_i32 = arith.constant 0 : i32
    %c0_i32_0 = arith.constant 0 : i32
    return %c0_i32, %arg1 : i32, i32
  }
  func.func @transform_3(%arg0: i32, %arg1: i32, %arg2: i32) -> (i32, i32) {
    %c0_i32 = arith.constant 0 : i32
    return %arg0, %arg1 : i32, i32
  }
}

module attributes {stable_mosaic.version = 11 : i64} {
  func.func @_mm_res_kernel(%arg0: i32, %arg1: i32, %arg2: i32, %arg3: memref<8x256xbf16, #tpu.memory_space<vmem>>, %arg4: memref<256x256xbf16, #tpu.memory_space<vmem>>, %arg5: memref<1x256xf32, #tpu.memory_space<vmem>>, %arg6: memref<8x256xf32, #tpu.memory_space<vmem>>, %arg7: memref<8x256xf32, #tpu.memory_space<vmem>>, %arg8: memref<8x256xf32, #tpu.memory_space<vmem>>) attributes {dimension_semantics = [#tpu.dimension_semantics<parallel>, #tpu.dimension_semantics<parallel>, #tpu.dimension_semantics<arbitrary>], iteration_bounds = array<i64: 1, 4, 1>, scalar_prefetch = 0 : i64, scratch_operands = 1 : i64, tpu.core_type = #tpu.core_type<tc>, window_params = [{transform_indices = @transform_0, window_bounds = array<i64: 8, 256>}, {transform_indices = @transform_1, window_bounds = array<i64: 256, 256>}, {transform_indices = @transform_2, window_bounds = array<i64: 1, 256>}, {transform_indices = @transform_3, window_bounds = array<i64: 8, 256>}, {transform_indices = @transform_4, window_bounds = array<i64: 8, 256>}]} {
    %c0_i32 = arith.constant 0 : i32
    %0 = arith.cmpi eq, %arg2, %c0_i32 : i32
    %1 = arith.extui %0 : i1 to i32
    %c0_i32_0 = arith.constant 0 : i32
    %2 = arith.cmpi ne, %1, %c0_i32_0 : i32
    scf.if %2 {
      %cst_10 = arith.constant 0.000000e+00 : f32
      %12 = vector.broadcast %cst_10 : f32 to vector<8x256xf32>
      %c0_11 = arith.constant 0 : index
      %c0_12 = arith.constant 0 : index
      %13 = vector.load %arg8[%c0_11, %c0_12] : memref<8x256xf32, #tpu.memory_space<vmem>>, vector<8x256xf32>
      tpu.vector_store %arg8[%c0_11, %c0_12], %12 {strides = array<i32>} : memref<8x256xf32, #tpu.memory_space<vmem>>, vector<8x256xf32>,
    } else {
    }
    %c0 = arith.constant 0 : index
    %c0_1 = arith.constant 0 : index
    %3 = vector.load %arg8[%c0, %c0_1] : memref<8x256xf32, #tpu.memory_space<vmem>>, vector<8x256xf32>
    %c0_2 = arith.constant 0 : index
    %c0_3 = arith.constant 0 : index
    %4 = vector.load %arg3[%c0_2, %c0_3] : memref<8x256xbf16, #tpu.memory_space<vmem>>, vector<8x256xbf16>
    %c0_4 = arith.constant 0 : index
    %c0_5 = arith.constant 0 : index
    %5 = vector.load %arg4[%c0_4, %c0_5] : memref<256x256xbf16, #tpu.memory_space<vmem>>, vector<256x256xbf16>
    %cst = arith.constant dense<0.000000e+00> : vector<8x256xf32>
    %6 = tpu.matmul %4, %5, %cst {dimension_numbers = #tpu.dot_dimension_numbers<[1], [0], [0], [1], [0, 0, 1, 1], [], []>} : vector<8x256xbf16>, vector<256x256xbf16>, vector<8x256xf32> -> vector<8x256xf32>
    %7 = arith.addf %3, %6 : vector<8x256xf32>
    %c0_6 = arith.constant 0 : index
    %c0_7 = arith.constant 0 : index
    %8 = vector.load %arg8[%c0_6, %c0_7] : memref<8x256xf32, #tpu.memory_space<vmem>>, vector<8x256xf32>
    tpu.vector_store %arg8[%c0_6, %c0_7], %7 {strides = array<i32>} : memref<8x256xf32, #tpu.memory_space<vmem>>, vector<8x256xf32>,
    %c0_i32_8 = arith.constant 0 : i32
    %9 = arith.cmpi eq, %arg2, %c0_i32_8 : i32
    %10 = arith.extui %9 : i1 to i32
    %c0_i32_9 = arith.constant 0 : i32
    %11 = arith.cmpi ne, %10, %c0_i32_9 : i32
    scf.if %11 {
      %c0_10 = arith.constant 0 : index
      %c0_11 = arith.constant 0 : index
      %12 = vector.load %arg8[%c0_10, %c0_11] : memref<8x256xf32, #tpu.memory_space<vmem>>, vector<8x256xf32>
      %c0_12 = arith.constant 0 : index
      %c0_13 = arith.constant 0 : index
      %13 = vector.load %arg5[%c0_12, %c0_13] : memref<1x256xf32, #tpu.memory_space<vmem>>, vector<1x256xf32>
      %14 = vector.broadcast %13 : vector<1x256xf32> to vector<8x256xf32>
      %15 = arith.addf %12, %14 : vector<8x256xf32>
      %c0_14 = arith.constant 0 : index
      %c0_15 = arith.constant 0 : index
      %16 = vector.load %arg6[%c0_14, %c0_15] : memref<8x256xf32, #tpu.memory_space<vmem>>, vector<8x256xf32>
      %17 = arith.addf %15, %16 : vector<8x256xf32>
      %cst_16 = arith.constant 0.000000e+00 : f32
      %18 = vector.broadcast %cst_16 : f32 to vector<8x256xf32>
      %19 = arith.maximumf %17, %18 : vector<8x256xf32>
      %c0_17 = arith.constant 0 : index
      %c0_18 = arith.constant 0 : index
      %20 = vector.load %arg7[%c0_17, %c0_18] : memref<8x256xf32, #tpu.memory_space<vmem>>, vector<8x256xf32>
      tpu.vector_store %arg7[%c0_17, %c0_18], %19 {strides = array<i32>} : memref<8x256xf32, #tpu.memory_space<vmem>>, vector<8x256xf32>,
    } else {
    }
    return
  }
  func.func @transform_0(%arg0: i32, %arg1: i32, %arg2: i32) -> (i32, i32) {
    %c0_i32 = arith.constant 0 : i32
    return %arg0, %arg2 : i32, i32
  }
  func.func @transform_1(%arg0: i32, %arg1: i32, %arg2: i32) -> (i32, i32) {
    %c0_i32 = arith.constant 0 : i32
    return %arg2, %arg1 : i32, i32
  }
  func.func @transform_2(%arg0: i32, %arg1: i32, %arg2: i32) -> (i32, i32) {
    %c0_i32 = arith.constant 0 : i32
    %c0_i32_0 = arith.constant 0 : i32
    return %c0_i32, %arg1 : i32, i32
  }
  func.func @transform_3(%arg0: i32, %arg1: i32, %arg2: i32) -> (i32, i32) {
    %c0_i32 = arith.constant 0 : i32
    return %arg0, %arg1 : i32, i32
  }
  func.func @transform_4(%arg0: i32, %arg1: i32, %arg2: i32) -> (i32, i32) {
    %c0_i32 = arith.constant 0 : i32
    return %arg0, %arg1 : i32, i32
  }
}

module attributes {stable_mosaic.version = 11 : i64} {
  func.func @_mm_kernel(%arg0: i32, %arg1: i32, %arg2: i32, %arg3: memref<8x256xbf16, #tpu.memory_space<vmem>>, %arg4: memref<256x256xbf16, #tpu.memory_space<vmem>>, %arg5: memref<1x256xf32, #tpu.memory_space<vmem>>, %arg6: memref<8x256xf32, #tpu.memory_space<vmem>>, %arg7: memref<8x256xf32, #tpu.memory_space<vmem>>) attributes {dimension_semantics = [#tpu.dimension_semantics<parallel>, #tpu.dimension_semantics<parallel>, #tpu.dimension_semantics<arbitrary>], iteration_bounds = array<i64: 1, 1, 4>, scalar_prefetch = 0 : i64, scratch_operands = 1 : i64, tpu.core_type = #tpu.core_type<tc>, window_params = [{transform_indices = @transform_0, window_bounds = array<i64: 8, 256>}, {transform_indices = @transform_1, window_bounds = array<i64: 256, 256>}, {transform_indices = @transform_2, window_bounds = array<i64: 1, 256>}, {transform_indices = @transform_3, window_bounds = array<i64: 8, 256>}]} {
    %c0_i32 = arith.constant 0 : i32
    %0 = arith.cmpi eq, %arg2, %c0_i32 : i32
    %1 = arith.extui %0 : i1 to i32
    %c0_i32_0 = arith.constant 0 : i32
    %2 = arith.cmpi ne, %1, %c0_i32_0 : i32
    scf.if %2 {
      %cst_9 = arith.constant 0.000000e+00 : f32
      %12 = vector.broadcast %cst_9 : f32 to vector<8x256xf32>
      %c0_10 = arith.constant 0 : index
      %c0_11 = arith.constant 0 : index
      %13 = vector.load %arg7[%c0_10, %c0_11] : memref<8x256xf32, #tpu.memory_space<vmem>>, vector<8x256xf32>
      tpu.vector_store %arg7[%c0_10, %c0_11], %12 {strides = array<i32>} : memref<8x256xf32, #tpu.memory_space<vmem>>, vector<8x256xf32>,
    } else {
    }
    %c0 = arith.constant 0 : index
    %c0_1 = arith.constant 0 : index
    %3 = vector.load %arg7[%c0, %c0_1] : memref<8x256xf32, #tpu.memory_space<vmem>>, vector<8x256xf32>
    %c0_2 = arith.constant 0 : index
    %c0_3 = arith.constant 0 : index
    %4 = vector.load %arg3[%c0_2, %c0_3] : memref<8x256xbf16, #tpu.memory_space<vmem>>, vector<8x256xbf16>
    %c0_4 = arith.constant 0 : index
    %c0_5 = arith.constant 0 : index
    %5 = vector.load %arg4[%c0_4, %c0_5] : memref<256x256xbf16, #tpu.memory_space<vmem>>, vector<256x256xbf16>
    %cst = arith.constant dense<0.000000e+00> : vector<8x256xf32>
    %6 = tpu.matmul %4, %5, %cst {dimension_numbers = #tpu.dot_dimension_numbers<[1], [0], [0], [1], [0, 0, 1, 1], [], []>} : vector<8x256xbf16>, vector<256x256xbf16>, vector<8x256xf32> -> vector<8x256xf32>
    %7 = arith.addf %3, %6 : vector<8x256xf32>
    %c0_6 = arith.constant 0 : index
    %c0_7 = arith.constant 0 : index
    %8 = vector.load %arg7[%c0_6, %c0_7] : memref<8x256xf32, #tpu.memory_space<vmem>>, vector<8x256xf32>
    tpu.vector_store %arg7[%c0_6, %c0_7], %7 {strides = array<i32>} : memref<8x256xf32, #tpu.memory_space<vmem>>, vector<8x256xf32>,
    %c3_i32 = arith.constant 3 : i32
    %9 = arith.cmpi eq, %arg2, %c3_i32 : i32
    %10 = arith.extui %9 : i1 to i32
    %c0_i32_8 = arith.constant 0 : i32
    %11 = arith.cmpi ne, %10, %c0_i32_8 : i32
    scf.if %11 {
      %c0_9 = arith.constant 0 : index
      %c0_10 = arith.constant 0 : index
      %12 = vector.load %arg7[%c0_9, %c0_10] : memref<8x256xf32, #tpu.memory_space<vmem>>, vector<8x256xf32>
      %c0_11 = arith.constant 0 : index
      %c0_12 = arith.constant 0 : index
      %13 = vector.load %arg5[%c0_11, %c0_12] : memref<1x256xf32, #tpu.memory_space<vmem>>, vector<1x256xf32>
      %14 = vector.broadcast %13 : vector<1x256xf32> to vector<8x256xf32>
      %15 = arith.addf %12, %14 : vector<8x256xf32>
      %cst_13 = arith.constant 0.000000e+00 : f32
      %16 = vector.broadcast %cst_13 : f32 to vector<8x256xf32>
      %17 = arith.maximumf %15, %16 : vector<8x256xf32>
      %c0_14 = arith.constant 0 : index
      %c0_15 = arith.constant 0 : index
      %18 = vector.load %arg6[%c0_14, %c0_15] : memref<8x256xf32, #tpu.memory_space<vmem>>, vector<8x256xf32>
      tpu.vector_store %arg6[%c0_14, %c0_15], %17 {strides = array<i32>} : memref<8x256xf32, #tpu.memory_space<vmem>>, vector<8x256xf32>,
    } else {
    }
    return
  }
  func.func @transform_0(%arg0: i32, %arg1: i32, %arg2: i32) -> (i32, i32) {
    %c0_i32 = arith.constant 0 : i32
    return %arg0, %arg2 : i32, i32
  }
  func.func @transform_1(%arg0: i32, %arg1: i32, %arg2: i32) -> (i32, i32) {
    %c0_i32 = arith.constant 0 : i32
    return %arg2, %arg1 : i32, i32
  }
  func.func @transform_2(%arg0: i32, %arg1: i32, %arg2: i32) -> (i32, i32) {
    %c0_i32 = arith.constant 0 : i32
    %c0_i32_0 = arith.constant 0 : i32
    return %c0_i32, %arg1 : i32, i32
  }
  func.func @transform_3(%arg0: i32, %arg1: i32, %arg2: i32) -> (i32, i32) {
    %c0_i32 = arith.constant 0 : i32
    return %arg0, %arg1 : i32, i32
  }
}

module attributes {stable_mosaic.version = 11 : i64} {
  func.func @_mm_kernel(%arg0: i32, %arg1: i32, %arg2: i32, %arg3: memref<8x256xbf16, #tpu.memory_space<vmem>>, %arg4: memref<256x256xbf16, #tpu.memory_space<vmem>>, %arg5: memref<1x256xf32, #tpu.memory_space<vmem>>, %arg6: memref<8x256xf32, #tpu.memory_space<vmem>>, %arg7: memref<8x256xf32, #tpu.memory_space<vmem>>) attributes {dimension_semantics = [#tpu.dimension_semantics<parallel>, #tpu.dimension_semantics<parallel>, #tpu.dimension_semantics<arbitrary>], iteration_bounds = array<i64: 1, 2, 4>, scalar_prefetch = 0 : i64, scratch_operands = 1 : i64, tpu.core_type = #tpu.core_type<tc>, window_params = [{transform_indices = @transform_0, window_bounds = array<i64: 8, 256>}, {transform_indices = @transform_1, window_bounds = array<i64: 256, 256>}, {transform_indices = @transform_2, window_bounds = array<i64: 1, 256>}, {transform_indices = @transform_3, window_bounds = array<i64: 8, 256>}]} {
    %c0_i32 = arith.constant 0 : i32
    %0 = arith.cmpi eq, %arg2, %c0_i32 : i32
    %1 = arith.extui %0 : i1 to i32
    %c0_i32_0 = arith.constant 0 : i32
    %2 = arith.cmpi ne, %1, %c0_i32_0 : i32
    scf.if %2 {
      %cst_9 = arith.constant 0.000000e+00 : f32
      %12 = vector.broadcast %cst_9 : f32 to vector<8x256xf32>
      %c0_10 = arith.constant 0 : index
      %c0_11 = arith.constant 0 : index
      %13 = vector.load %arg7[%c0_10, %c0_11] : memref<8x256xf32, #tpu.memory_space<vmem>>, vector<8x256xf32>
      tpu.vector_store %arg7[%c0_10, %c0_11], %12 {strides = array<i32>} : memref<8x256xf32, #tpu.memory_space<vmem>>, vector<8x256xf32>,
    } else {
    }
    %c0 = arith.constant 0 : index
    %c0_1 = arith.constant 0 : index
    %3 = vector.load %arg7[%c0, %c0_1] : memref<8x256xf32, #tpu.memory_space<vmem>>, vector<8x256xf32>
    %c0_2 = arith.constant 0 : index
    %c0_3 = arith.constant 0 : index
    %4 = vector.load %arg3[%c0_2, %c0_3] : memref<8x256xbf16, #tpu.memory_space<vmem>>, vector<8x256xbf16>
    %c0_4 = arith.constant 0 : index
    %c0_5 = arith.constant 0 : index
    %5 = vector.load %arg4[%c0_4, %c0_5] : memref<256x256xbf16, #tpu.memory_space<vmem>>, vector<256x256xbf16>
    %cst = arith.constant dense<0.000000e+00> : vector<8x256xf32>
    %6 = tpu.matmul %4, %5, %cst {dimension_numbers = #tpu.dot_dimension_numbers<[1], [0], [0], [1], [0, 0, 1, 1], [], []>} : vector<8x256xbf16>, vector<256x256xbf16>, vector<8x256xf32> -> vector<8x256xf32>
    %7 = arith.addf %3, %6 : vector<8x256xf32>
    %c0_6 = arith.constant 0 : index
    %c0_7 = arith.constant 0 : index
    %8 = vector.load %arg7[%c0_6, %c0_7] : memref<8x256xf32, #tpu.memory_space<vmem>>, vector<8x256xf32>
    tpu.vector_store %arg7[%c0_6, %c0_7], %7 {strides = array<i32>} : memref<8x256xf32, #tpu.memory_space<vmem>>, vector<8x256xf32>,
    %c3_i32 = arith.constant 3 : i32
    %9 = arith.cmpi eq, %arg2, %c3_i32 : i32
    %10 = arith.extui %9 : i1 to i32
    %c0_i32_8 = arith.constant 0 : i32
    %11 = arith.cmpi ne, %10, %c0_i32_8 : i32
    scf.if %11 {
      %c0_9 = arith.constant 0 : index
      %c0_10 = arith.constant 0 : index
      %12 = vector.load %arg7[%c0_9, %c0_10] : memref<8x256xf32, #tpu.memory_space<vmem>>, vector<8x256xf32>
      %c0_11 = arith.constant 0 : index
      %c0_12 = arith.constant 0 : index
      %13 = vector.load %arg5[%c0_11, %c0_12] : memref<1x256xf32, #tpu.memory_space<vmem>>, vector<1x256xf32>
      %14 = vector.broadcast %13 : vector<1x256xf32> to vector<8x256xf32>
      %15 = arith.addf %12, %14 : vector<8x256xf32>
      %cst_13 = arith.constant 0.000000e+00 : f32
      %16 = vector.broadcast %cst_13 : f32 to vector<8x256xf32>
      %17 = arith.maximumf %15, %16 : vector<8x256xf32>
      %c0_14 = arith.constant 0 : index
      %c0_15 = arith.constant 0 : index
      %18 = vector.load %arg6[%c0_14, %c0_15] : memref<8x256xf32, #tpu.memory_space<vmem>>, vector<8x256xf32>
      tpu.vector_store %arg6[%c0_14, %c0_15], %17 {strides = array<i32>} : memref<8x256xf32, #tpu.memory_space<vmem>>, vector<8x256xf32>,
    } else {
    }
    return
  }
  func.func @transform_0(%arg0: i32, %arg1: i32, %arg2: i32) -> (i32, i32) {
    %c0_i32 = arith.constant 0 : i32
    return %arg0, %arg2 : i32, i32
  }
  func.func @transform_1(%arg0: i32, %arg1: i32, %arg2: i32) -> (i32, i32) {
    %c0_i32 = arith.constant 0 : i32
    return %arg2, %arg1 : i32, i32
  }
  func.func @transform_2(%arg0: i32, %arg1: i32, %arg2: i32) -> (i32, i32) {
    %c0_i32 = arith.constant 0 : i32
    %c0_i32_0 = arith.constant 0 : i32
    return %c0_i32, %arg1 : i32, i32
  }
  func.func @transform_3(%arg0: i32, %arg1: i32, %arg2: i32) -> (i32, i32) {
    %c0_i32 = arith.constant 0 : i32
    return %arg0, %arg1 : i32, i32
  }
}

module attributes {stable_mosaic.version = 11 : i64} {
  func.func @_mm_kernel(%arg0: i32, %arg1: i32, %arg2: i32, %arg3: memref<8x256xbf16, #tpu.memory_space<vmem>>, %arg4: memref<256x256xbf16, #tpu.memory_space<vmem>>, %arg5: memref<1x256xf32, #tpu.memory_space<vmem>>, %arg6: memref<8x256xf32, #tpu.memory_space<vmem>>, %arg7: memref<8x256xf32, #tpu.memory_space<vmem>>) attributes {dimension_semantics = [#tpu.dimension_semantics<parallel>, #tpu.dimension_semantics<parallel>, #tpu.dimension_semantics<arbitrary>], iteration_bounds = array<i64: 1, 2, 18>, scalar_prefetch = 0 : i64, scratch_operands = 1 : i64, tpu.core_type = #tpu.core_type<tc>, window_params = [{transform_indices = @transform_0, window_bounds = array<i64: 8, 256>}, {transform_indices = @transform_1, window_bounds = array<i64: 256, 256>}, {transform_indices = @transform_2, window_bounds = array<i64: 1, 256>}, {transform_indices = @transform_3, window_bounds = array<i64: 8, 256>}]} {
    %c0_i32 = arith.constant 0 : i32
    %0 = arith.cmpi eq, %arg2, %c0_i32 : i32
    %1 = arith.extui %0 : i1 to i32
    %c0_i32_0 = arith.constant 0 : i32
    %2 = arith.cmpi ne, %1, %c0_i32_0 : i32
    scf.if %2 {
      %cst_9 = arith.constant 0.000000e+00 : f32
      %12 = vector.broadcast %cst_9 : f32 to vector<8x256xf32>
      %c0_10 = arith.constant 0 : index
      %c0_11 = arith.constant 0 : index
      %13 = vector.load %arg7[%c0_10, %c0_11] : memref<8x256xf32, #tpu.memory_space<vmem>>, vector<8x256xf32>
      tpu.vector_store %arg7[%c0_10, %c0_11], %12 {strides = array<i32>} : memref<8x256xf32, #tpu.memory_space<vmem>>, vector<8x256xf32>,
    } else {
    }
    %c0 = arith.constant 0 : index
    %c0_1 = arith.constant 0 : index
    %3 = vector.load %arg7[%c0, %c0_1] : memref<8x256xf32, #tpu.memory_space<vmem>>, vector<8x256xf32>
    %c0_2 = arith.constant 0 : index
    %c0_3 = arith.constant 0 : index
    %4 = vector.load %arg3[%c0_2, %c0_3] : memref<8x256xbf16, #tpu.memory_space<vmem>>, vector<8x256xbf16>
    %c0_4 = arith.constant 0 : index
    %c0_5 = arith.constant 0 : index
    %5 = vector.load %arg4[%c0_4, %c0_5] : memref<256x256xbf16, #tpu.memory_space<vmem>>, vector<256x256xbf16>
    %cst = arith.constant dense<0.000000e+00> : vector<8x256xf32>
    %6 = tpu.matmul %4, %5, %cst {dimension_numbers = #tpu.dot_dimension_numbers<[1], [0], [0], [1], [0, 0, 1, 1], [], []>} : vector<8x256xbf16>, vector<256x256xbf16>, vector<8x256xf32> -> vector<8x256xf32>
    %7 = arith.addf %3, %6 : vector<8x256xf32>
    %c0_6 = arith.constant 0 : index
    %c0_7 = arith.constant 0 : index
    %8 = vector.load %arg7[%c0_6, %c0_7] : memref<8x256xf32, #tpu.memory_space<vmem>>, vector<8x256xf32>
    tpu.vector_store %arg7[%c0_6, %c0_7], %7 {strides = array<i32>} : memref<8x256xf32, #tpu.memory_space<vmem>>, vector<8x256xf32>,
    %c17_i32 = arith.constant 17 : i32
    %9 = arith.cmpi eq, %arg2, %c17_i32 : i32
    %10 = arith.extui %9 : i1 to i32
    %c0_i32_8 = arith.constant 0 : i32
    %11 = arith.cmpi ne, %10, %c0_i32_8 : i32
    scf.if %11 {
      %c0_9 = arith.constant 0 : index
      %c0_10 = arith.constant 0 : index
      %12 = vector.load %arg7[%c0_9, %c0_10] : memref<8x256xf32, #tpu.memory_space<vmem>>, vector<8x256xf32>
      %c0_11 = arith.constant 0 : index
      %c0_12 = arith.constant 0 : index
      %13 = vector.load %arg5[%c0_11, %c0_12] : memref<1x256xf32, #tpu.memory_space<vmem>>, vector<1x256xf32>
      %14 = vector.broadcast %13 : vector<1x256xf32> to vector<8x256xf32>
      %15 = arith.addf %12, %14 : vector<8x256xf32>
      %cst_13 = arith.constant 0.000000e+00 : f32
      %16 = vector.broadcast %cst_13 : f32 to vector<8x256xf32>
      %17 = arith.maximumf %15, %16 : vector<8x256xf32>
      %c0_14 = arith.constant 0 : index
      %c0_15 = arith.constant 0 : index
      %18 = vector.load %arg6[%c0_14, %c0_15] : memref<8x256xf32, #tpu.memory_space<vmem>>, vector<8x256xf32>
      tpu.vector_store %arg6[%c0_14, %c0_15], %17 {strides = array<i32>} : memref<8x256xf32, #tpu.memory_space<vmem>>, vector<8x256xf32>,
    } else {
    }
    return
  }
  func.func @transform_0(%arg0: i32, %arg1: i32, %arg2: i32) -> (i32, i32) {
    %c0_i32 = arith.constant 0 : i32
    return %arg0, %arg2 : i32, i32
  }
  func.func @transform_1(%arg0: i32, %arg1: i32, %arg2: i32) -> (i32, i32) {
    %c0_i32 = arith.constant 0 : i32
    return %arg2, %arg1 : i32, i32
  }
  func.func @transform_2(%arg0: i32, %arg1: i32, %arg2: i32) -> (i32, i32) {
    %c0_i32 = arith.constant 0 : i32
    %c0_i32_0 = arith.constant 0 : i32
    return %c0_i32, %arg1 : i32, i32
  }
  func.func @transform_3(%arg0: i32, %arg1: i32, %arg2: i32) -> (i32, i32) {
    %c0_i32 = arith.constant 0 : i32
    return %arg0, %arg1 : i32, i32
  }
}

module attributes {stable_mosaic.version = 11 : i64} {
  func.func @_mm_kernel(%arg0: i32, %arg1: i32, %arg2: i32, %arg3: memref<8x256xbf16, #tpu.memory_space<vmem>>, %arg4: memref<256x256xbf16, #tpu.memory_space<vmem>>, %arg5: memref<1x256xf32, #tpu.memory_space<vmem>>, %arg6: memref<8x256xf32, #tpu.memory_space<vmem>>, %arg7: memref<8x256xf32, #tpu.memory_space<vmem>>) attributes {dimension_semantics = [#tpu.dimension_semantics<parallel>, #tpu.dimension_semantics<parallel>, #tpu.dimension_semantics<arbitrary>], iteration_bounds = array<i64: 1, 8, 4>, scalar_prefetch = 0 : i64, scratch_operands = 1 : i64, tpu.core_type = #tpu.core_type<tc>, window_params = [{transform_indices = @transform_0, window_bounds = array<i64: 8, 256>}, {transform_indices = @transform_1, window_bounds = array<i64: 256, 256>}, {transform_indices = @transform_2, window_bounds = array<i64: 1, 256>}, {transform_indices = @transform_3, window_bounds = array<i64: 8, 256>}]} {
    %c0_i32 = arith.constant 0 : i32
    %0 = arith.cmpi eq, %arg2, %c0_i32 : i32
    %1 = arith.extui %0 : i1 to i32
    %c0_i32_0 = arith.constant 0 : i32
    %2 = arith.cmpi ne, %1, %c0_i32_0 : i32
    scf.if %2 {
      %cst_9 = arith.constant 0.000000e+00 : f32
      %12 = vector.broadcast %cst_9 : f32 to vector<8x256xf32>
      %c0_10 = arith.constant 0 : index
      %c0_11 = arith.constant 0 : index
      %13 = vector.load %arg7[%c0_10, %c0_11] : memref<8x256xf32, #tpu.memory_space<vmem>>, vector<8x256xf32>
      tpu.vector_store %arg7[%c0_10, %c0_11], %12 {strides = array<i32>} : memref<8x256xf32, #tpu.memory_space<vmem>>, vector<8x256xf32>,
    } else {
    }
    %c0 = arith.constant 0 : index
    %c0_1 = arith.constant 0 : index
    %3 = vector.load %arg7[%c0, %c0_1] : memref<8x256xf32, #tpu.memory_space<vmem>>, vector<8x256xf32>
    %c0_2 = arith.constant 0 : index
    %c0_3 = arith.constant 0 : index
    %4 = vector.load %arg3[%c0_2, %c0_3] : memref<8x256xbf16, #tpu.memory_space<vmem>>, vector<8x256xbf16>
    %c0_4 = arith.constant 0 : index
    %c0_5 = arith.constant 0 : index
    %5 = vector.load %arg4[%c0_4, %c0_5] : memref<256x256xbf16, #tpu.memory_space<vmem>>, vector<256x256xbf16>
    %cst = arith.constant dense<0.000000e+00> : vector<8x256xf32>
    %6 = tpu.matmul %4, %5, %cst {dimension_numbers = #tpu.dot_dimension_numbers<[1], [0], [0], [1], [0, 0, 1, 1], [], []>} : vector<8x256xbf16>, vector<256x256xbf16>, vector<8x256xf32> -> vector<8x256xf32>
    %7 = arith.addf %3, %6 : vector<8x256xf32>
    %c0_6 = arith.constant 0 : index
    %c0_7 = arith.constant 0 : index
    %8 = vector.load %arg7[%c0_6, %c0_7] : memref<8x256xf32, #tpu.memory_space<vmem>>, vector<8x256xf32>
    tpu.vector_store %arg7[%c0_6, %c0_7], %7 {strides = array<i32>} : memref<8x256xf32, #tpu.memory_space<vmem>>, vector<8x256xf32>,
    %c3_i32 = arith.constant 3 : i32
    %9 = arith.cmpi eq, %arg2, %c3_i32 : i32
    %10 = arith.extui %9 : i1 to i32
    %c0_i32_8 = arith.constant 0 : i32
    %11 = arith.cmpi ne, %10, %c0_i32_8 : i32
    scf.if %11 {
      %c0_9 = arith.constant 0 : index
      %c0_10 = arith.constant 0 : index
      %12 = vector.load %arg7[%c0_9, %c0_10] : memref<8x256xf32, #tpu.memory_space<vmem>>, vector<8x256xf32>
      %c0_11 = arith.constant 0 : index
      %c0_12 = arith.constant 0 : index
      %13 = vector.load %arg5[%c0_11, %c0_12] : memref<1x256xf32, #tpu.memory_space<vmem>>, vector<1x256xf32>
      %14 = vector.broadcast %13 : vector<1x256xf32> to vector<8x256xf32>
      %15 = arith.addf %12, %14 : vector<8x256xf32>
      %c0_13 = arith.constant 0 : index
      %c0_14 = arith.constant 0 : index
      %16 = vector.load %arg6[%c0_13, %c0_14] : memref<8x256xf32, #tpu.memory_space<vmem>>, vector<8x256xf32>
      tpu.vector_store %arg6[%c0_13, %c0_14], %15 {strides = array<i32>} : memref<8x256xf32, #tpu.memory_space<vmem>>, vector<8x256xf32>,
    } else {
    }
    return
  }
  func.func @transform_0(%arg0: i32, %arg1: i32, %arg2: i32) -> (i32, i32) {
    %c0_i32 = arith.constant 0 : i32
    return %arg0, %arg2 : i32, i32
  }
  func.func @transform_1(%arg0: i32, %arg1: i32, %arg2: i32) -> (i32, i32) {
    %c0_i32 = arith.constant 0 : i32
    return %arg2, %arg1 : i32, i32
  }
  func.func @transform_2(%arg0: i32, %arg1: i32, %arg2: i32) -> (i32, i32) {
    %c0_i32 = arith.constant 0 : i32
    %c0_i32_0 = arith.constant 0 : i32
    return %c0_i32, %arg1 : i32, i32
  }
  func.func @transform_3(%arg0: i32, %arg1: i32, %arg2: i32) -> (i32, i32) {
    %c0_i32 = arith.constant 0 : i32
    return %arg0, %arg1 : i32, i32
  }
}

module attributes {stable_mosaic.version = 11 : i64} {
  func.func @_mm_res_kernel(%arg0: i32, %arg1: i32, %arg2: i32, %arg3: memref<8x256xbf16, #tpu.memory_space<vmem>>, %arg4: memref<256x256xbf16, #tpu.memory_space<vmem>>, %arg5: memref<1x256xf32, #tpu.memory_space<vmem>>, %arg6: memref<8x256xf32, #tpu.memory_space<vmem>>, %arg7: memref<8x256xf32, #tpu.memory_space<vmem>>, %arg8: memref<8x256xf32, #tpu.memory_space<vmem>>) attributes {dimension_semantics = [#tpu.dimension_semantics<parallel>, #tpu.dimension_semantics<parallel>, #tpu.dimension_semantics<arbitrary>], iteration_bounds = array<i64: 1, 8, 2>, scalar_prefetch = 0 : i64, scratch_operands = 1 : i64, tpu.core_type = #tpu.core_type<tc>, window_params = [{transform_indices = @transform_0, window_bounds = array<i64: 8, 256>}, {transform_indices = @transform_1, window_bounds = array<i64: 256, 256>}, {transform_indices = @transform_2, window_bounds = array<i64: 1, 256>}, {transform_indices = @transform_3, window_bounds = array<i64: 8, 256>}, {transform_indices = @transform_4, window_bounds = array<i64: 8, 256>}]} {
    %c0_i32 = arith.constant 0 : i32
    %0 = arith.cmpi eq, %arg2, %c0_i32 : i32
    %1 = arith.extui %0 : i1 to i32
    %c0_i32_0 = arith.constant 0 : i32
    %2 = arith.cmpi ne, %1, %c0_i32_0 : i32
    scf.if %2 {
      %cst_9 = arith.constant 0.000000e+00 : f32
      %12 = vector.broadcast %cst_9 : f32 to vector<8x256xf32>
      %c0_10 = arith.constant 0 : index
      %c0_11 = arith.constant 0 : index
      %13 = vector.load %arg8[%c0_10, %c0_11] : memref<8x256xf32, #tpu.memory_space<vmem>>, vector<8x256xf32>
      tpu.vector_store %arg8[%c0_10, %c0_11], %12 {strides = array<i32>} : memref<8x256xf32, #tpu.memory_space<vmem>>, vector<8x256xf32>,
    } else {
    }
    %c0 = arith.constant 0 : index
    %c0_1 = arith.constant 0 : index
    %3 = vector.load %arg8[%c0, %c0_1] : memref<8x256xf32, #tpu.memory_space<vmem>>, vector<8x256xf32>
    %c0_2 = arith.constant 0 : index
    %c0_3 = arith.constant 0 : index
    %4 = vector.load %arg3[%c0_2, %c0_3] : memref<8x256xbf16, #tpu.memory_space<vmem>>, vector<8x256xbf16>
    %c0_4 = arith.constant 0 : index
    %c0_5 = arith.constant 0 : index
    %5 = vector.load %arg4[%c0_4, %c0_5] : memref<256x256xbf16, #tpu.memory_space<vmem>>, vector<256x256xbf16>
    %cst = arith.constant dense<0.000000e+00> : vector<8x256xf32>
    %6 = tpu.matmul %4, %5, %cst {dimension_numbers = #tpu.dot_dimension_numbers<[1], [0], [0], [1], [0, 0, 1, 1], [], []>} : vector<8x256xbf16>, vector<256x256xbf16>, vector<8x256xf32> -> vector<8x256xf32>
    %7 = arith.addf %3, %6 : vector<8x256xf32>
    %c0_6 = arith.constant 0 : index
    %c0_7 = arith.constant 0 : index
    %8 = vector.load %arg8[%c0_6, %c0_7] : memref<8x256xf32, #tpu.memory_space<vmem>>, vector<8x256xf32>
    tpu.vector_store %arg8[%c0_6, %c0_7], %7 {strides = array<i32>} : memref<8x256xf32, #tpu.memory_space<vmem>>, vector<8x256xf32>,
    %c1_i32 = arith.constant 1 : i32
    %9 = arith.cmpi eq, %arg2, %c1_i32 : i32
    %10 = arith.extui %9 : i1 to i32
    %c0_i32_8 = arith.constant 0 : i32
    %11 = arith.cmpi ne, %10, %c0_i32_8 : i32
    scf.if %11 {
      %c0_9 = arith.constant 0 : index
      %c0_10 = arith.constant 0 : index
      %12 = vector.load %arg8[%c0_9, %c0_10] : memref<8x256xf32, #tpu.memory_space<vmem>>, vector<8x256xf32>
      %c0_11 = arith.constant 0 : index
      %c0_12 = arith.constant 0 : index
      %13 = vector.load %arg5[%c0_11, %c0_12] : memref<1x256xf32, #tpu.memory_space<vmem>>, vector<1x256xf32>
      %14 = vector.broadcast %13 : vector<1x256xf32> to vector<8x256xf32>
      %15 = arith.addf %12, %14 : vector<8x256xf32>
      %c0_13 = arith.constant 0 : index
      %c0_14 = arith.constant 0 : index
      %16 = vector.load %arg6[%c0_13, %c0_14] : memref<8x256xf32, #tpu.memory_space<vmem>>, vector<8x256xf32>
      %17 = arith.addf %15, %16 : vector<8x256xf32>
      %cst_15 = arith.constant 0.000000e+00 : f32
      %18 = vector.broadcast %cst_15 : f32 to vector<8x256xf32>
      %19 = arith.maximumf %17, %18 : vector<8x256xf32>
      %c0_16 = arith.constant 0 : index
      %c0_17 = arith.constant 0 : index
      %20 = vector.load %arg7[%c0_16, %c0_17] : memref<8x256xf32, #tpu.memory_space<vmem>>, vector<8x256xf32>
      tpu.vector_store %arg7[%c0_16, %c0_17], %19 {strides = array<i32>} : memref<8x256xf32, #tpu.memory_space<vmem>>, vector<8x256xf32>,
    } else {
    }
    return
  }
  func.func @transform_0(%arg0: i32, %arg1: i32, %arg2: i32) -> (i32, i32) {
    %c0_i32 = arith.constant 0 : i32
    return %arg0, %arg2 : i32, i32
  }
  func.func @transform_1(%arg0: i32, %arg1: i32, %arg2: i32) -> (i32, i32) {
    %c0_i32 = arith.constant 0 : i32
    return %arg2, %arg1 : i32, i32
  }
  func.func @transform_2(%arg0: i32, %arg1: i32, %arg2: i32) -> (i32, i32) {
    %c0_i32 = arith.constant 0 : i32
    %c0_i32_0 = arith.constant 0 : i32
    return %c0_i32, %arg1 : i32, i32
  }
  func.func @transform_3(%arg0: i32, %arg1: i32, %arg2: i32) -> (i32, i32) {
    %c0_i32 = arith.constant 0 : i32
    return %arg0, %arg1 : i32, i32
  }
  func.func @transform_4(%arg0: i32, %arg1: i32, %arg2: i32) -> (i32, i32) {
    %c0_i32 = arith.constant 0 : i32
    return %arg0, %arg1 : i32, i32
  }
}

module attributes {stable_mosaic.version = 11 : i64} {
  func.func @_mm_kernel(%arg0: i32, %arg1: i32, %arg2: i32, %arg3: memref<8x256xbf16, #tpu.memory_space<vmem>>, %arg4: memref<256x256xbf16, #tpu.memory_space<vmem>>, %arg5: memref<1x256xf32, #tpu.memory_space<vmem>>, %arg6: memref<8x256xf32, #tpu.memory_space<vmem>>, %arg7: memref<8x256xf32, #tpu.memory_space<vmem>>) attributes {dimension_semantics = [#tpu.dimension_semantics<parallel>, #tpu.dimension_semantics<parallel>, #tpu.dimension_semantics<arbitrary>], iteration_bounds = array<i64: 1, 2, 8>, scalar_prefetch = 0 : i64, scratch_operands = 1 : i64, tpu.core_type = #tpu.core_type<tc>, window_params = [{transform_indices = @transform_0, window_bounds = array<i64: 8, 256>}, {transform_indices = @transform_1, window_bounds = array<i64: 256, 256>}, {transform_indices = @transform_2, window_bounds = array<i64: 1, 256>}, {transform_indices = @transform_3, window_bounds = array<i64: 8, 256>}]} {
    %c0_i32 = arith.constant 0 : i32
    %0 = arith.cmpi eq, %arg2, %c0_i32 : i32
    %1 = arith.extui %0 : i1 to i32
    %c0_i32_0 = arith.constant 0 : i32
    %2 = arith.cmpi ne, %1, %c0_i32_0 : i32
    scf.if %2 {
      %cst_9 = arith.constant 0.000000e+00 : f32
      %12 = vector.broadcast %cst_9 : f32 to vector<8x256xf32>
      %c0_10 = arith.constant 0 : index
      %c0_11 = arith.constant 0 : index
      %13 = vector.load %arg7[%c0_10, %c0_11] : memref<8x256xf32, #tpu.memory_space<vmem>>, vector<8x256xf32>
      tpu.vector_store %arg7[%c0_10, %c0_11], %12 {strides = array<i32>} : memref<8x256xf32, #tpu.memory_space<vmem>>, vector<8x256xf32>,
    } else {
    }
    %c0 = arith.constant 0 : index
    %c0_1 = arith.constant 0 : index
    %3 = vector.load %arg7[%c0, %c0_1] : memref<8x256xf32, #tpu.memory_space<vmem>>, vector<8x256xf32>
    %c0_2 = arith.constant 0 : index
    %c0_3 = arith.constant 0 : index
    %4 = vector.load %arg3[%c0_2, %c0_3] : memref<8x256xbf16, #tpu.memory_space<vmem>>, vector<8x256xbf16>
    %c0_4 = arith.constant 0 : index
    %c0_5 = arith.constant 0 : index
    %5 = vector.load %arg4[%c0_4, %c0_5] : memref<256x256xbf16, #tpu.memory_space<vmem>>, vector<256x256xbf16>
    %cst = arith.constant dense<0.000000e+00> : vector<8x256xf32>
    %6 = tpu.matmul %4, %5, %cst {dimension_numbers = #tpu.dot_dimension_numbers<[1], [0], [0], [1], [0, 0, 1, 1], [], []>} : vector<8x256xbf16>, vector<256x256xbf16>, vector<8x256xf32> -> vector<8x256xf32>
    %7 = arith.addf %3, %6 : vector<8x256xf32>
    %c0_6 = arith.constant 0 : index
    %c0_7 = arith.constant 0 : index
    %8 = vector.load %arg7[%c0_6, %c0_7] : memref<8x256xf32, #tpu.memory_space<vmem>>, vector<8x256xf32>
    tpu.vector_store %arg7[%c0_6, %c0_7], %7 {strides = array<i32>} : memref<8x256xf32, #tpu.memory_space<vmem>>, vector<8x256xf32>,
    %c7_i32 = arith.constant 7 : i32
    %9 = arith.cmpi eq, %arg2, %c7_i32 : i32
    %10 = arith.extui %9 : i1 to i32
    %c0_i32_8 = arith.constant 0 : i32
    %11 = arith.cmpi ne, %10, %c0_i32_8 : i32
    scf.if %11 {
      %c0_9 = arith.constant 0 : index
      %c0_10 = arith.constant 0 : index
      %12 = vector.load %arg7[%c0_9, %c0_10] : memref<8x256xf32, #tpu.memory_space<vmem>>, vector<8x256xf32>
      %c0_11 = arith.constant 0 : index
      %c0_12 = arith.constant 0 : index
      %13 = vector.load %arg5[%c0_11, %c0_12] : memref<1x256xf32, #tpu.memory_space<vmem>>, vector<1x256xf32>
      %14 = vector.broadcast %13 : vector<1x256xf32> to vector<8x256xf32>
      %15 = arith.addf %12, %14 : vector<8x256xf32>
      %cst_13 = arith.constant 0.000000e+00 : f32
      %16 = vector.broadcast %cst_13 : f32 to vector<8x256xf32>
      %17 = arith.maximumf %15, %16 : vector<8x256xf32>
      %c0_14 = arith.constant 0 : index
      %c0_15 = arith.constant 0 : index
      %18 = vector.load %arg6[%c0_14, %c0_15] : memref<8x256xf32, #tpu.memory_space<vmem>>, vector<8x256xf32>
      tpu.vector_store %arg6[%c0_14, %c0_15], %17 {strides = array<i32>} : memref<8x256xf32, #tpu.memory_space<vmem>>, vector<8x256xf32>,
    } else {
    }
    return
  }
  func.func @transform_0(%arg0: i32, %arg1: i32, %arg2: i32) -> (i32, i32) {
    %c0_i32 = arith.constant 0 : i32
    return %arg0, %arg2 : i32, i32
  }
  func.func @transform_1(%arg0: i32, %arg1: i32, %arg2: i32) -> (i32, i32) {
    %c0_i32 = arith.constant 0 : i32
    return %arg2, %arg1 : i32, i32
  }
  func.func @transform_2(%arg0: i32, %arg1: i32, %arg2: i32) -> (i32, i32) {
    %c0_i32 = arith.constant 0 : i32
    %c0_i32_0 = arith.constant 0 : i32
    return %c0_i32, %arg1 : i32, i32
  }
  func.func @transform_3(%arg0: i32, %arg1: i32, %arg2: i32) -> (i32, i32) {
    %c0_i32 = arith.constant 0 : i32
    return %arg0, %arg1 : i32, i32
  }
}

module attributes {stable_mosaic.version = 11 : i64} {
  func.func @_head_kernel(%arg0: memref<2x1x2048xf32, #tpu.memory_space<vmem>>, %arg1: memref<2048x128xbf16, #tpu.memory_space<vmem>>, %arg2: memref<1x128xf32, #tpu.memory_space<vmem>>, %arg3: memref<128x128xbf16, #tpu.memory_space<vmem>>, %arg4: memref<1x128xf32, #tpu.memory_space<vmem>>, %arg5: memref<2x128xf32, #tpu.memory_space<vmem>>, %arg6: memref<2x128xf32, #tpu.memory_space<vmem>>) attributes {dimension_semantics = [], scalar_prefetch = 0 : i64, scratch_operands = 0 : i64, tpu.core_type = #tpu.core_type<tc>} {
    %c0 = arith.constant 0 : index
    %c0_0 = arith.constant 0 : index
    %c0_1 = arith.constant 0 : index
    %0 = vector.load %arg0[%c0, %c0_0, %c0_1] : memref<2x1x2048xf32, #tpu.memory_space<vmem>>, vector<2x1x2048xf32>
    %cst = arith.constant dense<0.000000e+00> : vector<2x2048xf32>
    %1 = vector.multi_reduction <add>, %0, %cst [1] : vector<2x1x2048xf32> to vector<2x2048xf32>
    %cst_2 = arith.constant 1.000000e+00 : f32
    %2 = vector.broadcast %cst_2 : f32 to vector<2x2048xf32>
    %3 = arith.divf %1, %2 : vector<2x2048xf32>
    %4 = arith.truncf %3 : vector<2x2048xf32> to vector<2x2048xbf16>
    %c0_3 = arith.constant 0 : index
    %c0_4 = arith.constant 0 : index
    %5 = vector.load %arg1[%c0_3, %c0_4] : memref<2048x128xbf16, #tpu.memory_space<vmem>>, vector<2048x128xbf16>
    %cst_5 = arith.constant dense<0.000000e+00> : vector<2x128xf32>
    %6 = tpu.matmul %4, %5, %cst_5 {dimension_numbers = #tpu.dot_dimension_numbers<[1], [0], [0], [1], [0, 0, 1, 1], [], []>} : vector<2x2048xbf16>, vector<2048x128xbf16>, vector<2x128xf32> -> vector<2x128xf32>
    %c0_6 = arith.constant 0 : index
    %c0_7 = arith.constant 0 : index
    %7 = vector.load %arg2[%c0_6, %c0_7] : memref<1x128xf32, #tpu.memory_space<vmem>>, vector<1x128xf32>
    %8 = vector.broadcast %7 : vector<1x128xf32> to vector<2x128xf32>
    %9 = arith.addf %6, %8 : vector<2x128xf32>
    %cst_8 = arith.constant 0.000000e+00 : f32
    %10 = vector.broadcast %cst_8 : f32 to vector<2x128xf32>
    %11 = arith.maximumf %9, %10 : vector<2x128xf32>
    %c0_9 = arith.constant 0 : index
    %c0_10 = arith.constant 0 : index
    %12 = vector.load %arg5[%c0_9, %c0_10] : memref<2x128xf32, #tpu.memory_space<vmem>>, vector<2x128xf32>
    tpu.vector_store %arg5[%c0_9, %c0_10], %11 {strides = array<i32>} : memref<2x128xf32, #tpu.memory_space<vmem>>, vector<2x128xf32>,
    %13 = arith.truncf %11 : vector<2x128xf32> to vector<2x128xbf16>
    %c0_11 = arith.constant 0 : index
    %c0_12 = arith.constant 0 : index
    %14 = vector.load %arg3[%c0_11, %c0_12] : memref<128x128xbf16, #tpu.memory_space<vmem>>, vector<128x128xbf16>
    %cst_13 = arith.constant dense<0.000000e+00> : vector<2x128xf32>
    %15 = tpu.matmul %13, %14, %cst_13 {dimension_numbers = #tpu.dot_dimension_numbers<[1], [0], [0], [1], [0, 0, 1, 1], [], []>} : vector<2x128xbf16>, vector<128x128xbf16>, vector<2x128xf32> -> vector<2x128xf32>
    %c0_14 = arith.constant 0 : index
    %c0_15 = arith.constant 0 : index
    %16 = vector.load %arg4[%c0_14, %c0_15] : memref<1x128xf32, #tpu.memory_space<vmem>>, vector<1x128xf32>
    %17 = vector.broadcast %16 : vector<1x128xf32> to vector<2x128xf32>
    %18 = arith.addf %15, %17 : vector<2x128xf32>
    %19 = arith.mulf %18, %18 : vector<2x128xf32>
    %cst_16 = arith.constant dense<0.000000e+00> : vector<2xf32>
    %20 = vector.multi_reduction <add>, %19, %cst_16 [1] : vector<2x128xf32> to vector<2xf32>
    %21 = vector.shape_cast %20 : vector<2xf32> to vector<2x1xf32>
    %cst_17 = arith.constant 1.000000e-24 : f32
    %22 = vector.broadcast %cst_17 : f32 to vector<2x1xf32>
    %23 = arith.maximumf %21, %22 : vector<2x1xf32>
    %24 = math.rsqrt %23 : vector<2x1xf32>
    %25 = vector.broadcast %24 : vector<2x1xf32> to vector<2x128xf32>
    %26 = arith.mulf %18, %25 : vector<2x128xf32>
    %c0_18 = arith.constant 0 : index
    %c0_19 = arith.constant 0 : index
    %27 = vector.load %arg6[%c0_18, %c0_19] : memref<2x128xf32, #tpu.memory_space<vmem>>, vector<2x128xf32>
    tpu.vector_store %arg6[%c0_18, %c0_19], %26 {strides = array<i32>} : memref<2x128xf32, #tpu.memory_space<vmem>>, vector<2x128xf32>,
    return
  }
}

</mosaic_0001>

<bundles_post_ra>
// kernel: multicom_res50_forward.56
= control target key start
LH: loop header
LB: loop body
LE: loop exit
PB: predicated region body
PF: predicated region fallthrough
CT: control target
= control target key end

     0   :  { %s602_s1 = inlined_call_operand.vmem [shape: bf16[128,128], index: 1, kind: input, shape index: {}]   ;;  %s603_s0 = inlined_call_operand.vmem [shape: bf16[128,128], index: 0, kind: input, shape index: {}]   ;;  %s604_s2 = inlined_call_operand.vmem [shape: f32[1,128], index: 2, kind: input, shape index: {}]   ;;  %s605_s3 = inlined_call_operand.vmem [shape: f32[128,128], index: 3, kind: output, shape index: {}]  }
   0x1   :  { %v467_v0 = vld [vmem:[%s602_s1] sm:$0xff]   ;;  %v468_v1 = vld [vmem:[%s602_s1 + $0x8] sm:$0xff]   ;;  %v469_v2 = vld [vmem:[%s602_s1 + $0x10] sm:$0xff]  }
   0x2   :  { %419 = vmatprep.subr.bf16.mxu0 %v467_v0  ;;  %451 = vmatprep.subr.bf16.mxu1 %v467_v0  ;;  %v470_v3 = vld [vmem:[%s602_s1 + $0x18] sm:$0xff]   ;;  %v475_v4 = vld [vmem:[%s603_s0] sm:$0xff]   ;;  %v472_v7 = vld [vmem:[%s602_s1 + $0x28] sm:$0xff]  }
   0x3   :  { %420 = vmatpush3.bf16.msra.mxu0 %v467_v0  ;;  %459 = vmatpush3.bf16.msra.mxu1 %v467_v0  ;;  %v476_v5 = vld [vmem:[%s603_s0 + $0x20] sm:$0xff]   ;;  %v473_v8 = vld [vmem:[%s602_s1 + $0x30] sm:$0xff]   ;;  %v474_v9 = vld [vmem:[%s602_s1 + $0x38] sm:$0xff]  }
   0x4   :  { %421 = vmatprep.subr.bf16.mxu0 %v468_v1  ;;  %452 = vmatprep.subr.bf16.mxu1 %v468_v1  ;;  %v471_v6 = vld [vmem:[%s602_s1 + $0x20] sm:$0xff]   ;;  %v477_v10 = vld [vmem:[%s603_s0 + $0x8] sm:$0xff]   ;;  %v479_v12 = vld [vmem:[%s603_s0 + $0x10] sm:$0xff]  }
   0x5   :  { %435 = vmatprep.mubr.bf16.mxu0 %v475_v4  ;;  %443 = vmatprep.mubr.bf16.mxu1 %v476_v5  ;;  %v478_v11 = vld [vmem:[%s603_s0 + $0x28] sm:$0xff]   ;;  %v480_v13 = vld [vmem:[%s603_s0 + $0x30] sm:$0xff]   ;;  %v481_v14 = vld [vmem:[%s603_s0 + $0x18] sm:$0xff]  }
   0x6   :  { %v482_v15 = vld [vmem:[%s603_s0 + $0x38] sm:$0xff]   ;;  %v402_v16 = vld [vmem:[%s604_s2] ss:$0 sm:$0xff] }
   0x7   :  { %422 = vmatpush3.bf16.msra.mxu0 %v468_v1  ;;  %460 = vmatpush3.bf16.msra.mxu1 %v468_v1 }
   0x8   :  { %423 = vmatprep.subr.bf16.mxu0 %v469_v2  ;;  %453 = vmatprep.subr.bf16.mxu1 %v469_v2 }
   0xb   :  { %424 = vmatpush3.bf16.msra.mxu0 %v469_v2  ;;  %461 = vmatpush3.bf16.msra.mxu1 %v469_v2 }
   0xc   :  { %425 = vmatprep.subr.bf16.mxu0 %v470_v3  ;;  %454 = vmatprep.subr.bf16.mxu1 %v470_v3 }
   0xf   :  { %426 = vmatpush3.bf16.msra.mxu0 %v470_v3  ;;  %462 = vmatpush3.bf16.msra.mxu1 %v470_v3 }
  0x10   :  { %427 = vmatprep.subr.bf16.mxu0 %v471_v6  ;;  %455 = vmatprep.subr.bf16.mxu1 %v471_v6 }
  0x13   :  { %428 = vmatpush3.bf16.msra.mxu0 %v471_v6  ;;  %463 = vmatpush3.bf16.msra.mxu1 %v471_v6 }
  0x14   :  { %429 = vmatprep.subr.bf16.mxu0 %v472_v7  ;;  %456 = vmatprep.subr.bf16.mxu1 %v472_v7 }
  0x17   :  { %430 = vmatpush3.bf16.msra.mxu0 %v472_v7  ;;  %464 = vmatpush3.bf16.msra.mxu1 %v472_v7 }
  0x18   :  { %431 = vmatprep.subr.bf16.mxu0 %v473_v8  ;;  %457 = vmatprep.subr.bf16.mxu1 %v473_v8 }
  0x1b   :  { %432 = vmatpush3.bf16.msra.mxu0 %v473_v8  ;;  %465 = vmatpush3.bf16.msra.mxu1 %v473_v8 }
  0x1c   :  { %433 = vmatprep.subr.bf16.mxu0 %v474_v9  ;;  %458 = vmatprep.subr.bf16.mxu1 %v474_v9 }
  0x1f   :  { %434 = vmatpush3.bf16.msra.mxu0 %v474_v9  ;;  %466 = vmatpush3.bf16.msra.mxu1 %v474_v9 }
  0x22   :  { %436 = vmatmul.mubr.bf16.vlgmr.msra.gmra.mrb[0].mxu0 %v477_v10  ;;  %444 = vmatmul.mubr.bf16.vlgmr.msra.gmra.mrb[0].mxu1 %v478_v11 }
  0x23   :  { %439 = vmatprep.mubr.bf16.mxu0 %v479_v12  ;;  %447 = vmatprep.mubr.bf16.mxu1 %v480_v13 }
  0x2a   :  { %440 = vmatmul.mubr.bf16.gmra.mrb[4].mxu0 %v481_v14  ;;  %448 = vmatmul.mubr.bf16.gmra.mrb[4].mxu1 %v482_v15 }
  0xf5   :  { %v437_v17 = vpop.f32.mrb[0].mxu0  ;;  %v445_v18 = vpop.f32.mrb[0].mxu1 }
  0xf6   :  { %v336_v19 = vadd.f32 %v437_v17, %v402_v16  ;;  %v344_v20 = vadd.f32 %v445_v18, %v402_v16  ;;  %v213_v21 = vpop.f32.mrb[1].mxu0  ;;  %v245_v22 = vpop.f32.mrb[1].mxu1 }
  0xf7   :  { %v334_v23 = vadd.f32 %v402_v16, %v213_v21  ;;  %v342_v24 = vadd.f32 %v402_v16, %v245_v22  ;;  %v438_v25 = vpop.f32.mrb[2].mxu0  ;;  %v446_v26 = vpop.f32.mrb[2].mxu1 }
  0xf8   :  { %v352_v27 = vmax.f32 %v336_v19, 0.0  ;;  %v360_v28 = vmax.f32 %v344_v20, 0.0  ;;  %v337_v29 = vadd.f32 %v438_v25, %v402_v16  ;;  %v345_v30 = vadd.f32 %v446_v26, %v402_v16  ;;  %v216_v31 = vpop.f32.mrb[3].mxu0  ;;  %v248_v32 = vpop.f32.mrb[3].mxu1 }
  0xf9   :  { %v350_v33 = vmax.f32 %v334_v23, 0.0  ;;  %v358_v34 = vmax.f32 %v342_v24, 0.0  ;;  %v335_v35 = vadd.f32 %v402_v16, %v216_v31  ;;  %v343_v36 = vadd.f32 %v402_v16, %v248_v32 }
  0xfa   :  { %368 = vst [vmem:[%s605_s3 + $0x10] sm:$0xff] %v352_v27  ;;  %376 = vst [vmem:[%s605_s3 + $0x50] sm:$0xff] %v360_v28  ;;  %v353_v37 = vmax.f32 %v337_v29, 0.0  ;;  %v361_v38 = vmax.f32 %v345_v30, 0.0 }
  0xfb   :  { %366 = vst [vmem:[%s605_s3] sm:$0xff] %v350_v33  ;;  %374 = vst [vmem:[%s605_s3 + $0x40] sm:$0xff] %v358_v34  ;;  %v351_v39 = vmax.f32 %v335_v35, 0.0  ;;  %v359_v40 = vmax.f32 %v343_v36, 0.0 }
  0xfc   :  { %369 = vst [vmem:[%s605_s3 + $0x18] sm:$0xff] %v353_v37  ;;  %377 = vst [vmem:[%s605_s3 + $0x58] sm:$0xff] %v361_v38 }
  0xfd   :  { %367 = vst [vmem:[%s605_s3 + $0x8] sm:$0xff] %v351_v39  ;;  %375 = vst [vmem:[%s605_s3 + $0x48] sm:$0xff] %v359_v40  ;;  %v441_v41 = vpop.f32.mrb[4].mxu0  ;;  %v449_v42 = vpop.f32.mrb[4].mxu1 }
  0xfe   :  { %v340_v43 = vadd.f32 %v441_v41, %v402_v16  ;;  %v348_v44 = vadd.f32 %v449_v42, %v402_v16  ;;  %v229_v45 = vpop.f32.mrb[5].mxu0  ;;  %v261_v46 = vpop.f32.mrb[5].mxu1 }
  0xff   :  { %v338_v47 = vadd.f32 %v402_v16, %v229_v45  ;;  %v346_v48 = vadd.f32 %v402_v16, %v261_v46  ;;  %v442_v49 = vpop.f32.mrb[6].mxu0  ;;  %v450_v50 = vpop.f32.mrb[6].mxu1 }
 0x100   :  { %v356_v51 = vmax.f32 %v340_v43, 0.0  ;;  %v364_v52 = vmax.f32 %v348_v44, 0.0  ;;  %v341_v53 = vadd.f32 %v442_v49, %v402_v16  ;;  %v349_v54 = vadd.f32 %v450_v50, %v402_v16  ;;  %v232_v55 = vpop.f32.mrb[7].mxu0  ;;  %v264_v56 = vpop.f32.mrb[7].mxu1 }
 0x101   :  { %v354_v57 = vmax.f32 %v338_v47, 0.0  ;;  %v362_v58 = vmax.f32 %v346_v48, 0.0  ;;  %v339_v59 = vadd.f32 %v402_v16, %v232_v55  ;;  %v347_v60 = vadd.f32 %v402_v16, %v264_v56 }
 0x102   :  { %372 = vst [vmem:[%s605_s3 + $0x30] sm:$0xff] %v356_v51  ;;  %380 = vst [vmem:[%s605_s3 + $0x70] sm:$0xff] %v364_v52  ;;  %v357_v61 = vmax.f32 %v341_v53, 0.0  ;;  %v365_v62 = vmax.f32 %v349_v54, 0.0 }
 0x103   :  { %370 = vst [vmem:[%s605_s3 + $0x20] sm:$0xff] %v354_v57  ;;  %378 = vst [vmem:[%s605_s3 + $0x60] sm:$0xff] %v362_v58  ;;  %v355_v63 = vmax.f32 %v339_v59, 0.0  ;;  %v363_v0 = vmax.f32 %v347_v60, 0.0 }
 0x104   :  { %373 = vst [vmem:[%s605_s3 + $0x38] sm:$0xff] %v357_v61  ;;  %381 = vst [vmem:[%s605_s3 + $0x78] sm:$0xff] %v365_v62 }
 0x105   :  { %371 = vst [vmem:[%s605_s3 + $0x28] sm:$0xff] %v355_v63  ;;  %379 = vst [vmem:[%s605_s3 + $0x68] sm:$0xff] %v363_v0 }

// kernel: multicom_res50_forward.54
= control target key start
LH: loop header
LB: loop body
LE: loop exit
PB: predicated region body
PF: predicated region fallthrough
CT: control target
= control target key end

     0   :  { %s1457_s12 = smov 0   ;;  %s1459_s13 = smov 0   ;;  %s1650_s0 = inlined_call_operand.vmem [shape: bf16[512,256], index: 0, kind: input, shape index: {}]   ;;  %s1651_s1 = inlined_call_operand.vmem [shape: bf16[256,128], index: 1, kind: input, shape index: {}]   ;;  %s1652_s2 = inlined_call_operand.vmem [shape: f32[1,128], index: 2, kind: input, shape index: {}]   ;;  %s1653_s3 = inlined_call_operand.vmem [shape: f32[512,128], index: 3, kind: output, shape index: {}]  }
   0x1   :  { %s1461_s14 = smov 0  }
   0x2 LB: > { %s32_s15 = sadd.s32 1, %s1431_s13  ;;  %p1139_p0 = scmp.ge.s32.totalorder %s1435_s14, 1  ;;  %s1435_s14 = sphi %s1461_s14, %s13_s14   ;;  %s1431_s13 = sphi %s1459_s13, %s1655_s13   ;;  %s1427_s12 = sphi %s1457_s12, %s1654_s12  }
   0x3   : > { %p34_p1 = scmp.ge.s32.totalorder %s32_s15, 2  ;;  %p191_p2 = scmp.lt.s32.totalorder %s1435_s14, 3 }
   0x5   : > { %s1657_s15 = smov (%p34_p1, %s32_s15), 0  ;;  %p192_p3 = pnand %p1139_p0, %p191_p2 }
   0x6   : > { %v1349_v0 = vld [vmem:[%s1651_s1 + $0x40] sm:$0xff] (!%p192_p3)   ;;  %s1140_s18 = sshll.u32 (!%p192_p3), %s1427_s12, 5  ;;  %v1351_v2 = vld [vmem:[%s1651_s1 + $0x48] sm:$0xff] (!%p192_p3)   ;;  %v1353_v4 = vld [vmem:[%s1651_s1 + $0x50] sm:$0xff] (!%p192_p3)  }
   0x7   : > { %195 = sbr.rel (%p192_p3) target bundleno = 317 (0x13d), region = 32  ;;  %v1350_v1 = vld [vmem:[%s1651_s1] sm:$0xff] (!%p192_p3)   ;;  %1197 = vmatprep.subr.bf16.mxu0 (!%p192_p3), %v1349_v0  ;;  %1309 = vmatprep.subr.bf16.mxu1 (!%p192_p3), %v1349_v0  ;;  %v1352_v3 = vld [vmem:[%s1651_s1 + $0x8] sm:$0xff] (!%p192_p3)   ;;  %p236_p4 = scmp.lt.s32.totalorder (!%p192_p3), %s1140_s18, 63  ;;  %v1354_v5 = vld [vmem:[%s1651_s1 + $0x10] sm:$0xff] (!%p192_p3)  }
   0x8   : > { %1198 = vmatpush3.bf16.msra.mxu0 (!%p192_p3), %v1350_v1  ;;  %1317 = vmatpush3.bf16.msra.mxu1 (!%p192_p3), %v1350_v1  ;;  %v1355_v6 = vld [vmem:[%s1651_s1 + $0x58] sm:$0xff] (!%p192_p3)   ;;  %v1357_v8 = vld [vmem:[%s1651_s1 + $0x60] sm:$0xff] (!%p192_p3)   ;;  %v1359_v10 = vld [vmem:[%s1651_s1 + $0x68] sm:$0xff] (!%p192_p3)  }
   0x9   : > { %1199 = vmatprep.subr.bf16.mxu0 (!%p192_p3), %v1351_v2  ;;  %1310 = vmatprep.subr.bf16.mxu1 (!%p192_p3), %v1351_v2  ;;  %v1356_v7 = vld [vmem:[%s1651_s1 + $0x18] sm:$0xff] (!%p192_p3)   ;;  %v1358_v9 = vld [vmem:[%s1651_s1 + $0x20] sm:$0xff] (!%p192_p3)   ;;  %v1360_v13 = vld [vmem:[%s1651_s1 + $0x28] sm:$0xff] (!%p192_p3)  }
   0xa   : > { %v1361_v14 = vld [vmem:[%s1651_s1 + $0x70] sm:$0xff] (!%p192_p3)   ;;  %v1363_v16 = vld [vmem:[%s1651_s1 + $0x78] sm:$0xff] (!%p192_p3)   ;;  %v1568_v51 = vld [vmem:[%s1652_s2] ss:$0 sm:$0xff] (!%p192_p3) }
   0xb   : > { %v1362_v15 = vld [vmem:[%s1651_s1 + $0x30] sm:$0xff] (!%p192_p3)   ;;  %v1364_v17 = vld [vmem:[%s1651_s1 + $0x38] sm:$0xff] (!%p192_p3)  }
   0xc   : > { %1200 = vmatpush3.bf16.msra.mxu0 (!%p192_p3), %v1352_v3  ;;  %1318 = vmatpush3.bf16.msra.mxu1 (!%p192_p3), %v1352_v3 }
   0xd   : > { %1201 = vmatprep.subr.bf16.mxu0 (!%p192_p3), %v1353_v4  ;;  %1311 = vmatprep.subr.bf16.mxu1 (!%p192_p3), %v1353_v4 }
   0xe   : > { %s1659_s18 = smov (!%p236_p4, %s1140_s18), 63 }
   0xf   : > { %s1196_s6 = sshll.u32 %s1659_s18, 3 }
  0x10   : > { %1202 = vmatpush3.bf16.msra.mxu0 %v1354_v5  ;;  %1319 = vmatpush3.bf16.msra.mxu1 %v1354_v5  ;;  %s1510_s11 = scalar_lea.vmem %s1650_s0, %s1196_s6  ;;  %s1577_s8 = scalar_lea.vmem %s1653_s3, %s1196_s6 }
  0x11   : > { %1203 = vmatprep.subr.bf16.mxu0 %v1355_v6  ;;  %1312 = vmatprep.subr.bf16.mxu1 %v1355_v6  ;;  %v1367_v11 = vld [vmem:[%s1510_s11 + $0x4] ss:$8 sps:$4 sm:$0xff]   ;;  %v1365_v18 = vld [vmem:[%s1510_s11] ss:$8 sps:$4 sm:$0xff]   ;;  %v1371_v20 = vld [vmem:[%s1510_s11 + $0x14] ss:$8 sps:$4 sm:$0xff]  }
  0x12   : > { %v1370_v12 = vld [vmem:[%s1510_s11 + $0x84] ss:$8 sps:$4 sm:$0xff]   ;;  %688 = vmatprep.mubr.bf16.mxu0 %v1367_v11  ;;  %v1368_v19 = vld [vmem:[%s1510_s11 + $0x80] ss:$8 sps:$4 sm:$0xff]   ;;  %v1373_v21 = vld [vmem:[%s1510_s11 + $0x94] ss:$8 sps:$4 sm:$0xff]  }
  0x13   : > { %752 = vmatprep.mubr.bf16.mxu1 %v1370_v12  ;;  %v1375_v22 = vld [vmem:[%s1510_s11 + $0x10] ss:$8 sps:$4 sm:$0xff]   ;;  %v1377_v24 = vld [vmem:[%s1510_s11 + $0x24] ss:$8 sps:$4 sm:$0xff]   ;;  %v1381_v26 = vld [vmem:[%s1510_s11 + $0x20] ss:$8 sps:$4 sm:$0xff]  }
  0x14   : > { %1204 = vmatpush3.bf16.msra.mxu0 %v1356_v7  ;;  %1320 = vmatpush3.bf16.msra.mxu1 %v1356_v7  ;;  %v1376_v23 = vld [vmem:[%s1510_s11 + $0x90] ss:$8 sps:$4 sm:$0xff]   ;;  %v1379_v25 = vld [vmem:[%s1510_s11 + $0xa4] ss:$8 sps:$4 sm:$0xff]   ;;  %v1382_v27 = vld [vmem:[%s1510_s11 + $0xa0] ss:$8 sps:$4 sm:$0xff]  }
  0x15   : > { %1205 = vmatprep.subr.bf16.mxu0 %v1357_v8  ;;  %1313 = vmatprep.subr.bf16.mxu1 %v1357_v8  ;;  %v1383_v28 = vld [vmem:[%s1510_s11 + $0x34] ss:$8 sps:$4 sm:$0xff]   ;;  %v1387_v30 = vld [vmem:[%s1510_s11 + $0x30] ss:$8 sps:$4 sm:$0xff]   ;;  %v1389_v32 = vld [vmem:[%s1510_s11 + $0x44] ss:$8 sps:$4 sm:$0xff]  }
  0x16   : > { %v1385_v29 = vld [vmem:[%s1510_s11 + $0xb4] ss:$8 sps:$4 sm:$0xff]   ;;  %v1388_v31 = vld [vmem:[%s1510_s11 + $0xb0] ss:$8 sps:$4 sm:$0xff]   ;;  %v1391_v33 = vld [vmem:[%s1510_s11 + $0xc4] ss:$8 sps:$4 sm:$0xff]  }
  0x17   : > { %v1393_v34 = vld [vmem:[%s1510_s11 + $0x40] ss:$8 sps:$4 sm:$0xff]   ;;  %v1395_v36 = vld [vmem:[%s1510_s11 + $0x54] ss:$8 sps:$4 sm:$0xff]   ;;  %v1399_v38 = vld [vmem:[%s1510_s11 + $0x50] ss:$8 sps:$4 sm:$0xff]  }
  0x18   : > { %1206 = vmatpush3.bf16.msra.mxu0 %v1358_v9  ;;  %1321 = vmatpush3.bf16.msra.mxu1 %v1358_v9  ;;  %v1394_v35 = vld [vmem:[%s1510_s11 + $0xc0] ss:$8 sps:$4 sm:$0xff]   ;;  %v1397_v37 = vld [vmem:[%s1510_s11 + $0xd4] ss:$8 sps:$4 sm:$0xff]   ;;  %v1400_v39 = vld [vmem:[%s1510_s11 + $0xd0] ss:$8 sps:$4 sm:$0xff]  }
  0x19   : > { %1207 = vmatprep.subr.bf16.mxu0 %v1359_v10  ;;  %1314 = vmatprep.subr.bf16.mxu1 %v1359_v10  ;;  %v1401_v40 = vld [vmem:[%s1510_s11 + $0x64] ss:$8 sps:$4 sm:$0xff]   ;;  %v1405_v42 = vld [vmem:[%s1510_s11 + $0x60] ss:$8 sps:$4 sm:$0xff]   ;;  %v1407_v44 = vld [vmem:[%s1510_s11 + $0x74] ss:$8 sps:$4 sm:$0xff]  }
  0x1a   : > { %v1403_v41 = vld [vmem:[%s1510_s11 + $0xe4] ss:$8 sps:$4 sm:$0xff]   ;;  %v1406_v43 = vld [vmem:[%s1510_s11 + $0xe0] ss:$8 sps:$4 sm:$0xff]   ;;  %v1409_v45 = vld [vmem:[%s1510_s11 + $0xf4] ss:$8 sps:$4 sm:$0xff]  }
  0x1b   : > { %v1411_v46 = vld [vmem:[%s1510_s11 + $0x70] ss:$8 sps:$4 sm:$0xff]  }
  0x1c   : > { %1208 = vmatpush3.bf16.msra.mxu0 %v1360_v13  ;;  %1322 = vmatpush3.bf16.msra.mxu1 %v1360_v13  ;;  %v1412_v47 = vld [vmem:[%s1510_s11 + $0xf0] ss:$8 sps:$4 sm:$0xff]  }
  0x1d   : > { %1209 = vmatprep.subr.bf16.mxu0 %v1361_v14  ;;  %1315 = vmatprep.subr.bf16.mxu1 %v1361_v14 }
  0x20   : > { %1210 = vmatpush3.bf16.msra.mxu0 %v1362_v15  ;;  %1323 = vmatpush3.bf16.msra.mxu1 %v1362_v15 }
  0x21   : > { %1211 = vmatprep.subr.bf16.mxu0 %v1363_v16  ;;  %1316 = vmatprep.subr.bf16.mxu1 %v1363_v16 }
  0x24   : > { %1212 = vmatpush3.bf16.msra.mxu0 %v1364_v17  ;;  %1324 = vmatpush3.bf16.msra.mxu1 %v1364_v17 }
  0x27   : > { %689 = vmatmul.mubr.bf16.vlgmr.msra.gmra.mrb[0].mxu0 %v1365_v18  ;;  %753 = vmatmul.mubr.bf16.vlgmr.msra.gmra.mrb[0].mxu1 %v1368_v19 }
  0x28   : > { %696 = vmatprep.mubr.bf16.mxu0 %v1371_v20  ;;  %760 = vmatprep.mubr.bf16.mxu1 %v1373_v21 }
  0x2f   : > { %697 = vmatmul.mubr.bf16.gmra.mrb[4].mxu0 %v1375_v22  ;;  %761 = vmatmul.mubr.bf16.gmra.mrb[4].mxu1 %v1376_v23 }
  0x30   : > { %704 = vmatprep.mubr.bf16.mxu0 %v1377_v24  ;;  %768 = vmatprep.mubr.bf16.mxu1 %v1379_v25 }
  0x37   : > { %705 = vmatmul.mubr.bf16.gmra.mrb[8].mxu0 %v1381_v26  ;;  %769 = vmatmul.mubr.bf16.gmra.mrb[8].mxu1 %v1382_v27 }
  0x38   : > { %712 = vmatprep.mubr.bf16.mxu0 %v1383_v28  ;;  %776 = vmatprep.mubr.bf16.mxu1 %v1385_v29 }
  0x3f   : > { %713 = vmatmul.mubr.bf16.gmra.mrb[12].mxu0 %v1387_v30  ;;  %777 = vmatmul.mubr.bf16.gmra.mrb[12].mxu1 %v1388_v31 }
  0x40   : > { %720 = vmatprep.mubr.bf16.mxu0 %v1389_v32  ;;  %784 = vmatprep.mubr.bf16.mxu1 %v1391_v33 }
  0x47   : > { %721 = vmatmul.mubr.bf16.gmra.mrb[16].mxu0 %v1393_v34  ;;  %785 = vmatmul.mubr.bf16.gmra.mrb[16].mxu1 %v1394_v35 }
  0x48   : > { %728 = vmatprep.mubr.bf16.mxu0 %v1395_v36  ;;  %792 = vmatprep.mubr.bf16.mxu1 %v1397_v37 }
  0x4f   : > { %729 = vmatmul.mubr.bf16.gmra.mrb[20].mxu0 %v1399_v38  ;;  %793 = vmatmul.mubr.bf16.gmra.mrb[20].mxu1 %v1400_v39 }
  0x50   : > { %736 = vmatprep.mubr.bf16.mxu0 %v1401_v40  ;;  %800 = vmatprep.mubr.bf16.mxu1 %v1403_v41 }
  0x57   : > { %737 = vmatmul.mubr.bf16.gmra.mrb[24].mxu0 %v1405_v42  ;;  %801 = vmatmul.mubr.bf16.gmra.mrb[24].mxu1 %v1406_v43 }
  0x58   : > { %744 = vmatprep.mubr.bf16.mxu0 %v1407_v44  ;;  %808 = vmatprep.mubr.bf16.mxu1 %v1409_v45 }
  0x5f   : > { %745 = vmatmul.mubr.bf16.gmra.mrb[28].mxu0 %v1411_v46  ;;  %809 = vmatmul.mubr.bf16.gmra.mrb[28].mxu1 %v1412_v47 }
  0xfa   : > { %v1213_v48 = vpop.f32.mrb[0].mxu0  ;;  %v1261_v49 = vpop.f32.mrb[0].mxu1 }
  0xfb   : > { %v1214_v50 = vpop.f32.mrb[1].mxu0  ;;  %v1262_v52 = vpop.f32.mrb[1].mxu1 }
  0xfc   : > { %v1215_v53 = vadd.f32 %v1214_v50, %v1213_v48  ;;  %v1263_v54 = vadd.f32 %v1262_v52, %v1261_v49  ;;  %v1216_v55 = vpop.f32.mrb[2].mxu0  ;;  %v1264_v56 = vpop.f32.mrb[2].mxu1 }
  0xfd   : > { %v1217_v57 = vpop.f32.mrb[3].mxu0  ;;  %v1265_v58 = vpop.f32.mrb[3].mxu1 }
  0xfe   : > { %v923_v59 = vadd.f32 %v1215_v53, %v1568_v51  ;;  %v939_v60 = vadd.f32 %v1263_v54, %v1568_v51  ;;  %v1218_v61 = vadd.f32 %v1217_v57, %v1216_v55  ;;  %v1266_v62 = vadd.f32 %v1265_v58, %v1264_v56 }
 0x100   : > { %v955_v63 = vmax.f32 %v923_v59, 0.0  ;;  %v971_v0 = vmax.f32 %v939_v60, 0.0  ;;  %v924_v1 = vadd.f32 %v1218_v61, %v1568_v51  ;;  %v940_v2 = vadd.f32 %v1266_v62, %v1568_v51 }
 0x102   : > { %987 = vst [vmem:[%s1577_s8] sm:$0xff] %v955_v63  ;;  %1003 = vst [vmem:[%s1577_s8 + $0x80] sm:$0xff] %v971_v0  ;;  %v956_v3 = vmax.f32 %v924_v1, 0.0  ;;  %v972_v4 = vmax.f32 %v940_v2, 0.0  ;;  %v1219_v5 = vpop.f32.mrb[4].mxu0  ;;  %v1267_v6 = vpop.f32.mrb[4].mxu1 }
 0x103   : > { %v1220_v7 = vpop.f32.mrb[5].mxu0  ;;  %v1268_v8 = vpop.f32.mrb[5].mxu1 }
 0x104   : > { %988 = vst [vmem:[%s1577_s8 + $0x8] sm:$0xff] %v956_v3  ;;  %1004 = vst [vmem:[%s1577_s8 + $0x88] sm:$0xff] %v972_v4  ;;  %v1221_v9 = vadd.f32 %v1220_v7, %v1219_v5  ;;  %v1269_v10 = vadd.f32 %v1268_v8, %v1267_v6  ;;  %v1222_v11 = vpop.f32.mrb[6].mxu0  ;;  %v1270_v12 = vpop.f32.mrb[6].mxu1 }
 0x105   : > { %v1223_v13 = vpop.f32.mrb[7].mxu0  ;;  %v1271_v14 = vpop.f32.mrb[7].mxu1 }
 0x106   : > { %v925_v15 = vadd.f32 %v1221_v9, %v1568_v51  ;;  %v941_v16 = vadd.f32 %v1269_v10, %v1568_v51  ;;  %v1224_v17 = vadd.f32 %v1223_v13, %v1222_v11  ;;  %v1272_v18 = vadd.f32 %v1271_v14, %v1270_v12 }
 0x108   : > { %v957_v19 = vmax.f32 %v925_v15, 0.0  ;;  %v973_v20 = vmax.f32 %v941_v16, 0.0  ;;  %v926_v21 = vadd.f32 %v1224_v17, %v1568_v51  ;;  %v942_v22 = vadd.f32 %v1272_v18, %v1568_v51 }
 0x10a   : > { %989 = vst [vmem:[%s1577_s8 + $0x10] sm:$0xff] %v957_v19  ;;  %1005 = vst [vmem:[%s1577_s8 + $0x90] sm:$0xff] %v973_v20  ;;  %v958_v23 = vmax.f32 %v926_v21, 0.0  ;;  %v974_v24 = vmax.f32 %v942_v22, 0.0  ;;  %v1225_v25 = vpop.f32.mrb[8].mxu0  ;;  %v1273_v26 = vpop.f32.mrb[8].mxu1 }
 0x10b   : > { %v1226_v27 = vpop.f32.mrb[9].mxu0  ;;  %v1274_v28 = vpop.f32.mrb[9].mxu1 }
 0x10c   : > { %990 = vst [vmem:[%s1577_s8 + $0x18] sm:$0xff] %v958_v23  ;;  %1006 = vst [vmem:[%s1577_s8 + $0x98] sm:$0xff] %v974_v24  ;;  %v1227_v29 = vadd.f32 %v1226_v27, %v1225_v25  ;;  %v1275_v30 = vadd.f32 %v1274_v28, %v1273_v26  ;;  %v1228_v31 = vpop.f32.mrb[10].mxu0  ;;  %v1276_v32 = vpop.f32.mrb[10].mxu1 }
 0x10d   : > { %v1229_v33 = vpop.f32.mrb[11].mxu0  ;;  %v1277_v34 = vpop.f32.mrb[11].mxu1 }
 0x10e   : > { %v927_v35 = vadd.f32 %v1227_v29, %v1568_v51  ;;  %v943_v36 = vadd.f32 %v1275_v30, %v1568_v51  ;;  %v1230_v37 = vadd.f32 %v1229_v33, %v1228_v31  ;;  %v1278_v38 = vadd.f32 %v1277_v34, %v1276_v32 }
 0x110   : > { %v959_v39 = vmax.f32 %v927_v35, 0.0  ;;  %v975_v40 = vmax.f32 %v943_v36, 0.0  ;;  %v928_v41 = vadd.f32 %v1230_v37, %v1568_v51  ;;  %v944_v42 = vadd.f32 %v1278_v38, %v1568_v51 }
 0x112   : > { %991 = vst [vmem:[%s1577_s8 + $0x20] sm:$0xff] %v959_v39  ;;  %1007 = vst [vmem:[%s1577_s8 + $0xa0] sm:$0xff] %v975_v40  ;;  %v960_v43 = vmax.f32 %v928_v41, 0.0  ;;  %v976_v44 = vmax.f32 %v944_v42, 0.0  ;;  %v1231_v45 = vpop.f32.mrb[12].mxu0  ;;  %v1279_v46 = vpop.f32.mrb[12].mxu1 }
 0x113   : > { %v1232_v47 = vpop.f32.mrb[13].mxu0  ;;  %v1280_v48 = vpop.f32.mrb[13].mxu1 }
 0x114   : > { %992 = vst [vmem:[%s1577_s8 + $0x28] sm:$0xff] %v960_v43  ;;  %1008 = vst [vmem:[%s1577_s8 + $0xa8] sm:$0xff] %v976_v44  ;;  %v1233_v49 = vadd.f32 %v1232_v47, %v1231_v45  ;;  %v1281_v50 = vadd.f32 %v1280_v48, %v1279_v46  ;;  %v1234_v52 = vpop.f32.mrb[14].mxu0  ;;  %v1282_v53 = vpop.f32.mrb[14].mxu1 }
 0x115   : > { %v1235_v54 = vpop.f32.mrb[15].mxu0  ;;  %v1283_v55 = vpop.f32.mrb[15].mxu1 }
 0x116   : > { %v929_v56 = vadd.f32 %v1233_v49, %v1568_v51  ;;  %v945_v57 = vadd.f32 %v1281_v50, %v1568_v51  ;;  %v1236_v58 = vadd.f32 %v1235_v54, %v1234_v52  ;;  %v1284_v59 = vadd.f32 %v1283_v55, %v1282_v53 }
 0x118   : > { %v961_v60 = vmax.f32 %v929_v56, 0.0  ;;  %v977_v61 = vmax.f32 %v945_v57, 0.0  ;;  %v930_v62 = vadd.f32 %v1236_v58, %v1568_v51  ;;  %v946_v63 = vadd.f32 %v1284_v59, %v1568_v51 }
 0x11a   : > { %993 = vst [vmem:[%s1577_s8 + $0x30] sm:$0xff] %v961_v60  ;;  %1009 = vst [vmem:[%s1577_s8 + $0xb0] sm:$0xff] %v977_v61  ;;  %v962_v0 = vmax.f32 %v930_v62, 0.0  ;;  %v978_v1 = vmax.f32 %v946_v63, 0.0  ;;  %v1237_v2 = vpop.f32.mrb[16].mxu0  ;;  %v1285_v3 = vpop.f32.mrb[16].mxu1 }
 0x11b   : > { %v1238_v4 = vpop.f32.mrb[17].mxu0  ;;  %v1286_v5 = vpop.f32.mrb[17].mxu1 }
 0x11c   : > { %994 = vst [vmem:[%s1577_s8 + $0x38] sm:$0xff] %v962_v0  ;;  %1010 = vst [vmem:[%s1577_s8 + $0xb8] sm:$0xff] %v978_v1  ;;  %v1239_v6 = vadd.f32 %v1238_v4, %v1237_v2  ;;  %v1287_v7 = vadd.f32 %v1286_v5, %v1285_v3  ;;  %v1240_v8 = vpop.f32.mrb[18].mxu0  ;;  %v1288_v9 = vpop.f32.mrb[18].mxu1 }
 0x11d   : > { %v1241_v10 = vpop.f32.mrb[19].mxu0  ;;  %v1289_v11 = vpop.f32.mrb[19].mxu1 }
 0x11e   : > { %v931_v12 = vadd.f32 %v1239_v6, %v1568_v51  ;;  %v947_v13 = vadd.f32 %v1287_v7, %v1568_v51  ;;  %v1242_v14 = vadd.f32 %v1241_v10, %v1240_v8  ;;  %v1290_v15 = vadd.f32 %v1289_v11, %v1288_v9 }
 0x120   : > { %v963_v16 = vmax.f32 %v931_v12, 0.0  ;;  %v979_v17 = vmax.f32 %v947_v13, 0.0  ;;  %v932_v18 = vadd.f32 %v1242_v14, %v1568_v51  ;;  %v948_v19 = vadd.f32 %v1290_v15, %v1568_v51 }
 0x122   : > { %995 = vst [vmem:[%s1577_s8 + $0x40] sm:$0xff] %v963_v16  ;;  %1011 = vst [vmem:[%s1577_s8 + $0xc0] sm:$0xff] %v979_v17  ;;  %v964_v20 = vmax.f32 %v932_v18, 0.0  ;;  %v980_v21 = vmax.f32 %v948_v19, 0.0  ;;  %v1243_v22 = vpop.f32.mrb[20].mxu0  ;;  %v1291_v23 = vpop.f32.mrb[20].mxu1 }
 0x123   : > { %v1244_v24 = vpop.f32.mrb[21].mxu0  ;;  %v1292_v25 = vpop.f32.mrb[21].mxu1 }
 0x124   : > { %996 = vst [vmem:[%s1577_s8 + $0x48] sm:$0xff] %v964_v20  ;;  %1012 = vst [vmem:[%s1577_s8 + $0xc8] sm:$0xff] %v980_v21  ;;  %v1245_v26 = vadd.f32 %v1244_v24, %v1243_v22  ;;  %v1293_v27 = vadd.f32 %v1292_v25, %v1291_v23  ;;  %v1246_v28 = vpop.f32.mrb[22].mxu0  ;;  %v1294_v29 = vpop.f32.mrb[22].mxu1 }
 0x125   : > { %v1247_v30 = vpop.f32.mrb[23].mxu0  ;;  %v1295_v31 = vpop.f32.mrb[23].mxu1 }
 0x126   : > { %v933_v32 = vadd.f32 %v1245_v26, %v1568_v51  ;;  %v949_v33 = vadd.f32 %v1293_v27, %v1568_v51  ;;  %v1248_v34 = vadd.f32 %v1247_v30, %v1246_v28  ;;  %v1296_v35 = vadd.f32 %v1295_v31, %v1294_v29 }
 0x128   : > { %v965_v36 = vmax.f32 %v933_v32, 0.0  ;;  %v981_v37 = vmax.f32 %v949_v33, 0.0  ;;  %v934_v38 = vadd.f32 %v1248_v34, %v1568_v51  ;;  %v950_v39 = vadd.f32 %v1296_v35, %v1568_v51 }
 0x12a   : > { %997 = vst [vmem:[%s1577_s8 + $0x50] sm:$0xff] %v965_v36  ;;  %1013 = vst [vmem:[%s1577_s8 + $0xd0] sm:$0xff] %v981_v37  ;;  %v966_v40 = vmax.f32 %v934_v38, 0.0  ;;  %v982_v41 = vmax.f32 %v950_v39, 0.0  ;;  %v1249_v42 = vpop.f32.mrb[24].mxu0  ;;  %v1297_v43 = vpop.f32.mrb[24].mxu1 }
 0x12b   : > { %v1250_v44 = vpop.f32.mrb[25].mxu0  ;;  %v1298_v45 = vpop.f32.mrb[25].mxu1 }
 0x12c   : > { %998 = vst [vmem:[%s1577_s8 + $0x58] sm:$0xff] %v966_v40  ;;  %1014 = vst [vmem:[%s1577_s8 + $0xd8] sm:$0xff] %v982_v41  ;;  %v1251_v46 = vadd.f32 %v1250_v44, %v1249_v42  ;;  %v1299_v47 = vadd.f32 %v1298_v45, %v1297_v43  ;;  %v1252_v48 = vpop.f32.mrb[26].mxu0  ;;  %v1300_v49 = vpop.f32.mrb[26].mxu1 }
 0x12d   : > { %v1253_v50 = vpop.f32.mrb[27].mxu0  ;;  %v1301_v52 = vpop.f32.mrb[27].mxu1 }
 0x12e   : > { %v935_v53 = vadd.f32 %v1251_v46, %v1568_v51  ;;  %v951_v54 = vadd.f32 %v1299_v47, %v1568_v51  ;;  %v1254_v55 = vadd.f32 %v1253_v50, %v1252_v48  ;;  %v1302_v56 = vadd.f32 %v1301_v52, %v1300_v49 }
 0x130   : > { %v967_v57 = vmax.f32 %v935_v53, 0.0  ;;  %v983_v58 = vmax.f32 %v951_v54, 0.0  ;;  %v936_v59 = vadd.f32 %v1254_v55, %v1568_v51  ;;  %v952_v60 = vadd.f32 %v1302_v56, %v1568_v51 }
 0x132   : > { %999 = vst [vmem:[%s1577_s8 + $0x60] sm:$0xff] %v967_v57  ;;  %1015 = vst [vmem:[%s1577_s8 + $0xe0] sm:$0xff] %v983_v58  ;;  %v968_v61 = vmax.f32 %v936_v59, 0.0  ;;  %v984_v62 = vmax.f32 %v952_v60, 0.0  ;;  %v1255_v63 = vpop.f32.mrb[28].mxu0  ;;  %v1303_v0 = vpop.f32.mrb[28].mxu1 }
 0x133   : > { %v1256_v1 = vpop.f32.mrb[29].mxu0  ;;  %v1304_v2 = vpop.f32.mrb[29].mxu1 }
 0x134   : > { %1000 = vst [vmem:[%s1577_s8 + $0x68] sm:$0xff] %v968_v61  ;;  %1016 = vst [vmem:[%s1577_s8 + $0xe8] sm:$0xff] %v984_v62  ;;  %v1257_v3 = vadd.f32 %v1256_v1, %v1255_v63  ;;  %v1305_v4 = vadd.f32 %v1304_v2, %v1303_v0  ;;  %v1258_v5 = vpop.f32.mrb[30].mxu0  ;;  %v1306_v6 = vpop.f32.mrb[30].mxu1 }
 0x135   : > { %v1259_v7 = vpop.f32.mrb[31].mxu0  ;;  %v1307_v8 = vpop.f32.mrb[31].mxu1 }
 0x136   : > { %v937_v9 = vadd.f32 %v1257_v3, %v1568_v51  ;;  %v953_v10 = vadd.f32 %v1305_v4, %v1568_v51  ;;  %v1260_v11 = vadd.f32 %v1259_v7, %v1258_v5  ;;  %v1308_v12 = vadd.f32 %v1307_v8, %v1306_v6 }
 0x138   : > { %v969_v13 = vmax.f32 %v937_v9, 0.0  ;;  %v985_v14 = vmax.f32 %v953_v10, 0.0  ;;  %v938_v15 = vadd.f32 %v1260_v11, %v1568_v51  ;;  %v954_v16 = vadd.f32 %v1308_v12, %v1568_v51 }
 0x13a   : > { %1001 = vst [vmem:[%s1577_s8 + $0x70] sm:$0xff] %v969_v13  ;;  %1017 = vst [vmem:[%s1577_s8 + $0xf0] sm:$0xff] %v985_v14  ;;  %v970_v17 = vmax.f32 %v938_v15, 0.0  ;;  %v986_v18 = vmax.f32 %v954_v16, 0.0 }
 0x13c   : > { %1002 = vst [vmem:[%s1577_s8 + $0x78] sm:$0xff] %v970_v17  ;;  %1018 = vst [vmem:[%s1577_s8 + $0xf8] sm:$0xff] %v986_v18 }
 0x13d PF: > { %s13_s14 = sadd.s32 1, %s1435_s14   ;;  %s1654_s12 = smov %s1431_s13 }
 0x13e   : > { %p10_p5 = scmp.ge.s32.totalorder %s13_s14, 4   ;;  %s1655_s13 = smov %s1657_s15 }
 0x140   :  { %12 = sbr.rel (!%p10_p5) target bundleno = 2 (0x2), region = 76 }

// kernel: multicom_res50_forward.57
= control target key start
LH: loop header
LB: loop body
LE: loop exit
PB: predicated region body
PF: predicated region fallthrough
CT: control target
= control target key end

     0   :  { %s1047_s12 = smov 0   ;;  %s1049_s13 = smov 0   ;;  %s1203_s0 = inlined_call_operand.vmem [shape: bf16[128,640], index: 0, kind: input, shape index: {}]   ;;  %s1204_s1 = inlined_call_operand.vmem [shape: bf16[640,128], index: 1, kind: input, shape index: {}]   ;;  %s1205_s2 = inlined_call_operand.vmem [shape: f32[1,128], index: 2, kind: input, shape index: {}]   ;;  %s1206_s3 = inlined_call_operand.vmem [shape: f32[128,128], index: 3, kind: output, shape index: {}]  }
   0x1   :  { %s1051_s14 = smov 0   ;;  %s1053_s15 = smov 0  }
   0x2   :  { %s1055_s16 = smov 0  }
   0x3 LB: > { %s25_s17 = sadd.s32 1, %s1020_s15  ;;  %p48_p1 = scmp.ne.s32.totalorder %s1012_s13, %s1008_s12  ;;  %s1024_s16 = sphi %s1055_s16, %s13_s16   ;;  %s1020_s15 = sphi %s1053_s15, %s1210_s15   ;;  %s1016_s14 = sphi %s1051_s14, %s1209_s14   ;;  %s1012_s13 = sphi %s1049_s13, %s1208_s13   ;;  %s1008_s12 = sphi %s1047_s12, %s1207_s12  }
   0x4   : > { %p26_p0 = scmp.ge.s32.totalorder %s25_s17, 5  ;;  %p49_p2 = scmp.eq.s32.totalorder %s1024_s16, 0 }
   0x5   : > { %s41_s19 = sadd.s32 1, %s1012_s13  ;;  %p835_p5 = scmp.ge.s32.totalorder %s1024_s16, 5 }
   0x6   : > { %s1212_s17 = smov (%p26_p0, %s25_s17), 0  ;;  %p50_p3 = por %p49_p2, %p48_p1 }
   0x7   : > { %s37_s18 = ssub.s32 %s1020_s15, %s1212_s17  ;;  %162 = sbr.rel (%p835_p5) target bundleno = 28 (0x1c), region = 20 }
   0x8   : > { %p39_p4 = scmp.eq.s32.totalorder %s37_s18, 0 }
   0xa   : > { %s1082_s20 = scalar_select %p39_p4, %s1012_s13, %s41_s19  }
   0xe   : > { %165 = sbr.rel (!%p50_p3) target bundleno = 28 (0x1c), region = 24  ;;  %s167_s21 = sand.u32 (%p50_p3), 1, %s1012_s13  }
   0xf   : > { %s837_s22 = sshll.u32 (%p50_p3), %s1020_s15, 2  ;;  %s836_s23 = sshll.u32 (%p50_p3), %s167_s21, 6 }
  0x10   : > { %s1090_s26 = scalar_lea.vmem (%p50_p3), %s1203_s0, %s837_s22  ;;  %s169_s27 = scalar_lea.vmem (%p50_p3), [#allocation3], %s836_s23 }
  0x11   : > { %v190_v0 = vld [vmem:[%s1090_s26] sm:$0xf] (%p50_p3)  ;;  %v192_v1 = vld [vmem:[%s1090_s26 + $0x14] sm:$0xf] (%p50_p3)  ;;  %v194_v2 = vld [vmem:[%s1090_s26 + $0x28] sm:$0xf] (%p50_p3) }
  0x12   : > { %191 = vst [vmem:[%s169_s27] sm:$0xf] (%p50_p3), %v190_v0  ;;  %193 = vst [vmem:[%s169_s27 + $0x4] sm:$0xf] (%p50_p3), %v192_v1  ;;  %v196_v3 = vld [vmem:[%s1090_s26 + $0x3c] sm:$0xf] (%p50_p3) }
  0x13   : > { %v198_v4 = vld [vmem:[%s1090_s26 + $0x50] sm:$0xf] (%p50_p3)  ;;  %195 = vst [vmem:[%s169_s27 + $0x8] sm:$0xf] (%p50_p3), %v194_v2  ;;  %197 = vst [vmem:[%s169_s27 + $0xc] sm:$0xf] (%p50_p3), %v196_v3 }
  0x14   : > { %199 = vst [vmem:[%s169_s27 + $0x10] sm:$0xf] (%p50_p3), %v198_v4  ;;  %v200_v5 = vld [vmem:[%s1090_s26 + $0x64] sm:$0xf] (%p50_p3)  ;;  %v202_v6 = vld [vmem:[%s1090_s26 + $0x78] sm:$0xf] (%p50_p3) }
  0x15   : > { %v204_v7 = vld [vmem:[%s1090_s26 + $0x8c] sm:$0xf]  ;;  %201 = vst [vmem:[%s169_s27 + $0x14] sm:$0xf] %v200_v5  ;;  %203 = vst [vmem:[%s169_s27 + $0x18] sm:$0xf] %v202_v6 }
  0x16   : > { %205 = vst [vmem:[%s169_s27 + $0x1c] sm:$0xf] %v204_v7  ;;  %v206_v8 = vld [vmem:[%s1090_s26 + $0xa0] sm:$0xf]  ;;  %v208_v9 = vld [vmem:[%s1090_s26 + $0xb4] sm:$0xf] }
  0x17   : > { %v210_v10 = vld [vmem:[%s1090_s26 + $0xc8] sm:$0xf]  ;;  %207 = vst [vmem:[%s169_s27 + $0x20] sm:$0xf] %v206_v8  ;;  %209 = vst [vmem:[%s169_s27 + $0x24] sm:$0xf] %v208_v9 }
  0x18   : > { %211 = vst [vmem:[%s169_s27 + $0x28] sm:$0xf] %v210_v10  ;;  %v212_v11 = vld [vmem:[%s1090_s26 + $0xdc] sm:$0xf]  ;;  %v214_v12 = vld [vmem:[%s1090_s26 + $0xf0] sm:$0xf] }
  0x19   : > { %v216_v13 = vld [vmem:[%s1090_s26 + $0x104] sm:$0xf]  ;;  %213 = vst [vmem:[%s169_s27 + $0x2c] sm:$0xf] %v212_v11  ;;  %215 = vst [vmem:[%s169_s27 + $0x30] sm:$0xf] %v214_v12 }
  0x1a   : > { %217 = vst [vmem:[%s169_s27 + $0x34] sm:$0xf] %v216_v13  ;;  %v218_v14 = vld [vmem:[%s1090_s26 + $0x118] sm:$0xf]  ;;  %v220_v15 = vld [vmem:[%s1090_s26 + $0x12c] sm:$0xf] }
  0x1b   : > { %219 = vst [vmem:[%s169_s27 + $0x38] sm:$0xf] %v218_v14  ;;  %221 = vst [vmem:[%s169_s27 + $0x3c] sm:$0xf] %v220_v15 }
  0x1c PF: > { %p838_p6 = scmp.ge.s32.totalorder %s1024_s16, 1  ;;  %p287_p7 = scmp.lt.s32.totalorder %s1024_s16, 6 }
  0x1e   : > { %p288_p8 = pnand %p838_p6, %p287_p7 }
  0x1f   : > { %s294_s28 = sand.u32 (!%p288_p8), 1, %s1008_s12   ;;  %s840_s29 = sshll.u32 (!%p288_p8), %s1016_s14, 4 }
  0x20   : > { %291 = sbr.rel (%p288_p8) target bundleno = 321 (0x141), region = 69  ;;  %s839_s30 = sshll.u32 (!%p288_p8), %s294_s28, 6 }
  0x21   : > { %p333_p9 = scmp.lt.s32.totalorder (!%p288_p8), %s840_s29, 79  ;;  %s1117_s8 = scalar_lea.vmem (!%p288_p8), [#allocation3], %s839_s30 }
  0x22   : > { %p842_p10 = scmp.ne.s32.totalorder (!%p288_p8), %s1016_s14, 0 }
  0x27   : > { %s1214_s29 = smov (!%p333_p9, %s840_s29), 79  ;;  %357 = sbr.rel (%p842_p10) target bundleno = 49 (0x31), region = 77 }
  0x28   : > { %s841_s4 = sshll.u32 %s1214_s29, 2  ;;  %v1026_v16 = vmov (!%p842_p10), 0.0  }
  0x29   : > { %s1115_s7 = scalar_lea.vmem %s1204_s1, %s841_s4  ;;  %358 = vst [vmem:[#allocation2] sm:$0xff] (!%p842_p10), %v1026_v16  ;;  %359 = vst [vmem:[#allocation2 + $0x8] sm:$0xff] (!%p842_p10), %v1026_v16 }
  0x2a   : > { %360 = vst [vmem:[#allocation2 + $0x10] sm:$0xff] (!%p842_p10), %v1026_v16  ;;  %361 = vst [vmem:[#allocation2 + $0x18] sm:$0xff] (!%p842_p10), %v1026_v16 }
  0x2b   : > { %362 = vst [vmem:[#allocation2 + $0x20] sm:$0xff] (!%p842_p10), %v1026_v16  ;;  %363 = vst [vmem:[#allocation2 + $0x28] sm:$0xff] (!%p842_p10), %v1026_v16 }
  0x2c   : > { %364 = vst [vmem:[#allocation2 + $0x30] sm:$0xff] (!%p842_p10), %v1026_v16  ;;  %365 = vst [vmem:[#allocation2 + $0x38] sm:$0xff] (!%p842_p10), %v1026_v16 }
  0x2d   : > { %366 = vst [vmem:[#allocation2 + $0x40] sm:$0xff] (!%p842_p10), %v1026_v16  ;;  %367 = vst [vmem:[#allocation2 + $0x48] sm:$0xff] (!%p842_p10), %v1026_v16 }
  0x2e   : > { %368 = vst [vmem:[#allocation2 + $0x50] sm:$0xff] %v1026_v16  ;;  %369 = vst [vmem:[#allocation2 + $0x58] sm:$0xff] %v1026_v16 }
  0x2f   : > { %370 = vst [vmem:[#allocation2 + $0x60] sm:$0xff] %v1026_v16  ;;  %371 = vst [vmem:[#allocation2 + $0x68] sm:$0xff] %v1026_v16 }
  0x30   : > { %372 = vst [vmem:[#allocation2 + $0x70] sm:$0xff] %v1026_v16  ;;  %373 = vst [vmem:[#allocation2 + $0x78] sm:$0xff] %v1026_v16 }
  0x31 PF: > { %v970_v17 = vld [vmem:[%s1115_s7] sm:$0xff]   ;;  %v971_v18 = vld [vmem:[%s1115_s7 + $0x8] sm:$0xff]   ;;  %v972_v19 = vld [vmem:[%s1115_s7 + $0x10] sm:$0xff]   ;;  %p859_p11 = scmp.ne.s32.totalorder %s1016_s14, 4 }
  0x32   : > { %881 = vmatprep.subr.bf16.mxu0 %v970_v17  ;;  %913 = vmatprep.subr.bf16.mxu1 %v970_v17  ;;  %v973_v20 = vld [vmem:[%s1115_s7 + $0x18] sm:$0xff]   ;;  %v978_v21 = vld [vmem:[%s1117_s8] sm:$0xff]   ;;  %v975_v24 = vld [vmem:[%s1115_s7 + $0x28] sm:$0xff]  }
  0x33   : > { %882 = vmatpush3.bf16.msra.mxu0 %v970_v17  ;;  %921 = vmatpush3.bf16.msra.mxu1 %v970_v17  ;;  %v979_v22 = vld [vmem:[%s1117_s8 + $0x20] sm:$0xff]   ;;  %v976_v25 = vld [vmem:[%s1115_s7 + $0x30] sm:$0xff]   ;;  %v977_v26 = vld [vmem:[%s1115_s7 + $0x38] sm:$0xff]  }
  0x34   : > { %883 = vmatprep.subr.bf16.mxu0 %v971_v18  ;;  %914 = vmatprep.subr.bf16.mxu1 %v971_v18  ;;  %v974_v23 = vld [vmem:[%s1115_s7 + $0x20] sm:$0xff]   ;;  %v980_v27 = vld [vmem:[%s1117_s8 + $0x8] sm:$0xff]   ;;  %v982_v29 = vld [vmem:[%s1117_s8 + $0x10] sm:$0xff]  }
  0x35   : > { %897 = vmatprep.mubr.bf16.mxu0 %v978_v21  ;;  %905 = vmatprep.mubr.bf16.mxu1 %v979_v22  ;;  %v981_v28 = vld [vmem:[%s1117_s8 + $0x28] sm:$0xff]   ;;  %v983_v30 = vld [vmem:[%s1117_s8 + $0x30] sm:$0xff]   ;;  %v984_v31 = vld [vmem:[%s1117_s8 + $0x18] sm:$0xff]  }
  0x36   : > { %v985_v32 = vld [vmem:[%s1117_s8 + $0x38] sm:$0xff]   ;;  %v376_v33 = vld [vmem:[#allocation2 + $0x10] sm:$0xff]  ;;  %v374_v35 = vld [vmem:[#allocation2] sm:$0xff] }
  0x37   : > { %884 = vmatpush3.bf16.msra.mxu0 %v971_v18  ;;  %922 = vmatpush3.bf16.msra.mxu1 %v971_v18  ;;  %v384_v34 = vld [vmem:[#allocation2 + $0x50] sm:$0xff]  ;;  %v382_v36 = vld [vmem:[#allocation2 + $0x40] sm:$0xff]  ;;  %v377_v39 = vld [vmem:[#allocation2 + $0x18] sm:$0xff] }
  0x38   : > { %885 = vmatprep.subr.bf16.mxu0 %v972_v19  ;;  %915 = vmatprep.subr.bf16.mxu1 %v972_v19  ;;  %v385_v40 = vld [vmem:[#allocation2 + $0x58] sm:$0xff]  ;;  %v375_v45 = vld [vmem:[#allocation2 + $0x8] sm:$0xff]  ;;  %v380_v57 = vld [vmem:[#allocation2 + $0x30] sm:$0xff] }
  0x39   : > { %v383_v46 = vld [vmem:[#allocation2 + $0x48] sm:$0xff]  ;;  %v388_v58 = vld [vmem:[#allocation2 + $0x70] sm:$0xff]  ;;  %v378_v59 = vld [vmem:[#allocation2 + $0x20] sm:$0xff] }
  0x3a   : > { %v386_v60 = vld [vmem:[#allocation2 + $0x60] sm:$0xff]  ;;  %v381_v63 = vld [vmem:[#allocation2 + $0x38] sm:$0xff]  ;;  %v379_v5 = vld [vmem:[#allocation2 + $0x28] sm:$0xff] }
  0x3b   : > { %886 = vmatpush3.bf16.msra.mxu0 %v972_v19  ;;  %923 = vmatpush3.bf16.msra.mxu1 %v972_v19  ;;  %v389_v0 = vld [vmem:[#allocation2 + $0x78] sm:$0xff]  ;;  %v387_v6 = vld [vmem:[#allocation2 + $0x68] sm:$0xff]  ;;  %v860_v18 = vld [vmem:[%s1205_s2] ss:$0 sm:$0xff] (!%p859_p11) }
  0x3c   : > { %887 = vmatprep.subr.bf16.mxu0 %v973_v20  ;;  %916 = vmatprep.subr.bf16.mxu1 %v973_v20 }
  0x3f   : > { %888 = vmatpush3.bf16.msra.mxu0 %v973_v20  ;;  %924 = vmatpush3.bf16.msra.mxu1 %v973_v20 }
  0x40   : > { %889 = vmatprep.subr.bf16.mxu0 %v974_v23  ;;  %917 = vmatprep.subr.bf16.mxu1 %v974_v23 }
  0x43   : > { %890 = vmatpush3.bf16.msra.mxu0 %v974_v23  ;;  %925 = vmatpush3.bf16.msra.mxu1 %v974_v23 }
  0x44   : > { %891 = vmatprep.subr.bf16.mxu0 %v975_v24  ;;  %918 = vmatprep.subr.bf16.mxu1 %v975_v24 }
  0x47   : > { %892 = vmatpush3.bf16.msra.mxu0 %v975_v24  ;;  %926 = vmatpush3.bf16.msra.mxu1 %v975_v24 }
  0x48   : > { %893 = vmatprep.subr.bf16.mxu0 %v976_v25  ;;  %919 = vmatprep.subr.bf16.mxu1 %v976_v25 }
  0x4b   : > { %894 = vmatpush3.bf16.msra.mxu0 %v976_v25  ;;  %927 = vmatpush3.bf16.msra.mxu1 %v976_v25 }
  0x4c   : > { %895 = vmatprep.subr.bf16.mxu0 %v977_v26  ;;  %920 = vmatprep.subr.bf16.mxu1 %v977_v26 }
  0x4f   : > { %896 = vmatpush3.bf16.msra.mxu0 %v977_v26  ;;  %928 = vmatpush3.bf16.msra.mxu1 %v977_v26 }
  0x52   : > { %898 = vmatmul.mubr.bf16.vlgmr.msra.gmra.mrb[0].mxu0 %v980_v27  ;;  %906 = vmatmul.mubr.bf16.vlgmr.msra.gmra.mrb[0].mxu1 %v981_v28 }
  0x53   : > { %901 = vmatprep.mubr.bf16.mxu0 %v982_v29  ;;  %909 = vmatprep.mubr.bf16.mxu1 %v983_v30 }
  0x5a   : > { %902 = vmatmul.mubr.bf16.gmra.mrb[4].mxu0 %v984_v31  ;;  %910 = vmatmul.mubr.bf16.gmra.mrb[4].mxu1 %v985_v32 }
 0x125   : > { %v899_v37 = vpop.f32.mrb[0].mxu0  ;;  %v907_v38 = vpop.f32.mrb[0].mxu1 }
 0x126   : > { %v617_v41 = vadd.f32 %v899_v37, %v376_v33  ;;  %v625_v42 = vadd.f32 %v907_v38, %v384_v34  ;;  %v552_v43 = vpop.f32.mrb[1].mxu0  ;;  %v584_v44 = vpop.f32.mrb[1].mxu1 }
 0x127   : > { %v615_v47 = vadd.f32 %v552_v43, %v374_v35  ;;  %v623_v48 = vadd.f32 %v584_v44, %v382_v36  ;;  %v900_v49 = vpop.f32.mrb[2].mxu0  ;;  %v908_v50 = vpop.f32.mrb[2].mxu1 }
 0x128   : > { %633 = vst [vmem:[#allocation2 + $0x10] sm:$0xff] %v617_v41  ;;  %641 = vst [vmem:[#allocation2 + $0x50] sm:$0xff] %v625_v42  ;;  %v618_v51 = vadd.f32 %v900_v49, %v377_v39  ;;  %v626_v52 = vadd.f32 %v908_v50, %v385_v40  ;;  %v555_v53 = vpop.f32.mrb[3].mxu0  ;;  %v587_v54 = vpop.f32.mrb[3].mxu1 }
 0x129   : > { %631 = vst [vmem:[#allocation2] sm:$0xff] %v615_v47  ;;  %639 = vst [vmem:[#allocation2 + $0x40] sm:$0xff] %v623_v48  ;;  %v616_v55 = vadd.f32 %v555_v53, %v375_v45  ;;  %v624_v56 = vadd.f32 %v587_v54, %v383_v46 }
 0x12a   : > { %634 = vst [vmem:[#allocation2 + $0x18] sm:$0xff] %v618_v51  ;;  %642 = vst [vmem:[#allocation2 + $0x58] sm:$0xff] %v626_v52 }
 0x12b   : > { %632 = vst [vmem:[#allocation2 + $0x8] sm:$0xff] %v616_v55  ;;  %640 = vst [vmem:[#allocation2 + $0x48] sm:$0xff] %v624_v56 }
 0x12d   : > { %v903_v61 = vpop.f32.mrb[4].mxu0  ;;  %v911_v62 = vpop.f32.mrb[4].mxu1  ;;  %650 = sbr.rel (%p859_p11) target bundleno = 321 (0x141), region = 81 }
 0x12e   : > { %v621_v1 = vadd.f32 %v903_v61, %v380_v57  ;;  %v629_v2 = vadd.f32 %v911_v62, %v388_v58  ;;  %v568_v3 = vpop.f32.mrb[5].mxu0  ;;  %v600_v4 = vpop.f32.mrb[5].mxu1 }
 0x12f   : > { %v619_v7 = vadd.f32 %v568_v3, %v378_v59  ;;  %v627_v8 = vadd.f32 %v600_v4, %v386_v60  ;;  %v904_v9 = vpop.f32.mrb[6].mxu0  ;;  %v912_v10 = vpop.f32.mrb[6].mxu1  ;;  %v653_v22 = vld [vmem:[#allocation2 + $0x10] sm:$0xff] (!%p859_p11) }
 0x130   : > { %637 = vst [vmem:[#allocation2 + $0x30] sm:$0xff] %v621_v1  ;;  %645 = vst [vmem:[#allocation2 + $0x70] sm:$0xff] %v629_v2  ;;  %v622_v11 = vadd.f32 %v904_v9, %v381_v63  ;;  %v630_v12 = vadd.f32 %v912_v10, %v389_v0  ;;  %v571_v13 = vpop.f32.mrb[7].mxu0  ;;  %v603_v14 = vpop.f32.mrb[7].mxu1  ;;  %v651_v17 = vld [vmem:[#allocation2] sm:$0xff] (!%p859_p11)  ;;  %v676_v25 = vadd.f32 (!%p859_p11), %v860_v18, %v653_v22  ;;  %v661_v37 = vld [vmem:[#allocation2 + $0x50] sm:$0xff] (!%p859_p11) }
 0x131   : > { %635 = vst [vmem:[#allocation2 + $0x20] sm:$0xff] %v619_v7  ;;  %643 = vst [vmem:[#allocation2 + $0x60] sm:$0xff] %v627_v8  ;;  %v620_v15 = vadd.f32 %v571_v13, %v379_v5  ;;  %v628_v16 = vadd.f32 %v603_v14, %v387_v6  ;;  %v674_v20 = vadd.f32 (!%p859_p11), %v860_v18, %v651_v17  ;;  %v654_v23 = vld [vmem:[#allocation2 + $0x18] sm:$0xff] (!%p859_p11)  ;;  %v659_v35 = vld [vmem:[#allocation2 + $0x40] sm:$0xff] (!%p859_p11) }
 0x132   : > { %638 = vst [vmem:[#allocation2 + $0x38] sm:$0xff] %v622_v11  ;;  %646 = vst [vmem:[#allocation2 + $0x78] sm:$0xff] %v630_v12  ;;  %v652_v19 = vld [vmem:[#allocation2 + $0x8] sm:$0xff] (!%p859_p11)  ;;  %v677_v26 = vadd.f32 (!%p859_p11), %v860_v18, %v654_v23  ;;  %v692_v38 = vmax.f32 (!%p859_p11), %v676_v25, 0.0  ;;  %v662_v42 = vld [vmem:[#allocation2 + $0x58] sm:$0xff] (!%p859_p11)  ;;  %v682_v47 = vadd.f32 (!%p859_p11), %v860_v18, %v659_v35  ;;  %v684_v52 = vadd.f32 (!%p859_p11), %v860_v18, %v661_v37 }
 0x133   : > { %636 = vst [vmem:[#allocation2 + $0x28] sm:$0xff] %v620_v15  ;;  %644 = vst [vmem:[#allocation2 + $0x68] sm:$0xff] %v628_v16  ;;  %v675_v21 = vadd.f32 (!%p859_p11), %v860_v18, %v652_v19  ;;  %v690_v31 = vmax.f32 (!%p859_p11), %v674_v20, 0.0  ;;  %v660_v36 = vld [vmem:[#allocation2 + $0x48] sm:$0xff] (!%p859_p11)  ;;  %v685_v53 = vadd.f32 (!%p859_p11), %v860_v18, %v662_v42 }
 0x134   : > { %v693_v39 = vmax.f32 %v677_v26, 0.0  ;;  %v683_v48 = vadd.f32 %v860_v18, %v660_v36  ;;  %708 = vst [vmem:[%s1206_s3 + $0x10] sm:$0xff] %v692_v38  ;;  %v698_v55 = vmax.f32 %v682_v47, 0.0  ;;  %v700_v59 = vmax.f32 %v684_v52, 0.0 }
 0x135   : > { %v691_v32 = vmax.f32 %v675_v21, 0.0  ;;  %706 = vst [vmem:[%s1206_s3] sm:$0xff] %v690_v31  ;;  %v701_v60 = vmax.f32 %v685_v53, 0.0 }
 0x136   : > { %709 = vst [vmem:[%s1206_s3 + $0x18] sm:$0xff] %v693_v39  ;;  %v699_v56 = vmax.f32 %v683_v48, 0.0  ;;  %714 = vst [vmem:[%s1206_s3 + $0x40] sm:$0xff] %v698_v55 }
 0x137   : > { %v657_v29 = vld [vmem:[#allocation2 + $0x30] sm:$0xff]  ;;  %707 = vst [vmem:[%s1206_s3 + $0x8] sm:$0xff] %v691_v32  ;;  %716 = vst [vmem:[%s1206_s3 + $0x50] sm:$0xff] %v700_v59 }
 0x138   : > { %v655_v24 = vld [vmem:[#allocation2 + $0x20] sm:$0xff]  ;;  %v680_v34 = vadd.f32 %v860_v18, %v657_v29  ;;  %v665_v49 = vld [vmem:[#allocation2 + $0x70] sm:$0xff]  ;;  %715 = vst [vmem:[%s1206_s3 + $0x48] sm:$0xff] %v699_v56  ;;  %717 = vst [vmem:[%s1206_s3 + $0x58] sm:$0xff] %v701_v60 }
 0x139   : > { %v678_v27 = vadd.f32 %v860_v18, %v655_v24  ;;  %v658_v30 = vld [vmem:[#allocation2 + $0x38] sm:$0xff]  ;;  %v663_v43 = vld [vmem:[#allocation2 + $0x60] sm:$0xff]  ;;  %v688_v58 = vadd.f32 %v860_v18, %v665_v49 }
 0x13a   : > { %v656_v28 = vld [vmem:[#allocation2 + $0x28] sm:$0xff]  ;;  %v681_v41 = vadd.f32 %v860_v18, %v658_v30  ;;  %v696_v46 = vmax.f32 %v680_v34, 0.0  ;;  %v666_v50 = vld [vmem:[#allocation2 + $0x78] sm:$0xff]  ;;  %v686_v54 = vadd.f32 %v860_v18, %v663_v43 }
 0x13b   : > { %v679_v33 = vadd.f32 %v860_v18, %v656_v28  ;;  %v694_v40 = vmax.f32 %v678_v27, 0.0  ;;  %v664_v44 = vld [vmem:[#allocation2 + $0x68] sm:$0xff]  ;;  %v689_v62 = vadd.f32 %v860_v18, %v666_v50  ;;  %v704_v0 = vmax.f32 %v688_v58, 0.0 }
 0x13c   : > { %v697_v51 = vmax.f32 %v681_v41, 0.0  ;;  %712 = vst [vmem:[%s1206_s3 + $0x30] sm:$0xff] %v696_v46  ;;  %v687_v57 = vadd.f32 %v860_v18, %v664_v44  ;;  %v702_v61 = vmax.f32 %v686_v54, 0.0 }
 0x13d   : > { %v695_v45 = vmax.f32 %v679_v33, 0.0  ;;  %710 = vst [vmem:[%s1206_s3 + $0x20] sm:$0xff] %v694_v40  ;;  %v705_v1 = vmax.f32 %v689_v62, 0.0  ;;  %720 = vst [vmem:[%s1206_s3 + $0x70] sm:$0xff] %v704_v0 }
 0x13e   : > { %713 = vst [vmem:[%s1206_s3 + $0x38] sm:$0xff] %v697_v51  ;;  %v703_v63 = vmax.f32 %v687_v57, 0.0  ;;  %718 = vst [vmem:[%s1206_s3 + $0x60] sm:$0xff] %v702_v61 }
 0x13f   : > { %711 = vst [vmem:[%s1206_s3 + $0x28] sm:$0xff] %v695_v45  ;;  %721 = vst [vmem:[%s1206_s3 + $0x78] sm:$0xff] %v705_v1 }
 0x140   : > { %719 = vst [vmem:[%s1206_s3 + $0x68] sm:$0xff] %v703_v63 }
 0x141 PF: > { %s13_s16 = sadd.s32 1, %s1024_s16   ;;  %s1207_s12 = smov %s1012_s13 }
 0x142   : > { %p10_p12 = scmp.ge.s32.totalorder %s13_s16, 7   ;;  %s1208_s13 = smov %s1082_s20 }
 0x143   : > { %s1209_s14 = smov %s1020_s15  ;;  %s1210_s15 = smov %s1212_s17 }
 0x144   :  { %12 = sbr.rel (!%p10_p12) target bundleno = 3 (0x3), region = 122 }

// kernel: multicom_res50_forward.55
= control target key start
LH: loop header
LB: loop body
LE: loop exit
PB: predicated region body
PF: predicated region fallthrough
CT: control target
= control target key end

     0   :  { %v608_v1 = vmov 0   ;;  %v457_v25 = vlaneseq  ;;  %s844_s1 = inlined_call_operand.vmem [shape: bf16[128,256], index: 1, kind: input, shape index: {}]   ;;  %s845_s0 = inlined_call_operand.vmem [shape: bf16[128,128], index: 0, kind: input, shape index: {}]   ;;  %s846_s2 = inlined_call_operand.vmem [shape: f32[1,256], index: 2, kind: input, shape index: {}]   ;;  %s847_s3 = inlined_call_operand.vmem [shape: f32[128,256], index: 3, kind: output, shape index: {}]  }
   0x1   :  { %v576_v0 = vld [vmem:[%s844_s1 + $0x4] ss:$8 sps:$4 sm:$0xff]   ;;  %275 = vmatprep.mubr.bf16.mxu0 %v608_v1  ;;  %315 = vmatprep.mubr.bf16.mxu1 %v608_v1  ;;  %v578_v2 = vld [vmem:[%s844_s1] ss:$8 sps:$4 sm:$0xff]   ;;  %v579_v3 = vld [vmem:[%s844_s1 + $0x14] ss:$8 sps:$4 sm:$0xff]  }
   0x2   :  { %243 = vmatprep.subr.bf16.mxu0 %v576_v0  ;;  %559 = vmatprep.subr.bf16.mxu1 %v576_v0  ;;  %v581_v4 = vld [vmem:[%s844_s1 + $0x10] ss:$8 sps:$4 sm:$0xff]   ;;  %v582_v5 = vld [vmem:[%s844_s1 + $0x24] ss:$8 sps:$4 sm:$0xff]   ;;  %v584_v6 = vld [vmem:[%s844_s1 + $0x20] ss:$8 sps:$4 sm:$0xff]  }
   0x3   :  { %244 = vmatpush1.bf16.msra.mxu0 %v578_v2  ;;  %567 = vmatpush1.bf16.msra.mxu1 %v578_v2  ;;  %v585_v7 = vld [vmem:[%s844_s1 + $0x34] ss:$8 sps:$4 sm:$0xff]   ;;  %v587_v8 = vld [vmem:[%s844_s1 + $0x30] ss:$8 sps:$4 sm:$0xff]   ;;  %v588_v9 = vld [vmem:[%s844_s1 + $0x44] ss:$8 sps:$4 sm:$0xff]  }
   0x4   :  { %245 = vmatprep.subr.bf16.mxu0 %v579_v3  ;;  %560 = vmatprep.subr.bf16.mxu1 %v579_v3  ;;  %v590_v10 = vld [vmem:[%s844_s1 + $0x40] ss:$8 sps:$4 sm:$0xff]   ;;  %v591_v11 = vld [vmem:[%s844_s1 + $0x54] ss:$8 sps:$4 sm:$0xff]   ;;  %v593_v12 = vld [vmem:[%s844_s1 + $0x50] ss:$8 sps:$4 sm:$0xff]  }
   0x5   :  { %v594_v13 = vld [vmem:[%s844_s1 + $0x64] ss:$8 sps:$4 sm:$0xff]   ;;  %v596_v14 = vld [vmem:[%s844_s1 + $0x60] ss:$8 sps:$4 sm:$0xff]   ;;  %v597_v15 = vld [vmem:[%s844_s1 + $0x74] ss:$8 sps:$4 sm:$0xff]  }
   0x6   :  { %v599_v16 = vld [vmem:[%s844_s1 + $0x70] ss:$8 sps:$4 sm:$0xff]   ;;  %v600_v17 = vld [vmem:[%s845_s0] sm:$0xff]   ;;  %v602_v19 = vld [vmem:[%s845_s0 + $0x8] sm:$0xff]   ;;  %v458_v26 = vshrl.u32 %v457_v25, 7 }
   0x7   :  { %246 = vmatpush1.bf16.msra.mxu0 %v581_v4  ;;  %568 = vmatpush1.bf16.msra.mxu1 %v581_v4  ;;  %v601_v18 = vld [vmem:[%s845_s0 + $0x20] sm:$0xff]   ;;  %v603_v20 = vld [vmem:[%s845_s0 + $0x28] sm:$0xff]   ;;  %v604_v21 = vld [vmem:[%s845_s0 + $0x10] sm:$0xff]  }
   0x8   :  { %247 = vmatprep.subr.bf16.mxu0 %v582_v5  ;;  %561 = vmatprep.subr.bf16.mxu1 %v582_v5  ;;  %v605_v22 = vld [vmem:[%s845_s0 + $0x30] sm:$0xff]   ;;  %v606_v23 = vld [vmem:[%s845_s0 + $0x18] sm:$0xff]   ;;  %v459_v27 = vsub.s32 0, %v458_v26  ;;  %v455_v28 = vld [vmem:[%s846_s2] sm:$0x3]  ;;  %v463_v29 = vsub.s32 1, %v458_v26 }
   0x9   :  { %v607_v24 = vld [vmem:[%s845_s0 + $0x38] sm:$0xff]  }
   0xa   :  { %v712_v30 = vrot.slane %v455_v28, %v459_v27  ;;  %v714_v31 = vrot.slane %v455_v28, %v463_v29 }
   0xb   :  { %248 = vmatpush1.bf16.msra.mxu0 %v584_v6  ;;  %569 = vmatpush1.bf16.msra.mxu1 %v584_v6 }
   0xc   :  { %249 = vmatprep.subr.bf16.mxu0 %v585_v7  ;;  %562 = vmatprep.subr.bf16.mxu1 %v585_v7 }
   0xf   :  { %250 = vmatpush1.bf16.msra.mxu0 %v587_v8  ;;  %570 = vmatpush1.bf16.msra.mxu1 %v587_v8 }
  0x10   :  { %251 = vmatprep.subr.bf16.mxu0 %v588_v9  ;;  %563 = vmatprep.subr.bf16.mxu1 %v588_v9 }
  0x13   :  { %252 = vmatpush1.bf16.msra.mxu0 %v590_v10  ;;  %571 = vmatpush1.bf16.msra.mxu1 %v590_v10 }
  0x14   :  { %253 = vmatprep.subr.bf16.mxu0 %v591_v11  ;;  %564 = vmatprep.subr.bf16.mxu1 %v591_v11 }
  0x17   :  { %254 = vmatpush1.bf16.msra.mxu0 %v593_v12  ;;  %572 = vmatpush1.bf16.msra.mxu1 %v593_v12 }
  0x18   :  { %255 = vmatprep.subr.bf16.mxu0 %v594_v13  ;;  %565 = vmatprep.subr.bf16.mxu1 %v594_v13 }
  0x1b   :  { %256 = vmatpush1.bf16.msra.mxu0 %v596_v14  ;;  %573 = vmatpush1.bf16.msra.mxu1 %v596_v14 }
  0x1c   :  { %257 = vmatprep.subr.bf16.mxu0 %v597_v15  ;;  %566 = vmatprep.subr.bf16.mxu1 %v597_v15 }
  0x1f   :  { %258 = vmatpush1.bf16.msra.mxu0 %v599_v16  ;;  %574 = vmatpush1.bf16.msra.mxu1 %v599_v16 }
  0x22   :  { %276 = vmatmul.mubr.bf16.vlgmr.msra.gmra.mrb[0].mxu0 %v600_v17  ;;  %316 = vmatmul.mubr.bf16.vlgmr.msra.gmra.mrb[0].mxu1 %v601_v18 }
  0x23   :  { %285 = vmatprep.mubr.bf16.mxu0 %v608_v1  ;;  %325 = vmatprep.mubr.bf16.mxu1 %v608_v1 }
  0x2a   :  { %286 = vmatmul.mubr.bf16.gmra.mrb[4].mxu0 %v602_v19  ;;  %326 = vmatmul.mubr.bf16.gmra.mrb[4].mxu1 %v603_v20 }
  0x2b   :  { %295 = vmatprep.mubr.bf16.mxu0 %v608_v1  ;;  %335 = vmatprep.mubr.bf16.mxu1 %v608_v1 }
  0x32   :  { %296 = vmatmul.mubr.bf16.gmra.mrb[8].mxu0 %v604_v21  ;;  %336 = vmatmul.mubr.bf16.gmra.mrb[8].mxu1 %v605_v22 }
  0x33   :  { %305 = vmatprep.mubr.bf16.mxu0 %v608_v1  ;;  %345 = vmatprep.mubr.bf16.mxu1 %v608_v1 }
  0x3a   :  { %306 = vmatmul.mubr.bf16.gmra.mrb[12].mxu0 %v606_v23  ;;  %346 = vmatmul.mubr.bf16.gmra.mrb[12].mxu1 %v607_v24 }
  0xf5   :  { %v277_v32 = vpop.f32.mrb[0].mxu0  ;;  %v317_v33 = vpop.f32.mrb[0].mxu1 }
  0xf6   :  { %v467_v34 = vadd.f32 %v712_v30, %v277_v32  ;;  %v483_v35 = vadd.f32 %v712_v30, %v317_v33  ;;  %v279_v36 = vpop.f32.mrb[1].mxu0  ;;  %v319_v37 = vpop.f32.mrb[1].mxu1 }
  0xf7   :  { %v468_v38 = vadd.f32 %v714_v31, %v279_v36  ;;  %v484_v39 = vadd.f32 %v714_v31, %v319_v37  ;;  %v281_v40 = vpop.f32.mrb[2].mxu0  ;;  %v321_v41 = vpop.f32.mrb[2].mxu1 }
  0xf8   :  { %499 = vst [vmem:[%s847_s3] sm:$0xff] %v467_v34  ;;  %515 = vst [vmem:[%s847_s3 + $0x80] sm:$0xff] %v483_v35  ;;  %v469_v42 = vadd.f32 %v712_v30, %v281_v40  ;;  %v485_v43 = vadd.f32 %v712_v30, %v321_v41  ;;  %v283_v44 = vpop.f32.mrb[3].mxu0  ;;  %v323_v45 = vpop.f32.mrb[3].mxu1 }
  0xf9   :  { %500 = vst [vmem:[%s847_s3 + $0x8] sm:$0xff] %v468_v38  ;;  %516 = vst [vmem:[%s847_s3 + $0x88] sm:$0xff] %v484_v39  ;;  %v470_v46 = vadd.f32 %v714_v31, %v283_v44  ;;  %v486_v47 = vadd.f32 %v714_v31, %v323_v45 }
  0xfa   :  { %501 = vst [vmem:[%s847_s3 + $0x10] sm:$0xff] %v469_v42  ;;  %517 = vst [vmem:[%s847_s3 + $0x90] sm:$0xff] %v485_v43 }
  0xfb   :  { %502 = vst [vmem:[%s847_s3 + $0x18] sm:$0xff] %v470_v46  ;;  %518 = vst [vmem:[%s847_s3 + $0x98] sm:$0xff] %v486_v47 }
  0xfd   :  { %v287_v48 = vpop.f32.mrb[4].mxu0  ;;  %v327_v49 = vpop.f32.mrb[4].mxu1 }
  0xfe   :  { %v471_v50 = vadd.f32 %v712_v30, %v287_v48  ;;  %v487_v51 = vadd.f32 %v712_v30, %v327_v49  ;;  %v289_v52 = vpop.f32.mrb[5].mxu0  ;;  %v329_v53 = vpop.f32.mrb[5].mxu1 }
  0xff   :  { %v472_v54 = vadd.f32 %v714_v31, %v289_v52  ;;  %v488_v55 = vadd.f32 %v714_v31, %v329_v53  ;;  %v291_v56 = vpop.f32.mrb[6].mxu0  ;;  %v331_v57 = vpop.f32.mrb[6].mxu1 }
 0x100   :  { %503 = vst [vmem:[%s847_s3 + $0x20] sm:$0xff] %v471_v50  ;;  %519 = vst [vmem:[%s847_s3 + $0xa0] sm:$0xff] %v487_v51  ;;  %v473_v58 = vadd.f32 %v712_v30, %v291_v56  ;;  %v489_v59 = vadd.f32 %v712_v30, %v331_v57  ;;  %v293_v60 = vpop.f32.mrb[7].mxu0  ;;  %v333_v61 = vpop.f32.mrb[7].mxu1 }
 0x101   :  { %504 = vst [vmem:[%s847_s3 + $0x28] sm:$0xff] %v472_v54  ;;  %520 = vst [vmem:[%s847_s3 + $0xa8] sm:$0xff] %v488_v55  ;;  %v474_v62 = vadd.f32 %v714_v31, %v293_v60  ;;  %v490_v63 = vadd.f32 %v714_v31, %v333_v61 }
 0x102   :  { %505 = vst [vmem:[%s847_s3 + $0x30] sm:$0xff] %v473_v58  ;;  %521 = vst [vmem:[%s847_s3 + $0xb0] sm:$0xff] %v489_v59 }
 0x103   :  { %506 = vst [vmem:[%s847_s3 + $0x38] sm:$0xff] %v474_v62  ;;  %522 = vst [vmem:[%s847_s3 + $0xb8] sm:$0xff] %v490_v63 }
 0x105   :  { %v297_v0 = vpop.f32.mrb[8].mxu0  ;;  %v337_v1 = vpop.f32.mrb[8].mxu1 }
 0x106   :  { %v475_v2 = vadd.f32 %v712_v30, %v297_v0  ;;  %v491_v3 = vadd.f32 %v712_v30, %v337_v1  ;;  %v299_v4 = vpop.f32.mrb[9].mxu0  ;;  %v339_v5 = vpop.f32.mrb[9].mxu1 }
 0x107   :  { %v476_v6 = vadd.f32 %v714_v31, %v299_v4  ;;  %v492_v7 = vadd.f32 %v714_v31, %v339_v5  ;;  %v301_v8 = vpop.f32.mrb[10].mxu0  ;;  %v341_v9 = vpop.f32.mrb[10].mxu1 }
 0x108   :  { %507 = vst [vmem:[%s847_s3 + $0x40] sm:$0xff] %v475_v2  ;;  %523 = vst [vmem:[%s847_s3 + $0xc0] sm:$0xff] %v491_v3  ;;  %v477_v10 = vadd.f32 %v712_v30, %v301_v8  ;;  %v493_v11 = vadd.f32 %v712_v30, %v341_v9  ;;  %v303_v12 = vpop.f32.mrb[11].mxu0  ;;  %v343_v13 = vpop.f32.mrb[11].mxu1 }
 0x109   :  { %508 = vst [vmem:[%s847_s3 + $0x48] sm:$0xff] %v476_v6  ;;  %524 = vst [vmem:[%s847_s3 + $0xc8] sm:$0xff] %v492_v7  ;;  %v478_v14 = vadd.f32 %v714_v31, %v303_v12  ;;  %v494_v15 = vadd.f32 %v714_v31, %v343_v13 }
 0x10a   :  { %509 = vst [vmem:[%s847_s3 + $0x50] sm:$0xff] %v477_v10  ;;  %525 = vst [vmem:[%s847_s3 + $0xd0] sm:$0xff] %v493_v11 }
 0x10b   :  { %510 = vst [vmem:[%s847_s3 + $0x58] sm:$0xff] %v478_v14  ;;  %526 = vst [vmem:[%s847_s3 + $0xd8] sm:$0xff] %v494_v15 }
 0x10d   :  { %v307_v16 = vpop.f32.mrb[12].mxu0  ;;  %v347_v17 = vpop.f32.mrb[12].mxu1 }
 0x10e   :  { %v479_v18 = vadd.f32 %v712_v30, %v307_v16  ;;  %v495_v19 = vadd.f32 %v712_v30, %v347_v17  ;;  %v309_v20 = vpop.f32.mrb[13].mxu0  ;;  %v349_v21 = vpop.f32.mrb[13].mxu1 }
 0x10f   :  { %v480_v22 = vadd.f32 %v714_v31, %v309_v20  ;;  %v496_v23 = vadd.f32 %v714_v31, %v349_v21  ;;  %v311_v24 = vpop.f32.mrb[14].mxu0  ;;  %v351_v25 = vpop.f32.mrb[14].mxu1 }
 0x110   :  { %511 = vst [vmem:[%s847_s3 + $0x60] sm:$0xff] %v479_v18  ;;  %527 = vst [vmem:[%s847_s3 + $0xe0] sm:$0xff] %v495_v19  ;;  %v481_v26 = vadd.f32 %v712_v30, %v311_v24  ;;  %v497_v27 = vadd.f32 %v712_v30, %v351_v25  ;;  %v313_v28 = vpop.f32.mrb[15].mxu0  ;;  %v353_v29 = vpop.f32.mrb[15].mxu1 }
 0x111   :  { %512 = vst [vmem:[%s847_s3 + $0x68] sm:$0xff] %v480_v22  ;;  %528 = vst [vmem:[%s847_s3 + $0xe8] sm:$0xff] %v496_v23  ;;  %v482_v32 = vadd.f32 %v714_v31, %v313_v28  ;;  %v498_v33 = vadd.f32 %v714_v31, %v353_v29 }
 0x112   :  { %513 = vst [vmem:[%s847_s3 + $0x70] sm:$0xff] %v481_v26  ;;  %529 = vst [vmem:[%s847_s3 + $0xf0] sm:$0xff] %v497_v27 }
 0x113   :  { %514 = vst [vmem:[%s847_s3 + $0x78] sm:$0xff] %v482_v32  ;;  %530 = vst [vmem:[%s847_s3 + $0xf8] sm:$0xff] %v498_v33 }

// kernel: multicom_res50_forward.58
= control target key start
LH: loop header
LB: loop body
LE: loop exit
PB: predicated region body
PF: predicated region fallthrough
CT: control target
= control target key end

     0   :  { %v707_v1 = vmov 0   ;;  %v460_v25 = vlaneseq  ;;  %s1044_s1 = inlined_call_operand.vmem [shape: bf16[128,256], index: 1, kind: input, shape index: {}]   ;;  %s1045_s0 = inlined_call_operand.vmem [shape: bf16[128,128], index: 0, kind: input, shape index: {}]   ;;  %s1046_s2 = inlined_call_operand.vmem [shape: f32[1,256], index: 2, kind: input, shape index: {}]   ;;  %s1047_s3 = inlined_call_operand.vmem [shape: f32[128,256], index: 3, kind: input, shape index: {}]   ;;  %s1048_s4 = inlined_call_operand.vmem [shape: f32[128,256], index: 4, kind: output, shape index: {}]  }
   0x1   :  { %v675_v0 = vld [vmem:[%s1044_s1 + $0x4] ss:$8 sps:$4 sm:$0xff]   ;;  %278 = vmatprep.mubr.bf16.mxu0 %v707_v1  ;;  %318 = vmatprep.mubr.bf16.mxu1 %v707_v1  ;;  %v677_v2 = vld [vmem:[%s1044_s1] ss:$8 sps:$4 sm:$0xff]   ;;  %v678_v3 = vld [vmem:[%s1044_s1 + $0x14] ss:$8 sps:$4 sm:$0xff]  }
   0x2   :  { %246 = vmatprep.subr.bf16.mxu0 %v675_v0  ;;  %658 = vmatprep.subr.bf16.mxu1 %v675_v0  ;;  %v680_v4 = vld [vmem:[%s1044_s1 + $0x10] ss:$8 sps:$4 sm:$0xff]   ;;  %v681_v5 = vld [vmem:[%s1044_s1 + $0x24] ss:$8 sps:$4 sm:$0xff]   ;;  %v683_v6 = vld [vmem:[%s1044_s1 + $0x20] ss:$8 sps:$4 sm:$0xff]  }
   0x3   :  { %247 = vmatpush1.bf16.msra.mxu0 %v677_v2  ;;  %666 = vmatpush1.bf16.msra.mxu1 %v677_v2  ;;  %v684_v7 = vld [vmem:[%s1044_s1 + $0x34] ss:$8 sps:$4 sm:$0xff]   ;;  %v686_v8 = vld [vmem:[%s1044_s1 + $0x30] ss:$8 sps:$4 sm:$0xff]   ;;  %v687_v9 = vld [vmem:[%s1044_s1 + $0x44] ss:$8 sps:$4 sm:$0xff]  }
   0x4   :  { %248 = vmatprep.subr.bf16.mxu0 %v678_v3  ;;  %659 = vmatprep.subr.bf16.mxu1 %v678_v3  ;;  %v689_v10 = vld [vmem:[%s1044_s1 + $0x40] ss:$8 sps:$4 sm:$0xff]   ;;  %v690_v11 = vld [vmem:[%s1044_s1 + $0x54] ss:$8 sps:$4 sm:$0xff]   ;;  %v692_v12 = vld [vmem:[%s1044_s1 + $0x50] ss:$8 sps:$4 sm:$0xff]  }
   0x5   :  { %v693_v13 = vld [vmem:[%s1044_s1 + $0x64] ss:$8 sps:$4 sm:$0xff]   ;;  %v695_v14 = vld [vmem:[%s1044_s1 + $0x60] ss:$8 sps:$4 sm:$0xff]   ;;  %v696_v15 = vld [vmem:[%s1044_s1 + $0x74] ss:$8 sps:$4 sm:$0xff]  }
   0x6   :  { %v698_v16 = vld [vmem:[%s1044_s1 + $0x70] ss:$8 sps:$4 sm:$0xff]   ;;  %v699_v17 = vld [vmem:[%s1045_s0] sm:$0xff]   ;;  %v701_v19 = vld [vmem:[%s1045_s0 + $0x8] sm:$0xff]   ;;  %v461_v26 = vshrl.u32 %v460_v25, 7 }
   0x7   :  { %249 = vmatpush1.bf16.msra.mxu0 %v680_v4  ;;  %667 = vmatpush1.bf16.msra.mxu1 %v680_v4  ;;  %v700_v18 = vld [vmem:[%s1045_s0 + $0x20] sm:$0xff]   ;;  %v702_v20 = vld [vmem:[%s1045_s0 + $0x28] sm:$0xff]   ;;  %v703_v21 = vld [vmem:[%s1045_s0 + $0x10] sm:$0xff]  }
   0x8   :  { %250 = vmatprep.subr.bf16.mxu0 %v681_v5  ;;  %660 = vmatprep.subr.bf16.mxu1 %v681_v5  ;;  %v704_v22 = vld [vmem:[%s1045_s0 + $0x30] sm:$0xff]   ;;  %v705_v23 = vld [vmem:[%s1045_s0 + $0x18] sm:$0xff]   ;;  %v462_v27 = vsub.s32 0, %v461_v26  ;;  %v458_v28 = vld [vmem:[%s1046_s2] sm:$0x3]  ;;  %v466_v29 = vsub.s32 1, %v461_v26 }
   0x9   :  { %v706_v24 = vld [vmem:[%s1045_s0 + $0x38] sm:$0xff]   ;;  %v502_v33 = vld [vmem:[%s1047_s3] sm:$0xff]  ;;  %v503_v39 = vld [vmem:[%s1047_s3 + $0x8] sm:$0xff] }
   0xa   :  { %v816_v30 = vrot.slane %v458_v28, %v462_v27  ;;  %v818_v31 = vrot.slane %v458_v28, %v466_v29  ;;  %v518_v35 = vld [vmem:[%s1047_s3 + $0x80] sm:$0xff]  ;;  %v519_v41 = vld [vmem:[%s1047_s3 + $0x88] sm:$0xff]  ;;  %v504_v45 = vld [vmem:[%s1047_s3 + $0x10] sm:$0xff] }
   0xb   :  { %251 = vmatpush1.bf16.msra.mxu0 %v683_v6  ;;  %668 = vmatpush1.bf16.msra.mxu1 %v683_v6  ;;  %v520_v47 = vld [vmem:[%s1047_s3 + $0x90] sm:$0xff]  ;;  %v505_v53 = vld [vmem:[%s1047_s3 + $0x18] sm:$0xff] }
   0xc   :  { %252 = vmatprep.subr.bf16.mxu0 %v684_v7  ;;  %661 = vmatprep.subr.bf16.mxu1 %v684_v7  ;;  %v521_v55 = vld [vmem:[%s1047_s3 + $0x98] sm:$0xff] }
   0xd   :  { %v509_v29 = vld [vmem:[%s1047_s3 + $0x38] sm:$0xff] }
   0xf   :  { %253 = vmatpush1.bf16.msra.mxu0 %v686_v8  ;;  %669 = vmatpush1.bf16.msra.mxu1 %v686_v8 }
  0x10   :  { %254 = vmatprep.subr.bf16.mxu0 %v687_v9  ;;  %662 = vmatprep.subr.bf16.mxu1 %v687_v9  ;;  %v506_v9 = vld [vmem:[%s1047_s3 + $0x20] sm:$0xff] }
  0x13   :  { %255 = vmatpush1.bf16.msra.mxu0 %v689_v10  ;;  %670 = vmatpush1.bf16.msra.mxu1 %v689_v10 }
  0x14   :  { %256 = vmatprep.subr.bf16.mxu0 %v690_v11  ;;  %663 = vmatprep.subr.bf16.mxu1 %v690_v11  ;;  %v522_v11 = vld [vmem:[%s1047_s3 + $0xa0] sm:$0xff] }
  0x17   :  { %257 = vmatpush1.bf16.msra.mxu0 %v692_v12  ;;  %671 = vmatpush1.bf16.msra.mxu1 %v692_v12 }
  0x18   :  { %258 = vmatprep.subr.bf16.mxu0 %v693_v13  ;;  %664 = vmatprep.subr.bf16.mxu1 %v693_v13 }
  0x1b   :  { %259 = vmatpush1.bf16.msra.mxu0 %v695_v14  ;;  %672 = vmatpush1.bf16.msra.mxu1 %v695_v14 }
  0x1c   :  { %260 = vmatprep.subr.bf16.mxu0 %v696_v15  ;;  %665 = vmatprep.subr.bf16.mxu1 %v696_v15  ;;  %v507_v15 = vld [vmem:[%s1047_s3 + $0x28] sm:$0xff] }
  0x1f   :  { %261 = vmatpush1.bf16.msra.mxu0 %v698_v16  ;;  %673 = vmatpush1.bf16.msra.mxu1 %v698_v16 }
  0x22   :  { %279 = vmatmul.mubr.bf16.vlgmr.msra.gmra.mrb[0].mxu0 %v699_v17  ;;  %319 = vmatmul.mubr.bf16.vlgmr.msra.gmra.mrb[0].mxu1 %v700_v18  ;;  %v523_v17 = vld [vmem:[%s1047_s3 + $0xa8] sm:$0xff] }
  0x23   :  { %288 = vmatprep.mubr.bf16.mxu0 %v707_v1  ;;  %328 = vmatprep.mubr.bf16.mxu1 %v707_v1 }
  0x2a   :  { %289 = vmatmul.mubr.bf16.gmra.mrb[4].mxu0 %v701_v19  ;;  %329 = vmatmul.mubr.bf16.gmra.mrb[4].mxu1 %v702_v20 }
  0x2b   :  { %298 = vmatprep.mubr.bf16.mxu0 %v707_v1  ;;  %338 = vmatprep.mubr.bf16.mxu1 %v707_v1 }
  0x32   :  { %299 = vmatmul.mubr.bf16.gmra.mrb[8].mxu0 %v703_v21  ;;  %339 = vmatmul.mubr.bf16.gmra.mrb[8].mxu1 %v704_v22  ;;  %v508_v21 = vld [vmem:[%s1047_s3 + $0x30] sm:$0xff] }
  0x33   :  { %308 = vmatprep.mubr.bf16.mxu0 %v707_v1  ;;  %348 = vmatprep.mubr.bf16.mxu1 %v707_v1 }
  0x3a   :  { %309 = vmatmul.mubr.bf16.gmra.mrb[12].mxu0 %v705_v23  ;;  %349 = vmatmul.mubr.bf16.gmra.mrb[12].mxu1 %v706_v24  ;;  %v524_v23 = vld [vmem:[%s1047_s3 + $0xb0] sm:$0xff] }
  0xf5   :  { %v280_v32 = vpop.f32.mrb[0].mxu0  ;;  %v320_v34 = vpop.f32.mrb[0].mxu1 }
  0xf6   :  { %v470_v36 = vadd.f32 %v816_v30, %v280_v32  ;;  %v486_v37 = vadd.f32 %v816_v30, %v320_v34  ;;  %v282_v38 = vpop.f32.mrb[1].mxu0  ;;  %v322_v40 = vpop.f32.mrb[1].mxu1 }
  0xf7   :  { %v471_v42 = vadd.f32 %v818_v31, %v282_v38  ;;  %v487_v43 = vadd.f32 %v818_v31, %v322_v40  ;;  %v284_v44 = vpop.f32.mrb[2].mxu0  ;;  %v324_v46 = vpop.f32.mrb[2].mxu1 }
  0xf8   :  { %v534_v48 = vadd.f32 %v502_v33, %v470_v36  ;;  %v550_v49 = vadd.f32 %v518_v35, %v486_v37  ;;  %v472_v50 = vadd.f32 %v816_v30, %v284_v44  ;;  %v488_v51 = vadd.f32 %v816_v30, %v324_v46  ;;  %v286_v52 = vpop.f32.mrb[3].mxu0  ;;  %v326_v54 = vpop.f32.mrb[3].mxu1  ;;  %v525_v33 = vld [vmem:[%s1047_s3 + $0xb8] sm:$0xff] }
  0xf9   :  { %v535_v56 = vadd.f32 %v503_v39, %v471_v42  ;;  %v551_v57 = vadd.f32 %v519_v41, %v487_v43  ;;  %v473_v58 = vadd.f32 %v818_v31, %v286_v52  ;;  %v489_v59 = vadd.f32 %v818_v31, %v326_v54 }
  0xfa   :  { %v566_v60 = vmax.f32 %v534_v48, 0.0  ;;  %v582_v61 = vmax.f32 %v550_v49, 0.0  ;;  %v536_v62 = vadd.f32 %v504_v45, %v472_v50  ;;  %v552_v63 = vadd.f32 %v520_v47, %v488_v51  ;;  %v510_v51 = vld [vmem:[%s1047_s3 + $0x40] sm:$0xff] }
  0xfb   :  { %v567_v0 = vmax.f32 %v535_v56, 0.0  ;;  %v583_v1 = vmax.f32 %v551_v57, 0.0  ;;  %v537_v2 = vadd.f32 %v505_v53, %v473_v58  ;;  %v553_v3 = vadd.f32 %v521_v55, %v489_v59  ;;  %v526_v53 = vld [vmem:[%s1047_s3 + $0xc0] sm:$0xff]  ;;  %v511_v57 = vld [vmem:[%s1047_s3 + $0x48] sm:$0xff] }
  0xfc   :  { %598 = vst [vmem:[%s1048_s4] sm:$0xff] %v566_v60  ;;  %614 = vst [vmem:[%s1048_s4 + $0x80] sm:$0xff] %v582_v61  ;;  %v568_v4 = vmax.f32 %v536_v62, 0.0  ;;  %v584_v5 = vmax.f32 %v552_v63, 0.0  ;;  %v527_v59 = vld [vmem:[%s1047_s3 + $0xc8] sm:$0xff]  ;;  %v512_v63 = vld [vmem:[%s1047_s3 + $0x50] sm:$0xff] }
  0xfd   :  { %599 = vst [vmem:[%s1048_s4 + $0x8] sm:$0xff] %v567_v0  ;;  %615 = vst [vmem:[%s1048_s4 + $0x88] sm:$0xff] %v583_v1  ;;  %v569_v6 = vmax.f32 %v537_v2, 0.0  ;;  %v585_v7 = vmax.f32 %v553_v3, 0.0  ;;  %v290_v8 = vpop.f32.mrb[4].mxu0  ;;  %v330_v10 = vpop.f32.mrb[4].mxu1 }
  0xfe   :  { %600 = vst [vmem:[%s1048_s4 + $0x10] sm:$0xff] %v568_v4  ;;  %616 = vst [vmem:[%s1048_s4 + $0x90] sm:$0xff] %v584_v5  ;;  %v474_v12 = vadd.f32 %v816_v30, %v290_v8  ;;  %v490_v13 = vadd.f32 %v816_v30, %v330_v10  ;;  %v292_v14 = vpop.f32.mrb[5].mxu0  ;;  %v332_v16 = vpop.f32.mrb[5].mxu1  ;;  %v528_v1 = vld [vmem:[%s1047_s3 + $0xd0] sm:$0xff] }
  0xff   :  { %601 = vst [vmem:[%s1048_s4 + $0x18] sm:$0xff] %v569_v6  ;;  %617 = vst [vmem:[%s1048_s4 + $0x98] sm:$0xff] %v585_v7  ;;  %v475_v18 = vadd.f32 %v818_v31, %v292_v14  ;;  %v491_v19 = vadd.f32 %v818_v31, %v332_v16  ;;  %v294_v20 = vpop.f32.mrb[6].mxu0  ;;  %v334_v22 = vpop.f32.mrb[6].mxu1  ;;  %v513_v7 = vld [vmem:[%s1047_s3 + $0x58] sm:$0xff] }
 0x100   :  { %v538_v24 = vadd.f32 %v506_v9, %v474_v12  ;;  %v554_v25 = vadd.f32 %v522_v11, %v490_v13  ;;  %v476_v26 = vadd.f32 %v816_v30, %v294_v20  ;;  %v492_v27 = vadd.f32 %v816_v30, %v334_v22  ;;  %v296_v28 = vpop.f32.mrb[7].mxu0  ;;  %v336_v32 = vpop.f32.mrb[7].mxu1  ;;  %v529_v9 = vld [vmem:[%s1047_s3 + $0xd8] sm:$0xff] }
 0x101   :  { %v539_v34 = vadd.f32 %v507_v15, %v475_v18  ;;  %v555_v35 = vadd.f32 %v523_v17, %v491_v19  ;;  %v477_v36 = vadd.f32 %v818_v31, %v296_v28  ;;  %v493_v37 = vadd.f32 %v818_v31, %v336_v32 }
 0x102   :  { %v570_v38 = vmax.f32 %v538_v24, 0.0  ;;  %v586_v39 = vmax.f32 %v554_v25, 0.0  ;;  %v540_v40 = vadd.f32 %v508_v21, %v476_v26  ;;  %v556_v41 = vadd.f32 %v524_v23, %v492_v27  ;;  %v514_v27 = vld [vmem:[%s1047_s3 + $0x60] sm:$0xff] }
 0x103   :  { %v571_v42 = vmax.f32 %v539_v34, 0.0  ;;  %v587_v43 = vmax.f32 %v555_v35, 0.0  ;;  %v541_v44 = vadd.f32 %v509_v29, %v477_v36  ;;  %v557_v45 = vadd.f32 %v525_v33, %v493_v37  ;;  %v530_v29 = vld [vmem:[%s1047_s3 + $0xe0] sm:$0xff]  ;;  %v515_v35 = vld [vmem:[%s1047_s3 + $0x68] sm:$0xff] }
 0x104   :  { %602 = vst [vmem:[%s1048_s4 + $0x20] sm:$0xff] %v570_v38  ;;  %618 = vst [vmem:[%s1048_s4 + $0xa0] sm:$0xff] %v586_v39  ;;  %v572_v46 = vmax.f32 %v540_v40, 0.0  ;;  %v588_v47 = vmax.f32 %v556_v41, 0.0  ;;  %v531_v37 = vld [vmem:[%s1047_s3 + $0xe8] sm:$0xff]  ;;  %v516_v41 = vld [vmem:[%s1047_s3 + $0x70] sm:$0xff] }
 0x105   :  { %603 = vst [vmem:[%s1048_s4 + $0x28] sm:$0xff] %v571_v42  ;;  %619 = vst [vmem:[%s1048_s4 + $0xa8] sm:$0xff] %v587_v43  ;;  %v573_v48 = vmax.f32 %v541_v44, 0.0  ;;  %v589_v49 = vmax.f32 %v557_v45, 0.0  ;;  %v300_v50 = vpop.f32.mrb[8].mxu0  ;;  %v340_v52 = vpop.f32.mrb[8].mxu1 }
 0x106   :  { %604 = vst [vmem:[%s1048_s4 + $0x30] sm:$0xff] %v572_v46  ;;  %620 = vst [vmem:[%s1048_s4 + $0xb0] sm:$0xff] %v588_v47  ;;  %v478_v54 = vadd.f32 %v816_v30, %v300_v50  ;;  %v494_v55 = vadd.f32 %v816_v30, %v340_v52  ;;  %v302_v56 = vpop.f32.mrb[9].mxu0  ;;  %v342_v58 = vpop.f32.mrb[9].mxu1  ;;  %v532_v43 = vld [vmem:[%s1047_s3 + $0xf0] sm:$0xff] }
 0x107   :  { %605 = vst [vmem:[%s1048_s4 + $0x38] sm:$0xff] %v573_v48  ;;  %621 = vst [vmem:[%s1048_s4 + $0xb8] sm:$0xff] %v589_v49  ;;  %v479_v60 = vadd.f32 %v818_v31, %v302_v56  ;;  %v495_v61 = vadd.f32 %v818_v31, %v342_v58  ;;  %v304_v62 = vpop.f32.mrb[10].mxu0  ;;  %v344_v0 = vpop.f32.mrb[10].mxu1  ;;  %v517_v49 = vld [vmem:[%s1047_s3 + $0x78] sm:$0xff] }
 0x108   :  { %v542_v2 = vadd.f32 %v510_v51, %v478_v54  ;;  %v558_v3 = vadd.f32 %v526_v53, %v494_v55  ;;  %v480_v4 = vadd.f32 %v816_v30, %v304_v62  ;;  %v496_v5 = vadd.f32 %v816_v30, %v344_v0  ;;  %v306_v6 = vpop.f32.mrb[11].mxu0  ;;  %v346_v8 = vpop.f32.mrb[11].mxu1  ;;  %v533_v51 = vld [vmem:[%s1047_s3 + $0xf8] sm:$0xff] }
 0x109   :  { %v543_v10 = vadd.f32 %v511_v57, %v479_v60  ;;  %v559_v11 = vadd.f32 %v527_v59, %v495_v61  ;;  %v481_v12 = vadd.f32 %v818_v31, %v306_v6  ;;  %v497_v13 = vadd.f32 %v818_v31, %v346_v8 }
 0x10a   :  { %v574_v14 = vmax.f32 %v542_v2, 0.0  ;;  %v590_v15 = vmax.f32 %v558_v3, 0.0  ;;  %v544_v16 = vadd.f32 %v512_v63, %v480_v4  ;;  %v560_v17 = vadd.f32 %v528_v1, %v496_v5 }
 0x10b   :  { %v575_v18 = vmax.f32 %v543_v10, 0.0  ;;  %v591_v19 = vmax.f32 %v559_v11, 0.0  ;;  %v545_v20 = vadd.f32 %v513_v7, %v481_v12  ;;  %v561_v21 = vadd.f32 %v529_v9, %v497_v13 }
 0x10c   :  { %606 = vst [vmem:[%s1048_s4 + $0x40] sm:$0xff] %v574_v14  ;;  %622 = vst [vmem:[%s1048_s4 + $0xc0] sm:$0xff] %v590_v15  ;;  %v576_v22 = vmax.f32 %v544_v16, 0.0  ;;  %v592_v23 = vmax.f32 %v560_v17, 0.0 }
 0x10d   :  { %607 = vst [vmem:[%s1048_s4 + $0x48] sm:$0xff] %v575_v18  ;;  %623 = vst [vmem:[%s1048_s4 + $0xc8] sm:$0xff] %v591_v19  ;;  %v577_v24 = vmax.f32 %v545_v20, 0.0  ;;  %v593_v25 = vmax.f32 %v561_v21, 0.0  ;;  %v310_v26 = vpop.f32.mrb[12].mxu0  ;;  %v350_v28 = vpop.f32.mrb[12].mxu1 }
 0x10e   :  { %608 = vst [vmem:[%s1048_s4 + $0x50] sm:$0xff] %v576_v22  ;;  %624 = vst [vmem:[%s1048_s4 + $0xd0] sm:$0xff] %v592_v23  ;;  %v482_v32 = vadd.f32 %v816_v30, %v310_v26  ;;  %v498_v33 = vadd.f32 %v816_v30, %v350_v28  ;;  %v312_v34 = vpop.f32.mrb[13].mxu0  ;;  %v352_v36 = vpop.f32.mrb[13].mxu1 }
 0x10f   :  { %609 = vst [vmem:[%s1048_s4 + $0x58] sm:$0xff] %v577_v24  ;;  %625 = vst [vmem:[%s1048_s4 + $0xd8] sm:$0xff] %v593_v25  ;;  %v483_v38 = vadd.f32 %v818_v31, %v312_v34  ;;  %v499_v39 = vadd.f32 %v818_v31, %v352_v36  ;;  %v314_v40 = vpop.f32.mrb[14].mxu0  ;;  %v354_v42 = vpop.f32.mrb[14].mxu1 }
 0x110   :  { %v546_v44 = vadd.f32 %v514_v27, %v482_v32  ;;  %v562_v45 = vadd.f32 %v530_v29, %v498_v33  ;;  %v484_v46 = vadd.f32 %v816_v30, %v314_v40  ;;  %v500_v47 = vadd.f32 %v816_v30, %v354_v42  ;;  %v316_v48 = vpop.f32.mrb[15].mxu0  ;;  %v356_v50 = vpop.f32.mrb[15].mxu1 }
 0x111   :  { %v547_v52 = vadd.f32 %v515_v35, %v483_v38  ;;  %v563_v53 = vadd.f32 %v531_v37, %v499_v39  ;;  %v485_v54 = vadd.f32 %v818_v31, %v316_v48  ;;  %v501_v55 = vadd.f32 %v818_v31, %v356_v50 }
 0x112   :  { %v578_v56 = vmax.f32 %v546_v44, 0.0  ;;  %v594_v57 = vmax.f32 %v562_v45, 0.0  ;;  %v548_v58 = vadd.f32 %v516_v41, %v484_v46  ;;  %v564_v30 = vadd.f32 %v532_v43, %v500_v47 }
 0x113   :  { %v579_v59 = vmax.f32 %v547_v52, 0.0  ;;  %v595_v60 = vmax.f32 %v563_v53, 0.0  ;;  %v549_v61 = vadd.f32 %v517_v49, %v485_v54  ;;  %v565_v62 = vadd.f32 %v533_v51, %v501_v55 }
 0x114   :  { %610 = vst [vmem:[%s1048_s4 + $0x60] sm:$0xff] %v578_v56  ;;  %626 = vst [vmem:[%s1048_s4 + $0xe0] sm:$0xff] %v594_v57  ;;  %v580_v63 = vmax.f32 %v548_v58, 0.0  ;;  %v596_v0 = vmax.f32 %v564_v30, 0.0 }
 0x115   :  { %611 = vst [vmem:[%s1048_s4 + $0x68] sm:$0xff] %v579_v59  ;;  %627 = vst [vmem:[%s1048_s4 + $0xe8] sm:$0xff] %v595_v60  ;;  %v581_v31 = vmax.f32 %v549_v61, 0.0  ;;  %v597_v1 = vmax.f32 %v565_v62, 0.0 }
 0x116   :  { %612 = vst [vmem:[%s1048_s4 + $0x70] sm:$0xff] %v580_v63  ;;  %628 = vst [vmem:[%s1048_s4 + $0xf0] sm:$0xff] %v596_v0 }
 0x117   :  { %613 = vst [vmem:[%s1048_s4 + $0x78] sm:$0xff] %v581_v31  ;;  %629 = vst [vmem:[%s1048_s4 + $0xf8] sm:$0xff] %v597_v1 }

// kernel: multicom_res50_forward.59
= control target key start
LH: loop header
LB: loop body
LE: loop exit
PB: predicated region body
PF: predicated region fallthrough
CT: control target
= control target key end

     0   :  { %s820_s1 = inlined_call_operand.vmem [shape: bf16[256,128], index: 1, kind: input, shape index: {}]   ;;  %s821_s0 = inlined_call_operand.vmem [shape: bf16[128,256], index: 0, kind: input, shape index: {}]   ;;  %s822_s2 = inlined_call_operand.vmem [shape: f32[1,128], index: 2, kind: input, shape index: {}]   ;;  %s823_s3 = inlined_call_operand.vmem [shape: f32[128,128], index: 3, kind: output, shape index: {}]  }
   0x1   :  { %v595_v0 = vld [vmem:[%s820_s1 + $0x40] sm:$0xff]   ;;  %v597_v2 = vld [vmem:[%s820_s1 + $0x48] sm:$0xff]   ;;  %v599_v4 = vld [vmem:[%s820_s1 + $0x50] sm:$0xff]  }
   0x2   :  { %v596_v1 = vld [vmem:[%s820_s1] sm:$0xff]   ;;  %515 = vmatprep.subr.bf16.mxu0 %v595_v0  ;;  %579 = vmatprep.subr.bf16.mxu1 %v595_v0  ;;  %v598_v3 = vld [vmem:[%s820_s1 + $0x8] sm:$0xff]   ;;  %v600_v5 = vld [vmem:[%s820_s1 + $0x10] sm:$0xff]  }
   0x3   :  { %516 = vmatpush3.bf16.msra.mxu0 %v596_v1  ;;  %587 = vmatpush3.bf16.msra.mxu1 %v596_v1  ;;  %v601_v6 = vld [vmem:[%s820_s1 + $0x58] sm:$0xff]   ;;  %v603_v8 = vld [vmem:[%s820_s1 + $0x60] sm:$0xff]   ;;  %v605_v10 = vld [vmem:[%s820_s1 + $0x68] sm:$0xff]  }
   0x4   :  { %517 = vmatprep.subr.bf16.mxu0 %v597_v2  ;;  %580 = vmatprep.subr.bf16.mxu1 %v597_v2  ;;  %v602_v7 = vld [vmem:[%s820_s1 + $0x18] sm:$0xff]   ;;  %v604_v9 = vld [vmem:[%s820_s1 + $0x20] sm:$0xff]   ;;  %v606_v13 = vld [vmem:[%s820_s1 + $0x28] sm:$0xff]  }
   0x5   :  { %v613_v11 = vld [vmem:[%s821_s0 + $0x4] ss:$8 sps:$4 sm:$0xff]   ;;  %v607_v14 = vld [vmem:[%s820_s1 + $0x70] sm:$0xff]   ;;  %v609_v16 = vld [vmem:[%s820_s1 + $0x78] sm:$0xff]  }
   0x6   :  { %v616_v12 = vld [vmem:[%s821_s0 + $0x44] ss:$8 sps:$4 sm:$0xff]   ;;  %307 = vmatprep.mubr.bf16.mxu0 %v613_v11  ;;  %v608_v15 = vld [vmem:[%s820_s1 + $0x30] sm:$0xff]   ;;  %v610_v17 = vld [vmem:[%s820_s1 + $0x38] sm:$0xff]  }
   0x7   :  { %518 = vmatpush3.bf16.msra.mxu0 %v598_v3  ;;  %588 = vmatpush3.bf16.msra.mxu1 %v598_v3  ;;  %v611_v18 = vld [vmem:[%s821_s0] ss:$8 sps:$4 sm:$0xff]   ;;  %v617_v20 = vld [vmem:[%s821_s0 + $0x14] ss:$8 sps:$4 sm:$0xff]   ;;  %v621_v22 = vld [vmem:[%s821_s0 + $0x10] ss:$8 sps:$4 sm:$0xff]  }
   0x8   :  { %519 = vmatprep.subr.bf16.mxu0 %v599_v4  ;;  %581 = vmatprep.subr.bf16.mxu1 %v599_v4  ;;  %v614_v19 = vld [vmem:[%s821_s0 + $0x40] ss:$8 sps:$4 sm:$0xff]   ;;  %v619_v21 = vld [vmem:[%s821_s0 + $0x54] ss:$8 sps:$4 sm:$0xff]   ;;  %v622_v23 = vld [vmem:[%s821_s0 + $0x50] ss:$8 sps:$4 sm:$0xff]  }
   0x9   :  { %339 = vmatprep.mubr.bf16.mxu1 %v616_v12  ;;  %v623_v24 = vld [vmem:[%s821_s0 + $0x24] ss:$8 sps:$4 sm:$0xff]   ;;  %v627_v26 = vld [vmem:[%s821_s0 + $0x20] ss:$8 sps:$4 sm:$0xff]   ;;  %v629_v28 = vld [vmem:[%s821_s0 + $0x34] ss:$8 sps:$4 sm:$0xff]  }
   0xa   :  { %v625_v25 = vld [vmem:[%s821_s0 + $0x64] ss:$8 sps:$4 sm:$0xff]   ;;  %v628_v27 = vld [vmem:[%s821_s0 + $0x60] ss:$8 sps:$4 sm:$0xff]   ;;  %v631_v29 = vld [vmem:[%s821_s0 + $0x74] ss:$8 sps:$4 sm:$0xff]  }
   0xb   :  { %520 = vmatpush3.bf16.msra.mxu0 %v600_v5  ;;  %589 = vmatpush3.bf16.msra.mxu1 %v600_v5  ;;  %v633_v30 = vld [vmem:[%s821_s0 + $0x30] ss:$8 sps:$4 sm:$0xff]   ;;  %v754_v35 = vld [vmem:[%s822_s2] ss:$0 sm:$0xff] }
   0xc   :  { %521 = vmatprep.subr.bf16.mxu0 %v601_v6  ;;  %582 = vmatprep.subr.bf16.mxu1 %v601_v6  ;;  %v634_v31 = vld [vmem:[%s821_s0 + $0x70] ss:$8 sps:$4 sm:$0xff]  }
   0xf   :  { %522 = vmatpush3.bf16.msra.mxu0 %v602_v7  ;;  %590 = vmatpush3.bf16.msra.mxu1 %v602_v7 }
  0x10   :  { %523 = vmatprep.subr.bf16.mxu0 %v603_v8  ;;  %583 = vmatprep.subr.bf16.mxu1 %v603_v8 }
  0x13   :  { %524 = vmatpush3.bf16.msra.mxu0 %v604_v9  ;;  %591 = vmatpush3.bf16.msra.mxu1 %v604_v9 }
  0x14   :  { %525 = vmatprep.subr.bf16.mxu0 %v605_v10  ;;  %584 = vmatprep.subr.bf16.mxu1 %v605_v10 }
  0x17   :  { %526 = vmatpush3.bf16.msra.mxu0 %v606_v13  ;;  %592 = vmatpush3.bf16.msra.mxu1 %v606_v13 }
  0x18   :  { %527 = vmatprep.subr.bf16.mxu0 %v607_v14  ;;  %585 = vmatprep.subr.bf16.mxu1 %v607_v14 }
  0x1b   :  { %528 = vmatpush3.bf16.msra.mxu0 %v608_v15  ;;  %593 = vmatpush3.bf16.msra.mxu1 %v608_v15 }
  0x1c   :  { %529 = vmatprep.subr.bf16.mxu0 %v609_v16  ;;  %586 = vmatprep.subr.bf16.mxu1 %v609_v16 }
  0x1f   :  { %530 = vmatpush3.bf16.msra.mxu0 %v610_v17  ;;  %594 = vmatpush3.bf16.msra.mxu1 %v610_v17 }
  0x22   :  { %308 = vmatmul.mubr.bf16.vlgmr.msra.gmra.mrb[0].mxu0 %v611_v18  ;;  %340 = vmatmul.mubr.bf16.vlgmr.msra.gmra.mrb[0].mxu1 %v614_v19 }
  0x23   :  { %315 = vmatprep.mubr.bf16.mxu0 %v617_v20  ;;  %347 = vmatprep.mubr.bf16.mxu1 %v619_v21 }
  0x2a   :  { %316 = vmatmul.mubr.bf16.gmra.mrb[4].mxu0 %v621_v22  ;;  %348 = vmatmul.mubr.bf16.gmra.mrb[4].mxu1 %v622_v23 }
  0x2b   :  { %323 = vmatprep.mubr.bf16.mxu0 %v623_v24  ;;  %355 = vmatprep.mubr.bf16.mxu1 %v625_v25 }
  0x32   :  { %324 = vmatmul.mubr.bf16.gmra.mrb[8].mxu0 %v627_v26  ;;  %356 = vmatmul.mubr.bf16.gmra.mrb[8].mxu1 %v628_v27 }
  0x33   :  { %331 = vmatprep.mubr.bf16.mxu0 %v629_v28  ;;  %363 = vmatprep.mubr.bf16.mxu1 %v631_v29 }
  0x3a   :  { %332 = vmatmul.mubr.bf16.gmra.mrb[12].mxu0 %v633_v30  ;;  %364 = vmatmul.mubr.bf16.gmra.mrb[12].mxu1 %v634_v31 }
  0xf5   :  { %v531_v32 = vpop.f32.mrb[0].mxu0  ;;  %v555_v33 = vpop.f32.mrb[0].mxu1 }
  0xf6   :  { %v532_v34 = vpop.f32.mrb[1].mxu0  ;;  %v556_v36 = vpop.f32.mrb[1].mxu1 }
  0xf7   :  { %v533_v37 = vadd.f32 %v532_v34, %v531_v32  ;;  %v557_v38 = vadd.f32 %v556_v36, %v555_v33  ;;  %v534_v39 = vpop.f32.mrb[2].mxu0  ;;  %v558_v40 = vpop.f32.mrb[2].mxu1 }
  0xf8   :  { %v535_v41 = vpop.f32.mrb[3].mxu0  ;;  %v559_v42 = vpop.f32.mrb[3].mxu1 }
  0xf9   :  { %v430_v43 = vadd.f32 %v533_v37, %v754_v35  ;;  %v438_v44 = vadd.f32 %v557_v38, %v754_v35  ;;  %v536_v45 = vadd.f32 %v535_v41, %v534_v39  ;;  %v560_v46 = vadd.f32 %v559_v42, %v558_v40 }
  0xfb   :  { %v446_v47 = vmax.f32 %v430_v43, 0.0  ;;  %v454_v48 = vmax.f32 %v438_v44, 0.0  ;;  %v431_v49 = vadd.f32 %v536_v45, %v754_v35  ;;  %v439_v50 = vadd.f32 %v560_v46, %v754_v35 }
  0xfd   :  { %462 = vst [vmem:[%s823_s3] sm:$0xff] %v446_v47  ;;  %470 = vst [vmem:[%s823_s3 + $0x40] sm:$0xff] %v454_v48  ;;  %v447_v51 = vmax.f32 %v431_v49, 0.0  ;;  %v455_v52 = vmax.f32 %v439_v50, 0.0  ;;  %v537_v53 = vpop.f32.mrb[4].mxu0  ;;  %v561_v54 = vpop.f32.mrb[4].mxu1 }
  0xfe   :  { %v538_v55 = vpop.f32.mrb[5].mxu0  ;;  %v562_v56 = vpop.f32.mrb[5].mxu1 }
  0xff   :  { %463 = vst [vmem:[%s823_s3 + $0x8] sm:$0xff] %v447_v51  ;;  %471 = vst [vmem:[%s823_s3 + $0x48] sm:$0xff] %v455_v52  ;;  %v539_v57 = vadd.f32 %v538_v55, %v537_v53  ;;  %v563_v58 = vadd.f32 %v562_v56, %v561_v54  ;;  %v540_v59 = vpop.f32.mrb[6].mxu0  ;;  %v564_v60 = vpop.f32.mrb[6].mxu1 }
 0x100   :  { %v541_v61 = vpop.f32.mrb[7].mxu0  ;;  %v565_v62 = vpop.f32.mrb[7].mxu1 }
 0x101   :  { %v432_v63 = vadd.f32 %v539_v57, %v754_v35  ;;  %v440_v0 = vadd.f32 %v563_v58, %v754_v35  ;;  %v542_v1 = vadd.f32 %v541_v61, %v540_v59  ;;  %v566_v2 = vadd.f32 %v565_v62, %v564_v60 }
 0x103   :  { %v448_v3 = vmax.f32 %v432_v63, 0.0  ;;  %v456_v4 = vmax.f32 %v440_v0, 0.0  ;;  %v433_v5 = vadd.f32 %v542_v1, %v754_v35  ;;  %v441_v6 = vadd.f32 %v566_v2, %v754_v35 }
 0x105   :  { %464 = vst [vmem:[%s823_s3 + $0x10] sm:$0xff] %v448_v3  ;;  %472 = vst [vmem:[%s823_s3 + $0x50] sm:$0xff] %v456_v4  ;;  %v449_v7 = vmax.f32 %v433_v5, 0.0  ;;  %v457_v8 = vmax.f32 %v441_v6, 0.0  ;;  %v543_v9 = vpop.f32.mrb[8].mxu0  ;;  %v567_v10 = vpop.f32.mrb[8].mxu1 }
 0x106   :  { %v544_v11 = vpop.f32.mrb[9].mxu0  ;;  %v568_v12 = vpop.f32.mrb[9].mxu1 }
 0x107   :  { %465 = vst [vmem:[%s823_s3 + $0x18] sm:$0xff] %v449_v7  ;;  %473 = vst [vmem:[%s823_s3 + $0x58] sm:$0xff] %v457_v8  ;;  %v545_v13 = vadd.f32 %v544_v11, %v543_v9  ;;  %v569_v14 = vadd.f32 %v568_v12, %v567_v10  ;;  %v546_v15 = vpop.f32.mrb[10].mxu0  ;;  %v570_v16 = vpop.f32.mrb[10].mxu1 }
 0x108   :  { %v547_v17 = vpop.f32.mrb[11].mxu0  ;;  %v571_v18 = vpop.f32.mrb[11].mxu1 }
 0x109   :  { %v434_v19 = vadd.f32 %v545_v13, %v754_v35  ;;  %v442_v20 = vadd.f32 %v569_v14, %v754_v35  ;;  %v548_v21 = vadd.f32 %v547_v17, %v546_v15  ;;  %v572_v22 = vadd.f32 %v571_v18, %v570_v16 }
 0x10b   :  { %v450_v23 = vmax.f32 %v434_v19, 0.0  ;;  %v458_v24 = vmax.f32 %v442_v20, 0.0  ;;  %v435_v25 = vadd.f32 %v548_v21, %v754_v35  ;;  %v443_v26 = vadd.f32 %v572_v22, %v754_v35 }
 0x10d   :  { %466 = vst [vmem:[%s823_s3 + $0x20] sm:$0xff] %v450_v23  ;;  %474 = vst [vmem:[%s823_s3 + $0x60] sm:$0xff] %v458_v24  ;;  %v451_v27 = vmax.f32 %v435_v25, 0.0  ;;  %v459_v28 = vmax.f32 %v443_v26, 0.0  ;;  %v549_v29 = vpop.f32.mrb[12].mxu0  ;;  %v573_v30 = vpop.f32.mrb[12].mxu1 }
 0x10e   :  { %v550_v31 = vpop.f32.mrb[13].mxu0  ;;  %v574_v32 = vpop.f32.mrb[13].mxu1 }
 0x10f   :  { %467 = vst [vmem:[%s823_s3 + $0x28] sm:$0xff] %v451_v27  ;;  %475 = vst [vmem:[%s823_s3 + $0x68] sm:$0xff] %v459_v28  ;;  %v551_v33 = vadd.f32 %v550_v31, %v549_v29  ;;  %v575_v34 = vadd.f32 %v574_v32, %v573_v30  ;;  %v552_v36 = vpop.f32.mrb[14].mxu0  ;;  %v576_v37 = vpop.f32.mrb[14].mxu1 }
 0x110   :  { %v553_v38 = vpop.f32.mrb[15].mxu0  ;;  %v577_v39 = vpop.f32.mrb[15].mxu1 }
 0x111   :  { %v436_v40 = vadd.f32 %v551_v33, %v754_v35  ;;  %v444_v41 = vadd.f32 %v575_v34, %v754_v35  ;;  %v554_v42 = vadd.f32 %v553_v38, %v552_v36  ;;  %v578_v43 = vadd.f32 %v577_v39, %v576_v37 }
 0x113   :  { %v452_v44 = vmax.f32 %v436_v40, 0.0  ;;  %v460_v45 = vmax.f32 %v444_v41, 0.0  ;;  %v437_v46 = vadd.f32 %v554_v42, %v754_v35  ;;  %v445_v47 = vadd.f32 %v578_v43, %v754_v35 }
 0x115   :  { %468 = vst [vmem:[%s823_s3 + $0x30] sm:$0xff] %v452_v44  ;;  %476 = vst [vmem:[%s823_s3 + $0x70] sm:$0xff] %v460_v45  ;;  %v453_v48 = vmax.f32 %v437_v46, 0.0  ;;  %v461_v49 = vmax.f32 %v445_v47, 0.0 }
 0x117   :  { %469 = vst [vmem:[%s823_s3 + $0x38] sm:$0xff] %v453_v48  ;;  %477 = vst [vmem:[%s823_s3 + $0x78] sm:$0xff] %v461_v49 }

// kernel: multicom_res50_forward.67
= control target key start
LH: loop header
LB: loop body
LE: loop exit
PB: predicated region body
PF: predicated region fallthrough
CT: control target
= control target key end

     0   :  { %s761_s12 = smov 0   ;;  %s763_s13 = smov 0   ;;  %s860_s0 = inlined_call_operand.vmem [shape: bf16[32,1152], index: 0, kind: input, shape index: {}]   ;;  %s861_s1 = inlined_call_operand.vmem [shape: bf16[1152,128], index: 1, kind: input, shape index: {}]   ;;  %s862_s2 = inlined_call_operand.vmem [shape: f32[1,128], index: 2, kind: input, shape index: {}]   ;;  %s863_s3 = inlined_call_operand.vmem [shape: f32[32,128], index: 3, kind: output, shape index: {}]  }
   0x1   :  { %s765_s14 = smov 0   ;;  %s767_s15 = smov 0  }
   0x2   :  { %s769_s16 = smov 0  }
   0x3 LB: > { %s25_s17 = sadd.s32 1, %s734_s15  ;;  %p48_p1 = scmp.ne.s32.totalorder %s726_s13, %s722_s12  ;;  %s738_s16 = sphi %s769_s16, %s13_s16   ;;  %s734_s15 = sphi %s767_s15, %s867_s15   ;;  %s730_s14 = sphi %s765_s14, %s866_s14   ;;  %s726_s13 = sphi %s763_s13, %s865_s13   ;;  %s722_s12 = sphi %s761_s12, %s864_s12  }
   0x4   : > { %p26_p0 = scmp.ge.s32.totalorder %s25_s17, 9  ;;  %p49_p2 = scmp.eq.s32.totalorder %s738_s16, 0 }
   0x5   : > { %s41_s19 = sadd.s32 1, %s726_s13  ;;  %p595_p5 = scmp.ge.s32.totalorder %s738_s16, 9 }
   0x6   : > { %s869_s17 = smov (%p26_p0, %s25_s17), 0  ;;  %p50_p3 = por %p49_p2, %p48_p1 }
   0x7   : > { %s37_s18 = ssub.s32 %s734_s15, %s869_s17  ;;  %162 = sbr.rel (%p595_p5) target bundleno = 21 (0x15), region = 20 }
   0x8   : > { %p39_p4 = scmp.eq.s32.totalorder %s37_s18, 0 }
   0xa   : > { %s796_s20 = scalar_select %p39_p4, %s726_s13, %s41_s19  }
   0xe   : > { %165 = sbr.rel (!%p50_p3) target bundleno = 21 (0x15), region = 24  ;;  %s167_s21 = sand.u32 (%p50_p3), 1, %s726_s13  }
   0xf   : > { %s597_s22 = sshll.u32 (%p50_p3), %s734_s15, 2  ;;  %s596_s23 = sshll.u32 (%p50_p3), %s167_s21, 4 }
  0x10   : > { %s174_s26 = scalar_lea.vmem (%p50_p3), %s860_s0, %s597_s22  ;;  %s169_s27 = scalar_lea.vmem (%p50_p3), [#allocation3], %s596_s23 }
  0x11   : > { %v190_v0 = vld [vmem:[%s174_s26] sm:$0xf] (%p50_p3)  ;;  %v192_v1 = vld [vmem:[%s174_s26 + $0x24] sm:$0xf] (%p50_p3)  ;;  %v194_v2 = vld [vmem:[%s174_s26 + $0x48] sm:$0xf] (%p50_p3) }
  0x12   : > { %191 = vst [vmem:[%s169_s27] sm:$0xf] (%p50_p3), %v190_v0  ;;  %193 = vst [vmem:[%s169_s27 + $0x4] sm:$0xf] (%p50_p3), %v192_v1  ;;  %v196_v3 = vld [vmem:[%s174_s26 + $0x6c] sm:$0xf] (%p50_p3) }
  0x13   : > { %195 = vst [vmem:[%s169_s27 + $0x8] sm:$0xf] (%p50_p3), %v194_v2  ;;  %197 = vst [vmem:[%s169_s27 + $0xc] sm:$0xf] (%p50_p3), %v196_v3 }
  0x15 PF: > { %p598_p6 = scmp.ge.s32.totalorder %s738_s16, 1  ;;  %p239_p7 = scmp.lt.s32.totalorder %s738_s16, 10 }
  0x17   : > { %p240_p8 = pnand %p598_p6, %p239_p7 }
  0x18   : > { %s246_s28 = sand.u32 (!%p240_p8), 1, %s722_s12   ;;  %s600_s29 = sshll.u32 (!%p240_p8), %s730_s14, 4 }
  0x19   : > { %243 = sbr.rel (%p240_p8) target bundleno = 302 (0x12e), region = 69  ;;  %s808_s30 = sshll.u32 (!%p240_p8), %s246_s28, 4 }
  0x1a   : > { %p285_p9 = scmp.lt.s32.totalorder (!%p240_p8), %s600_s29, 143  ;;  %s248_s8 = scalar_lea.vmem (!%p240_p8), [#allocation3], %s808_s30 }
  0x1b   : > { %p602_p10 = scmp.ne.s32.totalorder (!%p240_p8), %s730_s14, 0 }
  0x20   : > { %s871_s29 = smov (!%p285_p9, %s600_s29), 143  ;;  %309 = sbr.rel (%p602_p10) target bundleno = 39 (0x27), region = 77 }
  0x21   : > { %s601_s4 = sshll.u32 %s871_s29, 2  ;;  %v740_v4 = vmov (!%p602_p10), 0.0  }
  0x22   : > { %s813_s7 = scalar_lea.vmem %s861_s1, %s601_s4  ;;  %310 = vst [vmem:[#allocation2] sm:$0xff] (!%p602_p10), %v740_v4  ;;  %311 = vst [vmem:[#allocation2 + $0x8] sm:$0xff] (!%p602_p10), %v740_v4 }
  0x23   : > { %312 = vst [vmem:[#allocation2 + $0x10] sm:$0xff] (!%p602_p10), %v740_v4  ;;  %313 = vst [vmem:[#allocation2 + $0x18] sm:$0xff] (!%p602_p10), %v740_v4 }
  0x27 PF: > { %v690_v5 = vld [vmem:[%s813_s7] sm:$0xff]   ;;  %v691_v6 = vld [vmem:[%s813_s7 + $0x8] sm:$0xff]   ;;  %v692_v7 = vld [vmem:[%s813_s7 + $0x10] sm:$0xff]   ;;  %p613_p11 = scmp.ne.s32.totalorder %s730_s14, 8 }
  0x28   : > { %629 = vmatprep.subr.bf16.mxu0 %v690_v5  ;;  %v693_v8 = vld [vmem:[%s813_s7 + $0x18] sm:$0xff]   ;;  %v698_v9 = vld [vmem:[%s248_s8] sm:$0xff]   ;;  %v695_v11 = vld [vmem:[%s813_s7 + $0x28] sm:$0xff]  }
  0x29   : > { %630 = vmatpush3.bf16.msra.mxu0 %v690_v5  ;;  %645 = vmatprep.mubr.bf16.mxu0 %v698_v9  ;;  %v694_v10 = vld [vmem:[%s813_s7 + $0x20] sm:$0xff]   ;;  %v696_v12 = vld [vmem:[%s813_s7 + $0x30] sm:$0xff]   ;;  %v697_v13 = vld [vmem:[%s813_s7 + $0x38] sm:$0xff]  }
  0x2a   : > { %631 = vmatprep.subr.bf16.mxu0 %v691_v6  ;;  %v699_v14 = vld [vmem:[%s248_s8 + $0x8] sm:$0xff]   ;;  %v316_v15 = vld [vmem:[#allocation2 + $0x10] sm:$0xff]  ;;  %v314_v16 = vld [vmem:[#allocation2] sm:$0xff] }
  0x2b   : > { %v317_v18 = vld [vmem:[#allocation2 + $0x18] sm:$0xff]  ;;  %v315_v21 = vld [vmem:[#allocation2 + $0x8] sm:$0xff]  ;;  %v614_v28 = vld [vmem:[%s862_s2] ss:$0 sm:$0xff] (!%p613_p11) }
  0x2d   : > { %632 = vmatpush3.bf16.msra.mxu0 %v691_v6 }
  0x2e   : > { %633 = vmatprep.subr.bf16.mxu0 %v692_v7 }
  0x31   : > { %634 = vmatpush3.bf16.msra.mxu0 %v692_v7 }
  0x32   : > { %635 = vmatprep.subr.bf16.mxu0 %v693_v8 }
  0x35   : > { %636 = vmatpush3.bf16.msra.mxu0 %v693_v8 }
  0x36   : > { %637 = vmatprep.subr.bf16.mxu0 %v694_v10 }
  0x39   : > { %638 = vmatpush3.bf16.msra.mxu0 %v694_v10 }
  0x3a   : > { %639 = vmatprep.subr.bf16.mxu0 %v695_v11 }
  0x3d   : > { %640 = vmatpush3.bf16.msra.mxu0 %v695_v11 }
  0x3e   : > { %641 = vmatprep.subr.bf16.mxu0 %v696_v12 }
  0x41   : > { %642 = vmatpush3.bf16.msra.mxu0 %v696_v12 }
  0x42   : > { %643 = vmatprep.subr.bf16.mxu0 %v697_v13 }
  0x45   : > { %644 = vmatpush3.bf16.msra.mxu0 %v697_v13 }
  0x48   : > { %646 = vmatmul.mubr.bf16.vlgmr.msra.gmra.mrb[0].mxu0 %v699_v14 }
 0x11b   : > { %v647_v17 = vpop.f32.mrb[0].mxu0  ;;  %458 = sbr.rel (%p613_p11) target bundleno = 302 (0x12e), region = 81 }
 0x11c   : > { %v449_v19 = vadd.f32 %v647_v17, %v316_v15  ;;  %v432_v20 = vpop.f32.mrb[1].mxu0 }
 0x11d   : > { %v447_v22 = vadd.f32 %v432_v20, %v314_v16  ;;  %v648_v23 = vpop.f32.mrb[2].mxu0 }
 0x11e   : > { %453 = vst [vmem:[#allocation2 + $0x10] sm:$0xff] %v449_v19  ;;  %v450_v24 = vadd.f32 %v648_v23, %v317_v18  ;;  %v435_v25 = vpop.f32.mrb[3].mxu0 }
 0x11f   : > { %451 = vst [vmem:[#allocation2] sm:$0xff] %v447_v22  ;;  %v448_v26 = vadd.f32 %v435_v25, %v315_v21 }
 0x120   : > { %454 = vst [vmem:[#allocation2 + $0x18] sm:$0xff] %v450_v24 }
 0x121   : > { %452 = vst [vmem:[#allocation2 + $0x8] sm:$0xff] %v448_v26 }
 0x125   : > { %v461_v32 = vld [vmem:[#allocation2 + $0x10] sm:$0xff] }
 0x126   : > { %v459_v27 = vld [vmem:[#allocation2] sm:$0xff]  ;;  %v472_v34 = vadd.f32 %v614_v28, %v461_v32 }
 0x127   : > { %v470_v30 = vadd.f32 %v614_v28, %v459_v27  ;;  %v462_v33 = vld [vmem:[#allocation2 + $0x18] sm:$0xff] }
 0x128   : > { %v460_v29 = vld [vmem:[#allocation2 + $0x8] sm:$0xff]  ;;  %v473_v35 = vadd.f32 %v614_v28, %v462_v33  ;;  %v476_v38 = vmax.f32 %v472_v34, 0.0 }
 0x129   : > { %v471_v31 = vadd.f32 %v614_v28, %v460_v29  ;;  %v474_v36 = vmax.f32 %v470_v30, 0.0 }
 0x12a   : > { %v477_v39 = vmax.f32 %v473_v35, 0.0  ;;  %480 = vst [vmem:[%s863_s3 + $0x10] sm:$0xff] %v476_v38 }
 0x12b   : > { %v475_v37 = vmax.f32 %v471_v31, 0.0  ;;  %478 = vst [vmem:[%s863_s3] sm:$0xff] %v474_v36 }
 0x12c   : > { %481 = vst [vmem:[%s863_s3 + $0x18] sm:$0xff] %v477_v39 }
 0x12d   : > { %479 = vst [vmem:[%s863_s3 + $0x8] sm:$0xff] %v475_v37 }
 0x12e PF: > { %s13_s16 = sadd.s32 1, %s738_s16   ;;  %s864_s12 = smov %s726_s13 }
 0x12f   : > { %p10_p12 = scmp.ge.s32.totalorder %s13_s16, 11   ;;  %s865_s13 = smov %s796_s20 }
 0x130   : > { %s866_s14 = smov %s734_s15  ;;  %s867_s15 = smov %s869_s17 }
 0x131   :  { %12 = sbr.rel (!%p10_p12) target bundleno = 3 (0x3), region = 122 }

// kernel: multicom_res50_forward.65
= control target key start
LH: loop header
LB: loop body
LE: loop exit
PB: predicated region body
PF: predicated region fallthrough
CT: control target
= control target key end

     0   :  { %s1147_s12 = smov 0   ;;  %s1149_s13 = smov 0   ;;  %s1359_s0 = inlined_call_operand.vmem [shape: bf16[32,256], index: 0, kind: input, shape index: {}]   ;;  %s1360_s1 = inlined_call_operand.vmem [shape: bf16[256,512], index: 1, kind: input, shape index: {}]   ;;  %s1361_s2 = inlined_call_operand.vmem [shape: f32[1,512], index: 2, kind: input, shape index: {}]   ;;  %s1362_s3 = inlined_call_operand.vmem [shape: f32[32,512], index: 3, kind: output, shape index: {}]  }
   0x1   :  { %s1151_s14 = smov 0   ;;  %s1153_s15 = smov 0  }
   0x2   :  { %s1155_s16 = smov 0  }
   0x3 LB: > { %s28_s17 = sadd.s32 1, %s1121_s15  ;;  %s906_s18 = sadd.s32 4294967295, %s1125_s16   ;;  %s1125_s16 = sphi %s1155_s16, %s13_s16   ;;  %s1121_s15 = sphi %s1153_s15, %s1367_s15   ;;  %s1117_s14 = sphi %s1151_s14, %s1366_s14   ;;  %s1113_s13 = sphi %s1149_s13, %s1365_s13   ;;  %s1109_s12 = sphi %s1147_s12, %s1364_s12  }
   0x4   : > { %p30_p0 = scmp.ge.s32.totalorder %s28_s17, 2  ;;  %p76_p1 = scmp.ne.s32.totalorder %s1113_s13, %s1109_s12 }
   0x5   : > { %p77_p2 = scmp.eq.s32.totalorder %s1125_s16, 0  ;;  %p134_p4 = scmp.eq.s32.totalorder %s906_s18, 1 }
   0x6   : > { %s1369_s17 = smov (%p30_p0, %s28_s17), 0  ;;  %s69_s20 = sadd.s32 1, %s1113_s13 }
   0x7   : > { %p78_p3 = por %p77_p2, %p76_p1  ;;  %s65_s19 = ssub.s32 %s1121_s15, %s1369_s17 }
   0x8   : > { %p67_p5 = scmp.eq.s32.totalorder %s65_s19, 0  ;;  %p1182_p6 = por %p134_p4, %p76_p1 }
   0x9   : > { %p910_p7 = scmp.ge.s32.totalorder %s1125_s16, 2 }
   0xa   : > { %s1187_s22 = scalar_select %p67_p5, %s1113_s13, %s69_s20  }
   0xb   : > { %171 = sbr.rel (%p910_p7) target bundleno = 38 (0x26), region = 20 }
  0x12   : > { %174 = sbr.rel (!%p78_p3) target bundleno = 38 (0x26), region = 24  ;;  %s176_s23 = sand.u32 (%p78_p3), 1, %s1113_s13  }
  0x13   : > { %s959_s24 = sshll.u32 (%p78_p3), %s1121_s15, 3  ;;  %s911_s25 = sshll.u32 (%p78_p3), %s176_s23, 8 }
  0x14   : > { %s1195_s28 = scalar_lea.vmem (%p78_p3), %s1360_s1, %s959_s24  ;;  %s1200_s29 = scalar_lea.vmem (%p78_p3), [#allocation3], %s911_s25 }
  0x15   : > { %v274_v0 = vld [vmem:[%s1195_s28] sm:$0xff] (%p78_p3)  ;;  %v276_v1 = vld [vmem:[%s1195_s28 + $0x10] sm:$0xff] (%p78_p3) }
  0x16   : > { %v278_v2 = vld [vmem:[%s1195_s28 + $0x20] sm:$0xff] (%p78_p3)  ;;  %275 = vst [vmem:[%s1200_s29] sm:$0xff] (%p78_p3), %v274_v0  ;;  %277 = vst [vmem:[%s1200_s29 + $0x8] sm:$0xff] (%p78_p3), %v276_v1  ;;  %v280_v3 = vld [vmem:[%s1195_s28 + $0x30] sm:$0xff] (%p78_p3) }
  0x17   : > { %279 = vst [vmem:[%s1200_s29 + $0x10] sm:$0xff] (%p78_p3), %v278_v2  ;;  %v282_v4 = vld [vmem:[%s1195_s28 + $0x40] sm:$0xff] (%p78_p3)  ;;  %v284_v5 = vld [vmem:[%s1195_s28 + $0x50] sm:$0xff] (%p78_p3)  ;;  %281 = vst [vmem:[%s1200_s29 + $0x18] sm:$0xff] (%p78_p3), %v280_v3 }
  0x18   : > { %283 = vst [vmem:[%s1200_s29 + $0x20] sm:$0xff] (%p78_p3), %v282_v4  ;;  %285 = vst [vmem:[%s1200_s29 + $0x28] sm:$0xff] (%p78_p3), %v284_v5  ;;  %v286_v6 = vld [vmem:[%s1195_s28 + $0x60] sm:$0xff] (%p78_p3)  ;;  %v288_v7 = vld [vmem:[%s1195_s28 + $0x70] sm:$0xff] (%p78_p3) }
  0x19   : > { %v290_v8 = vld [vmem:[%s1195_s28 + $0x80] sm:$0xff]  ;;  %287 = vst [vmem:[%s1200_s29 + $0x30] sm:$0xff] %v286_v6  ;;  %289 = vst [vmem:[%s1200_s29 + $0x38] sm:$0xff] %v288_v7  ;;  %v292_v9 = vld [vmem:[%s1195_s28 + $0x90] sm:$0xff] }
  0x1a   : > { %291 = vst [vmem:[%s1200_s29 + $0x40] sm:$0xff] %v290_v8  ;;  %v294_v10 = vld [vmem:[%s1195_s28 + $0xa0] sm:$0xff]  ;;  %v296_v11 = vld [vmem:[%s1195_s28 + $0xb0] sm:$0xff]  ;;  %293 = vst [vmem:[%s1200_s29 + $0x48] sm:$0xff] %v292_v9 }
  0x1b   : > { %295 = vst [vmem:[%s1200_s29 + $0x50] sm:$0xff] %v294_v10  ;;  %297 = vst [vmem:[%s1200_s29 + $0x58] sm:$0xff] %v296_v11  ;;  %v298_v12 = vld [vmem:[%s1195_s28 + $0xc0] sm:$0xff]  ;;  %v300_v13 = vld [vmem:[%s1195_s28 + $0xd0] sm:$0xff] }
  0x1c   : > { %v302_v14 = vld [vmem:[%s1195_s28 + $0xe0] sm:$0xff]  ;;  %299 = vst [vmem:[%s1200_s29 + $0x60] sm:$0xff] %v298_v12  ;;  %301 = vst [vmem:[%s1200_s29 + $0x68] sm:$0xff] %v300_v13  ;;  %v304_v15 = vld [vmem:[%s1195_s28 + $0xf0] sm:$0xff] }
  0x1d   : > { %303 = vst [vmem:[%s1200_s29 + $0x70] sm:$0xff] %v302_v14  ;;  %v306_v16 = vld [vmem:[%s1195_s28 + $0x100] sm:$0xff]  ;;  %v308_v17 = vld [vmem:[%s1195_s28 + $0x110] sm:$0xff]  ;;  %305 = vst [vmem:[%s1200_s29 + $0x78] sm:$0xff] %v304_v15 }
  0x1e   : > { %307 = vst [vmem:[%s1200_s29 + $0x80] sm:$0xff] %v306_v16  ;;  %309 = vst [vmem:[%s1200_s29 + $0x88] sm:$0xff] %v308_v17  ;;  %v310_v18 = vld [vmem:[%s1195_s28 + $0x120] sm:$0xff]  ;;  %v312_v19 = vld [vmem:[%s1195_s28 + $0x130] sm:$0xff] }
  0x1f   : > { %v314_v20 = vld [vmem:[%s1195_s28 + $0x140] sm:$0xff]  ;;  %311 = vst [vmem:[%s1200_s29 + $0x90] sm:$0xff] %v310_v18  ;;  %313 = vst [vmem:[%s1200_s29 + $0x98] sm:$0xff] %v312_v19  ;;  %v316_v21 = vld [vmem:[%s1195_s28 + $0x150] sm:$0xff] }
  0x20   : > { %315 = vst [vmem:[%s1200_s29 + $0xa0] sm:$0xff] %v314_v20  ;;  %v318_v22 = vld [vmem:[%s1195_s28 + $0x160] sm:$0xff]  ;;  %v320_v23 = vld [vmem:[%s1195_s28 + $0x170] sm:$0xff]  ;;  %317 = vst [vmem:[%s1200_s29 + $0xa8] sm:$0xff] %v316_v21 }
  0x21   : > { %319 = vst [vmem:[%s1200_s29 + $0xb0] sm:$0xff] %v318_v22  ;;  %321 = vst [vmem:[%s1200_s29 + $0xb8] sm:$0xff] %v320_v23  ;;  %v322_v24 = vld [vmem:[%s1195_s28 + $0x180] sm:$0xff]  ;;  %v324_v25 = vld [vmem:[%s1195_s28 + $0x190] sm:$0xff] }
  0x22   : > { %v326_v26 = vld [vmem:[%s1195_s28 + $0x1a0] sm:$0xff]  ;;  %323 = vst [vmem:[%s1200_s29 + $0xc0] sm:$0xff] %v322_v24  ;;  %325 = vst [vmem:[%s1200_s29 + $0xc8] sm:$0xff] %v324_v25  ;;  %v328_v27 = vld [vmem:[%s1195_s28 + $0x1b0] sm:$0xff] }
  0x23   : > { %327 = vst [vmem:[%s1200_s29 + $0xd0] sm:$0xff] %v326_v26  ;;  %v330_v28 = vld [vmem:[%s1195_s28 + $0x1c0] sm:$0xff]  ;;  %v332_v29 = vld [vmem:[%s1195_s28 + $0x1d0] sm:$0xff]  ;;  %329 = vst [vmem:[%s1200_s29 + $0xd8] sm:$0xff] %v328_v27 }
  0x24   : > { %331 = vst [vmem:[%s1200_s29 + $0xe0] sm:$0xff] %v330_v28  ;;  %333 = vst [vmem:[%s1200_s29 + $0xe8] sm:$0xff] %v332_v29  ;;  %v334_v30 = vld [vmem:[%s1195_s28 + $0x1e0] sm:$0xff]  ;;  %v336_v31 = vld [vmem:[%s1195_s28 + $0x1f0] sm:$0xff] }
  0x25   : > { %335 = vst [vmem:[%s1200_s29 + $0xf0] sm:$0xff] %v334_v30  ;;  %337 = vst [vmem:[%s1200_s29 + $0xf8] sm:$0xff] %v336_v31 }
  0x26 PF: > { %p914_p8 = scmp.ge.s32.totalorder %s1125_s16, 1  ;;  %p350_p9 = scmp.lt.s32.totalorder %s1125_s16, 3 }
  0x28   : > { %p351_p10 = pnand %p914_p8, %p350_p9 }
  0x29   : > { %s357_s30 = sand.u32 (!%p351_p10), 1, %s1109_s12   ;;  %v1083_v32 = vld [vmem:[%s1359_s0 + $0x4] ss:$8 sps:$4 sm:$0xff] (!%p351_p10)   ;;  %v1086_v33 = vld [vmem:[%s1359_s0 + $0x14] ss:$8 sps:$4 sm:$0xff] (!%p351_p10)   ;;  %s917_s20 = sshll.u32 (!%p351_p10), %s1117_s14, 1  ;;  %v732_v4 = vlaneseq (!%p351_p10) }
  0x2a   : > { %354 = sbr.rel (%p351_p10) target bundleno = 336 (0x150), region = 66  ;;  %s915_s4 = sshll.u32 (!%p351_p10), %s357_s30, 8  ;;  %682 = vmatprep.mubr.bf16.mxu0 (!%p351_p10), %v1083_v32  ;;  %692 = vmatprep.mubr.bf16.mxu1 (!%p351_p10), %v1086_v33  ;;  %v1081_v2 = vld [vmem:[%s1359_s0] ss:$8 sps:$4 sm:$0xff] (!%p351_p10)   ;;  %v1084_v3 = vld [vmem:[%s1359_s0 + $0x10] ss:$8 sps:$4 sm:$0xff] (!%p351_p10)  }
  0x2b   : > { %s1274_s9 = scalar_lea.vmem (!%p351_p10), [#allocation3], %s915_s4  ;;  %p408_p11 = scmp.lt.s32.totalorder (!%p351_p10), %s917_s20, 3  ;;  %v733_v5 = vshrl.u32 (!%p351_p10), %v732_v4, 7 }
  0x2c   : > { %v1033_v34 = vld [vmem:[%s1274_s9 + $0x4] ss:$8 sps:$4 sm:$0xff] (!%p351_p10)   ;;  %v1035_v35 = vld [vmem:[%s1274_s9] ss:$8 sps:$4 sm:$0xff] (!%p351_p10)   ;;  %v1036_v36 = vld [vmem:[%s1274_s9 + $0x14] ss:$8 sps:$4 sm:$0xff] (!%p351_p10)  }
  0x2d   : > { %650 = vmatprep.subr.bf16.mxu0 (!%p351_p10), %v1033_v34  ;;  %961 = vmatprep.subr.bf16.mxu1 (!%p351_p10), %v1033_v34  ;;  %v1038_v37 = vld [vmem:[%s1274_s9 + $0x10] ss:$8 sps:$4 sm:$0xff] (!%p351_p10)   ;;  %v1039_v38 = vld [vmem:[%s1274_s9 + $0x24] ss:$8 sps:$4 sm:$0xff] (!%p351_p10)   ;;  %v1041_v39 = vld [vmem:[%s1274_s9 + $0x20] ss:$8 sps:$4 sm:$0xff] (!%p351_p10)  }
  0x2e   : > { %651 = vmatpush1.bf16.msra.mxu0 (!%p351_p10), %v1035_v35  ;;  %977 = vmatpush1.bf16.msra.mxu1 (!%p351_p10), %v1035_v35  ;;  %v1042_v40 = vld [vmem:[%s1274_s9 + $0x34] ss:$8 sps:$4 sm:$0xff] (!%p351_p10)   ;;  %v1044_v41 = vld [vmem:[%s1274_s9 + $0x30] ss:$8 sps:$4 sm:$0xff] (!%p351_p10)   ;;  %v1045_v42 = vld [vmem:[%s1274_s9 + $0x44] ss:$8 sps:$4 sm:$0xff] (!%p351_p10)  }
  0x2f   : > { %652 = vmatprep.subr.bf16.mxu0 (!%p351_p10), %v1036_v36  ;;  %962 = vmatprep.subr.bf16.mxu1 (!%p351_p10), %v1036_v36  ;;  %v1047_v43 = vld [vmem:[%s1274_s9 + $0x40] ss:$8 sps:$4 sm:$0xff] (!%p351_p10)   ;;  %v1048_v44 = vld [vmem:[%s1274_s9 + $0x54] ss:$8 sps:$4 sm:$0xff] (!%p351_p10)   ;;  %v1050_v45 = vld [vmem:[%s1274_s9 + $0x50] ss:$8 sps:$4 sm:$0xff] (!%p351_p10)  }
  0x30   : > { %v1051_v46 = vld [vmem:[%s1274_s9 + $0x64] ss:$8 sps:$4 sm:$0xff] (!%p351_p10)   ;;  %v1053_v47 = vld [vmem:[%s1274_s9 + $0x60] ss:$8 sps:$4 sm:$0xff] (!%p351_p10)   ;;  %v1054_v48 = vld [vmem:[%s1274_s9 + $0x74] ss:$8 sps:$4 sm:$0xff] (!%p351_p10)  }
  0x31   : > { %v1056_v49 = vld [vmem:[%s1274_s9 + $0x70] ss:$8 sps:$4 sm:$0xff]   ;;  %v1057_v50 = vld [vmem:[%s1274_s9 + $0x84] ss:$8 sps:$4 sm:$0xff]   ;;  %v1059_v51 = vld [vmem:[%s1274_s9 + $0x80] ss:$8 sps:$4 sm:$0xff]  }
  0x32   : > { %653 = vmatpush1.bf16.msra.mxu0 %v1038_v37  ;;  %978 = vmatpush1.bf16.msra.mxu1 %v1038_v37  ;;  %v1060_v52 = vld [vmem:[%s1274_s9 + $0x94] ss:$8 sps:$4 sm:$0xff]   ;;  %v1062_v53 = vld [vmem:[%s1274_s9 + $0x90] ss:$8 sps:$4 sm:$0xff]   ;;  %v1063_v54 = vld [vmem:[%s1274_s9 + $0xa4] ss:$8 sps:$4 sm:$0xff]  }
  0x33   : > { %654 = vmatprep.subr.bf16.mxu0 %v1039_v38  ;;  %963 = vmatprep.subr.bf16.mxu1 %v1039_v38  ;;  %v1065_v55 = vld [vmem:[%s1274_s9 + $0xa0] ss:$8 sps:$4 sm:$0xff]   ;;  %v1066_v56 = vld [vmem:[%s1274_s9 + $0xb4] ss:$8 sps:$4 sm:$0xff]   ;;  %v1068_v57 = vld [vmem:[%s1274_s9 + $0xb0] ss:$8 sps:$4 sm:$0xff]  }
  0x34   : > { %v1069_v58 = vld [vmem:[%s1274_s9 + $0xc4] ss:$8 sps:$4 sm:$0xff]   ;;  %v1071_v59 = vld [vmem:[%s1274_s9 + $0xc0] ss:$8 sps:$4 sm:$0xff]   ;;  %v1072_v60 = vld [vmem:[%s1274_s9 + $0xd4] ss:$8 sps:$4 sm:$0xff]  }
  0x35   : > { %v1074_v61 = vld [vmem:[%s1274_s9 + $0xd0] ss:$8 sps:$4 sm:$0xff]   ;;  %v1075_v62 = vld [vmem:[%s1274_s9 + $0xe4] ss:$8 sps:$4 sm:$0xff]   ;;  %v1077_v63 = vld [vmem:[%s1274_s9 + $0xe0] ss:$8 sps:$4 sm:$0xff]  }
  0x36   : > { %655 = vmatpush1.bf16.msra.mxu0 %v1041_v39  ;;  %979 = vmatpush1.bf16.msra.mxu1 %v1041_v39  ;;  %v1078_v0 = vld [vmem:[%s1274_s9 + $0xf4] ss:$8 sps:$4 sm:$0xff]   ;;  %v1080_v1 = vld [vmem:[%s1274_s9 + $0xf0] ss:$8 sps:$4 sm:$0xff]   ;;  %s1371_s20 = smov (!%p408_p11, %s917_s20), 3  ;;  %v734_v6 = vsub.s32 0, %v733_v5 }
  0x37   : > { %656 = vmatprep.subr.bf16.mxu0 %v1042_v40  ;;  %964 = vmatprep.subr.bf16.mxu1 %v1042_v40  ;;  %s410_s25 = scalar_lea.vmem %s1361_s2, %s1371_s20  ;;  %v738_v8 = vsub.s32 1, %v733_v5  ;;  %s916_s26 = sshll.u32 %s357_s30, 6 }
  0x38   : > { %v730_v7 = vld [vmem:[%s410_s25] sm:$0x3]  ;;  %s1320_s27 = scalar_lea.vmem [#allocation4], %s916_s26  ;;  %s960_s12 = sshll.u32 (%p1182_p6), %s1117_s14, 4 }
  0x39   : > { %v735_v9 = vrot.slane %v730_v7, %v734_v6  ;;  %v739_v10 = vrot.slane %v730_v7, %v738_v8  ;;  %s770_s30 = scalar_lea.vmem (%p1182_p6), %s1362_s3, %s960_s12 }
  0x3a   : > { %657 = vmatpush1.bf16.msra.mxu0 %v1044_v41  ;;  %980 = vmatpush1.bf16.msra.mxu1 %v1044_v41 }
  0x3b   : > { %658 = vmatprep.subr.bf16.mxu0 %v1045_v42  ;;  %965 = vmatprep.subr.bf16.mxu1 %v1045_v42 }
  0x3e   : > { %659 = vmatpush1.bf16.msra.mxu0 %v1047_v43  ;;  %981 = vmatpush1.bf16.msra.mxu1 %v1047_v43 }
  0x3f   : > { %660 = vmatprep.subr.bf16.mxu0 %v1048_v44  ;;  %966 = vmatprep.subr.bf16.mxu1 %v1048_v44 }
  0x42   : > { %661 = vmatpush1.bf16.msra.mxu0 %v1050_v45  ;;  %982 = vmatpush1.bf16.msra.mxu1 %v1050_v45 }
  0x43   : > { %662 = vmatprep.subr.bf16.mxu0 %v1051_v46  ;;  %967 = vmatprep.subr.bf16.mxu1 %v1051_v46 }
  0x46   : > { %663 = vmatpush1.bf16.msra.mxu0 %v1053_v47  ;;  %983 = vmatpush1.bf16.msra.mxu1 %v1053_v47 }
  0x47   : > { %664 = vmatprep.subr.bf16.mxu0 %v1054_v48  ;;  %968 = vmatprep.subr.bf16.mxu1 %v1054_v48 }
  0x4a   : > { %665 = vmatpush1.bf16.msra.mxu0 %v1056_v49  ;;  %984 = vmatpush1.bf16.msra.mxu1 %v1056_v49 }
  0x4b   : > { %666 = vmatprep.subr.bf16.mxu0 %v1057_v50  ;;  %969 = vmatprep.subr.bf16.mxu1 %v1057_v50 }
  0x4e   : > { %667 = vmatpush1.bf16.msra.mxu0 %v1059_v51  ;;  %985 = vmatpush1.bf16.msra.mxu1 %v1059_v51 }
  0x4f   : > { %668 = vmatprep.subr.bf16.mxu0 %v1060_v52  ;;  %970 = vmatprep.subr.bf16.mxu1 %v1060_v52 }
  0x52   : > { %669 = vmatpush1.bf16.msra.mxu0 %v1062_v53  ;;  %986 = vmatpush1.bf16.msra.mxu1 %v1062_v53 }
  0x53   : > { %670 = vmatprep.subr.bf16.mxu0 %v1063_v54  ;;  %971 = vmatprep.subr.bf16.mxu1 %v1063_v54 }
  0x56   : > { %671 = vmatpush1.bf16.msra.mxu0 %v1065_v55  ;;  %987 = vmatpush1.bf16.msra.mxu1 %v1065_v55 }
  0x57   : > { %672 = vmatprep.subr.bf16.mxu0 %v1066_v56  ;;  %972 = vmatprep.subr.bf16.mxu1 %v1066_v56 }
  0x5a   : > { %673 = vmatpush1.bf16.msra.mxu0 %v1068_v57  ;;  %988 = vmatpush1.bf16.msra.mxu1 %v1068_v57 }
  0x5b   : > { %674 = vmatprep.subr.bf16.mxu0 %v1069_v58  ;;  %973 = vmatprep.subr.bf16.mxu1 %v1069_v58 }
  0x5e   : > { %675 = vmatpush1.bf16.msra.mxu0 %v1071_v59  ;;  %989 = vmatpush1.bf16.msra.mxu1 %v1071_v59 }
  0x5f   : > { %676 = vmatprep.subr.bf16.mxu0 %v1072_v60  ;;  %974 = vmatprep.subr.bf16.mxu1 %v1072_v60 }
  0x62   : > { %677 = vmatpush1.bf16.msra.mxu0 %v1074_v61  ;;  %990 = vmatpush1.bf16.msra.mxu1 %v1074_v61 }
  0x63   : > { %678 = vmatprep.subr.bf16.mxu0 %v1075_v62  ;;  %975 = vmatprep.subr.bf16.mxu1 %v1075_v62 }
  0x66   : > { %679 = vmatpush1.bf16.msra.mxu0 %v1077_v63  ;;  %991 = vmatpush1.bf16.msra.mxu1 %v1077_v63 }
  0x67   : > { %680 = vmatprep.subr.bf16.mxu0 %v1078_v0  ;;  %976 = vmatprep.subr.bf16.mxu1 %v1078_v0 }
  0x6a   : > { %681 = vmatpush1.bf16.msra.mxu0 %v1080_v1  ;;  %992 = vmatpush1.bf16.msra.mxu1 %v1080_v1 }
  0x6d   : > { %683 = vmatmul.mubr.bf16.vlgmr.msra.gmra.mrb[0].mxu0 %v1081_v2  ;;  %693 = vmatmul.mubr.bf16.vlgmr.msra.gmra.mrb[0].mxu1 %v1084_v3 }
 0x140   : > { %v684_v11 = vpop.f32.mrb[0].mxu0  ;;  %v694_v12 = vpop.f32.mrb[0].mxu1  ;;  %764 = sbr.rel (!%p1182_p6) target bundleno = 336 (0x150), region = 82 }
 0x141   : > { %v742_v13 = vadd.f32 %v735_v9, %v684_v11  ;;  %v746_v14 = vadd.f32 %v735_v9, %v694_v12  ;;  %v686_v15 = vpop.f32.mrb[1].mxu0  ;;  %v696_v16 = vpop.f32.mrb[1].mxu1 }
 0x142   : > { %v743_v17 = vadd.f32 %v739_v10, %v686_v15  ;;  %v747_v18 = vadd.f32 %v739_v10, %v696_v16  ;;  %v688_v19 = vpop.f32.mrb[2].mxu0  ;;  %v698_v20 = vpop.f32.mrb[2].mxu1 }
 0x143   : > { %750 = vst [vmem:[%s1320_s27] sm:$0xff] %v742_v13  ;;  %754 = vst [vmem:[%s1320_s27 + $0x20] sm:$0xff] %v746_v14  ;;  %v744_v21 = vadd.f32 %v735_v9, %v688_v19  ;;  %v748_v22 = vadd.f32 %v735_v9, %v698_v20  ;;  %v690_v23 = vpop.f32.mrb[3].mxu0  ;;  %v700_v24 = vpop.f32.mrb[3].mxu1 }
 0x144   : > { %751 = vst [vmem:[%s1320_s27 + $0x8] sm:$0xff] %v743_v17  ;;  %755 = vst [vmem:[%s1320_s27 + $0x28] sm:$0xff] %v747_v18  ;;  %v745_v25 = vadd.f32 %v739_v10, %v690_v23  ;;  %v749_v26 = vadd.f32 %v739_v10, %v700_v24 }
 0x145   : > { %752 = vst [vmem:[%s1320_s27 + $0x10] sm:$0xff] %v744_v21  ;;  %756 = vst [vmem:[%s1320_s27 + $0x30] sm:$0xff] %v748_v22 }
 0x146   : > { %753 = vst [vmem:[%s1320_s27 + $0x18] sm:$0xff] %v745_v25  ;;  %757 = vst [vmem:[%s1320_s27 + $0x38] sm:$0xff] %v749_v26 }
 0x14a   : > { %v783_v27 = vld [vmem:[%s1320_s27] sm:$0xff] }
 0x14b   : > { %v785_v28 = vld [vmem:[%s1320_s27 + $0x8] sm:$0xff]  ;;  %v791_v31 = vld [vmem:[%s1320_s27 + $0x20] sm:$0xff]  ;;  %784 = vst [vmem:[%s770_s30] sm:$0xff] %v783_v27 }
 0x14c   : > { %v787_v29 = vld [vmem:[%s1320_s27 + $0x10] sm:$0xff]  ;;  %v793_v32 = vld [vmem:[%s1320_s27 + $0x28] sm:$0xff]  ;;  %786 = vst [vmem:[%s770_s30 + $0x8] sm:$0xff] %v785_v28  ;;  %792 = vst [vmem:[%s770_s30 + $0x40] sm:$0xff] %v791_v31 }
 0x14d   : > { %v789_v30 = vld [vmem:[%s1320_s27 + $0x18] sm:$0xff]  ;;  %788 = vst [vmem:[%s770_s30 + $0x20] sm:$0xff] %v787_v29  ;;  %794 = vst [vmem:[%s770_s30 + $0x48] sm:$0xff] %v793_v32  ;;  %v795_v33 = vld [vmem:[%s1320_s27 + $0x30] sm:$0xff] }
 0x14e   : > { %790 = vst [vmem:[%s770_s30 + $0x28] sm:$0xff] %v789_v30  ;;  %v797_v34 = vld [vmem:[%s1320_s27 + $0x38] sm:$0xff]  ;;  %796 = vst [vmem:[%s770_s30 + $0x60] sm:$0xff] %v795_v33 }
 0x14f   : > { %798 = vst [vmem:[%s770_s30 + $0x68] sm:$0xff] %v797_v34 }
 0x150 PF: > { %s13_s16 = sadd.s32 1, %s1125_s16   ;;  %s1364_s12 = smov %s1113_s13 }
 0x151   : > { %p10_p12 = scmp.ge.s32.totalorder %s13_s16, 4   ;;  %s1365_s13 = smov %s1187_s22 }
 0x152   : > { %s1366_s14 = smov %s1121_s15  ;;  %s1367_s15 = smov %s1369_s17 }
 0x153   :  { %12 = sbr.rel (!%p10_p12) target bundleno = 3 (0x3), region = 142 }

// kernel: multicom_res50_forward.68
= control target key start
LH: loop header
LB: loop body
LE: loop exit
PB: predicated region body
PF: predicated region fallthrough
CT: control target
= control target key end

     0   :  { %s1052_s15 = smov 0   ;;  %s1054_s16 = smov 0   ;;  %s1191_s0 = inlined_call_operand.vmem [shape: bf16[32,128], index: 0, kind: input, shape index: {}]   ;;  %s1192_s1 = inlined_call_operand.vmem [shape: bf16[128,512], index: 1, kind: input, shape index: {}]   ;;  %s1193_s2 = inlined_call_operand.vmem [shape: f32[1,512], index: 2, kind: input, shape index: {}]   ;;  %s1194_s3 = inlined_call_operand.vmem [shape: f32[32,512], index: 3, kind: input, shape index: {}]   ;;  %s1195_s4 = inlined_call_operand.vmem [shape: f32[32,512], index: 4, kind: output, shape index: {}]  }
   0x1   :  { %s1056_s17 = smov 0   ;;  %s1058_s18 = smov 0  }
   0x2   :  { %s1060_s19 = smov 0  }
   0x3 LB: > { %s29_s20 = sadd.s32 1, %s1020_s18  ;;  %s861_s21 = sadd.s32 4294967295, %s1024_s19   ;;  %s1024_s19 = sphi %s1060_s19, %s14_s19   ;;  %s1020_s18 = sphi %s1058_s18, %s1201_s18   ;;  %s1016_s17 = sphi %s1056_s17, %s1200_s17   ;;  %s1012_s16 = sphi %s1054_s16, %s1199_s16   ;;  %s1008_s15 = sphi %s1052_s15, %s1198_s15  }
   0x4   : > { %p31_p0 = scmp.ge.s32.totalorder %s29_s20, 2  ;;  %p77_p1 = scmp.ne.s32.totalorder %s1012_s16, %s1008_s15 }
   0x5   : > { %p78_p2 = scmp.eq.s32.totalorder %s1024_s19, 0  ;;  %p163_p4 = scmp.eq.s32.totalorder %s861_s21, 1 }
   0x6   : > { %s1203_s20 = smov (%p31_p0, %s29_s20), 0  ;;  %s70_s24 = sadd.s32 1, %s1012_s16 }
   0x7   : > { %p1084_p3 = por %p78_p2, %p77_p1  ;;  %s66_s23 = ssub.s32 %s1020_s18, %s1203_s20 }
   0x8   : > { %p68_p5 = scmp.eq.s32.totalorder %s66_s23, 0  ;;  %p1091_p6 = por %p163_p4, %p77_p1 }
   0x9   : > { %p865_p7 = scmp.ge.s32.totalorder %s1024_s19, 2 }
   0xa   : > { %s1096_s26 = scalar_select %p68_p5, %s1012_s16, %s70_s24  }
   0xb   : > { %197 = sbr.rel (%p865_p7) target bundleno = 38 (0x26), region = 20 }
  0x12   : > { %200 = sbr.rel (!%p1084_p3) target bundleno = 30 (0x1e), region = 24  ;;  %s202_s27 = sand.u32 (%p1084_p3), 1, %s1012_s16  }
  0x13   : > { %s900_s28 = sshll.u32 (%p1084_p3), %s1020_s18, 3  ;;  %s866_s29 = sshll.u32 (%p1084_p3), %s202_s27, 7 }
  0x14   : > { %s1106_s6 = scalar_lea.vmem (%p1084_p3), %s1192_s1, %s900_s28  ;;  %s204_s7 = scalar_lea.vmem (%p1084_p3), [#allocation3], %s866_s29 }
  0x15   : > { %v268_v0 = vld [vmem:[%s1106_s6] sm:$0xff] (%p1084_p3)  ;;  %v270_v1 = vld [vmem:[%s1106_s6 + $0x10] sm:$0xff] (%p1084_p3) }
  0x16   : > { %v272_v2 = vld [vmem:[%s1106_s6 + $0x20] sm:$0xff] (%p1084_p3)  ;;  %269 = vst [vmem:[%s204_s7] sm:$0xff] (%p1084_p3), %v268_v0  ;;  %271 = vst [vmem:[%s204_s7 + $0x8] sm:$0xff] (%p1084_p3), %v270_v1  ;;  %v274_v3 = vld [vmem:[%s1106_s6 + $0x30] sm:$0xff] (%p1084_p3) }
  0x17   : > { %273 = vst [vmem:[%s204_s7 + $0x10] sm:$0xff] (%p1084_p3), %v272_v2  ;;  %v276_v4 = vld [vmem:[%s1106_s6 + $0x40] sm:$0xff] (%p1084_p3)  ;;  %v278_v5 = vld [vmem:[%s1106_s6 + $0x50] sm:$0xff] (%p1084_p3)  ;;  %275 = vst [vmem:[%s204_s7 + $0x18] sm:$0xff] (%p1084_p3), %v274_v3 }
  0x18   : > { %277 = vst [vmem:[%s204_s7 + $0x20] sm:$0xff] (%p1084_p3), %v276_v4  ;;  %279 = vst [vmem:[%s204_s7 + $0x28] sm:$0xff] (%p1084_p3), %v278_v5  ;;  %v280_v6 = vld [vmem:[%s1106_s6 + $0x60] sm:$0xff] (%p1084_p3)  ;;  %v282_v7 = vld [vmem:[%s1106_s6 + $0x70] sm:$0xff] (%p1084_p3) }
  0x19   : > { %v284_v8 = vld [vmem:[%s1106_s6 + $0x80] sm:$0xff]  ;;  %281 = vst [vmem:[%s204_s7 + $0x30] sm:$0xff] %v280_v6  ;;  %283 = vst [vmem:[%s204_s7 + $0x38] sm:$0xff] %v282_v7  ;;  %v286_v9 = vld [vmem:[%s1106_s6 + $0x90] sm:$0xff] }
  0x1a   : > { %285 = vst [vmem:[%s204_s7 + $0x40] sm:$0xff] %v284_v8  ;;  %v288_v10 = vld [vmem:[%s1106_s6 + $0xa0] sm:$0xff]  ;;  %v290_v11 = vld [vmem:[%s1106_s6 + $0xb0] sm:$0xff]  ;;  %287 = vst [vmem:[%s204_s7 + $0x48] sm:$0xff] %v286_v9 }
  0x1b   : > { %289 = vst [vmem:[%s204_s7 + $0x50] sm:$0xff] %v288_v10  ;;  %291 = vst [vmem:[%s204_s7 + $0x58] sm:$0xff] %v290_v11  ;;  %v292_v12 = vld [vmem:[%s1106_s6 + $0xc0] sm:$0xff]  ;;  %v294_v13 = vld [vmem:[%s1106_s6 + $0xd0] sm:$0xff] }
  0x1c   : > { %v296_v14 = vld [vmem:[%s1106_s6 + $0xe0] sm:$0xff]  ;;  %293 = vst [vmem:[%s204_s7 + $0x60] sm:$0xff] %v292_v12  ;;  %295 = vst [vmem:[%s204_s7 + $0x68] sm:$0xff] %v294_v13  ;;  %v298_v15 = vld [vmem:[%s1106_s6 + $0xf0] sm:$0xff] }
  0x1d   : > { %297 = vst [vmem:[%s204_s7 + $0x70] sm:$0xff] %v296_v14  ;;  %299 = vst [vmem:[%s204_s7 + $0x78] sm:$0xff] %v298_v15 }
  0x1e PF: > { %313 = sbr.rel (!%p1084_p3) target bundleno = 38 (0x26), region = 66  ;;  %s315_s8 = sand.u32 (%p1084_p3), 1, %s1012_s16  }
  0x1f   : > { %s901_s9 = sshll.u32 (%p1084_p3), %s1020_s18, 4  ;;  %s869_s10 = sshll.u32 (%p1084_p3), %s315_s8, 6 }
  0x20   : > { %s323_s13 = scalar_lea.vmem (%p1084_p3), %s1194_s3, %s901_s9  ;;  %s317_s14 = scalar_lea.vmem (%p1084_p3), [#allocation4], %s869_s10 }
  0x21   : > { %v336_v16 = vld [vmem:[%s323_s13] sm:$0xff] (%p1084_p3)  ;;  %v338_v17 = vld [vmem:[%s323_s13 + $0x8] sm:$0xff] (%p1084_p3) }
  0x22   : > { %v340_v18 = vld [vmem:[%s323_s13 + $0x20] sm:$0xff] (%p1084_p3)  ;;  %337 = vst [vmem:[%s317_s14] sm:$0xff] (%p1084_p3), %v336_v16  ;;  %339 = vst [vmem:[%s317_s14 + $0x8] sm:$0xff] (%p1084_p3), %v338_v17  ;;  %v342_v19 = vld [vmem:[%s323_s13 + $0x28] sm:$0xff] (%p1084_p3) }
  0x23   : > { %341 = vst [vmem:[%s317_s14 + $0x10] sm:$0xff] (%p1084_p3), %v340_v18  ;;  %v344_v20 = vld [vmem:[%s323_s13 + $0x40] sm:$0xff] (%p1084_p3)  ;;  %v346_v21 = vld [vmem:[%s323_s13 + $0x48] sm:$0xff] (%p1084_p3)  ;;  %343 = vst [vmem:[%s317_s14 + $0x18] sm:$0xff] (%p1084_p3), %v342_v19 }
  0x24   : > { %345 = vst [vmem:[%s317_s14 + $0x20] sm:$0xff] (%p1084_p3), %v344_v20  ;;  %347 = vst [vmem:[%s317_s14 + $0x28] sm:$0xff] (%p1084_p3), %v346_v21  ;;  %v348_v22 = vld [vmem:[%s323_s13 + $0x60] sm:$0xff] (%p1084_p3)  ;;  %v350_v23 = vld [vmem:[%s323_s13 + $0x68] sm:$0xff] (%p1084_p3) }
  0x25   : > { %349 = vst [vmem:[%s317_s14 + $0x30] sm:$0xff] %v348_v22  ;;  %351 = vst [vmem:[%s317_s14 + $0x38] sm:$0xff] %v350_v23 }
  0x26 PF: > { %p872_p8 = scmp.ge.s32.totalorder %s1024_s19, 1  ;;  %p356_p9 = scmp.lt.s32.totalorder %s1024_s19, 3 }
  0x28   : > { %p357_p10 = pnand %p872_p8, %p356_p9 }
  0x29   : > { %s363_s21 = sand.u32 (!%p357_p10), 1, %s1008_s15   ;;  %v1026_v24 = vmov (!%p357_p10), 0   ;;  %v984_v41 = vld [vmem:[%s1191_s0] sm:$0xff] (!%p357_p10)   ;;  %v985_v42 = vld [vmem:[%s1191_s0 + $0x8] sm:$0xff] (!%p357_p10)   ;;  %s876_s30 = sshll.u32 (!%p357_p10), %s1016_s17, 1  ;;  %v645_v43 = vlaneseq (!%p357_p10) }
  0x2a   : > { %360 = sbr.rel (%p357_p10) target bundleno = 308 (0x134), region = 89  ;;  %s873_s22 = sshll.u32 (!%p357_p10), %s363_s21, 7  ;;  %595 = vmatprep.mubr.bf16.mxu0 (!%p357_p10), %v1026_v24  ;;  %605 = vmatprep.mubr.bf16.mxu1 (!%p357_p10), %v1026_v24 }
  0x2b   : > { %s1136_s23 = scalar_lea.vmem (!%p357_p10), [#allocation3], %s873_s22  ;;  %p422_p11 = scmp.lt.s32.totalorder (!%p357_p10), %s876_s30, 3  ;;  %v646_v44 = vshrl.u32 (!%p357_p10), %v645_v43, 7 }
  0x2c   : > { %v960_v25 = vld [vmem:[%s1136_s23 + $0x4] ss:$8 sps:$4 sm:$0xff] (!%p357_p10)   ;;  %v962_v26 = vld [vmem:[%s1136_s23] ss:$8 sps:$4 sm:$0xff] (!%p357_p10)   ;;  %v963_v27 = vld [vmem:[%s1136_s23 + $0x14] ss:$8 sps:$4 sm:$0xff] (!%p357_p10)  }
  0x2d   : > { %563 = vmatprep.subr.bf16.mxu0 (!%p357_p10), %v960_v25  ;;  %903 = vmatprep.subr.bf16.mxu1 (!%p357_p10), %v960_v25  ;;  %v965_v28 = vld [vmem:[%s1136_s23 + $0x10] ss:$8 sps:$4 sm:$0xff] (!%p357_p10)   ;;  %v966_v29 = vld [vmem:[%s1136_s23 + $0x24] ss:$8 sps:$4 sm:$0xff] (!%p357_p10)   ;;  %v968_v30 = vld [vmem:[%s1136_s23 + $0x20] ss:$8 sps:$4 sm:$0xff] (!%p357_p10)  }
  0x2e   : > { %564 = vmatpush1.bf16.msra.mxu0 (!%p357_p10), %v962_v26  ;;  %911 = vmatpush1.bf16.msra.mxu1 (!%p357_p10), %v962_v26  ;;  %v969_v31 = vld [vmem:[%s1136_s23 + $0x34] ss:$8 sps:$4 sm:$0xff] (!%p357_p10)   ;;  %v971_v32 = vld [vmem:[%s1136_s23 + $0x30] ss:$8 sps:$4 sm:$0xff] (!%p357_p10)   ;;  %v972_v33 = vld [vmem:[%s1136_s23 + $0x44] ss:$8 sps:$4 sm:$0xff] (!%p357_p10)  }
  0x2f   : > { %565 = vmatprep.subr.bf16.mxu0 (!%p357_p10), %v963_v27  ;;  %904 = vmatprep.subr.bf16.mxu1 (!%p357_p10), %v963_v27  ;;  %v974_v34 = vld [vmem:[%s1136_s23 + $0x40] ss:$8 sps:$4 sm:$0xff] (!%p357_p10)   ;;  %v975_v35 = vld [vmem:[%s1136_s23 + $0x54] ss:$8 sps:$4 sm:$0xff] (!%p357_p10)   ;;  %v977_v36 = vld [vmem:[%s1136_s23 + $0x50] ss:$8 sps:$4 sm:$0xff] (!%p357_p10)  }
  0x30   : > { %v978_v37 = vld [vmem:[%s1136_s23 + $0x64] ss:$8 sps:$4 sm:$0xff] (!%p357_p10)   ;;  %v980_v38 = vld [vmem:[%s1136_s23 + $0x60] ss:$8 sps:$4 sm:$0xff] (!%p357_p10)   ;;  %v981_v39 = vld [vmem:[%s1136_s23 + $0x74] ss:$8 sps:$4 sm:$0xff] (!%p357_p10)  }
  0x31   : > { %v983_v40 = vld [vmem:[%s1136_s23 + $0x70] ss:$8 sps:$4 sm:$0xff]   ;;  %s1205_s30 = smov (!%p422_p11, %s876_s30), 3  ;;  %v647_v45 = vsub.s32 0, %v646_v44  ;;  %s1166_s8 = sshll.u32 %s363_s21, 6  ;;  %v651_v47 = vsub.s32 1, %v646_v44 }
  0x32   : > { %566 = vmatpush1.bf16.msra.mxu0 %v965_v28  ;;  %912 = vmatpush1.bf16.msra.mxu1 %v965_v28  ;;  %s424_s7 = scalar_lea.vmem %s1193_s2, %s1205_s30  ;;  %s372_s9 = scalar_lea.vmem [#allocation4], %s1166_s8 }
  0x33   : > { %567 = vmatprep.subr.bf16.mxu0 %v966_v29  ;;  %905 = vmatprep.subr.bf16.mxu1 %v966_v29  ;;  %v643_v46 = vld [vmem:[%s424_s7] sm:$0x3]  ;;  %v664_v57 = vld [vmem:[%s372_s9 + $0x8] sm:$0xff]  ;;  %v665_v63 = vld [vmem:[%s372_s9 + $0x10] sm:$0xff]  ;;  %s409_s15 = scalar_lea.vmem [#allocation5], %s1166_s8  ;;  %s902_s10 = sshll.u32 (%p1091_p6), %s1016_s17, 4 }
  0x34   : > { %v648_v48 = vrot.slane %v643_v46, %v647_v45  ;;  %v652_v49 = vrot.slane %v643_v46, %v651_v47  ;;  %v663_v51 = vld [vmem:[%s372_s9] sm:$0xff]  ;;  %v668_v59 = vld [vmem:[%s372_s9 + $0x28] sm:$0xff]  ;;  %v669_v1 = vld [vmem:[%s372_s9 + $0x30] sm:$0xff]  ;;  %s707_s13 = scalar_lea.vmem (%p1091_p6), %s1195_s4, %s902_s10 }
  0x35   : > { %v667_v53 = vld [vmem:[%s372_s9 + $0x20] sm:$0xff]  ;;  %v666_v7 = vld [vmem:[%s372_s9 + $0x18] sm:$0xff] }
  0x36   : > { %568 = vmatpush1.bf16.msra.mxu0 %v968_v30  ;;  %913 = vmatpush1.bf16.msra.mxu1 %v968_v30  ;;  %v670_v9 = vld [vmem:[%s372_s9 + $0x38] sm:$0xff] }
  0x37   : > { %569 = vmatprep.subr.bf16.mxu0 %v969_v31  ;;  %906 = vmatprep.subr.bf16.mxu1 %v969_v31 }
  0x3a   : > { %570 = vmatpush1.bf16.msra.mxu0 %v971_v32  ;;  %914 = vmatpush1.bf16.msra.mxu1 %v971_v32 }
  0x3b   : > { %571 = vmatprep.subr.bf16.mxu0 %v972_v33  ;;  %907 = vmatprep.subr.bf16.mxu1 %v972_v33 }
  0x3e   : > { %572 = vmatpush1.bf16.msra.mxu0 %v974_v34  ;;  %915 = vmatpush1.bf16.msra.mxu1 %v974_v34 }
  0x3f   : > { %573 = vmatprep.subr.bf16.mxu0 %v975_v35  ;;  %908 = vmatprep.subr.bf16.mxu1 %v975_v35 }
  0x42   : > { %574 = vmatpush1.bf16.msra.mxu0 %v977_v36  ;;  %916 = vmatpush1.bf16.msra.mxu1 %v977_v36 }
  0x43   : > { %575 = vmatprep.subr.bf16.mxu0 %v978_v37  ;;  %909 = vmatprep.subr.bf16.mxu1 %v978_v37 }
  0x46   : > { %576 = vmatpush1.bf16.msra.mxu0 %v980_v38  ;;  %917 = vmatpush1.bf16.msra.mxu1 %v980_v38 }
  0x47   : > { %577 = vmatprep.subr.bf16.mxu0 %v981_v39  ;;  %910 = vmatprep.subr.bf16.mxu1 %v981_v39 }
  0x4a   : > { %578 = vmatpush1.bf16.msra.mxu0 %v983_v40  ;;  %918 = vmatpush1.bf16.msra.mxu1 %v983_v40 }
  0x4d   : > { %596 = vmatmul.mubr.bf16.vlgmr.msra.gmra.mrb[0].mxu0 %v984_v41  ;;  %606 = vmatmul.mubr.bf16.vlgmr.msra.gmra.mrb[0].mxu1 %v985_v42 }
 0x120   : > { %v597_v50 = vpop.f32.mrb[0].mxu0  ;;  %v607_v52 = vpop.f32.mrb[0].mxu1 }
 0x121   : > { %v655_v54 = vadd.f32 %v648_v48, %v597_v50  ;;  %v659_v55 = vadd.f32 %v648_v48, %v607_v52  ;;  %v599_v56 = vpop.f32.mrb[1].mxu0  ;;  %v609_v58 = vpop.f32.mrb[1].mxu1 }
 0x122   : > { %v656_v60 = vadd.f32 %v652_v49, %v599_v56  ;;  %v660_v61 = vadd.f32 %v652_v49, %v609_v58  ;;  %v601_v62 = vpop.f32.mrb[2].mxu0  ;;  %v611_v0 = vpop.f32.mrb[2].mxu1 }
 0x123   : > { %v671_v2 = vadd.f32 %v663_v51, %v655_v54  ;;  %v675_v3 = vadd.f32 %v667_v53, %v659_v55  ;;  %v657_v4 = vadd.f32 %v648_v48, %v601_v62  ;;  %v661_v5 = vadd.f32 %v648_v48, %v611_v0  ;;  %v603_v6 = vpop.f32.mrb[3].mxu0  ;;  %v613_v8 = vpop.f32.mrb[3].mxu1 }
 0x124   : > { %v672_v10 = vadd.f32 %v664_v57, %v656_v60  ;;  %v676_v11 = vadd.f32 %v668_v59, %v660_v61  ;;  %v658_v12 = vadd.f32 %v652_v49, %v603_v6  ;;  %v662_v13 = vadd.f32 %v652_v49, %v613_v8  ;;  %701 = sbr.rel (!%p1091_p6) target bundleno = 308 (0x134), region = 109 }
 0x125   : > { %v679_v14 = vmax.f32 %v671_v2, 0.0  ;;  %v683_v15 = vmax.f32 %v675_v3, 0.0  ;;  %v673_v16 = vadd.f32 %v665_v63, %v657_v4  ;;  %v677_v17 = vadd.f32 %v669_v1, %v661_v5 }
 0x126   : > { %v680_v18 = vmax.f32 %v672_v10, 0.0  ;;  %v684_v19 = vmax.f32 %v676_v11, 0.0  ;;  %v674_v20 = vadd.f32 %v666_v7, %v658_v12  ;;  %v678_v21 = vadd.f32 %v670_v9, %v662_v13 }
 0x127   : > { %687 = vst [vmem:[%s409_s15] sm:$0xff] %v679_v14  ;;  %691 = vst [vmem:[%s409_s15 + $0x20] sm:$0xff] %v683_v15  ;;  %v681_v22 = vmax.f32 %v673_v16, 0.0  ;;  %v685_v23 = vmax.f32 %v677_v17, 0.0 }
 0x128   : > { %688 = vst [vmem:[%s409_s15 + $0x8] sm:$0xff] %v680_v18  ;;  %692 = vst [vmem:[%s409_s15 + $0x28] sm:$0xff] %v684_v19  ;;  %v682_v24 = vmax.f32 %v674_v20, 0.0  ;;  %v686_v25 = vmax.f32 %v678_v21, 0.0 }
 0x129   : > { %689 = vst [vmem:[%s409_s15 + $0x10] sm:$0xff] %v681_v22  ;;  %693 = vst [vmem:[%s409_s15 + $0x30] sm:$0xff] %v685_v23 }
 0x12a   : > { %690 = vst [vmem:[%s409_s15 + $0x18] sm:$0xff] %v682_v24  ;;  %694 = vst [vmem:[%s409_s15 + $0x38] sm:$0xff] %v686_v25 }
 0x12e   : > { %v720_v26 = vld [vmem:[%s409_s15] sm:$0xff] }
 0x12f   : > { %v722_v27 = vld [vmem:[%s409_s15 + $0x8] sm:$0xff]  ;;  %v728_v30 = vld [vmem:[%s409_s15 + $0x20] sm:$0xff]  ;;  %721 = vst [vmem:[%s707_s13] sm:$0xff] %v720_v26 }
 0x130   : > { %v724_v28 = vld [vmem:[%s409_s15 + $0x10] sm:$0xff]  ;;  %v730_v31 = vld [vmem:[%s409_s15 + $0x28] sm:$0xff]  ;;  %723 = vst [vmem:[%s707_s13 + $0x8] sm:$0xff] %v722_v27  ;;  %729 = vst [vmem:[%s707_s13 + $0x40] sm:$0xff] %v728_v30 }
 0x131   : > { %v726_v29 = vld [vmem:[%s409_s15 + $0x18] sm:$0xff]  ;;  %725 = vst [vmem:[%s707_s13 + $0x20] sm:$0xff] %v724_v28  ;;  %731 = vst [vmem:[%s707_s13 + $0x48] sm:$0xff] %v730_v31  ;;  %v732_v32 = vld [vmem:[%s409_s15 + $0x30] sm:$0xff] }
 0x132   : > { %727 = vst [vmem:[%s707_s13 + $0x28] sm:$0xff] %v726_v29  ;;  %v734_v33 = vld [vmem:[%s409_s15 + $0x38] sm:$0xff]  ;;  %733 = vst [vmem:[%s707_s13 + $0x60] sm:$0xff] %v732_v32 }
 0x133   : > { %735 = vst [vmem:[%s707_s13 + $0x68] sm:$0xff] %v734_v33 }
 0x134 PF: > { %s14_s19 = sadd.s32 1, %s1024_s19   ;;  %s1198_s15 = smov %s1012_s16 }
 0x135   : > { %p11_p12 = scmp.ge.s32.totalorder %s14_s19, 4   ;;  %s1199_s16 = smov %s1096_s26 }
 0x136   : > { %s1200_s17 = smov %s1020_s18  ;;  %s1201_s18 = smov %s1203_s20 }
 0x137   :  { %13 = sbr.rel (!%p11_p12) target bundleno = 3 (0x3), region = 177 }

// kernel: multicom_res50_forward.69
= control target key start
LH: loop header
LB: loop body
LE: loop exit
PB: predicated region body
PF: predicated region fallthrough
CT: control target
= control target key end

     0   :  { %s867_s12 = smov 0   ;;  %s869_s13 = smov 0   ;;  %s973_s0 = inlined_call_operand.vmem [shape: bf16[32,512], index: 0, kind: input, shape index: {}]   ;;  %s974_s1 = inlined_call_operand.vmem [shape: bf16[512,128], index: 1, kind: input, shape index: {}]   ;;  %s975_s2 = inlined_call_operand.vmem [shape: f32[1,128], index: 2, kind: input, shape index: {}]   ;;  %s976_s3 = inlined_call_operand.vmem [shape: f32[32,128], index: 3, kind: output, shape index: {}]  }
   0x1   :  { %s871_s14 = smov 0   ;;  %s873_s15 = smov 0  }
   0x2   :  { %s875_s16 = smov 0  }
   0x3 LB: > { %s25_s17 = sadd.s32 1, %s840_s15  ;;  %p48_p1 = scmp.ne.s32.totalorder %s832_s13, %s828_s12  ;;  %s844_s16 = sphi %s875_s16, %s13_s16   ;;  %s840_s15 = sphi %s873_s15, %s980_s15   ;;  %s836_s14 = sphi %s871_s14, %s979_s14   ;;  %s832_s13 = sphi %s869_s13, %s978_s13   ;;  %s828_s12 = sphi %s867_s12, %s977_s12  }
   0x4   : > { %p26_p0 = scmp.ge.s32.totalorder %s25_s17, 2  ;;  %p49_p2 = scmp.eq.s32.totalorder %s844_s16, 0 }
   0x5   : > { %s41_s19 = sadd.s32 1, %s832_s13  ;;  %p663_p5 = scmp.ge.s32.totalorder %s844_s16, 2 }
   0x6   : > { %s982_s17 = smov (%p26_p0, %s25_s17), 0  ;;  %p50_p3 = por %p49_p2, %p48_p1 }
   0x7   : > { %s37_s18 = ssub.s32 %s840_s15, %s982_s17  ;;  %162 = sbr.rel (%p663_p5) target bundleno = 21 (0x15), region = 20 }
   0x8   : > { %p39_p4 = scmp.eq.s32.totalorder %s37_s18, 0 }
   0xa   : > { %s902_s20 = scalar_select %p39_p4, %s832_s13, %s41_s19  }
   0xe   : > { %165 = sbr.rel (!%p50_p3) target bundleno = 21 (0x15), region = 24  ;;  %s167_s21 = sand.u32 (%p50_p3), 1, %s832_s13  }
   0xf   : > { %s698_s22 = sshll.u32 (%p50_p3), %s840_s15, 3  ;;  %s664_s23 = sshll.u32 (%p50_p3), %s167_s21, 5 }
  0x10   : > { %s175_s26 = scalar_lea.vmem (%p50_p3), %s973_s0, %s698_s22  ;;  %s169_s27 = scalar_lea.vmem (%p50_p3), [#allocation3], %s664_s23 }
  0x11   : > { %v209_v0 = vld [vmem:[%s175_s26] sm:$0xff] (%p50_p3)  ;;  %v211_v1 = vld [vmem:[%s175_s26 + $0x10] sm:$0xff] (%p50_p3) }
  0x12   : > { %v213_v2 = vld [vmem:[%s175_s26 + $0x20] sm:$0xff] (%p50_p3)  ;;  %210 = vst [vmem:[%s169_s27] sm:$0xff] (%p50_p3), %v209_v0  ;;  %212 = vst [vmem:[%s169_s27 + $0x8] sm:$0xff] (%p50_p3), %v211_v1  ;;  %v215_v3 = vld [vmem:[%s175_s26 + $0x30] sm:$0xff] (%p50_p3) }
  0x13   : > { %214 = vst [vmem:[%s169_s27 + $0x10] sm:$0xff] (%p50_p3), %v213_v2  ;;  %216 = vst [vmem:[%s169_s27 + $0x18] sm:$0xff] (%p50_p3), %v215_v3 }
  0x15 PF: > { %p667_p6 = scmp.ge.s32.totalorder %s844_s16, 1  ;;  %p233_p7 = scmp.lt.s32.totalorder %s844_s16, 3 }
  0x17   : > { %p234_p8 = pnand %p667_p6, %p233_p7 }
  0x18   : > { %s240_s28 = sand.u32 (!%p234_p8), 1, %s828_s12   ;;  %s669_s29 = sshll.u32 (!%p234_p8), %s836_s14, 5 }
  0x19   : > { %237 = sbr.rel (%p234_p8) target bundleno = 304 (0x130), region = 66  ;;  %s668_s30 = sshll.u32 (!%p234_p8), %s240_s28, 5 }
  0x1a   : > { %p280_p9 = scmp.lt.s32.totalorder (!%p234_p8), %s669_s29, 63  ;;  %s919_s8 = scalar_lea.vmem (!%p234_p8), [#allocation3], %s668_s30 }
  0x1b   : > { %p671_p10 = scmp.ne.s32.totalorder (!%p234_p8), %s836_s14, 0 }
  0x20   : > { %s984_s29 = smov (!%p280_p9, %s669_s29), 63  ;;  %304 = sbr.rel (%p671_p10) target bundleno = 39 (0x27), region = 74 }
  0x21   : > { %s670_s4 = sshll.u32 %s984_s29, 2  ;;  %v846_v4 = vmov (!%p671_p10), 0.0  }
  0x22   : > { %s917_s7 = scalar_lea.vmem %s974_s1, %s670_s4  ;;  %305 = vst [vmem:[#allocation2] sm:$0xff] (!%p671_p10), %v846_v4  ;;  %306 = vst [vmem:[#allocation2 + $0x8] sm:$0xff] (!%p671_p10), %v846_v4 }
  0x23   : > { %307 = vst [vmem:[#allocation2 + $0x10] sm:$0xff] (!%p671_p10), %v846_v4  ;;  %308 = vst [vmem:[#allocation2 + $0x18] sm:$0xff] (!%p671_p10), %v846_v4 }
  0x27 PF: > { %v784_v5 = vld [vmem:[%s917_s7 + $0x40] sm:$0xff]   ;;  %v786_v7 = vld [vmem:[%s917_s7 + $0x48] sm:$0xff]   ;;  %v788_v9 = vld [vmem:[%s917_s7 + $0x50] sm:$0xff]   ;;  %p692_p11 = scmp.ne.s32.totalorder %s836_s14, 1 }
  0x28   : > { %v785_v6 = vld [vmem:[%s917_s7] sm:$0xff]   ;;  %699 = vmatprep.subr.bf16.mxu0 %v784_v5  ;;  %727 = vmatprep.subr.bf16.mxu1 %v784_v5  ;;  %v787_v8 = vld [vmem:[%s917_s7 + $0x8] sm:$0xff]   ;;  %v789_v10 = vld [vmem:[%s917_s7 + $0x10] sm:$0xff]  }
  0x29   : > { %700 = vmatpush3.bf16.msra.mxu0 %v785_v6  ;;  %735 = vmatpush3.bf16.msra.mxu1 %v785_v6  ;;  %v790_v11 = vld [vmem:[%s917_s7 + $0x58] sm:$0xff]   ;;  %v792_v13 = vld [vmem:[%s917_s7 + $0x60] sm:$0xff]   ;;  %v794_v15 = vld [vmem:[%s917_s7 + $0x68] sm:$0xff]  }
  0x2a   : > { %701 = vmatprep.subr.bf16.mxu0 %v786_v7  ;;  %728 = vmatprep.subr.bf16.mxu1 %v786_v7  ;;  %v791_v12 = vld [vmem:[%s917_s7 + $0x18] sm:$0xff]   ;;  %v793_v14 = vld [vmem:[%s917_s7 + $0x20] sm:$0xff]   ;;  %v795_v18 = vld [vmem:[%s917_s7 + $0x28] sm:$0xff]  }
  0x2b   : > { %v802_v16 = vld [vmem:[%s919_s8 + $0x4] ss:$8 sps:$4 sm:$0xff]   ;;  %v805_v17 = vld [vmem:[%s919_s8 + $0x14] ss:$8 sps:$4 sm:$0xff]   ;;  %v800_v23 = vld [vmem:[%s919_s8] ss:$8 sps:$4 sm:$0xff]  }
  0x2c   : > { %v796_v19 = vld [vmem:[%s917_s7 + $0x70] sm:$0xff]   ;;  %497 = vmatprep.mubr.bf16.mxu0 %v802_v16  ;;  %505 = vmatprep.mubr.bf16.mxu1 %v805_v17  ;;  %v798_v21 = vld [vmem:[%s917_s7 + $0x78] sm:$0xff]   ;;  %v309_v27 = vld [vmem:[#allocation2] sm:$0xff] }
  0x2d   : > { %702 = vmatpush3.bf16.msra.mxu0 %v787_v8  ;;  %736 = vmatpush3.bf16.msra.mxu1 %v787_v8  ;;  %v797_v20 = vld [vmem:[%s917_s7 + $0x30] sm:$0xff]   ;;  %v799_v22 = vld [vmem:[%s917_s7 + $0x38] sm:$0xff]   ;;  %v310_v35 = vld [vmem:[#allocation2 + $0x8] sm:$0xff] }
  0x2e   : > { %703 = vmatprep.subr.bf16.mxu0 %v788_v9  ;;  %729 = vmatprep.subr.bf16.mxu1 %v788_v9  ;;  %v803_v24 = vld [vmem:[%s919_s8 + $0x10] ss:$8 sps:$4 sm:$0xff]   ;;  %v693_v46 = vld [vmem:[%s975_s2] ss:$0 sm:$0xff] (!%p692_p11) }
  0x2f   : > { %v311_v29 = vld [vmem:[#allocation2 + $0x10] sm:$0xff]  ;;  %v312_v37 = vld [vmem:[#allocation2 + $0x18] sm:$0xff] }
  0x31   : > { %704 = vmatpush3.bf16.msra.mxu0 %v789_v10  ;;  %737 = vmatpush3.bf16.msra.mxu1 %v789_v10 }
  0x32   : > { %705 = vmatprep.subr.bf16.mxu0 %v790_v11  ;;  %730 = vmatprep.subr.bf16.mxu1 %v790_v11 }
  0x35   : > { %706 = vmatpush3.bf16.msra.mxu0 %v791_v12  ;;  %738 = vmatpush3.bf16.msra.mxu1 %v791_v12 }
  0x36   : > { %707 = vmatprep.subr.bf16.mxu0 %v792_v13  ;;  %731 = vmatprep.subr.bf16.mxu1 %v792_v13 }
  0x39   : > { %708 = vmatpush3.bf16.msra.mxu0 %v793_v14  ;;  %739 = vmatpush3.bf16.msra.mxu1 %v793_v14 }
  0x3a   : > { %709 = vmatprep.subr.bf16.mxu0 %v794_v15  ;;  %732 = vmatprep.subr.bf16.mxu1 %v794_v15 }
  0x3d   : > { %710 = vmatpush3.bf16.msra.mxu0 %v795_v18  ;;  %740 = vmatpush3.bf16.msra.mxu1 %v795_v18 }
  0x3e   : > { %711 = vmatprep.subr.bf16.mxu0 %v796_v19  ;;  %733 = vmatprep.subr.bf16.mxu1 %v796_v19 }
  0x41   : > { %712 = vmatpush3.bf16.msra.mxu0 %v797_v20  ;;  %741 = vmatpush3.bf16.msra.mxu1 %v797_v20 }
  0x42   : > { %713 = vmatprep.subr.bf16.mxu0 %v798_v21  ;;  %734 = vmatprep.subr.bf16.mxu1 %v798_v21 }
  0x45   : > { %714 = vmatpush3.bf16.msra.mxu0 %v799_v22  ;;  %742 = vmatpush3.bf16.msra.mxu1 %v799_v22 }
  0x48   : > { %498 = vmatmul.mubr.bf16.vlgmr.msra.gmra.mrb[0].mxu0 %v800_v23  ;;  %506 = vmatmul.mubr.bf16.vlgmr.msra.gmra.mrb[0].mxu1 %v803_v24 }
 0x11b   : > { %v715_v25 = vpop.f32.mrb[0].mxu0  ;;  %v721_v26 = vpop.f32.mrb[0].mxu1 }
 0x11c   : > { %v716_v28 = vpop.f32.mrb[1].mxu0  ;;  %v722_v30 = vpop.f32.mrb[1].mxu1 }
 0x11d   : > { %v717_v31 = vadd.f32 %v716_v28, %v715_v25  ;;  %v723_v32 = vadd.f32 %v722_v30, %v721_v26  ;;  %v718_v33 = vpop.f32.mrb[2].mxu0  ;;  %v724_v34 = vpop.f32.mrb[2].mxu1  ;;  %525 = sbr.rel (%p692_p11) target bundleno = 304 (0x130), region = 78 }
 0x11e   : > { %v719_v36 = vpop.f32.mrb[3].mxu0  ;;  %v725_v38 = vpop.f32.mrb[3].mxu1 }
 0x11f   : > { %v514_v39 = vadd.f32 %v717_v31, %v309_v27  ;;  %v516_v40 = vadd.f32 %v723_v32, %v311_v29  ;;  %v720_v41 = vadd.f32 %v719_v36, %v718_v33  ;;  %v726_v42 = vadd.f32 %v725_v38, %v724_v34 }
 0x121   : > { %518 = vst [vmem:[#allocation2] sm:$0xff] %v514_v39  ;;  %520 = vst [vmem:[#allocation2 + $0x10] sm:$0xff] %v516_v40  ;;  %v515_v43 = vadd.f32 %v720_v41, %v310_v35  ;;  %v517_v44 = vadd.f32 %v726_v42, %v312_v37 }
 0x123   : > { %519 = vst [vmem:[#allocation2 + $0x8] sm:$0xff] %v515_v43  ;;  %521 = vst [vmem:[#allocation2 + $0x18] sm:$0xff] %v517_v44 }
 0x128   : > { %v526_v45 = vld [vmem:[#allocation2] sm:$0xff]  ;;  %v528_v50 = vld [vmem:[#allocation2 + $0x10] sm:$0xff] }
 0x129   : > { %v537_v48 = vadd.f32 %v693_v46, %v526_v45  ;;  %v539_v52 = vadd.f32 %v693_v46, %v528_v50 }
 0x12a   : > { %v527_v47 = vld [vmem:[#allocation2 + $0x8] sm:$0xff]  ;;  %v529_v51 = vld [vmem:[#allocation2 + $0x18] sm:$0xff] }
 0x12b   : > { %v538_v49 = vadd.f32 %v693_v46, %v527_v47  ;;  %v540_v53 = vadd.f32 %v693_v46, %v529_v51  ;;  %v541_v54 = vmax.f32 %v537_v48, 0.0  ;;  %v543_v56 = vmax.f32 %v539_v52, 0.0 }
 0x12d   : > { %v542_v55 = vmax.f32 %v538_v49, 0.0  ;;  %v544_v57 = vmax.f32 %v540_v53, 0.0  ;;  %545 = vst [vmem:[%s976_s3] sm:$0xff] %v541_v54  ;;  %547 = vst [vmem:[%s976_s3 + $0x10] sm:$0xff] %v543_v56 }
 0x12f   : > { %546 = vst [vmem:[%s976_s3 + $0x8] sm:$0xff] %v542_v55  ;;  %548 = vst [vmem:[%s976_s3 + $0x18] sm:$0xff] %v544_v57 }
 0x130 PF: > { %s13_s16 = sadd.s32 1, %s844_s16   ;;  %s977_s12 = smov %s832_s13 }
 0x131   : > { %p10_p12 = scmp.ge.s32.totalorder %s13_s16, 4   ;;  %s978_s13 = smov %s902_s20 }
 0x132   : > { %s979_s14 = smov %s840_s15  ;;  %s980_s15 = smov %s982_s17 }
 0x133   :  { %12 = sbr.rel (!%p10_p12) target bundleno = 3 (0x3), region = 119 }

// kernel: multicom_res50_forward.79
= control target key start
LH: loop header
LB: loop body
LE: loop exit
PB: predicated region body
PF: predicated region fallthrough
CT: control target
= control target key end

     0   :  { %s1038_s12 = smov 0   ;;  %s1040_s13 = smov 0   ;;  %s1172_s0 = inlined_call_operand.vmem [shape: bf16[32,512], index: 0, kind: input, shape index: {}]   ;;  %s1173_s1 = inlined_call_operand.vmem [shape: bf16[512,256], index: 1, kind: input, shape index: {}]   ;;  %s1174_s2 = inlined_call_operand.vmem [shape: f32[1,256], index: 2, kind: input, shape index: {}]   ;;  %s1175_s3 = inlined_call_operand.vmem [shape: f32[32,256], index: 3, kind: output, shape index: {}]  }
   0x1   :  { %s1042_s14 = smov 0   ;;  %s1044_s15 = smov 0  }
   0x2   :  { %s1046_s16 = smov 0  }
   0x3 LB: > { %s25_s17 = sadd.s32 1, %s1011_s15  ;;  %p48_p1 = scmp.ne.s32.totalorder %s1003_s13, %s999_s12  ;;  %s1015_s16 = sphi %s1046_s16, %s13_s16   ;;  %s1011_s15 = sphi %s1044_s15, %s1179_s15   ;;  %s1007_s14 = sphi %s1042_s14, %s1178_s14   ;;  %s1003_s13 = sphi %s1040_s13, %s1177_s13   ;;  %s999_s12 = sphi %s1038_s12, %s1176_s12  }
   0x4   : > { %p26_p0 = scmp.ge.s32.totalorder %s25_s17, 2  ;;  %p49_p2 = scmp.eq.s32.totalorder %s1015_s16, 0 }
   0x5   : > { %s41_s19 = sadd.s32 1, %s1003_s13  ;;  %p797_p5 = scmp.ge.s32.totalorder %s1015_s16, 2 }
   0x6   : > { %s1181_s17 = smov (%p26_p0, %s25_s17), 0  ;;  %p50_p3 = por %p49_p2, %p48_p1 }
   0x7   : > { %s37_s18 = ssub.s32 %s1011_s15, %s1181_s17  ;;  %164 = sbr.rel (%p797_p5) target bundleno = 21 (0x15), region = 20 }
   0x8   : > { %p39_p4 = scmp.eq.s32.totalorder %s37_s18, 0 }
   0xa   : > { %s1073_s20 = scalar_select %p39_p4, %s1003_s13, %s41_s19  }
   0xe   : > { %167 = sbr.rel (!%p50_p3) target bundleno = 21 (0x15), region = 24  ;;  %s169_s21 = sand.u32 (%p50_p3), 1, %s1003_s13  }
   0xf   : > { %s848_s22 = sshll.u32 (%p50_p3), %s1011_s15, 3  ;;  %s798_s23 = sshll.u32 (%p50_p3), %s169_s21, 5 }
  0x10   : > { %s177_s26 = scalar_lea.vmem (%p50_p3), %s1172_s0, %s848_s22  ;;  %s171_s27 = scalar_lea.vmem (%p50_p3), [#allocation3], %s798_s23 }
  0x11   : > { %v211_v0 = vld [vmem:[%s177_s26] sm:$0xff] (%p50_p3)  ;;  %v213_v1 = vld [vmem:[%s177_s26 + $0x10] sm:$0xff] (%p50_p3) }
  0x12   : > { %v215_v2 = vld [vmem:[%s177_s26 + $0x20] sm:$0xff] (%p50_p3)  ;;  %212 = vst [vmem:[%s171_s27] sm:$0xff] (%p50_p3), %v211_v0  ;;  %214 = vst [vmem:[%s171_s27 + $0x8] sm:$0xff] (%p50_p3), %v213_v1  ;;  %v217_v3 = vld [vmem:[%s177_s26 + $0x30] sm:$0xff] (%p50_p3) }
  0x13   : > { %216 = vst [vmem:[%s171_s27 + $0x10] sm:$0xff] (%p50_p3), %v215_v2  ;;  %218 = vst [vmem:[%s171_s27 + $0x18] sm:$0xff] (%p50_p3), %v217_v3 }
  0x15 PF: > { %p801_p6 = scmp.ge.s32.totalorder %s1015_s16, 1  ;;  %p238_p7 = scmp.lt.s32.totalorder %s1015_s16, 3 }
  0x17   : > { %p239_p8 = pnand %p801_p6, %p238_p7 }
  0x18   : > { %s245_s28 = sand.u32 (!%p239_p8), 1, %s999_s12   ;;  %s803_s29 = sshll.u32 (!%p239_p8), %s1007_s14, 5 }
  0x19   : > { %242 = sbr.rel (%p239_p8) target bundleno = 335 (0x14f), region = 66  ;;  %s802_s30 = sshll.u32 (!%p239_p8), %s245_s28, 5 }
  0x1a   : > { %p291_p9 = scmp.lt.s32.totalorder (!%p239_p8), %s803_s29, 63  ;;  %s1090_s8 = scalar_lea.vmem (!%p239_p8), [#allocation3], %s802_s30 }
  0x1b   : > { %p806_p10 = scmp.ne.s32.totalorder (!%p239_p8), %s1007_s14, 0 }
  0x20   : > { %s1183_s29 = smov (!%p291_p9, %s803_s29), 63  ;;  %321 = sbr.rel (%p806_p10) target bundleno = 39 (0x27), region = 74 }
  0x21   : > { %s849_s4 = sshll.u32 %s1183_s29, 3  ;;  %v1017_v4 = vmov (!%p806_p10), 0.0  }
  0x22   : > { %s1088_s7 = scalar_lea.vmem %s1173_s1, %s849_s4  ;;  %322 = vst [vmem:[#allocation2] sm:$0xff] (!%p806_p10), %v1017_v4  ;;  %323 = vst [vmem:[#allocation2 + $0x8] sm:$0xff] (!%p806_p10), %v1017_v4 }
  0x23   : > { %324 = vst [vmem:[#allocation2 + $0x10] sm:$0xff] (!%p806_p10), %v1017_v4  ;;  %325 = vst [vmem:[#allocation2 + $0x18] sm:$0xff] (!%p806_p10), %v1017_v4 }
  0x24   : > { %326 = vst [vmem:[#allocation2 + $0x20] sm:$0xff] (!%p806_p10), %v1017_v4  ;;  %327 = vst [vmem:[#allocation2 + $0x28] sm:$0xff] (!%p806_p10), %v1017_v4 }
  0x25   : > { %328 = vst [vmem:[#allocation2 + $0x30] sm:$0xff] (!%p806_p10), %v1017_v4  ;;  %329 = vst [vmem:[#allocation2 + $0x38] sm:$0xff] (!%p806_p10), %v1017_v4 }
  0x27 PF: > { %v923_v5 = vld [vmem:[%s1088_s7 + $0x4] ss:$8 sps:$4 sm:$0xff]   ;;  %v925_v6 = vld [vmem:[%s1088_s7] ss:$8 sps:$4 sm:$0xff]   ;;  %v926_v7 = vld [vmem:[%s1088_s7 + $0x14] ss:$8 sps:$4 sm:$0xff]  }
  0x28   : > { %554 = vmatprep.subr.bf16.mxu0 %v923_v5  ;;  %850 = vmatprep.subr.bf16.mxu1 %v923_v5  ;;  %v928_v8 = vld [vmem:[%s1088_s7 + $0x10] ss:$8 sps:$4 sm:$0xff]   ;;  %v929_v9 = vld [vmem:[%s1088_s7 + $0x24] ss:$8 sps:$4 sm:$0xff]   ;;  %v931_v10 = vld [vmem:[%s1088_s7 + $0x20] ss:$8 sps:$4 sm:$0xff]  }
  0x29   : > { %555 = vmatpush1.bf16.msra.mxu0 %v925_v6  ;;  %866 = vmatpush1.bf16.msra.mxu1 %v925_v6  ;;  %v932_v11 = vld [vmem:[%s1088_s7 + $0x34] ss:$8 sps:$4 sm:$0xff]   ;;  %v934_v12 = vld [vmem:[%s1088_s7 + $0x30] ss:$8 sps:$4 sm:$0xff]   ;;  %v935_v13 = vld [vmem:[%s1088_s7 + $0x44] ss:$8 sps:$4 sm:$0xff]  }
  0x2a   : > { %556 = vmatprep.subr.bf16.mxu0 %v926_v7  ;;  %851 = vmatprep.subr.bf16.mxu1 %v926_v7  ;;  %v937_v14 = vld [vmem:[%s1088_s7 + $0x40] ss:$8 sps:$4 sm:$0xff]   ;;  %v938_v15 = vld [vmem:[%s1088_s7 + $0x54] ss:$8 sps:$4 sm:$0xff]   ;;  %v940_v16 = vld [vmem:[%s1088_s7 + $0x50] ss:$8 sps:$4 sm:$0xff]  }
  0x2b   : > { %v941_v17 = vld [vmem:[%s1088_s7 + $0x64] ss:$8 sps:$4 sm:$0xff]   ;;  %v943_v19 = vld [vmem:[%s1088_s7 + $0x60] ss:$8 sps:$4 sm:$0xff]   ;;  %v976_v20 = vld [vmem:[%s1090_s8 + $0x14] ss:$8 sps:$4 sm:$0xff]  }
  0x2c   : > { %v973_v18 = vld [vmem:[%s1090_s8 + $0x4] ss:$8 sps:$4 sm:$0xff]   ;;  %v944_v21 = vld [vmem:[%s1088_s7 + $0x74] ss:$8 sps:$4 sm:$0xff]   ;;  %596 = vmatprep.mubr.bf16.mxu1 %v976_v20  ;;  %v946_v22 = vld [vmem:[%s1088_s7 + $0x70] ss:$8 sps:$4 sm:$0xff]  }
  0x2d   : > { %557 = vmatpush1.bf16.msra.mxu0 %v928_v8  ;;  %867 = vmatpush1.bf16.msra.mxu1 %v928_v8  ;;  %v947_v23 = vld [vmem:[%s1088_s7 + $0x84] ss:$8 sps:$4 sm:$0xff]   ;;  %v949_v24 = vld [vmem:[%s1088_s7 + $0x80] ss:$8 sps:$4 sm:$0xff]   ;;  %v950_v25 = vld [vmem:[%s1088_s7 + $0x94] ss:$8 sps:$4 sm:$0xff]  }
  0x2e   : > { %558 = vmatprep.subr.bf16.mxu0 %v929_v9  ;;  %852 = vmatprep.subr.bf16.mxu1 %v929_v9  ;;  %v952_v26 = vld [vmem:[%s1088_s7 + $0x90] ss:$8 sps:$4 sm:$0xff]   ;;  %v953_v27 = vld [vmem:[%s1088_s7 + $0xa4] ss:$8 sps:$4 sm:$0xff]   ;;  %v955_v28 = vld [vmem:[%s1088_s7 + $0xa0] ss:$8 sps:$4 sm:$0xff]  }
  0x2f   : > { %586 = vmatprep.mubr.bf16.mxu0 %v973_v18  ;;  %v956_v29 = vld [vmem:[%s1088_s7 + $0xb4] ss:$8 sps:$4 sm:$0xff]   ;;  %v958_v30 = vld [vmem:[%s1088_s7 + $0xb0] ss:$8 sps:$4 sm:$0xff]   ;;  %v959_v31 = vld [vmem:[%s1088_s7 + $0xc4] ss:$8 sps:$4 sm:$0xff]  }
  0x30   : > { %v961_v32 = vld [vmem:[%s1088_s7 + $0xc0] ss:$8 sps:$4 sm:$0xff]   ;;  %v962_v33 = vld [vmem:[%s1088_s7 + $0xd4] ss:$8 sps:$4 sm:$0xff]   ;;  %v964_v34 = vld [vmem:[%s1088_s7 + $0xd0] ss:$8 sps:$4 sm:$0xff]  }
  0x31   : > { %559 = vmatpush1.bf16.msra.mxu0 %v931_v10  ;;  %868 = vmatpush1.bf16.msra.mxu1 %v931_v10  ;;  %v965_v35 = vld [vmem:[%s1088_s7 + $0xe4] ss:$8 sps:$4 sm:$0xff]   ;;  %v967_v36 = vld [vmem:[%s1088_s7 + $0xe0] ss:$8 sps:$4 sm:$0xff]   ;;  %v968_v37 = vld [vmem:[%s1088_s7 + $0xf4] ss:$8 sps:$4 sm:$0xff]  }
  0x32   : > { %560 = vmatprep.subr.bf16.mxu0 %v932_v11  ;;  %853 = vmatprep.subr.bf16.mxu1 %v932_v11  ;;  %v970_v38 = vld [vmem:[%s1088_s7 + $0xf0] ss:$8 sps:$4 sm:$0xff]   ;;  %v971_v39 = vld [vmem:[%s1090_s8] ss:$8 sps:$4 sm:$0xff]   ;;  %p843_p11 = scmp.ne.s32.totalorder %s1007_s14, 1 }
  0x33   : > { %v974_v40 = vld [vmem:[%s1090_s8 + $0x10] ss:$8 sps:$4 sm:$0xff]   ;;  %v330_v41 = vld [vmem:[#allocation2] sm:$0xff]  ;;  %v331_v43 = vld [vmem:[#allocation2 + $0x8] sm:$0xff]  ;;  %v637_v1 = vlaneseq (!%p843_p11) }
  0x34   : > { %v334_v42 = vld [vmem:[#allocation2 + $0x20] sm:$0xff]  ;;  %v335_v44 = vld [vmem:[#allocation2 + $0x28] sm:$0xff]  ;;  %v332_v47 = vld [vmem:[#allocation2 + $0x10] sm:$0xff] }
  0x35   : > { %561 = vmatpush1.bf16.msra.mxu0 %v934_v12  ;;  %869 = vmatpush1.bf16.msra.mxu1 %v934_v12  ;;  %v336_v48 = vld [vmem:[#allocation2 + $0x30] sm:$0xff]  ;;  %v333_v53 = vld [vmem:[#allocation2 + $0x18] sm:$0xff]  ;;  %v638_v2 = vshrl.u32 (!%p843_p11), %v637_v1, 7  ;;  %v635_v3 = vld [vmem:[%s1174_s2] sm:$0x3] (!%p843_p11) }
  0x36   : > { %562 = vmatprep.subr.bf16.mxu0 %v935_v13  ;;  %854 = vmatprep.subr.bf16.mxu1 %v935_v13  ;;  %v337_v54 = vld [vmem:[#allocation2 + $0x38] sm:$0xff] }
  0x37   : > { %v639_v5 = vsub.s32 (!%p843_p11), 0, %v638_v2  ;;  %v643_v7 = vsub.s32 (!%p843_p11), 1, %v638_v2 }
  0x39   : > { %563 = vmatpush1.bf16.msra.mxu0 %v937_v14  ;;  %870 = vmatpush1.bf16.msra.mxu1 %v937_v14  ;;  %v640_v11 = vrot.slane (!%p843_p11), %v635_v3, %v639_v5  ;;  %v644_v12 = vrot.slane (!%p843_p11), %v635_v3, %v643_v7 }
  0x3a   : > { %564 = vmatprep.subr.bf16.mxu0 %v938_v15  ;;  %855 = vmatprep.subr.bf16.mxu1 %v938_v15 }
  0x3d   : > { %565 = vmatpush1.bf16.msra.mxu0 %v940_v16  ;;  %871 = vmatpush1.bf16.msra.mxu1 %v940_v16 }
  0x3e   : > { %566 = vmatprep.subr.bf16.mxu0 %v941_v17  ;;  %856 = vmatprep.subr.bf16.mxu1 %v941_v17 }
  0x41   : > { %567 = vmatpush1.bf16.msra.mxu0 %v943_v19  ;;  %872 = vmatpush1.bf16.msra.mxu1 %v943_v19 }
  0x42   : > { %568 = vmatprep.subr.bf16.mxu0 %v944_v21  ;;  %857 = vmatprep.subr.bf16.mxu1 %v944_v21 }
  0x45   : > { %569 = vmatpush1.bf16.msra.mxu0 %v946_v22  ;;  %873 = vmatpush1.bf16.msra.mxu1 %v946_v22 }
  0x46   : > { %570 = vmatprep.subr.bf16.mxu0 %v947_v23  ;;  %858 = vmatprep.subr.bf16.mxu1 %v947_v23 }
  0x49   : > { %571 = vmatpush1.bf16.msra.mxu0 %v949_v24  ;;  %874 = vmatpush1.bf16.msra.mxu1 %v949_v24 }
  0x4a   : > { %572 = vmatprep.subr.bf16.mxu0 %v950_v25  ;;  %859 = vmatprep.subr.bf16.mxu1 %v950_v25 }
  0x4d   : > { %573 = vmatpush1.bf16.msra.mxu0 %v952_v26  ;;  %875 = vmatpush1.bf16.msra.mxu1 %v952_v26 }
  0x4e   : > { %574 = vmatprep.subr.bf16.mxu0 %v953_v27  ;;  %860 = vmatprep.subr.bf16.mxu1 %v953_v27 }
  0x51   : > { %575 = vmatpush1.bf16.msra.mxu0 %v955_v28  ;;  %876 = vmatpush1.bf16.msra.mxu1 %v955_v28 }
  0x52   : > { %576 = vmatprep.subr.bf16.mxu0 %v956_v29  ;;  %861 = vmatprep.subr.bf16.mxu1 %v956_v29 }
  0x55   : > { %577 = vmatpush1.bf16.msra.mxu0 %v958_v30  ;;  %877 = vmatpush1.bf16.msra.mxu1 %v958_v30 }
  0x56   : > { %578 = vmatprep.subr.bf16.mxu0 %v959_v31  ;;  %862 = vmatprep.subr.bf16.mxu1 %v959_v31 }
  0x59   : > { %579 = vmatpush1.bf16.msra.mxu0 %v961_v32  ;;  %878 = vmatpush1.bf16.msra.mxu1 %v961_v32 }
  0x5a   : > { %580 = vmatprep.subr.bf16.mxu0 %v962_v33  ;;  %863 = vmatprep.subr.bf16.mxu1 %v962_v33 }
  0x5d   : > { %581 = vmatpush1.bf16.msra.mxu0 %v964_v34  ;;  %879 = vmatpush1.bf16.msra.mxu1 %v964_v34 }
  0x5e   : > { %582 = vmatprep.subr.bf16.mxu0 %v965_v35  ;;  %864 = vmatprep.subr.bf16.mxu1 %v965_v35 }
  0x61   : > { %583 = vmatpush1.bf16.msra.mxu0 %v967_v36  ;;  %880 = vmatpush1.bf16.msra.mxu1 %v967_v36 }
  0x62   : > { %584 = vmatprep.subr.bf16.mxu0 %v968_v37  ;;  %865 = vmatprep.subr.bf16.mxu1 %v968_v37 }
  0x65   : > { %585 = vmatpush1.bf16.msra.mxu0 %v970_v38  ;;  %881 = vmatpush1.bf16.msra.mxu1 %v970_v38 }
  0x68   : > { %587 = vmatmul.mubr.bf16.vlgmr.msra.gmra.mrb[0].mxu0 %v971_v39  ;;  %597 = vmatmul.mubr.bf16.vlgmr.msra.gmra.mrb[0].mxu1 %v974_v40 }
 0x13b   : > { %v588_v45 = vpop.f32.mrb[0].mxu0  ;;  %v598_v46 = vpop.f32.mrb[0].mxu1  ;;  %626 = sbr.rel (%p843_p11) target bundleno = 335 (0x14f), region = 78 }
 0x13c   : > { %v607_v49 = vadd.f32 %v588_v45, %v330_v41  ;;  %v611_v50 = vadd.f32 %v598_v46, %v334_v42  ;;  %v590_v51 = vpop.f32.mrb[1].mxu0  ;;  %v600_v52 = vpop.f32.mrb[1].mxu1 }
 0x13d   : > { %v608_v55 = vadd.f32 %v590_v51, %v331_v43  ;;  %v612_v56 = vadd.f32 %v600_v52, %v335_v44  ;;  %v592_v57 = vpop.f32.mrb[2].mxu0  ;;  %v602_v58 = vpop.f32.mrb[2].mxu1 }
 0x13e   : > { %615 = vst [vmem:[#allocation2] sm:$0xff] %v607_v49  ;;  %619 = vst [vmem:[#allocation2 + $0x20] sm:$0xff] %v611_v50  ;;  %v609_v59 = vadd.f32 %v592_v57, %v332_v47  ;;  %v613_v60 = vadd.f32 %v602_v58, %v336_v48  ;;  %v594_v61 = vpop.f32.mrb[3].mxu0  ;;  %v604_v62 = vpop.f32.mrb[3].mxu1 }
 0x13f   : > { %616 = vst [vmem:[#allocation2 + $0x8] sm:$0xff] %v608_v55  ;;  %620 = vst [vmem:[#allocation2 + $0x28] sm:$0xff] %v612_v56  ;;  %v610_v63 = vadd.f32 %v594_v61, %v333_v53  ;;  %v614_v0 = vadd.f32 %v604_v62, %v337_v54 }
 0x140   : > { %617 = vst [vmem:[#allocation2 + $0x10] sm:$0xff] %v609_v59  ;;  %621 = vst [vmem:[#allocation2 + $0x30] sm:$0xff] %v613_v60 }
 0x141   : > { %618 = vst [vmem:[#allocation2 + $0x18] sm:$0xff] %v610_v63  ;;  %622 = vst [vmem:[#allocation2 + $0x38] sm:$0xff] %v614_v0 }
 0x145   : > { %v627_v4 = vld [vmem:[#allocation2] sm:$0xff] }
 0x146   : > { %v628_v6 = vld [vmem:[#allocation2 + $0x8] sm:$0xff]  ;;  %v631_v10 = vld [vmem:[#allocation2 + $0x20] sm:$0xff]  ;;  %v647_v16 = vadd.f32 %v640_v11, %v627_v4 }
 0x147   : > { %v629_v8 = vld [vmem:[#allocation2 + $0x10] sm:$0xff]  ;;  %v632_v13 = vld [vmem:[#allocation2 + $0x28] sm:$0xff]  ;;  %v648_v17 = vadd.f32 %v644_v12, %v628_v6  ;;  %v651_v20 = vadd.f32 %v640_v11, %v631_v10 }
 0x148   : > { %v630_v9 = vld [vmem:[#allocation2 + $0x18] sm:$0xff]  ;;  %v633_v14 = vld [vmem:[#allocation2 + $0x30] sm:$0xff]  ;;  %v649_v18 = vadd.f32 %v640_v11, %v629_v8  ;;  %v652_v21 = vadd.f32 %v644_v12, %v632_v13  ;;  %v655_v24 = vmax.f32 %v647_v16, 0.0 }
 0x149   : > { %v634_v15 = vld [vmem:[#allocation2 + $0x38] sm:$0xff]  ;;  %v650_v19 = vadd.f32 %v644_v12, %v630_v9  ;;  %v653_v22 = vadd.f32 %v640_v11, %v633_v14  ;;  %v656_v25 = vmax.f32 %v648_v17, 0.0  ;;  %v659_v28 = vmax.f32 %v651_v20, 0.0 }
 0x14a   : > { %v654_v23 = vadd.f32 %v644_v12, %v634_v15  ;;  %v657_v26 = vmax.f32 %v649_v18, 0.0  ;;  %v660_v29 = vmax.f32 %v652_v21, 0.0  ;;  %663 = vst [vmem:[%s1175_s3] sm:$0xff] %v655_v24 }
 0x14b   : > { %v658_v27 = vmax.f32 %v650_v19, 0.0  ;;  %v661_v30 = vmax.f32 %v653_v22, 0.0  ;;  %664 = vst [vmem:[%s1175_s3 + $0x8] sm:$0xff] %v656_v25  ;;  %667 = vst [vmem:[%s1175_s3 + $0x20] sm:$0xff] %v659_v28 }
 0x14c   : > { %v662_v31 = vmax.f32 %v654_v23, 0.0  ;;  %665 = vst [vmem:[%s1175_s3 + $0x10] sm:$0xff] %v657_v26  ;;  %668 = vst [vmem:[%s1175_s3 + $0x28] sm:$0xff] %v660_v29 }
 0x14d   : > { %666 = vst [vmem:[%s1175_s3 + $0x18] sm:$0xff] %v658_v27  ;;  %669 = vst [vmem:[%s1175_s3 + $0x30] sm:$0xff] %v661_v30 }
 0x14e   : > { %670 = vst [vmem:[%s1175_s3 + $0x38] sm:$0xff] %v662_v31 }
 0x14f PF: > { %s13_s16 = sadd.s32 1, %s1015_s16   ;;  %s1176_s12 = smov %s1003_s13 }
 0x150   : > { %p10_p12 = scmp.ge.s32.totalorder %s13_s16, 4   ;;  %s1177_s13 = smov %s1073_s20 }
 0x151   : > { %s1178_s14 = smov %s1011_s15  ;;  %s1179_s15 = smov %s1181_s17 }
 0x152   :  { %12 = sbr.rel (!%p10_p12) target bundleno = 3 (0x3), region = 119 }

// kernel: multicom_res50_forward.80
= control target key start
LH: loop header
LB: loop body
LE: loop exit
PB: predicated region body
PF: predicated region fallthrough
CT: control target
= control target key end

     0   :  { %s842_s12 = smov 0   ;;  %s844_s13 = smov 0   ;;  %s927_s0 = inlined_call_operand.vmem [shape: bf16[8,2304], index: 0, kind: input, shape index: {}]   ;;  %s928_s1 = inlined_call_operand.vmem [shape: bf16[2304,256], index: 1, kind: input, shape index: {}]   ;;  %s929_s2 = inlined_call_operand.vmem [shape: f32[1,256], index: 2, kind: input, shape index: {}]   ;;  %s930_s3 = inlined_call_operand.vmem [shape: f32[8,256], index: 3, kind: output, shape index: {}]  }
   0x1   :  { %s846_s14 = smov 0  }
   0x2 LB: > { %s25_s15 = sadd.s32 1, %s815_s13  ;;  %p675_p0 = scmp.ge.s32.totalorder %s819_s14, 1  ;;  %s819_s14 = sphi %s846_s14, %s13_s14   ;;  %s815_s13 = sphi %s844_s13, %s932_s13   ;;  %s811_s12 = sphi %s842_s12, %s931_s12  }
   0x3   : > { %p26_p1 = scmp.ge.s32.totalorder %s25_s15, 9  ;;  %p194_p2 = scmp.lt.s32.totalorder %s819_s14, 10 }
   0x5   : > { %s934_s15 = smov (%p26_p1, %s25_s15), 0  ;;  %p195_p3 = pnand %p675_p0, %p194_p2 }
   0x6   : > { %s676_s16 = sshll.u32 (!%p195_p3), %s811_s12, 1  ;;  %s678_s17 = sshll.u32 (!%p195_p3), %s811_s12, 5 }
   0x7   : > { %198 = sbr.rel (%p195_p3) target bundleno = 317 (0x13d), region = 32  ;;  %p243_p4 = scmp.lt.s32.totalorder (!%p195_p3), %s676_s16, 17 }
   0x8   : > { %p252_p5 = scmp.lt.s32.totalorder (!%p195_p3), %s678_s17, 287  ;;  %p681_p6 = scmp.ne.s32.totalorder (!%p195_p3), %s811_s12, 0 }
   0xe   : > { %s936_s16 = smov (!%p243_p4, %s676_s16), 17  ;;  %s938_s17 = smov (!%p252_p5, %s678_s17), 287 }
   0xf   : > { %s677_s18 = sshll.u32 %s936_s16, 2  ;;  %s721_s22 = sshll.u32 %s938_s17, 3  ;;  %v821_v0 = vmov (!%p681_p6), 0.0  }
  0x10   : > { %s867_s21 = scalar_lea.vmem %s927_s0, %s677_s18  ;;  %s872_s25 = scalar_lea.vmem %s928_s1, %s721_s22  ;;  %281 = vst [vmem:[#allocation2] sm:$0xff] (!%p681_p6), %v821_v0  ;;  %282 = vst [vmem:[#allocation2 + $0x8] sm:$0xff] (!%p681_p6), %v821_v0 }
  0x11   : > { %280 = sbr.rel (%p681_p6) target bundleno = 24 (0x18), region = 36 }
  0x18 PF: > { %v747_v1 = vld [vmem:[%s872_s25 + $0x4] ss:$8 sps:$4 sm:$0xff]   ;;  %v749_v2 = vld [vmem:[%s872_s25] ss:$8 sps:$4 sm:$0xff]   ;;  %v750_v3 = vld [vmem:[%s872_s25 + $0x14] ss:$8 sps:$4 sm:$0xff]  }
  0x19   : > { %485 = vmatprep.subr.bf16.mxu0 %v747_v1  ;;  %v752_v4 = vld [vmem:[%s872_s25 + $0x10] ss:$8 sps:$4 sm:$0xff]   ;;  %v753_v5 = vld [vmem:[%s872_s25 + $0x24] ss:$8 sps:$4 sm:$0xff]   ;;  %v755_v6 = vld [vmem:[%s872_s25 + $0x20] ss:$8 sps:$4 sm:$0xff]  }
  0x1a   : > { %486 = vmatpush1.bf16.msra.mxu0 %v749_v2  ;;  %v756_v7 = vld [vmem:[%s872_s25 + $0x34] ss:$8 sps:$4 sm:$0xff]   ;;  %v758_v8 = vld [vmem:[%s872_s25 + $0x30] ss:$8 sps:$4 sm:$0xff]   ;;  %v759_v9 = vld [vmem:[%s872_s25 + $0x44] ss:$8 sps:$4 sm:$0xff]  }
  0x1b   : > { %487 = vmatprep.subr.bf16.mxu0 %v750_v3  ;;  %v761_v10 = vld [vmem:[%s872_s25 + $0x40] ss:$8 sps:$4 sm:$0xff]   ;;  %v762_v11 = vld [vmem:[%s872_s25 + $0x54] ss:$8 sps:$4 sm:$0xff]   ;;  %v764_v12 = vld [vmem:[%s872_s25 + $0x50] ss:$8 sps:$4 sm:$0xff]  }
  0x1c   : > { %v765_v13 = vld [vmem:[%s872_s25 + $0x64] ss:$8 sps:$4 sm:$0xff]   ;;  %v767_v16 = vld [vmem:[%s872_s25 + $0x60] ss:$8 sps:$4 sm:$0xff]   ;;  %v768_v17 = vld [vmem:[%s872_s25 + $0x74] ss:$8 sps:$4 sm:$0xff]  }
  0x1d   : > { %v285_v14 = vld [vmem:[%s867_s21] sm:$0xff]  ;;  %v770_v18 = vld [vmem:[%s872_s25 + $0x70] ss:$8 sps:$4 sm:$0xff]   ;;  %v774_v21 = vld [vmem:[%s872_s25 + $0x94] ss:$8 sps:$4 sm:$0xff]   ;;  %p716_p7 = scmp.ne.s32.totalorder %s811_s12, 8 }
  0x1e   : > { %488 = vmatpush1.bf16.msra.mxu0 %v752_v4  ;;  %v683_v15 = vcombine.high %v285_v14, %v285_v14  ;;  %v771_v19 = vld [vmem:[%s872_s25 + $0x84] ss:$8 sps:$4 sm:$0xff]   ;;  %v773_v20 = vld [vmem:[%s872_s25 + $0x80] ss:$8 sps:$4 sm:$0xff]   ;;  %v776_v22 = vld [vmem:[%s872_s25 + $0x90] ss:$8 sps:$4 sm:$0xff]   ;;  %v682_v35 = vcombine.low %v285_v14, %v285_v14  ;;  %v538_v44 = vlaneseq (!%p716_p7) }
  0x1f   : > { %489 = vmatprep.subr.bf16.mxu0 %v753_v5  ;;  %v777_v23 = vld [vmem:[%s872_s25 + $0xa4] ss:$8 sps:$4 sm:$0xff]   ;;  %v779_v24 = vld [vmem:[%s872_s25 + $0xa0] ss:$8 sps:$4 sm:$0xff]   ;;  %v780_v25 = vld [vmem:[%s872_s25 + $0xb4] ss:$8 sps:$4 sm:$0xff]  }
  0x20   : > { %517 = vmatprep.mubr.bf16.mxu0 %v683_v15  ;;  %v782_v26 = vld [vmem:[%s872_s25 + $0xb0] ss:$8 sps:$4 sm:$0xff]   ;;  %v783_v27 = vld [vmem:[%s872_s25 + $0xc4] ss:$8 sps:$4 sm:$0xff]   ;;  %v785_v28 = vld [vmem:[%s872_s25 + $0xc0] ss:$8 sps:$4 sm:$0xff]  }
  0x21   : > { %v786_v29 = vld [vmem:[%s872_s25 + $0xd4] ss:$8 sps:$4 sm:$0xff]   ;;  %v788_v30 = vld [vmem:[%s872_s25 + $0xd0] ss:$8 sps:$4 sm:$0xff]   ;;  %v789_v31 = vld [vmem:[%s872_s25 + $0xe4] ss:$8 sps:$4 sm:$0xff]  }
  0x22   : > { %490 = vmatpush1.bf16.msra.mxu0 %v755_v6  ;;  %v791_v32 = vld [vmem:[%s872_s25 + $0xe0] ss:$8 sps:$4 sm:$0xff]   ;;  %v792_v33 = vld [vmem:[%s872_s25 + $0xf4] ss:$8 sps:$4 sm:$0xff]   ;;  %v794_v34 = vld [vmem:[%s872_s25 + $0xf0] ss:$8 sps:$4 sm:$0xff]  }
  0x23   : > { %491 = vmatprep.subr.bf16.mxu0 %v756_v7  ;;  %v283_v36 = vld [vmem:[#allocation2] sm:$0xff]  ;;  %v284_v37 = vld [vmem:[#allocation2 + $0x8] sm:$0xff]  ;;  %v539_v45 = vshrl.u32 (!%p716_p7), %v538_v44, 7 }
  0x24   : > { %v536_v46 = vld [vmem:[%s929_s2] sm:$0x3] (!%p716_p7) }
  0x25   : > { %v540_v47 = vsub.s32 (!%p716_p7), 0, %v539_v45  ;;  %v544_v48 = vsub.s32 (!%p716_p7), 1, %v539_v45 }
  0x26   : > { %492 = vmatpush1.bf16.msra.mxu0 %v758_v8 }
  0x27   : > { %493 = vmatprep.subr.bf16.mxu0 %v759_v9  ;;  %v541_v51 = vrot.slane (!%p716_p7), %v536_v46, %v540_v47  ;;  %v545_v52 = vrot.slane (!%p716_p7), %v536_v46, %v544_v48 }
  0x2a   : > { %494 = vmatpush1.bf16.msra.mxu0 %v761_v10 }
  0x2b   : > { %495 = vmatprep.subr.bf16.mxu0 %v762_v11 }
  0x2e   : > { %496 = vmatpush1.bf16.msra.mxu0 %v764_v12 }
  0x2f   : > { %497 = vmatprep.subr.bf16.mxu0 %v765_v13 }
  0x32   : > { %498 = vmatpush1.bf16.msra.mxu0 %v767_v16 }
  0x33   : > { %499 = vmatprep.subr.bf16.mxu0 %v768_v17 }
  0x36   : > { %500 = vmatpush1.bf16.msra.mxu0 %v770_v18 }
  0x37   : > { %501 = vmatprep.subr.bf16.mxu0 %v771_v19 }
  0x3a   : > { %502 = vmatpush1.bf16.msra.mxu0 %v773_v20 }
  0x3b   : > { %503 = vmatprep.subr.bf16.mxu0 %v774_v21 }
  0x3e   : > { %504 = vmatpush1.bf16.msra.mxu0 %v776_v22 }
  0x3f   : > { %505 = vmatprep.subr.bf16.mxu0 %v777_v23 }
  0x42   : > { %506 = vmatpush1.bf16.msra.mxu0 %v779_v24 }
  0x43   : > { %507 = vmatprep.subr.bf16.mxu0 %v780_v25 }
  0x46   : > { %508 = vmatpush1.bf16.msra.mxu0 %v782_v26 }
  0x47   : > { %509 = vmatprep.subr.bf16.mxu0 %v783_v27 }
  0x4a   : > { %510 = vmatpush1.bf16.msra.mxu0 %v785_v28 }
  0x4b   : > { %511 = vmatprep.subr.bf16.mxu0 %v786_v29 }
  0x4e   : > { %512 = vmatpush1.bf16.msra.mxu0 %v788_v30 }
  0x4f   : > { %513 = vmatprep.subr.bf16.mxu0 %v789_v31 }
  0x52   : > { %514 = vmatpush1.bf16.msra.mxu0 %v791_v32 }
  0x53   : > { %515 = vmatprep.subr.bf16.mxu0 %v792_v33 }
  0x56   : > { %516 = vmatpush1.bf16.msra.mxu0 %v794_v34 }
  0x59   : > { %518 = vmatmul.mubr.bf16.vlgmr.msra.gmra.mrb[0].mxu0 %v682_v35 }
 0x12a   : > { %533 = sbr.rel (%p716_p7) target bundleno = 317 (0x13d), region = 40 }
 0x12c   : > { %v519_v38 = vpop.f32.mrb[0].mxu0 }
 0x12d   : > { %v526_v39 = vadd.f32 %v519_v38, %v283_v36  ;;  %v521_v40 = vpop.f32.mrb[1].mxu0 }
 0x12e   : > { %v527_v41 = vadd.f32 %v521_v40, %v284_v37  ;;  %v523_v42 = vpop.f32.mrb[2].mxu0 }
 0x12f   : > { %528 = vst [vmem:[#allocation2] sm:$0xff] %v526_v39  ;;  %v524_v43 = vpop.f32.mrb[3].mxu0 }
 0x130   : > { %529 = vst [vmem:[#allocation2 + $0x8] sm:$0xff] %v527_v41 }
 0x136   : > { %v534_v49 = vld [vmem:[#allocation2] sm:$0xff] }
 0x137   : > { %v535_v50 = vld [vmem:[#allocation2 + $0x8] sm:$0xff]  ;;  %v548_v53 = vadd.f32 %v541_v51, %v534_v49 }
 0x138   : > { %v549_v54 = vadd.f32 %v545_v52, %v535_v50 }
 0x139   : > { %v550_v55 = vmax.f32 %v548_v53, 0.0 }
 0x13a   : > { %v551_v56 = vmax.f32 %v549_v54, 0.0 }
 0x13b   : > { %552 = vst [vmem:[%s930_s3] sm:$0xff] %v550_v55 }
 0x13c   : > { %553 = vst [vmem:[%s930_s3 + $0x8] sm:$0xff] %v551_v56 }
 0x13d PF: > { %s13_s14 = sadd.s32 1, %s819_s14   ;;  %s931_s12 = smov %s815_s13 }
 0x13e   : > { %p10_p8 = scmp.ge.s32.totalorder %s13_s14, 11   ;;  %s932_s13 = smov %s934_s15 }
 0x140   :  { %12 = sbr.rel (!%p10_p8) target bundleno = 2 (0x2), region = 76 }

// kernel: multicom_res50_forward.78
= control target key start
LH: loop header
LB: loop body
LE: loop exit
PB: predicated region body
PF: predicated region fallthrough
CT: control target
= control target key end

     0   :  { %s1059_s12 = smov 0   ;;  %s1061_s13 = smov 0   ;;  %s1274_s0 = inlined_call_operand.vmem [shape: bf16[8,512], index: 0, kind: input, shape index: {}]   ;;  %s1275_s1 = inlined_call_operand.vmem [shape: bf16[512,1024], index: 1, kind: input, shape index: {}]   ;;  %s1276_s2 = inlined_call_operand.vmem [shape: f32[1,1024], index: 2, kind: input, shape index: {}]   ;;  %s1277_s3 = inlined_call_operand.vmem [shape: f32[8,1024], index: 3, kind: output, shape index: {}]  }
   0x1   :  { %s1063_s14 = smov 0   ;;  %s1065_s15 = smov 0  }
   0x2   :  { %s1067_s16 = smov 0   ;;  %s1069_s17 = smov 0  }
   0x3   :  { %s1071_s18 = smov 0  }
   0x4 LB: > { %s25_s19 = sadd.s32 1, %s1028_s16  ;;  %s28_s20 = sadd.s32 1, %s1032_s17  ;;  %s1036_s18 = sphi %s1071_s18, %s13_s18   ;;  %s1032_s17 = sphi %s1069_s17, %s1283_s17   ;;  %s1028_s16 = sphi %s1067_s16, %s1282_s16   ;;  %s1024_s15 = sphi %s1065_s15, %s1281_s15   ;;  %s1020_s14 = sphi %s1063_s14, %s1280_s14   ;;  %s1016_s13 = sphi %s1061_s13, %s1279_s13   ;;  %s1012_s12 = sphi %s1059_s12, %s1278_s12  }
   0x5   : > { %p26_p0 = scmp.ge.s32.totalorder %s25_s19, 2  ;;  %p76_p1 = scmp.ne.s32.totalorder %s1016_s13, %s1012_s12 }
   0x6   : > { %p77_p2 = scmp.eq.s32.totalorder %s1036_s18, 0  ;;  %s69_s24 = sadd.s32 1, %s1016_s13 }
   0x7   : > { %s1285_s19 = smov (%p26_p0, %s25_s19), 0  ;;  %s1287_s20 = smov (!%p26_p0, %s28_s20), %s1032_s17 }
   0x8   : > { %p78_p3 = por %p77_p2, %p76_p1  ;;  %p30_p4 = scmp.ge.s32.totalorder %s1287_s20, 4 }
   0x9   : > { %s64_s21 = ssub.s32 %s1028_s16, %s1285_s19  ;;  %p823_p6 = scmp.ge.s32.totalorder %s1036_s18, 8 }
   0xa   : > { %s1289_s20 = smov (%p30_p4, %s1287_s20), 0 }
   0xb   : > { %s65_s22 = ssub.s32 %s1032_s17, %s1289_s20  ;;  %156 = sbr.rel (%p823_p6) target bundleno = 57 (0x39), region = 16 }
   0xc   : > { %s66_s23 = sor.u32 %s65_s22, %s64_s21 }
   0xd   : > { %p67_p5 = scmp.eq.s32.totalorder %s66_s23, 0 }
   0xf   : > { %s1110_s25 = scalar_select %p67_p5, %s1016_s13, %s69_s24  }
  0x12   : > { %172 = sbr.rel (!%p78_p3) target bundleno = 57 (0x39), region = 24  ;;  %s174_s26 = sand.u32 (%p78_p3), 1, %s1016_s13  }
  0x13   : > { %s826_s27 = sshll.u32 (%p78_p3), %s1032_s17, 1  ;;  %s824_s28 = sshll.u32 (%p78_p3), %s174_s26, 8 }
  0x14   : > { %s874_s29 = sshll.u32 (%p78_p3), %s1028_s16, 8  ;;  %s1124_s8 = scalar_lea.vmem (%p78_p3), [#allocation3], %s824_s28 }
  0x15   : > { %s180_s30 = sadd.s32 (%p78_p3), %s874_s29, %s826_s27 }
  0x16   : > { %s828_s4 = sshll.u32 (%p78_p3), %s180_s30, 2 }
  0x17   : > { %s1119_s7 = scalar_lea.vmem (%p78_p3), %s1275_s1, %s828_s4 }
  0x18   : > { %v272_v0 = vld [vmem:[%s1119_s7] sm:$0xff] (%p78_p3) }
  0x19   : > { %v274_v1 = vld [vmem:[%s1119_s7 + $0x20] sm:$0xff]  ;;  %273 = vst [vmem:[%s1124_s8] sm:$0xff] %v272_v0 }
  0x1a   : > { %v276_v2 = vld [vmem:[%s1119_s7 + $0x40] sm:$0xff]  ;;  %275 = vst [vmem:[%s1124_s8 + $0x8] sm:$0xff] %v274_v1 }
  0x1b   : > { %277 = vst [vmem:[%s1124_s8 + $0x10] sm:$0xff] %v276_v2  ;;  %v278_v3 = vld [vmem:[%s1119_s7 + $0x60] sm:$0xff] }
  0x1c   : > { %v280_v4 = vld [vmem:[%s1119_s7 + $0x80] sm:$0xff]  ;;  %279 = vst [vmem:[%s1124_s8 + $0x18] sm:$0xff] %v278_v3 }
  0x1d   : > { %v282_v5 = vld [vmem:[%s1119_s7 + $0xa0] sm:$0xff]  ;;  %281 = vst [vmem:[%s1124_s8 + $0x20] sm:$0xff] %v280_v4 }
  0x1e   : > { %283 = vst [vmem:[%s1124_s8 + $0x28] sm:$0xff] %v282_v5  ;;  %v284_v6 = vld [vmem:[%s1119_s7 + $0xc0] sm:$0xff] }
  0x1f   : > { %v286_v7 = vld [vmem:[%s1119_s7 + $0xe0] sm:$0xff]  ;;  %285 = vst [vmem:[%s1124_s8 + $0x30] sm:$0xff] %v284_v6 }
  0x20   : > { %v288_v8 = vld [vmem:[%s1119_s7 + $0x100] sm:$0xff]  ;;  %287 = vst [vmem:[%s1124_s8 + $0x38] sm:$0xff] %v286_v7 }
  0x21   : > { %289 = vst [vmem:[%s1124_s8 + $0x40] sm:$0xff] %v288_v8  ;;  %v290_v9 = vld [vmem:[%s1119_s7 + $0x120] sm:$0xff] }
  0x22   : > { %v292_v10 = vld [vmem:[%s1119_s7 + $0x140] sm:$0xff]  ;;  %291 = vst [vmem:[%s1124_s8 + $0x48] sm:$0xff] %v290_v9 }
  0x23   : > { %v294_v11 = vld [vmem:[%s1119_s7 + $0x160] sm:$0xff]  ;;  %293 = vst [vmem:[%s1124_s8 + $0x50] sm:$0xff] %v292_v10 }
  0x24   : > { %295 = vst [vmem:[%s1124_s8 + $0x58] sm:$0xff] %v294_v11  ;;  %v296_v12 = vld [vmem:[%s1119_s7 + $0x180] sm:$0xff] }
  0x25   : > { %v298_v13 = vld [vmem:[%s1119_s7 + $0x1a0] sm:$0xff]  ;;  %297 = vst [vmem:[%s1124_s8 + $0x60] sm:$0xff] %v296_v12 }
  0x26   : > { %v300_v14 = vld [vmem:[%s1119_s7 + $0x1c0] sm:$0xff]  ;;  %299 = vst [vmem:[%s1124_s8 + $0x68] sm:$0xff] %v298_v13 }
  0x27   : > { %301 = vst [vmem:[%s1124_s8 + $0x70] sm:$0xff] %v300_v14  ;;  %v302_v15 = vld [vmem:[%s1119_s7 + $0x1e0] sm:$0xff] }
  0x28   : > { %v304_v16 = vld [vmem:[%s1119_s7 + $0x200] sm:$0xff]  ;;  %303 = vst [vmem:[%s1124_s8 + $0x78] sm:$0xff] %v302_v15 }
  0x29   : > { %v306_v17 = vld [vmem:[%s1119_s7 + $0x220] sm:$0xff]  ;;  %305 = vst [vmem:[%s1124_s8 + $0x80] sm:$0xff] %v304_v16 }
  0x2a   : > { %307 = vst [vmem:[%s1124_s8 + $0x88] sm:$0xff] %v306_v17  ;;  %v308_v18 = vld [vmem:[%s1119_s7 + $0x240] sm:$0xff] }
  0x2b   : > { %v310_v19 = vld [vmem:[%s1119_s7 + $0x260] sm:$0xff]  ;;  %309 = vst [vmem:[%s1124_s8 + $0x90] sm:$0xff] %v308_v18 }
  0x2c   : > { %v312_v20 = vld [vmem:[%s1119_s7 + $0x280] sm:$0xff]  ;;  %311 = vst [vmem:[%s1124_s8 + $0x98] sm:$0xff] %v310_v19 }
  0x2d   : > { %313 = vst [vmem:[%s1124_s8 + $0xa0] sm:$0xff] %v312_v20  ;;  %v314_v21 = vld [vmem:[%s1119_s7 + $0x2a0] sm:$0xff] }
  0x2e   : > { %v316_v22 = vld [vmem:[%s1119_s7 + $0x2c0] sm:$0xff]  ;;  %315 = vst [vmem:[%s1124_s8 + $0xa8] sm:$0xff] %v314_v21 }
  0x2f   : > { %v318_v23 = vld [vmem:[%s1119_s7 + $0x2e0] sm:$0xff]  ;;  %317 = vst [vmem:[%s1124_s8 + $0xb0] sm:$0xff] %v316_v22 }
  0x30   : > { %319 = vst [vmem:[%s1124_s8 + $0xb8] sm:$0xff] %v318_v23  ;;  %v320_v24 = vld [vmem:[%s1119_s7 + $0x300] sm:$0xff] }
  0x31   : > { %v322_v25 = vld [vmem:[%s1119_s7 + $0x320] sm:$0xff]  ;;  %321 = vst [vmem:[%s1124_s8 + $0xc0] sm:$0xff] %v320_v24 }
  0x32   : > { %v324_v26 = vld [vmem:[%s1119_s7 + $0x340] sm:$0xff]  ;;  %323 = vst [vmem:[%s1124_s8 + $0xc8] sm:$0xff] %v322_v25 }
  0x33   : > { %325 = vst [vmem:[%s1124_s8 + $0xd0] sm:$0xff] %v324_v26  ;;  %v326_v27 = vld [vmem:[%s1119_s7 + $0x360] sm:$0xff] }
  0x34   : > { %v328_v28 = vld [vmem:[%s1119_s7 + $0x380] sm:$0xff]  ;;  %327 = vst [vmem:[%s1124_s8 + $0xd8] sm:$0xff] %v326_v27 }
  0x35   : > { %v330_v29 = vld [vmem:[%s1119_s7 + $0x3a0] sm:$0xff]  ;;  %329 = vst [vmem:[%s1124_s8 + $0xe0] sm:$0xff] %v328_v28 }
  0x36   : > { %331 = vst [vmem:[%s1124_s8 + $0xe8] sm:$0xff] %v330_v29  ;;  %v332_v30 = vld [vmem:[%s1119_s7 + $0x3c0] sm:$0xff] }
  0x37   : > { %v334_v31 = vld [vmem:[%s1119_s7 + $0x3e0] sm:$0xff]  ;;  %333 = vst [vmem:[%s1124_s8 + $0xf0] sm:$0xff] %v332_v30 }
  0x38   : > { %335 = vst [vmem:[%s1124_s8 + $0xf8] sm:$0xff] %v334_v31 }
  0x39 PF: > { %p829_p7 = scmp.ge.s32.totalorder %s1036_s18, 1  ;;  %p348_p8 = scmp.lt.s32.totalorder %s1036_s18, 9 }
  0x3b   : > { %p349_p9 = pnand %p829_p7, %p348_p8 }
  0x3c   : > { %s355_s9 = sand.u32 (!%p349_p9), 1, %s1012_s12   ;;  %s831_s10 = sshll.u32 (!%p349_p9), %s1020_s14, 1 }
  0x3d   : > { %352 = sbr.rel (%p349_p9) target bundleno = 369 (0x171), region = 66  ;;  %s830_s11 = sshll.u32 (!%p349_p9), %s355_s9, 8 }
  0x3e   : > { %p398_p10 = scmp.lt.s32.totalorder (!%p349_p9), %s831_s10, 3  ;;  %s833_s21 = sshll.u32 (!%p349_p9), %s1024_s15, 1 }
  0x3f   : > { %p408_p11 = scmp.lt.s32.totalorder (!%p349_p9), %s833_s21, 7  ;;  %s1209_s5 = scalar_lea.vmem (!%p349_p9), [#allocation3], %s830_s11 }
  0x40   : > { %p836_p12 = scmp.ne.s32.totalorder (!%p349_p9), %s1020_s14, 0 }
  0x44   : > { %s1291_s10 = smov (!%p398_p10, %s831_s10), 3  ;;  %s1293_s21 = smov (!%p408_p11, %s833_s21), 7 }
  0x45   : > { %s832_s22 = sshll.u32 %s1291_s10, 2  ;;  %s410_s12 = scalar_lea.vmem %s1276_s2, %s1293_s21  ;;  %v1038_v32 = vmov (!%p836_p12), 0.0  }
  0x46   : > { %s1195_s26 = scalar_lea.vmem %s1274_s0, %s832_s22  ;;  %s835_s29 = sshll.u32 %s1293_s21, 3  ;;  %426 = vst [vmem:[#allocation2] sm:$0xff] (!%p836_p12), %v1038_v32  ;;  %427 = vst [vmem:[#allocation2 + $0x8] sm:$0xff] (!%p836_p12), %v1038_v32 }
  0x47   : > { %s1207_s15 = scalar_lea.vmem %s1277_s3, %s835_s29  ;;  %425 = sbr.rel (%p836_p12) target bundleno = 78 (0x4e), region = 74 }
  0x4e PF: > { %v932_v33 = vld [vmem:[%s1209_s5 + $0x4] ss:$8 sps:$4 sm:$0xff]   ;;  %v934_v34 = vld [vmem:[%s1209_s5] ss:$8 sps:$4 sm:$0xff]   ;;  %v935_v35 = vld [vmem:[%s1209_s5 + $0x14] ss:$8 sps:$4 sm:$0xff]  }
  0x4f   : > { %630 = vmatprep.subr.bf16.mxu0 %v932_v33  ;;  %v937_v36 = vld [vmem:[%s1209_s5 + $0x10] ss:$8 sps:$4 sm:$0xff]   ;;  %v938_v37 = vld [vmem:[%s1209_s5 + $0x24] ss:$8 sps:$4 sm:$0xff]   ;;  %v940_v38 = vld [vmem:[%s1209_s5 + $0x20] ss:$8 sps:$4 sm:$0xff]  }
  0x50   : > { %631 = vmatpush1.bf16.msra.mxu0 %v934_v34  ;;  %v941_v39 = vld [vmem:[%s1209_s5 + $0x34] ss:$8 sps:$4 sm:$0xff]   ;;  %v943_v40 = vld [vmem:[%s1209_s5 + $0x30] ss:$8 sps:$4 sm:$0xff]   ;;  %v944_v41 = vld [vmem:[%s1209_s5 + $0x44] ss:$8 sps:$4 sm:$0xff]  }
  0x51   : > { %632 = vmatprep.subr.bf16.mxu0 %v935_v35  ;;  %v946_v42 = vld [vmem:[%s1209_s5 + $0x40] ss:$8 sps:$4 sm:$0xff]   ;;  %v947_v43 = vld [vmem:[%s1209_s5 + $0x54] ss:$8 sps:$4 sm:$0xff]   ;;  %v949_v44 = vld [vmem:[%s1209_s5 + $0x50] ss:$8 sps:$4 sm:$0xff]  }
  0x52   : > { %v950_v45 = vld [vmem:[%s1209_s5 + $0x64] ss:$8 sps:$4 sm:$0xff]   ;;  %v430_v46 = vld [vmem:[%s1195_s26] sm:$0xff]  ;;  %v952_v48 = vld [vmem:[%s1209_s5 + $0x60] ss:$8 sps:$4 sm:$0xff]   ;;  %p871_p13 = scmp.ne.s32.totalorder %s1020_s14, 1 }
  0x53   : > { %v838_v47 = vcombine.high %v430_v46, %v430_v46  ;;  %v953_v49 = vld [vmem:[%s1209_s5 + $0x74] ss:$8 sps:$4 sm:$0xff]   ;;  %v955_v50 = vld [vmem:[%s1209_s5 + $0x70] ss:$8 sps:$4 sm:$0xff]   ;;  %v956_v51 = vld [vmem:[%s1209_s5 + $0x84] ss:$8 sps:$4 sm:$0xff]   ;;  %v837_v3 = vcombine.low %v430_v46, %v430_v46  ;;  %v683_v12 = vlaneseq (!%p871_p13) }
  0x54   : > { %633 = vmatpush1.bf16.msra.mxu0 %v937_v36  ;;  %v958_v52 = vld [vmem:[%s1209_s5 + $0x80] ss:$8 sps:$4 sm:$0xff]   ;;  %v959_v53 = vld [vmem:[%s1209_s5 + $0x94] ss:$8 sps:$4 sm:$0xff]   ;;  %v961_v54 = vld [vmem:[%s1209_s5 + $0x90] ss:$8 sps:$4 sm:$0xff]  }
  0x55   : > { %634 = vmatprep.subr.bf16.mxu0 %v938_v37  ;;  %662 = vmatprep.mubr.bf16.mxu0 %v838_v47  ;;  %v962_v55 = vld [vmem:[%s1209_s5 + $0xa4] ss:$8 sps:$4 sm:$0xff]   ;;  %v964_v56 = vld [vmem:[%s1209_s5 + $0xa0] ss:$8 sps:$4 sm:$0xff]   ;;  %v965_v57 = vld [vmem:[%s1209_s5 + $0xb4] ss:$8 sps:$4 sm:$0xff]  }
  0x56   : > { %v967_v58 = vld [vmem:[%s1209_s5 + $0xb0] ss:$8 sps:$4 sm:$0xff]   ;;  %v968_v59 = vld [vmem:[%s1209_s5 + $0xc4] ss:$8 sps:$4 sm:$0xff]   ;;  %v970_v60 = vld [vmem:[%s1209_s5 + $0xc0] ss:$8 sps:$4 sm:$0xff]  }
  0x57   : > { %v971_v61 = vld [vmem:[%s1209_s5 + $0xd4] ss:$8 sps:$4 sm:$0xff]   ;;  %v973_v62 = vld [vmem:[%s1209_s5 + $0xd0] ss:$8 sps:$4 sm:$0xff]   ;;  %v974_v63 = vld [vmem:[%s1209_s5 + $0xe4] ss:$8 sps:$4 sm:$0xff]  }
  0x58   : > { %635 = vmatpush1.bf16.msra.mxu0 %v940_v38  ;;  %v976_v0 = vld [vmem:[%s1209_s5 + $0xe0] ss:$8 sps:$4 sm:$0xff]   ;;  %v977_v1 = vld [vmem:[%s1209_s5 + $0xf4] ss:$8 sps:$4 sm:$0xff]   ;;  %v979_v2 = vld [vmem:[%s1209_s5 + $0xf0] ss:$8 sps:$4 sm:$0xff]  }
  0x59   : > { %636 = vmatprep.subr.bf16.mxu0 %v941_v39  ;;  %v428_v4 = vld [vmem:[#allocation2] sm:$0xff]  ;;  %v429_v5 = vld [vmem:[#allocation2 + $0x8] sm:$0xff]  ;;  %v684_v13 = vshrl.u32 (!%p871_p13), %v683_v12, 7 }
  0x5a   : > { %v681_v14 = vld [vmem:[%s410_s12] sm:$0x3] (!%p871_p13) }
  0x5b   : > { %v685_v15 = vsub.s32 (!%p871_p13), 0, %v684_v13  ;;  %v689_v16 = vsub.s32 (!%p871_p13), 1, %v684_v13 }
  0x5c   : > { %637 = vmatpush1.bf16.msra.mxu0 %v943_v40 }
  0x5d   : > { %638 = vmatprep.subr.bf16.mxu0 %v944_v41  ;;  %v686_v19 = vrot.slane (!%p871_p13), %v681_v14, %v685_v15  ;;  %v690_v20 = vrot.slane (!%p871_p13), %v681_v14, %v689_v16 }
  0x60   : > { %639 = vmatpush1.bf16.msra.mxu0 %v946_v42 }
  0x61   : > { %640 = vmatprep.subr.bf16.mxu0 %v947_v43 }
  0x64   : > { %641 = vmatpush1.bf16.msra.mxu0 %v949_v44 }
  0x65   : > { %642 = vmatprep.subr.bf16.mxu0 %v950_v45 }
  0x68   : > { %643 = vmatpush1.bf16.msra.mxu0 %v952_v48 }
  0x69   : > { %644 = vmatprep.subr.bf16.mxu0 %v953_v49 }
  0x6c   : > { %645 = vmatpush1.bf16.msra.mxu0 %v955_v50 }
  0x6d   : > { %646 = vmatprep.subr.bf16.mxu0 %v956_v51 }
  0x70   : > { %647 = vmatpush1.bf16.msra.mxu0 %v958_v52 }
  0x71   : > { %648 = vmatprep.subr.bf16.mxu0 %v959_v53 }
  0x74   : > { %649 = vmatpush1.bf16.msra.mxu0 %v961_v54 }
  0x75   : > { %650 = vmatprep.subr.bf16.mxu0 %v962_v55 }
  0x78   : > { %651 = vmatpush1.bf16.msra.mxu0 %v964_v56 }
  0x79   : > { %652 = vmatprep.subr.bf16.mxu0 %v965_v57 }
  0x7c   : > { %653 = vmatpush1.bf16.msra.mxu0 %v967_v58 }
  0x7d   : > { %654 = vmatprep.subr.bf16.mxu0 %v968_v59 }
  0x80   : > { %655 = vmatpush1.bf16.msra.mxu0 %v970_v60 }
  0x81   : > { %656 = vmatprep.subr.bf16.mxu0 %v971_v61 }
  0x84   : > { %657 = vmatpush1.bf16.msra.mxu0 %v973_v62 }
  0x85   : > { %658 = vmatprep.subr.bf16.mxu0 %v974_v63 }
  0x88   : > { %659 = vmatpush1.bf16.msra.mxu0 %v976_v0 }
  0x89   : > { %660 = vmatprep.subr.bf16.mxu0 %v977_v1 }
  0x8c   : > { %661 = vmatpush1.bf16.msra.mxu0 %v979_v2 }
  0x8f   : > { %663 = vmatmul.mubr.bf16.vlgmr.msra.gmra.mrb[0].mxu0 %v837_v3 }
 0x160   : > { %678 = sbr.rel (%p871_p13) target bundleno = 369 (0x171), region = 78 }
 0x162   : > { %v664_v6 = vpop.f32.mrb[0].mxu0 }
 0x163   : > { %v671_v7 = vadd.f32 %v664_v6, %v428_v4  ;;  %v666_v8 = vpop.f32.mrb[1].mxu0 }
 0x164   : > { %v672_v9 = vadd.f32 %v666_v8, %v429_v5  ;;  %v668_v10 = vpop.f32.mrb[2].mxu0 }
 0x165   : > { %673 = vst [vmem:[#allocation2] sm:$0xff] %v671_v7  ;;  %v669_v11 = vpop.f32.mrb[3].mxu0 }
 0x166   : > { %674 = vst [vmem:[#allocation2 + $0x8] sm:$0xff] %v672_v9 }
 0x16c   : > { %v679_v17 = vld [vmem:[#allocation2] sm:$0xff] }
 0x16d   : > { %v680_v18 = vld [vmem:[#allocation2 + $0x8] sm:$0xff]  ;;  %v693_v21 = vadd.f32 %v686_v19, %v679_v17 }
 0x16e   : > { %v694_v22 = vadd.f32 %v690_v20, %v680_v18 }
 0x16f   : > { %695 = vst [vmem:[%s1207_s15] sm:$0xff] %v693_v21 }
 0x170   : > { %696 = vst [vmem:[%s1207_s15 + $0x8] sm:$0xff] %v694_v22 }
 0x171 PF: > { %s13_s18 = sadd.s32 1, %s1036_s18   ;;  %s1278_s12 = smov %s1016_s13 }
 0x172   : > { %p10_p0 = scmp.ge.s32.totalorder %s13_s18, 10   ;;  %s1279_s13 = smov %s1110_s25 }
 0x173   : > { %s1280_s14 = smov %s1028_s16  ;;  %s1281_s15 = smov %s1032_s17 }
 0x174   : > { %s1282_s16 = smov %s1285_s19  ;;  %s1283_s17 = smov %s1289_s20 }
 0x175   :  { %12 = sbr.rel (!%p10_p0) target bundleno = 4 (0x4), region = 119 }

// kernel: multicom_res50_forward.81
= control target key start
LH: loop header
LB: loop body
LE: loop exit
PB: predicated region body
PF: predicated region fallthrough
CT: control target
= control target key end

     0   :  { %s1113_s15 = smov 0   ;;  %s1115_s16 = smov 0   ;;  %s1295_s0 = inlined_call_operand.vmem [shape: bf16[8,256], index: 0, kind: input, shape index: {}]   ;;  %s1296_s1 = inlined_call_operand.vmem [shape: bf16[256,1024], index: 1, kind: input, shape index: {}]   ;;  %s1297_s2 = inlined_call_operand.vmem [shape: f32[1,1024], index: 2, kind: input, shape index: {}]   ;;  %s1298_s3 = inlined_call_operand.vmem [shape: f32[8,1024], index: 3, kind: input, shape index: {}]   ;;  %s1299_s4 = inlined_call_operand.vmem [shape: f32[8,1024], index: 4, kind: output, shape index: {}]  }
   0x1   :  { %s1117_s17 = smov 0   ;;  %s1119_s18 = smov 0  }
   0x2   :  { %s1121_s19 = smov 0  }
   0x3 LB: > { %s29_s20 = sadd.s32 1, %s1082_s18  ;;  %p77_p1 = scmp.ne.s32.totalorder %s1074_s16, %s1070_s15  ;;  %s1086_s19 = sphi %s1121_s19, %s14_s19   ;;  %s1082_s18 = sphi %s1119_s18, %s1303_s18   ;;  %s1078_s17 = sphi %s1117_s17, %s1302_s17   ;;  %s1074_s16 = sphi %s1115_s16, %s1301_s16   ;;  %s1070_s15 = sphi %s1113_s15, %s1300_s15  }
   0x4   : > { %p31_p0 = scmp.ge.s32.totalorder %s29_s20, 4  ;;  %p78_p2 = scmp.eq.s32.totalorder %s1086_s19, 0 }
   0x5   : > { %s70_s22 = sadd.s32 1, %s1074_s16  ;;  %p910_p5 = scmp.ge.s32.totalorder %s1086_s19, 4 }
   0x6   : > { %s1305_s20 = smov (%p31_p0, %s29_s20), 0  ;;  %p79_p3 = por %p78_p2, %p77_p1 }
   0x7   : > { %s66_s21 = ssub.s32 %s1082_s18, %s1305_s20  ;;  %198 = sbr.rel (%p910_p5) target bundleno = 50 (0x32), region = 20 }
   0x8   : > { %p68_p4 = scmp.eq.s32.totalorder %s66_s21, 0 }
   0xa   : > { %s1148_s23 = scalar_select %p68_p4, %s1074_s16, %s70_s22  }
   0xe   : > { %201 = sbr.rel (!%p79_p3) target bundleno = 50 (0x32), region = 24  ;;  %s203_s24 = sand.u32 (%p79_p3), 1, %s1074_s16  }
   0xf   : > { %s957_s25 = sshll.u32 (%p79_p3), %s1082_s18, 3  ;;  %s911_s26 = sshll.u32 (%p79_p3), %s203_s24, 8 }
  0x10   : > { %s1156_s29 = scalar_lea.vmem (%p79_p3), %s1296_s1, %s957_s25  ;;  %s1161_s30 = scalar_lea.vmem (%p79_p3), [#allocation3], %s911_s26 }
  0x11   : > { %v301_v0 = vld [vmem:[%s1156_s29] sm:$0xff] (%p79_p3) }
  0x12   : > { %v303_v1 = vld [vmem:[%s1156_s29 + $0x20] sm:$0xff] (%p79_p3)  ;;  %302 = vst [vmem:[%s1161_s30] sm:$0xff] (%p79_p3), %v301_v0 }
  0x13   : > { %v305_v2 = vld [vmem:[%s1156_s29 + $0x40] sm:$0xff] (%p79_p3)  ;;  %304 = vst [vmem:[%s1161_s30 + $0x8] sm:$0xff] (%p79_p3), %v303_v1 }
  0x14   : > { %306 = vst [vmem:[%s1161_s30 + $0x10] sm:$0xff] (%p79_p3), %v305_v2  ;;  %v307_v3 = vld [vmem:[%s1156_s29 + $0x60] sm:$0xff] (%p79_p3) }
  0x15   : > { %v309_v4 = vld [vmem:[%s1156_s29 + $0x80] sm:$0xff]  ;;  %308 = vst [vmem:[%s1161_s30 + $0x18] sm:$0xff] %v307_v3 }
  0x16   : > { %v311_v5 = vld [vmem:[%s1156_s29 + $0xa0] sm:$0xff]  ;;  %310 = vst [vmem:[%s1161_s30 + $0x20] sm:$0xff] %v309_v4 }
  0x17   : > { %312 = vst [vmem:[%s1161_s30 + $0x28] sm:$0xff] %v311_v5  ;;  %v313_v6 = vld [vmem:[%s1156_s29 + $0xc0] sm:$0xff] }
  0x18   : > { %v315_v7 = vld [vmem:[%s1156_s29 + $0xe0] sm:$0xff]  ;;  %314 = vst [vmem:[%s1161_s30 + $0x30] sm:$0xff] %v313_v6 }
  0x19   : > { %v317_v8 = vld [vmem:[%s1156_s29 + $0x100] sm:$0xff]  ;;  %316 = vst [vmem:[%s1161_s30 + $0x38] sm:$0xff] %v315_v7 }
  0x1a   : > { %318 = vst [vmem:[%s1161_s30 + $0x40] sm:$0xff] %v317_v8  ;;  %v319_v9 = vld [vmem:[%s1156_s29 + $0x120] sm:$0xff] }
  0x1b   : > { %v321_v10 = vld [vmem:[%s1156_s29 + $0x140] sm:$0xff]  ;;  %320 = vst [vmem:[%s1161_s30 + $0x48] sm:$0xff] %v319_v9 }
  0x1c   : > { %v323_v11 = vld [vmem:[%s1156_s29 + $0x160] sm:$0xff]  ;;  %322 = vst [vmem:[%s1161_s30 + $0x50] sm:$0xff] %v321_v10 }
  0x1d   : > { %324 = vst [vmem:[%s1161_s30 + $0x58] sm:$0xff] %v323_v11  ;;  %v325_v12 = vld [vmem:[%s1156_s29 + $0x180] sm:$0xff] }
  0x1e   : > { %v327_v13 = vld [vmem:[%s1156_s29 + $0x1a0] sm:$0xff]  ;;  %326 = vst [vmem:[%s1161_s30 + $0x60] sm:$0xff] %v325_v12 }
  0x1f   : > { %v329_v14 = vld [vmem:[%s1156_s29 + $0x1c0] sm:$0xff]  ;;  %328 = vst [vmem:[%s1161_s30 + $0x68] sm:$0xff] %v327_v13 }
  0x20   : > { %330 = vst [vmem:[%s1161_s30 + $0x70] sm:$0xff] %v329_v14  ;;  %v331_v15 = vld [vmem:[%s1156_s29 + $0x1e0] sm:$0xff] }
  0x21   : > { %v333_v16 = vld [vmem:[%s1156_s29 + $0x200] sm:$0xff]  ;;  %332 = vst [vmem:[%s1161_s30 + $0x78] sm:$0xff] %v331_v15 }
  0x22   : > { %v335_v17 = vld [vmem:[%s1156_s29 + $0x220] sm:$0xff]  ;;  %334 = vst [vmem:[%s1161_s30 + $0x80] sm:$0xff] %v333_v16 }
  0x23   : > { %336 = vst [vmem:[%s1161_s30 + $0x88] sm:$0xff] %v335_v17  ;;  %v337_v18 = vld [vmem:[%s1156_s29 + $0x240] sm:$0xff] }
  0x24   : > { %v339_v19 = vld [vmem:[%s1156_s29 + $0x260] sm:$0xff]  ;;  %338 = vst [vmem:[%s1161_s30 + $0x90] sm:$0xff] %v337_v18 }
  0x25   : > { %v341_v20 = vld [vmem:[%s1156_s29 + $0x280] sm:$0xff]  ;;  %340 = vst [vmem:[%s1161_s30 + $0x98] sm:$0xff] %v339_v19 }
  0x26   : > { %342 = vst [vmem:[%s1161_s30 + $0xa0] sm:$0xff] %v341_v20  ;;  %v343_v21 = vld [vmem:[%s1156_s29 + $0x2a0] sm:$0xff] }
  0x27   : > { %v345_v22 = vld [vmem:[%s1156_s29 + $0x2c0] sm:$0xff]  ;;  %344 = vst [vmem:[%s1161_s30 + $0xa8] sm:$0xff] %v343_v21 }
  0x28   : > { %v347_v23 = vld [vmem:[%s1156_s29 + $0x2e0] sm:$0xff]  ;;  %346 = vst [vmem:[%s1161_s30 + $0xb0] sm:$0xff] %v345_v22 }
  0x29   : > { %348 = vst [vmem:[%s1161_s30 + $0xb8] sm:$0xff] %v347_v23  ;;  %v349_v24 = vld [vmem:[%s1156_s29 + $0x300] sm:$0xff] }
  0x2a   : > { %v351_v25 = vld [vmem:[%s1156_s29 + $0x320] sm:$0xff]  ;;  %350 = vst [vmem:[%s1161_s30 + $0xc0] sm:$0xff] %v349_v24 }
  0x2b   : > { %v353_v26 = vld [vmem:[%s1156_s29 + $0x340] sm:$0xff]  ;;  %352 = vst [vmem:[%s1161_s30 + $0xc8] sm:$0xff] %v351_v25 }
  0x2c   : > { %354 = vst [vmem:[%s1161_s30 + $0xd0] sm:$0xff] %v353_v26  ;;  %v355_v27 = vld [vmem:[%s1156_s29 + $0x360] sm:$0xff] }
  0x2d   : > { %v357_v28 = vld [vmem:[%s1156_s29 + $0x380] sm:$0xff]  ;;  %356 = vst [vmem:[%s1161_s30 + $0xd8] sm:$0xff] %v355_v27 }
  0x2e   : > { %v359_v29 = vld [vmem:[%s1156_s29 + $0x3a0] sm:$0xff]  ;;  %358 = vst [vmem:[%s1161_s30 + $0xe0] sm:$0xff] %v357_v28 }
  0x2f   : > { %360 = vst [vmem:[%s1161_s30 + $0xe8] sm:$0xff] %v359_v29  ;;  %v361_v30 = vld [vmem:[%s1156_s29 + $0x3c0] sm:$0xff] }
  0x30   : > { %v363_v31 = vld [vmem:[%s1156_s29 + $0x3e0] sm:$0xff]  ;;  %362 = vst [vmem:[%s1161_s30 + $0xf0] sm:$0xff] %v361_v30 }
  0x31   : > { %364 = vst [vmem:[%s1161_s30 + $0xf8] sm:$0xff] %v363_v31 }
  0x32 PF: > { %p914_p6 = scmp.ge.s32.totalorder %s1086_s19, 1  ;;  %p390_p7 = scmp.lt.s32.totalorder %s1086_s19, 5 }
  0x34   : > { %p391_p8 = pnand %p914_p6, %p390_p7 }
  0x35   : > { %s397_s5 = sand.u32 (!%p391_p8), 1, %s1070_s15   ;;  %v1230_v32 = vld [vmem:[%s1295_s0] sm:$0xff] (!%p391_p8)  ;;  %s916_s10 = sshll.u32 (!%p391_p8), %s1078_s17, 1  ;;  %v745_v3 = vlaneseq (!%p391_p8) }
  0x36   : > { %394 = sbr.rel (%p391_p8) target bundleno = 341 (0x155), region = 70  ;;  %s915_s8 = sshll.u32 (!%p391_p8), %s397_s5, 8  ;;  %v922_v33 = vcombine.high (!%p391_p8), %v1230_v32, %v1230_v32  ;;  %v921_v2 = vcombine.low (!%p391_p8), %v1230_v32, %v1230_v32 }
  0x37   : > { %s1234_s9 = scalar_lea.vmem (!%p391_p8), [#allocation3], %s915_s8  ;;  %p461_p9 = scmp.lt.s32.totalorder (!%p391_p8), %s916_s10, 7  ;;  %v746_v4 = vshrl.u32 (!%p391_p8), %v745_v3, 7 }
  0x38   : > { %v998_v34 = vld [vmem:[%s1234_s9 + $0x4] ss:$8 sps:$4 sm:$0xff] (!%p391_p8)   ;;  %725 = vmatprep.mubr.bf16.mxu0 (!%p391_p8), %v922_v33  ;;  %v1000_v35 = vld [vmem:[%s1234_s9] ss:$8 sps:$4 sm:$0xff] (!%p391_p8)   ;;  %v1001_v36 = vld [vmem:[%s1234_s9 + $0x14] ss:$8 sps:$4 sm:$0xff] (!%p391_p8)  }
  0x39   : > { %693 = vmatprep.subr.bf16.mxu0 (!%p391_p8), %v998_v34  ;;  %v1003_v37 = vld [vmem:[%s1234_s9 + $0x10] ss:$8 sps:$4 sm:$0xff] (!%p391_p8)   ;;  %v1004_v38 = vld [vmem:[%s1234_s9 + $0x24] ss:$8 sps:$4 sm:$0xff] (!%p391_p8)   ;;  %v1006_v39 = vld [vmem:[%s1234_s9 + $0x20] ss:$8 sps:$4 sm:$0xff] (!%p391_p8)  }
  0x3a   : > { %694 = vmatpush1.bf16.msra.mxu0 (!%p391_p8), %v1000_v35  ;;  %v1007_v40 = vld [vmem:[%s1234_s9 + $0x34] ss:$8 sps:$4 sm:$0xff] (!%p391_p8)   ;;  %v1009_v41 = vld [vmem:[%s1234_s9 + $0x30] ss:$8 sps:$4 sm:$0xff] (!%p391_p8)   ;;  %v1010_v42 = vld [vmem:[%s1234_s9 + $0x44] ss:$8 sps:$4 sm:$0xff] (!%p391_p8)  }
  0x3b   : > { %695 = vmatprep.subr.bf16.mxu0 (!%p391_p8), %v1001_v36  ;;  %v1012_v43 = vld [vmem:[%s1234_s9 + $0x40] ss:$8 sps:$4 sm:$0xff] (!%p391_p8)   ;;  %v1013_v44 = vld [vmem:[%s1234_s9 + $0x54] ss:$8 sps:$4 sm:$0xff] (!%p391_p8)   ;;  %v1015_v45 = vld [vmem:[%s1234_s9 + $0x50] ss:$8 sps:$4 sm:$0xff] (!%p391_p8)  }
  0x3c   : > { %v1016_v46 = vld [vmem:[%s1234_s9 + $0x64] ss:$8 sps:$4 sm:$0xff] (!%p391_p8)   ;;  %v1018_v47 = vld [vmem:[%s1234_s9 + $0x60] ss:$8 sps:$4 sm:$0xff] (!%p391_p8)   ;;  %v1019_v48 = vld [vmem:[%s1234_s9 + $0x74] ss:$8 sps:$4 sm:$0xff] (!%p391_p8)  }
  0x3d   : > { %v1021_v49 = vld [vmem:[%s1234_s9 + $0x70] ss:$8 sps:$4 sm:$0xff]   ;;  %v1022_v50 = vld [vmem:[%s1234_s9 + $0x84] ss:$8 sps:$4 sm:$0xff]   ;;  %v1024_v51 = vld [vmem:[%s1234_s9 + $0x80] ss:$8 sps:$4 sm:$0xff]  }
  0x3e   : > { %696 = vmatpush1.bf16.msra.mxu0 %v1003_v37  ;;  %v1025_v52 = vld [vmem:[%s1234_s9 + $0x94] ss:$8 sps:$4 sm:$0xff]   ;;  %v1027_v53 = vld [vmem:[%s1234_s9 + $0x90] ss:$8 sps:$4 sm:$0xff]   ;;  %v1028_v54 = vld [vmem:[%s1234_s9 + $0xa4] ss:$8 sps:$4 sm:$0xff]  }
  0x3f   : > { %697 = vmatprep.subr.bf16.mxu0 %v1004_v38  ;;  %v1030_v55 = vld [vmem:[%s1234_s9 + $0xa0] ss:$8 sps:$4 sm:$0xff]   ;;  %v1031_v56 = vld [vmem:[%s1234_s9 + $0xb4] ss:$8 sps:$4 sm:$0xff]   ;;  %v1033_v57 = vld [vmem:[%s1234_s9 + $0xb0] ss:$8 sps:$4 sm:$0xff]  }
  0x40   : > { %v1034_v58 = vld [vmem:[%s1234_s9 + $0xc4] ss:$8 sps:$4 sm:$0xff]   ;;  %v1036_v59 = vld [vmem:[%s1234_s9 + $0xc0] ss:$8 sps:$4 sm:$0xff]   ;;  %v1037_v60 = vld [vmem:[%s1234_s9 + $0xd4] ss:$8 sps:$4 sm:$0xff]  }
  0x41   : > { %v1039_v61 = vld [vmem:[%s1234_s9 + $0xd0] ss:$8 sps:$4 sm:$0xff]   ;;  %v1040_v62 = vld [vmem:[%s1234_s9 + $0xe4] ss:$8 sps:$4 sm:$0xff]   ;;  %v1042_v63 = vld [vmem:[%s1234_s9 + $0xe0] ss:$8 sps:$4 sm:$0xff]  }
  0x42   : > { %698 = vmatpush1.bf16.msra.mxu0 %v1006_v39  ;;  %v1043_v0 = vld [vmem:[%s1234_s9 + $0xf4] ss:$8 sps:$4 sm:$0xff]   ;;  %v1045_v1 = vld [vmem:[%s1234_s9 + $0xf0] ss:$8 sps:$4 sm:$0xff]   ;;  %s1307_s10 = smov (!%p461_p9, %s916_s10), 7  ;;  %v747_v5 = vsub.s32 0, %v746_v4 }
  0x43   : > { %699 = vmatprep.subr.bf16.mxu0 %v1007_v40  ;;  %s463_s13 = scalar_lea.vmem %s1297_s2, %s1307_s10  ;;  %s918_s14 = sshll.u32 %s1307_s10, 3  ;;  %v751_v7 = vsub.s32 1, %v746_v4 }
  0x44   : > { %v743_v6 = vld [vmem:[%s463_s13] sm:$0x3]  ;;  %s473_s22 = scalar_lea.vmem %s1298_s3, %s918_s14  ;;  %s483_s25 = scalar_lea.vmem %s1299_s4, %s918_s14 }
  0x45   : > { %v748_v8 = vrot.slane %v743_v6, %v747_v5  ;;  %v752_v9 = vrot.slane %v743_v6, %v751_v7  ;;  %v757_v11 = vld [vmem:[%s473_s22] sm:$0xff]  ;;  %v758_v14 = vld [vmem:[%s473_s22 + $0x8] sm:$0xff] }
  0x46   : > { %700 = vmatpush1.bf16.msra.mxu0 %v1009_v41 }
  0x47   : > { %701 = vmatprep.subr.bf16.mxu0 %v1010_v42 }
  0x4a   : > { %702 = vmatpush1.bf16.msra.mxu0 %v1012_v43 }
  0x4b   : > { %703 = vmatprep.subr.bf16.mxu0 %v1013_v44 }
  0x4e   : > { %704 = vmatpush1.bf16.msra.mxu0 %v1015_v45 }
  0x4f   : > { %705 = vmatprep.subr.bf16.mxu0 %v1016_v46 }
  0x52   : > { %706 = vmatpush1.bf16.msra.mxu0 %v1018_v47 }
  0x53   : > { %707 = vmatprep.subr.bf16.mxu0 %v1019_v48 }
  0x56   : > { %708 = vmatpush1.bf16.msra.mxu0 %v1021_v49 }
  0x57   : > { %709 = vmatprep.subr.bf16.mxu0 %v1022_v50 }
  0x5a   : > { %710 = vmatpush1.bf16.msra.mxu0 %v1024_v51 }
  0x5b   : > { %711 = vmatprep.subr.bf16.mxu0 %v1025_v52 }
  0x5e   : > { %712 = vmatpush1.bf16.msra.mxu0 %v1027_v53 }
  0x5f   : > { %713 = vmatprep.subr.bf16.mxu0 %v1028_v54 }
  0x62   : > { %714 = vmatpush1.bf16.msra.mxu0 %v1030_v55 }
  0x63   : > { %715 = vmatprep.subr.bf16.mxu0 %v1031_v56 }
  0x66   : > { %716 = vmatpush1.bf16.msra.mxu0 %v1033_v57 }
  0x67   : > { %717 = vmatprep.subr.bf16.mxu0 %v1034_v58 }
  0x6a   : > { %718 = vmatpush1.bf16.msra.mxu0 %v1036_v59 }
  0x6b   : > { %719 = vmatprep.subr.bf16.mxu0 %v1037_v60 }
  0x6e   : > { %720 = vmatpush1.bf16.msra.mxu0 %v1039_v61 }
  0x6f   : > { %721 = vmatprep.subr.bf16.mxu0 %v1040_v62 }
  0x72   : > { %722 = vmatpush1.bf16.msra.mxu0 %v1042_v63 }
  0x73   : > { %723 = vmatprep.subr.bf16.mxu0 %v1043_v0 }
  0x76   : > { %724 = vmatpush1.bf16.msra.mxu0 %v1045_v1 }
  0x79   : > { %726 = vmatmul.mubr.bf16.vlgmr.msra.gmra.mrb[0].mxu0 %v921_v2 }
 0x14c   : > { %v727_v10 = vpop.f32.mrb[0].mxu0 }
 0x14d   : > { %v755_v12 = vadd.f32 %v748_v8, %v727_v10  ;;  %v729_v13 = vpop.f32.mrb[1].mxu0 }
 0x14e   : > { %v756_v15 = vadd.f32 %v752_v9, %v729_v13  ;;  %v731_v16 = vpop.f32.mrb[2].mxu0 }
 0x14f   : > { %v759_v17 = vadd.f32 %v757_v11, %v755_v12  ;;  %v732_v18 = vpop.f32.mrb[3].mxu0 }
 0x150   : > { %v760_v19 = vadd.f32 %v758_v14, %v756_v15 }
 0x151   : > { %v761_v20 = vmax.f32 %v759_v17, 0.0 }
 0x152   : > { %v762_v21 = vmax.f32 %v760_v19, 0.0 }
 0x153   : > { %763 = vst [vmem:[%s483_s25] sm:$0xff] %v761_v20 }
 0x154   : > { %764 = vst [vmem:[%s483_s25 + $0x8] sm:$0xff] %v762_v21 }
 0x155 PF: > { %s14_s19 = sadd.s32 1, %s1086_s19   ;;  %s1300_s15 = smov %s1074_s16 }
 0x156   : > { %p11_p10 = scmp.ge.s32.totalorder %s14_s19, 6   ;;  %s1301_s16 = smov %s1148_s23 }
 0x157   : > { %s1302_s17 = smov %s1082_s18  ;;  %s1303_s18 = smov %s1305_s20 }
 0x158   :  { %13 = sbr.rel (!%p11_p10) target bundleno = 3 (0x3), region = 126 }

// kernel: multicom_res50_forward.82
= control target key start
LH: loop header
LB: loop body
LE: loop exit
PB: predicated region body
PF: predicated region fallthrough
CT: control target
= control target key end

     0   :  { %s842_s12 = smov 0   ;;  %s844_s13 = smov 0   ;;  %s927_s0 = inlined_call_operand.vmem [shape: bf16[8,1024], index: 0, kind: input, shape index: {}]   ;;  %s928_s1 = inlined_call_operand.vmem [shape: bf16[1024,256], index: 1, kind: input, shape index: {}]   ;;  %s929_s2 = inlined_call_operand.vmem [shape: f32[1,256], index: 2, kind: input, shape index: {}]   ;;  %s930_s3 = inlined_call_operand.vmem [shape: f32[8,256], index: 3, kind: output, shape index: {}]  }
   0x1   :  { %s846_s14 = smov 0  }
   0x2 LB: > { %s25_s15 = sadd.s32 1, %s815_s13  ;;  %p675_p0 = scmp.ge.s32.totalorder %s819_s14, 1  ;;  %s819_s14 = sphi %s846_s14, %s13_s14   ;;  %s815_s13 = sphi %s844_s13, %s932_s13   ;;  %s811_s12 = sphi %s842_s12, %s931_s12  }
   0x3   : > { %p26_p1 = scmp.ge.s32.totalorder %s25_s15, 4  ;;  %p194_p2 = scmp.lt.s32.totalorder %s819_s14, 5 }
   0x5   : > { %s934_s15 = smov (%p26_p1, %s25_s15), 0  ;;  %p195_p3 = pnand %p675_p0, %p194_p2 }
   0x6   : > { %s676_s16 = sshll.u32 (!%p195_p3), %s811_s12, 1  ;;  %s678_s17 = sshll.u32 (!%p195_p3), %s811_s12, 5 }
   0x7   : > { %198 = sbr.rel (%p195_p3) target bundleno = 317 (0x13d), region = 32  ;;  %p243_p4 = scmp.lt.s32.totalorder (!%p195_p3), %s676_s16, 7 }
   0x8   : > { %p252_p5 = scmp.lt.s32.totalorder (!%p195_p3), %s678_s17, 127  ;;  %p681_p6 = scmp.ne.s32.totalorder (!%p195_p3), %s811_s12, 0 }
   0xe   : > { %s936_s16 = smov (!%p243_p4, %s676_s16), 7  ;;  %s938_s17 = smov (!%p252_p5, %s678_s17), 127 }
   0xf   : > { %s677_s18 = sshll.u32 %s936_s16, 2  ;;  %s721_s22 = sshll.u32 %s938_s17, 3  ;;  %v821_v0 = vmov (!%p681_p6), 0.0  }
  0x10   : > { %s867_s21 = scalar_lea.vmem %s927_s0, %s677_s18  ;;  %s872_s25 = scalar_lea.vmem %s928_s1, %s721_s22  ;;  %281 = vst [vmem:[#allocation2] sm:$0xff] (!%p681_p6), %v821_v0  ;;  %282 = vst [vmem:[#allocation2 + $0x8] sm:$0xff] (!%p681_p6), %v821_v0 }
  0x11   : > { %280 = sbr.rel (%p681_p6) target bundleno = 24 (0x18), region = 36 }
  0x18 PF: > { %v747_v1 = vld [vmem:[%s872_s25 + $0x4] ss:$8 sps:$4 sm:$0xff]   ;;  %v749_v2 = vld [vmem:[%s872_s25] ss:$8 sps:$4 sm:$0xff]   ;;  %v750_v3 = vld [vmem:[%s872_s25 + $0x14] ss:$8 sps:$4 sm:$0xff]  }
  0x19   : > { %485 = vmatprep.subr.bf16.mxu0 %v747_v1  ;;  %v752_v4 = vld [vmem:[%s872_s25 + $0x10] ss:$8 sps:$4 sm:$0xff]   ;;  %v753_v5 = vld [vmem:[%s872_s25 + $0x24] ss:$8 sps:$4 sm:$0xff]   ;;  %v755_v6 = vld [vmem:[%s872_s25 + $0x20] ss:$8 sps:$4 sm:$0xff]  }
  0x1a   : > { %486 = vmatpush1.bf16.msra.mxu0 %v749_v2  ;;  %v756_v7 = vld [vmem:[%s872_s25 + $0x34] ss:$8 sps:$4 sm:$0xff]   ;;  %v758_v8 = vld [vmem:[%s872_s25 + $0x30] ss:$8 sps:$4 sm:$0xff]   ;;  %v759_v9 = vld [vmem:[%s872_s25 + $0x44] ss:$8 sps:$4 sm:$0xff]  }
  0x1b   : > { %487 = vmatprep.subr.bf16.mxu0 %v750_v3  ;;  %v761_v10 = vld [vmem:[%s872_s25 + $0x40] ss:$8 sps:$4 sm:$0xff]   ;;  %v762_v11 = vld [vmem:[%s872_s25 + $0x54] ss:$8 sps:$4 sm:$0xff]   ;;  %v764_v12 = vld [vmem:[%s872_s25 + $0x50] ss:$8 sps:$4 sm:$0xff]  }
  0x1c   : > { %v765_v13 = vld [vmem:[%s872_s25 + $0x64] ss:$8 sps:$4 sm:$0xff]   ;;  %v767_v16 = vld [vmem:[%s872_s25 + $0x60] ss:$8 sps:$4 sm:$0xff]   ;;  %v768_v17 = vld [vmem:[%s872_s25 + $0x74] ss:$8 sps:$4 sm:$0xff]  }
  0x1d   : > { %v285_v14 = vld [vmem:[%s867_s21] sm:$0xff]  ;;  %v770_v18 = vld [vmem:[%s872_s25 + $0x70] ss:$8 sps:$4 sm:$0xff]   ;;  %v774_v21 = vld [vmem:[%s872_s25 + $0x94] ss:$8 sps:$4 sm:$0xff]   ;;  %p716_p7 = scmp.ne.s32.totalorder %s811_s12, 3 }
  0x1e   : > { %488 = vmatpush1.bf16.msra.mxu0 %v752_v4  ;;  %v683_v15 = vcombine.high %v285_v14, %v285_v14  ;;  %v771_v19 = vld [vmem:[%s872_s25 + $0x84] ss:$8 sps:$4 sm:$0xff]   ;;  %v773_v20 = vld [vmem:[%s872_s25 + $0x80] ss:$8 sps:$4 sm:$0xff]   ;;  %v776_v22 = vld [vmem:[%s872_s25 + $0x90] ss:$8 sps:$4 sm:$0xff]   ;;  %v682_v35 = vcombine.low %v285_v14, %v285_v14  ;;  %v538_v44 = vlaneseq (!%p716_p7) }
  0x1f   : > { %489 = vmatprep.subr.bf16.mxu0 %v753_v5  ;;  %v777_v23 = vld [vmem:[%s872_s25 + $0xa4] ss:$8 sps:$4 sm:$0xff]   ;;  %v779_v24 = vld [vmem:[%s872_s25 + $0xa0] ss:$8 sps:$4 sm:$0xff]   ;;  %v780_v25 = vld [vmem:[%s872_s25 + $0xb4] ss:$8 sps:$4 sm:$0xff]  }
  0x20   : > { %517 = vmatprep.mubr.bf16.mxu0 %v683_v15  ;;  %v782_v26 = vld [vmem:[%s872_s25 + $0xb0] ss:$8 sps:$4 sm:$0xff]   ;;  %v783_v27 = vld [vmem:[%s872_s25 + $0xc4] ss:$8 sps:$4 sm:$0xff]   ;;  %v785_v28 = vld [vmem:[%s872_s25 + $0xc0] ss:$8 sps:$4 sm:$0xff]  }
  0x21   : > { %v786_v29 = vld [vmem:[%s872_s25 + $0xd4] ss:$8 sps:$4 sm:$0xff]   ;;  %v788_v30 = vld [vmem:[%s872_s25 + $0xd0] ss:$8 sps:$4 sm:$0xff]   ;;  %v789_v31 = vld [vmem:[%s872_s25 + $0xe4] ss:$8 sps:$4 sm:$0xff]  }
  0x22   : > { %490 = vmatpush1.bf16.msra.mxu0 %v755_v6  ;;  %v791_v32 = vld [vmem:[%s872_s25 + $0xe0] ss:$8 sps:$4 sm:$0xff]   ;;  %v792_v33 = vld [vmem:[%s872_s25 + $0xf4] ss:$8 sps:$4 sm:$0xff]   ;;  %v794_v34 = vld [vmem:[%s872_s25 + $0xf0] ss:$8 sps:$4 sm:$0xff]  }
  0x23   : > { %491 = vmatprep.subr.bf16.mxu0 %v756_v7  ;;  %v283_v36 = vld [vmem:[#allocation2] sm:$0xff]  ;;  %v284_v37 = vld [vmem:[#allocation2 + $0x8] sm:$0xff]  ;;  %v539_v45 = vshrl.u32 (!%p716_p7), %v538_v44, 7 }
  0x24   : > { %v536_v46 = vld [vmem:[%s929_s2] sm:$0x3] (!%p716_p7) }
  0x25   : > { %v540_v47 = vsub.s32 (!%p716_p7), 0, %v539_v45  ;;  %v544_v48 = vsub.s32 (!%p716_p7), 1, %v539_v45 }
  0x26   : > { %492 = vmatpush1.bf16.msra.mxu0 %v758_v8 }
  0x27   : > { %493 = vmatprep.subr.bf16.mxu0 %v759_v9  ;;  %v541_v51 = vrot.slane (!%p716_p7), %v536_v46, %v540_v47  ;;  %v545_v52 = vrot.slane (!%p716_p7), %v536_v46, %v544_v48 }
  0x2a   : > { %494 = vmatpush1.bf16.msra.mxu0 %v761_v10 }
  0x2b   : > { %495 = vmatprep.subr.bf16.mxu0 %v762_v11 }
  0x2e   : > { %496 = vmatpush1.bf16.msra.mxu0 %v764_v12 }
  0x2f   : > { %497 = vmatprep.subr.bf16.mxu0 %v765_v13 }
  0x32   : > { %498 = vmatpush1.bf16.msra.mxu0 %v767_v16 }
  0x33   : > { %499 = vmatprep.subr.bf16.mxu0 %v768_v17 }
  0x36   : > { %500 = vmatpush1.bf16.msra.mxu0 %v770_v18 }
  0x37   : > { %501 = vmatprep.subr.bf16.mxu0 %v771_v19 }
  0x3a   : > { %502 = vmatpush1.bf16.msra.mxu0 %v773_v20 }
  0x3b   : > { %503 = vmatprep.subr.bf16.mxu0 %v774_v21 }
  0x3e   : > { %504 = vmatpush1.bf16.msra.mxu0 %v776_v22 }
  0x3f   : > { %505 = vmatprep.subr.bf16.mxu0 %v777_v23 }
  0x42   : > { %506 = vmatpush1.bf16.msra.mxu0 %v779_v24 }
  0x43   : > { %507 = vmatprep.subr.bf16.mxu0 %v780_v25 }
  0x46   : > { %508 = vmatpush1.bf16.msra.mxu0 %v782_v26 }
  0x47   : > { %509 = vmatprep.subr.bf16.mxu0 %v783_v27 }
  0x4a   : > { %510 = vmatpush1.bf16.msra.mxu0 %v785_v28 }
  0x4b   : > { %511 = vmatprep.subr.bf16.mxu0 %v786_v29 }
  0x4e   : > { %512 = vmatpush1.bf16.msra.mxu0 %v788_v30 }
  0x4f   : > { %513 = vmatprep.subr.bf16.mxu0 %v789_v31 }
  0x52   : > { %514 = vmatpush1.bf16.msra.mxu0 %v791_v32 }
  0x53   : > { %515 = vmatprep.subr.bf16.mxu0 %v792_v33 }
  0x56   : > { %516 = vmatpush1.bf16.msra.mxu0 %v794_v34 }
  0x59   : > { %518 = vmatmul.mubr.bf16.vlgmr.msra.gmra.mrb[0].mxu0 %v682_v35 }
 0x12a   : > { %533 = sbr.rel (%p716_p7) target bundleno = 317 (0x13d), region = 40 }
 0x12c   : > { %v519_v38 = vpop.f32.mrb[0].mxu0 }
 0x12d   : > { %v526_v39 = vadd.f32 %v519_v38, %v283_v36  ;;  %v521_v40 = vpop.f32.mrb[1].mxu0 }
 0x12e   : > { %v527_v41 = vadd.f32 %v521_v40, %v284_v37  ;;  %v523_v42 = vpop.f32.mrb[2].mxu0 }
 0x12f   : > { %528 = vst [vmem:[#allocation2] sm:$0xff] %v526_v39  ;;  %v524_v43 = vpop.f32.mrb[3].mxu0 }
 0x130   : > { %529 = vst [vmem:[#allocation2 + $0x8] sm:$0xff] %v527_v41 }
 0x136   : > { %v534_v49 = vld [vmem:[#allocation2] sm:$0xff] }
 0x137   : > { %v535_v50 = vld [vmem:[#allocation2 + $0x8] sm:$0xff]  ;;  %v548_v53 = vadd.f32 %v541_v51, %v534_v49 }
 0x138   : > { %v549_v54 = vadd.f32 %v545_v52, %v535_v50 }
 0x139   : > { %v550_v55 = vmax.f32 %v548_v53, 0.0 }
 0x13a   : > { %v551_v56 = vmax.f32 %v549_v54, 0.0 }
 0x13b   : > { %552 = vst [vmem:[%s930_s3] sm:$0xff] %v550_v55 }
 0x13c   : > { %553 = vst [vmem:[%s930_s3 + $0x8] sm:$0xff] %v551_v56 }
 0x13d PF: > { %s13_s14 = sadd.s32 1, %s819_s14   ;;  %s931_s12 = smov %s815_s13 }
 0x13e   : > { %p10_p8 = scmp.ge.s32.totalorder %s13_s14, 6   ;;  %s932_s13 = smov %s934_s15 }
 0x140   :  { %12 = sbr.rel (!%p10_p8) target bundleno = 2 (0x2), region = 76 }

// kernel: multicom_res50_forward.98
= control target key start
LH: loop header
LB: loop body
LE: loop exit
PB: predicated region body
PF: predicated region fallthrough
CT: control target
= control target key end

     0   :  { %s1061_s12 = smov 0   ;;  %s1063_s13 = smov 0   ;;  %s1276_s0 = inlined_call_operand.vmem [shape: bf16[8,1024], index: 0, kind: input, shape index: {}]   ;;  %s1277_s1 = inlined_call_operand.vmem [shape: bf16[1024,512], index: 1, kind: input, shape index: {}]   ;;  %s1278_s2 = inlined_call_operand.vmem [shape: f32[1,512], index: 2, kind: input, shape index: {}]   ;;  %s1279_s3 = inlined_call_operand.vmem [shape: f32[8,512], index: 3, kind: output, shape index: {}]  }
   0x1   :  { %s1065_s14 = smov 0   ;;  %s1067_s15 = smov 0  }
   0x2   :  { %s1069_s16 = smov 0   ;;  %s1071_s17 = smov 0  }
   0x3   :  { %s1073_s18 = smov 0  }
   0x4 LB: > { %s25_s19 = sadd.s32 1, %s1030_s16  ;;  %s28_s20 = sadd.s32 1, %s1034_s17  ;;  %s1038_s18 = sphi %s1073_s18, %s13_s18   ;;  %s1034_s17 = sphi %s1071_s17, %s1285_s17   ;;  %s1030_s16 = sphi %s1069_s16, %s1284_s16   ;;  %s1026_s15 = sphi %s1067_s15, %s1283_s15   ;;  %s1022_s14 = sphi %s1065_s14, %s1282_s14   ;;  %s1018_s13 = sphi %s1063_s13, %s1281_s13   ;;  %s1014_s12 = sphi %s1061_s12, %s1280_s12  }
   0x5   : > { %p26_p0 = scmp.ge.s32.totalorder %s25_s19, 4  ;;  %p76_p1 = scmp.ne.s32.totalorder %s1018_s13, %s1014_s12 }
   0x6   : > { %p77_p2 = scmp.eq.s32.totalorder %s1038_s18, 0  ;;  %s69_s24 = sadd.s32 1, %s1018_s13 }
   0x7   : > { %s1287_s19 = smov (%p26_p0, %s25_s19), 0  ;;  %s1289_s20 = smov (!%p26_p0, %s28_s20), %s1034_s17 }
   0x8   : > { %p78_p3 = por %p77_p2, %p76_p1  ;;  %p30_p4 = scmp.ge.s32.totalorder %s1289_s20, 2 }
   0x9   : > { %s64_s21 = ssub.s32 %s1030_s16, %s1287_s19  ;;  %p825_p6 = scmp.ge.s32.totalorder %s1038_s18, 8 }
   0xa   : > { %s1291_s20 = smov (%p30_p4, %s1289_s20), 0 }
   0xb   : > { %s65_s22 = ssub.s32 %s1034_s17, %s1291_s20  ;;  %156 = sbr.rel (%p825_p6) target bundleno = 41 (0x29), region = 16 }
   0xc   : > { %s66_s23 = sor.u32 %s65_s22, %s64_s21 }
   0xd   : > { %p67_p5 = scmp.eq.s32.totalorder %s66_s23, 0 }
   0xf   : > { %s1112_s25 = scalar_select %p67_p5, %s1018_s13, %s69_s24  }
  0x12   : > { %172 = sbr.rel (!%p78_p3) target bundleno = 41 (0x29), region = 24  ;;  %s174_s26 = sand.u32 (%p78_p3), 1, %s1018_s13  }
  0x13   : > { %s828_s27 = sshll.u32 (%p78_p3), %s1034_s17, 1  ;;  %s826_s28 = sshll.u32 (%p78_p3), %s174_s26, 8 }
  0x14   : > { %s876_s29 = sshll.u32 (%p78_p3), %s1030_s16, 7  ;;  %s1126_s8 = scalar_lea.vmem (%p78_p3), [#allocation3], %s826_s28 }
  0x15   : > { %s180_s30 = sadd.s32 (%p78_p3), %s876_s29, %s828_s27 }
  0x16   : > { %s830_s4 = sshll.u32 (%p78_p3), %s180_s30, 2 }
  0x17   : > { %s1121_s7 = scalar_lea.vmem (%p78_p3), %s1277_s1, %s830_s4 }
  0x18   : > { %v272_v0 = vld [vmem:[%s1121_s7] sm:$0xff] (%p78_p3)  ;;  %v274_v1 = vld [vmem:[%s1121_s7 + $0x10] sm:$0xff] (%p78_p3) }
  0x19   : > { %v276_v2 = vld [vmem:[%s1121_s7 + $0x20] sm:$0xff]  ;;  %273 = vst [vmem:[%s1126_s8] sm:$0xff] %v272_v0  ;;  %275 = vst [vmem:[%s1126_s8 + $0x8] sm:$0xff] %v274_v1  ;;  %v278_v3 = vld [vmem:[%s1121_s7 + $0x30] sm:$0xff] }
  0x1a   : > { %277 = vst [vmem:[%s1126_s8 + $0x10] sm:$0xff] %v276_v2  ;;  %v280_v4 = vld [vmem:[%s1121_s7 + $0x40] sm:$0xff]  ;;  %v282_v5 = vld [vmem:[%s1121_s7 + $0x50] sm:$0xff]  ;;  %279 = vst [vmem:[%s1126_s8 + $0x18] sm:$0xff] %v278_v3 }
  0x1b   : > { %281 = vst [vmem:[%s1126_s8 + $0x20] sm:$0xff] %v280_v4  ;;  %283 = vst [vmem:[%s1126_s8 + $0x28] sm:$0xff] %v282_v5  ;;  %v284_v6 = vld [vmem:[%s1121_s7 + $0x60] sm:$0xff]  ;;  %v286_v7 = vld [vmem:[%s1121_s7 + $0x70] sm:$0xff] }
  0x1c   : > { %v288_v8 = vld [vmem:[%s1121_s7 + $0x80] sm:$0xff]  ;;  %285 = vst [vmem:[%s1126_s8 + $0x30] sm:$0xff] %v284_v6  ;;  %287 = vst [vmem:[%s1126_s8 + $0x38] sm:$0xff] %v286_v7  ;;  %v290_v9 = vld [vmem:[%s1121_s7 + $0x90] sm:$0xff] }
  0x1d   : > { %289 = vst [vmem:[%s1126_s8 + $0x40] sm:$0xff] %v288_v8  ;;  %v292_v10 = vld [vmem:[%s1121_s7 + $0xa0] sm:$0xff]  ;;  %v294_v11 = vld [vmem:[%s1121_s7 + $0xb0] sm:$0xff]  ;;  %291 = vst [vmem:[%s1126_s8 + $0x48] sm:$0xff] %v290_v9 }
  0x1e   : > { %293 = vst [vmem:[%s1126_s8 + $0x50] sm:$0xff] %v292_v10  ;;  %295 = vst [vmem:[%s1126_s8 + $0x58] sm:$0xff] %v294_v11  ;;  %v296_v12 = vld [vmem:[%s1121_s7 + $0xc0] sm:$0xff]  ;;  %v298_v13 = vld [vmem:[%s1121_s7 + $0xd0] sm:$0xff] }
  0x1f   : > { %v300_v14 = vld [vmem:[%s1121_s7 + $0xe0] sm:$0xff]  ;;  %297 = vst [vmem:[%s1126_s8 + $0x60] sm:$0xff] %v296_v12  ;;  %299 = vst [vmem:[%s1126_s8 + $0x68] sm:$0xff] %v298_v13  ;;  %v302_v15 = vld [vmem:[%s1121_s7 + $0xf0] sm:$0xff] }
  0x20   : > { %301 = vst [vmem:[%s1126_s8 + $0x70] sm:$0xff] %v300_v14  ;;  %v304_v16 = vld [vmem:[%s1121_s7 + $0x100] sm:$0xff]  ;;  %v306_v17 = vld [vmem:[%s1121_s7 + $0x110] sm:$0xff]  ;;  %303 = vst [vmem:[%s1126_s8 + $0x78] sm:$0xff] %v302_v15 }
  0x21   : > { %305 = vst [vmem:[%s1126_s8 + $0x80] sm:$0xff] %v304_v16  ;;  %307 = vst [vmem:[%s1126_s8 + $0x88] sm:$0xff] %v306_v17  ;;  %v308_v18 = vld [vmem:[%s1121_s7 + $0x120] sm:$0xff]  ;;  %v310_v19 = vld [vmem:[%s1121_s7 + $0x130] sm:$0xff] }
  0x22   : > { %v312_v20 = vld [vmem:[%s1121_s7 + $0x140] sm:$0xff]  ;;  %309 = vst [vmem:[%s1126_s8 + $0x90] sm:$0xff] %v308_v18  ;;  %311 = vst [vmem:[%s1126_s8 + $0x98] sm:$0xff] %v310_v19  ;;  %v314_v21 = vld [vmem:[%s1121_s7 + $0x150] sm:$0xff] }
  0x23   : > { %313 = vst [vmem:[%s1126_s8 + $0xa0] sm:$0xff] %v312_v20  ;;  %v316_v22 = vld [vmem:[%s1121_s7 + $0x160] sm:$0xff]  ;;  %v318_v23 = vld [vmem:[%s1121_s7 + $0x170] sm:$0xff]  ;;  %315 = vst [vmem:[%s1126_s8 + $0xa8] sm:$0xff] %v314_v21 }
  0x24   : > { %317 = vst [vmem:[%s1126_s8 + $0xb0] sm:$0xff] %v316_v22  ;;  %319 = vst [vmem:[%s1126_s8 + $0xb8] sm:$0xff] %v318_v23  ;;  %v320_v24 = vld [vmem:[%s1121_s7 + $0x180] sm:$0xff]  ;;  %v322_v25 = vld [vmem:[%s1121_s7 + $0x190] sm:$0xff] }
  0x25   : > { %v324_v26 = vld [vmem:[%s1121_s7 + $0x1a0] sm:$0xff]  ;;  %321 = vst [vmem:[%s1126_s8 + $0xc0] sm:$0xff] %v320_v24  ;;  %323 = vst [vmem:[%s1126_s8 + $0xc8] sm:$0xff] %v322_v25  ;;  %v326_v27 = vld [vmem:[%s1121_s7 + $0x1b0] sm:$0xff] }
  0x26   : > { %325 = vst [vmem:[%s1126_s8 + $0xd0] sm:$0xff] %v324_v26  ;;  %v328_v28 = vld [vmem:[%s1121_s7 + $0x1c0] sm:$0xff]  ;;  %v330_v29 = vld [vmem:[%s1121_s7 + $0x1d0] sm:$0xff]  ;;  %327 = vst [vmem:[%s1126_s8 + $0xd8] sm:$0xff] %v326_v27 }
  0x27   : > { %329 = vst [vmem:[%s1126_s8 + $0xe0] sm:$0xff] %v328_v28  ;;  %331 = vst [vmem:[%s1126_s8 + $0xe8] sm:$0xff] %v330_v29  ;;  %v332_v30 = vld [vmem:[%s1121_s7 + $0x1e0] sm:$0xff]  ;;  %v334_v31 = vld [vmem:[%s1121_s7 + $0x1f0] sm:$0xff] }
  0x28   : > { %333 = vst [vmem:[%s1126_s8 + $0xf0] sm:$0xff] %v332_v30  ;;  %335 = vst [vmem:[%s1126_s8 + $0xf8] sm:$0xff] %v334_v31 }
  0x29 PF: > { %p831_p7 = scmp.ge.s32.totalorder %s1038_s18, 1  ;;  %p348_p8 = scmp.lt.s32.totalorder %s1038_s18, 9 }
  0x2b   : > { %p349_p9 = pnand %p831_p7, %p348_p8 }
  0x2c   : > { %s355_s9 = sand.u32 (!%p349_p9), 1, %s1014_s12   ;;  %s833_s10 = sshll.u32 (!%p349_p9), %s1022_s14, 1 }
  0x2d   : > { %352 = sbr.rel (%p349_p9) target bundleno = 355 (0x163), region = 66  ;;  %s832_s11 = sshll.u32 (!%p349_p9), %s355_s9, 8 }
  0x2e   : > { %p398_p10 = scmp.lt.s32.totalorder (!%p349_p9), %s833_s10, 7  ;;  %s835_s21 = sshll.u32 (!%p349_p9), %s1026_s15, 1 }
  0x2f   : > { %p408_p11 = scmp.lt.s32.totalorder (!%p349_p9), %s835_s21, 3  ;;  %s1211_s5 = scalar_lea.vmem (!%p349_p9), [#allocation3], %s832_s11 }
  0x30   : > { %p838_p12 = scmp.ne.s32.totalorder (!%p349_p9), %s1022_s14, 0 }
  0x34   : > { %s1293_s10 = smov (!%p398_p10, %s833_s10), 7  ;;  %s1295_s21 = smov (!%p408_p11, %s835_s21), 3 }
  0x35   : > { %s834_s22 = sshll.u32 %s1293_s10, 2  ;;  %s410_s12 = scalar_lea.vmem %s1278_s2, %s1295_s21  ;;  %v1040_v32 = vmov (!%p838_p12), 0.0  }
  0x36   : > { %s1197_s26 = scalar_lea.vmem %s1276_s0, %s834_s22  ;;  %s837_s29 = sshll.u32 %s1295_s21, 3  ;;  %426 = vst [vmem:[#allocation2] sm:$0xff] (!%p838_p12), %v1040_v32  ;;  %427 = vst [vmem:[#allocation2 + $0x8] sm:$0xff] (!%p838_p12), %v1040_v32 }
  0x37   : > { %s1209_s15 = scalar_lea.vmem %s1279_s3, %s837_s29  ;;  %425 = sbr.rel (%p838_p12) target bundleno = 62 (0x3e), region = 74 }
  0x3e PF: > { %v934_v33 = vld [vmem:[%s1211_s5 + $0x4] ss:$8 sps:$4 sm:$0xff]   ;;  %v936_v34 = vld [vmem:[%s1211_s5] ss:$8 sps:$4 sm:$0xff]   ;;  %v937_v35 = vld [vmem:[%s1211_s5 + $0x14] ss:$8 sps:$4 sm:$0xff]  }
  0x3f   : > { %630 = vmatprep.subr.bf16.mxu0 %v934_v33  ;;  %v939_v36 = vld [vmem:[%s1211_s5 + $0x10] ss:$8 sps:$4 sm:$0xff]   ;;  %v940_v37 = vld [vmem:[%s1211_s5 + $0x24] ss:$8 sps:$4 sm:$0xff]   ;;  %v942_v38 = vld [vmem:[%s1211_s5 + $0x20] ss:$8 sps:$4 sm:$0xff]  }
  0x40   : > { %631 = vmatpush1.bf16.msra.mxu0 %v936_v34  ;;  %v943_v39 = vld [vmem:[%s1211_s5 + $0x34] ss:$8 sps:$4 sm:$0xff]   ;;  %v945_v40 = vld [vmem:[%s1211_s5 + $0x30] ss:$8 sps:$4 sm:$0xff]   ;;  %v946_v41 = vld [vmem:[%s1211_s5 + $0x44] ss:$8 sps:$4 sm:$0xff]  }
  0x41   : > { %632 = vmatprep.subr.bf16.mxu0 %v937_v35  ;;  %v948_v42 = vld [vmem:[%s1211_s5 + $0x40] ss:$8 sps:$4 sm:$0xff]   ;;  %v949_v43 = vld [vmem:[%s1211_s5 + $0x54] ss:$8 sps:$4 sm:$0xff]   ;;  %v951_v44 = vld [vmem:[%s1211_s5 + $0x50] ss:$8 sps:$4 sm:$0xff]  }
  0x42   : > { %v952_v45 = vld [vmem:[%s1211_s5 + $0x64] ss:$8 sps:$4 sm:$0xff]   ;;  %v430_v46 = vld [vmem:[%s1197_s26] sm:$0xff]  ;;  %v954_v48 = vld [vmem:[%s1211_s5 + $0x60] ss:$8 sps:$4 sm:$0xff]   ;;  %p873_p13 = scmp.ne.s32.totalorder %s1022_s14, 3 }
  0x43   : > { %v840_v47 = vcombine.high %v430_v46, %v430_v46  ;;  %v955_v49 = vld [vmem:[%s1211_s5 + $0x74] ss:$8 sps:$4 sm:$0xff]   ;;  %v957_v50 = vld [vmem:[%s1211_s5 + $0x70] ss:$8 sps:$4 sm:$0xff]   ;;  %v958_v51 = vld [vmem:[%s1211_s5 + $0x84] ss:$8 sps:$4 sm:$0xff]   ;;  %v839_v3 = vcombine.low %v430_v46, %v430_v46  ;;  %v683_v12 = vlaneseq (!%p873_p13) }
  0x44   : > { %633 = vmatpush1.bf16.msra.mxu0 %v939_v36  ;;  %v960_v52 = vld [vmem:[%s1211_s5 + $0x80] ss:$8 sps:$4 sm:$0xff]   ;;  %v961_v53 = vld [vmem:[%s1211_s5 + $0x94] ss:$8 sps:$4 sm:$0xff]   ;;  %v963_v54 = vld [vmem:[%s1211_s5 + $0x90] ss:$8 sps:$4 sm:$0xff]  }
  0x45   : > { %634 = vmatprep.subr.bf16.mxu0 %v940_v37  ;;  %662 = vmatprep.mubr.bf16.mxu0 %v840_v47  ;;  %v964_v55 = vld [vmem:[%s1211_s5 + $0xa4] ss:$8 sps:$4 sm:$0xff]   ;;  %v966_v56 = vld [vmem:[%s1211_s5 + $0xa0] ss:$8 sps:$4 sm:$0xff]   ;;  %v967_v57 = vld [vmem:[%s1211_s5 + $0xb4] ss:$8 sps:$4 sm:$0xff]  }
  0x46   : > { %v969_v58 = vld [vmem:[%s1211_s5 + $0xb0] ss:$8 sps:$4 sm:$0xff]   ;;  %v970_v59 = vld [vmem:[%s1211_s5 + $0xc4] ss:$8 sps:$4 sm:$0xff]   ;;  %v972_v60 = vld [vmem:[%s1211_s5 + $0xc0] ss:$8 sps:$4 sm:$0xff]  }
  0x47   : > { %v973_v61 = vld [vmem:[%s1211_s5 + $0xd4] ss:$8 sps:$4 sm:$0xff]   ;;  %v975_v62 = vld [vmem:[%s1211_s5 + $0xd0] ss:$8 sps:$4 sm:$0xff]   ;;  %v976_v63 = vld [vmem:[%s1211_s5 + $0xe4] ss:$8 sps:$4 sm:$0xff]  }
  0x48   : > { %635 = vmatpush1.bf16.msra.mxu0 %v942_v38  ;;  %v978_v0 = vld [vmem:[%s1211_s5 + $0xe0] ss:$8 sps:$4 sm:$0xff]   ;;  %v979_v1 = vld [vmem:[%s1211_s5 + $0xf4] ss:$8 sps:$4 sm:$0xff]   ;;  %v981_v2 = vld [vmem:[%s1211_s5 + $0xf0] ss:$8 sps:$4 sm:$0xff]  }
  0x49   : > { %636 = vmatprep.subr.bf16.mxu0 %v943_v39  ;;  %v428_v4 = vld [vmem:[#allocation2] sm:$0xff]  ;;  %v429_v5 = vld [vmem:[#allocation2 + $0x8] sm:$0xff]  ;;  %v684_v13 = vshrl.u32 (!%p873_p13), %v683_v12, 7 }
  0x4a   : > { %v681_v14 = vld [vmem:[%s410_s12] sm:$0x3] (!%p873_p13) }
  0x4b   : > { %v685_v15 = vsub.s32 (!%p873_p13), 0, %v684_v13  ;;  %v689_v16 = vsub.s32 (!%p873_p13), 1, %v684_v13 }
  0x4c   : > { %637 = vmatpush1.bf16.msra.mxu0 %v945_v40 }
  0x4d   : > { %638 = vmatprep.subr.bf16.mxu0 %v946_v41  ;;  %v686_v19 = vrot.slane (!%p873_p13), %v681_v14, %v685_v15  ;;  %v690_v20 = vrot.slane (!%p873_p13), %v681_v14, %v689_v16 }
  0x50   : > { %639 = vmatpush1.bf16.msra.mxu0 %v948_v42 }
  0x51   : > { %640 = vmatprep.subr.bf16.mxu0 %v949_v43 }
  0x54   : > { %641 = vmatpush1.bf16.msra.mxu0 %v951_v44 }
  0x55   : > { %642 = vmatprep.subr.bf16.mxu0 %v952_v45 }
  0x58   : > { %643 = vmatpush1.bf16.msra.mxu0 %v954_v48 }
  0x59   : > { %644 = vmatprep.subr.bf16.mxu0 %v955_v49 }
  0x5c   : > { %645 = vmatpush1.bf16.msra.mxu0 %v957_v50 }
  0x5d   : > { %646 = vmatprep.subr.bf16.mxu0 %v958_v51 }
  0x60   : > { %647 = vmatpush1.bf16.msra.mxu0 %v960_v52 }
  0x61   : > { %648 = vmatprep.subr.bf16.mxu0 %v961_v53 }
  0x64   : > { %649 = vmatpush1.bf16.msra.mxu0 %v963_v54 }
  0x65   : > { %650 = vmatprep.subr.bf16.mxu0 %v964_v55 }
  0x68   : > { %651 = vmatpush1.bf16.msra.mxu0 %v966_v56 }
  0x69   : > { %652 = vmatprep.subr.bf16.mxu0 %v967_v57 }
  0x6c   : > { %653 = vmatpush1.bf16.msra.mxu0 %v969_v58 }
  0x6d   : > { %654 = vmatprep.subr.bf16.mxu0 %v970_v59 }
  0x70   : > { %655 = vmatpush1.bf16.msra.mxu0 %v972_v60 }
  0x71   : > { %656 = vmatprep.subr.bf16.mxu0 %v973_v61 }
  0x74   : > { %657 = vmatpush1.bf16.msra.mxu0 %v975_v62 }
  0x75   : > { %658 = vmatprep.subr.bf16.mxu0 %v976_v63 }
  0x78   : > { %659 = vmatpush1.bf16.msra.mxu0 %v978_v0 }
  0x79   : > { %660 = vmatprep.subr.bf16.mxu0 %v979_v1 }
  0x7c   : > { %661 = vmatpush1.bf16.msra.mxu0 %v981_v2 }
  0x7f   : > { %663 = vmatmul.mubr.bf16.vlgmr.msra.gmra.mrb[0].mxu0 %v839_v3 }
 0x150   : > { %678 = sbr.rel (%p873_p13) target bundleno = 355 (0x163), region = 78 }
 0x152   : > { %v664_v6 = vpop.f32.mrb[0].mxu0 }
 0x153   : > { %v671_v7 = vadd.f32 %v664_v6, %v428_v4  ;;  %v666_v8 = vpop.f32.mrb[1].mxu0 }
 0x154   : > { %v672_v9 = vadd.f32 %v666_v8, %v429_v5  ;;  %v668_v10 = vpop.f32.mrb[2].mxu0 }
 0x155   : > { %673 = vst [vmem:[#allocation2] sm:$0xff] %v671_v7  ;;  %v669_v11 = vpop.f32.mrb[3].mxu0 }
 0x156   : > { %674 = vst [vmem:[#allocation2 + $0x8] sm:$0xff] %v672_v9 }
 0x15c   : > { %v679_v17 = vld [vmem:[#allocation2] sm:$0xff] }
 0x15d   : > { %v680_v18 = vld [vmem:[#allocation2 + $0x8] sm:$0xff]  ;;  %v693_v21 = vadd.f32 %v686_v19, %v679_v17 }
 0x15e   : > { %v694_v22 = vadd.f32 %v690_v20, %v680_v18 }
 0x15f   : > { %v695_v23 = vmax.f32 %v693_v21, 0.0 }
 0x160   : > { %v696_v24 = vmax.f32 %v694_v22, 0.0 }
 0x161   : > { %697 = vst [vmem:[%s1209_s15] sm:$0xff] %v695_v23 }
 0x162   : > { %698 = vst [vmem:[%s1209_s15 + $0x8] sm:$0xff] %v696_v24 }
 0x163 PF: > { %s13_s18 = sadd.s32 1, %s1038_s18   ;;  %s1280_s12 = smov %s1018_s13 }
 0x164   : > { %p10_p0 = scmp.ge.s32.totalorder %s13_s18, 10   ;;  %s1281_s13 = smov %s1112_s25 }
 0x165   : > { %s1282_s14 = smov %s1030_s16  ;;  %s1283_s15 = smov %s1034_s17 }
 0x166   : > { %s1284_s16 = smov %s1287_s19  ;;  %s1285_s17 = smov %s1291_s20 }
 0x167   :  { %12 = sbr.rel (!%p10_p0) target bundleno = 4 (0x4), region = 119 }

// kernel: multicom_res50_forward.99
= control target key start
LH: loop header
LB: loop body
LE: loop exit
PB: predicated region body
PF: predicated region fallthrough
CT: control target
= control target key end

     0   :  { %s1061_s12 = smov 0   ;;  %s1063_s13 = smov 0   ;;  %s1276_s0 = inlined_call_operand.vmem [shape: bf16[8,4608], index: 0, kind: input, shape index: {}]   ;;  %s1277_s1 = inlined_call_operand.vmem [shape: bf16[4608,512], index: 1, kind: input, shape index: {}]   ;;  %s1278_s2 = inlined_call_operand.vmem [shape: f32[1,512], index: 2, kind: input, shape index: {}]   ;;  %s1279_s3 = inlined_call_operand.vmem [shape: f32[8,512], index: 3, kind: output, shape index: {}]  }
   0x1   :  { %s1065_s14 = smov 0   ;;  %s1067_s15 = smov 0  }
   0x2   :  { %s1069_s16 = smov 0   ;;  %s1071_s17 = smov 0  }
   0x3   :  { %s1073_s18 = smov 0  }
   0x4 LB: > { %s25_s19 = sadd.s32 1, %s1030_s16  ;;  %s28_s20 = sadd.s32 1, %s1034_s17  ;;  %s1038_s18 = sphi %s1073_s18, %s13_s18   ;;  %s1034_s17 = sphi %s1071_s17, %s1285_s17   ;;  %s1030_s16 = sphi %s1069_s16, %s1284_s16   ;;  %s1026_s15 = sphi %s1067_s15, %s1283_s15   ;;  %s1022_s14 = sphi %s1065_s14, %s1282_s14   ;;  %s1018_s13 = sphi %s1063_s13, %s1281_s13   ;;  %s1014_s12 = sphi %s1061_s12, %s1280_s12  }
   0x5   : > { %p26_p0 = scmp.ge.s32.totalorder %s25_s19, 18  ;;  %p76_p1 = scmp.ne.s32.totalorder %s1018_s13, %s1014_s12 }
   0x6   : > { %p77_p2 = scmp.eq.s32.totalorder %s1038_s18, 0  ;;  %s69_s24 = sadd.s32 1, %s1018_s13 }
   0x7   : > { %s1287_s19 = smov (%p26_p0, %s25_s19), 0  ;;  %s1289_s20 = smov (!%p26_p0, %s28_s20), %s1034_s17 }
   0x8   : > { %p78_p3 = por %p77_p2, %p76_p1  ;;  %p30_p4 = scmp.ge.s32.totalorder %s1289_s20, 2 }
   0x9   : > { %s64_s21 = ssub.s32 %s1030_s16, %s1287_s19  ;;  %p825_p6 = scmp.ge.s32.totalorder %s1038_s18, 36 }
   0xa   : > { %s1291_s20 = smov (%p30_p4, %s1289_s20), 0 }
   0xb   : > { %s65_s22 = ssub.s32 %s1034_s17, %s1291_s20  ;;  %156 = sbr.rel (%p825_p6) target bundleno = 41 (0x29), region = 16 }
   0xc   : > { %s66_s23 = sor.u32 %s65_s22, %s64_s21 }
   0xd   : > { %p67_p5 = scmp.eq.s32.totalorder %s66_s23, 0 }
   0xf   : > { %s1112_s25 = scalar_select %p67_p5, %s1018_s13, %s69_s24  }
  0x12   : > { %172 = sbr.rel (!%p78_p3) target bundleno = 41 (0x29), region = 24  ;;  %s174_s26 = sand.u32 (%p78_p3), 1, %s1018_s13  }
  0x13   : > { %s828_s27 = sshll.u32 (%p78_p3), %s1034_s17, 1  ;;  %s826_s28 = sshll.u32 (%p78_p3), %s174_s26, 8 }
  0x14   : > { %s876_s29 = sshll.u32 (%p78_p3), %s1030_s16, 7  ;;  %s1126_s8 = scalar_lea.vmem (%p78_p3), [#allocation3], %s826_s28 }
  0x15   : > { %s180_s30 = sadd.s32 (%p78_p3), %s876_s29, %s828_s27 }
  0x16   : > { %s830_s4 = sshll.u32 (%p78_p3), %s180_s30, 2 }
  0x17   : > { %s1121_s7 = scalar_lea.vmem (%p78_p3), %s1277_s1, %s830_s4 }
  0x18   : > { %v272_v0 = vld [vmem:[%s1121_s7] sm:$0xff] (%p78_p3)  ;;  %v274_v1 = vld [vmem:[%s1121_s7 + $0x10] sm:$0xff] (%p78_p3) }
  0x19   : > { %v276_v2 = vld [vmem:[%s1121_s7 + $0x20] sm:$0xff]  ;;  %273 = vst [vmem:[%s1126_s8] sm:$0xff] %v272_v0  ;;  %275 = vst [vmem:[%s1126_s8 + $0x8] sm:$0xff] %v274_v1  ;;  %v278_v3 = vld [vmem:[%s1121_s7 + $0x30] sm:$0xff] }
  0x1a   : > { %277 = vst [vmem:[%s1126_s8 + $0x10] sm:$0xff] %v276_v2  ;;  %v280_v4 = vld [vmem:[%s1121_s7 + $0x40] sm:$0xff]  ;;  %v282_v5 = vld [vmem:[%s1121_s7 + $0x50] sm:$0xff]  ;;  %279 = vst [vmem:[%s1126_s8 + $0x18] sm:$0xff] %v278_v3 }
  0x1b   : > { %281 = vst [vmem:[%s1126_s8 + $0x20] sm:$0xff] %v280_v4  ;;  %283 = vst [vmem:[%s1126_s8 + $0x28] sm:$0xff] %v282_v5  ;;  %v284_v6 = vld [vmem:[%s1121_s7 + $0x60] sm:$0xff]  ;;  %v286_v7 = vld [vmem:[%s1121_s7 + $0x70] sm:$0xff] }
  0x1c   : > { %v288_v8 = vld [vmem:[%s1121_s7 + $0x80] sm:$0xff]  ;;  %285 = vst [vmem:[%s1126_s8 + $0x30] sm:$0xff] %v284_v6  ;;  %287 = vst [vmem:[%s1126_s8 + $0x38] sm:$0xff] %v286_v7  ;;  %v290_v9 = vld [vmem:[%s1121_s7 + $0x90] sm:$0xff] }
  0x1d   : > { %289 = vst [vmem:[%s1126_s8 + $0x40] sm:$0xff] %v288_v8  ;;  %v292_v10 = vld [vmem:[%s1121_s7 + $0xa0] sm:$0xff]  ;;  %v294_v11 = vld [vmem:[%s1121_s7 + $0xb0] sm:$0xff]  ;;  %291 = vst [vmem:[%s1126_s8 + $0x48] sm:$0xff] %v290_v9 }
  0x1e   : > { %293 = vst [vmem:[%s1126_s8 + $0x50] sm:$0xff] %v292_v10  ;;  %295 = vst [vmem:[%s1126_s8 + $0x58] sm:$0xff] %v294_v11  ;;  %v296_v12 = vld [vmem:[%s1121_s7 + $0xc0] sm:$0xff]  ;;  %v298_v13 = vld [vmem:[%s1121_s7 + $0xd0] sm:$0xff] }
  0x1f   : > { %v300_v14 = vld [vmem:[%s1121_s7 + $0xe0] sm:$0xff]  ;;  %297 = vst [vmem:[%s1126_s8 + $0x60] sm:$0xff] %v296_v12  ;;  %299 = vst [vmem:[%s1126_s8 + $0x68] sm:$0xff] %v298_v13  ;;  %v302_v15 = vld [vmem:[%s1121_s7 + $0xf0] sm:$0xff] }
  0x20   : > { %301 = vst [vmem:[%s1126_s8 + $0x70] sm:$0xff] %v300_v14  ;;  %v304_v16 = vld [vmem:[%s1121_s7 + $0x100] sm:$0xff]  ;;  %v306_v17 = vld [vmem:[%s1121_s7 + $0x110] sm:$0xff]  ;;  %303 = vst [vmem:[%s1126_s8 + $0x78] sm:$0xff] %v302_v15 }
  0x21   : > { %305 = vst [vmem:[%s1126_s8 + $0x80] sm:$0xff] %v304_v16  ;;  %307 = vst [vmem:[%s1126_s8 + $0x88] sm:$0xff] %v306_v17  ;;  %v308_v18 = vld [vmem:[%s1121_s7 + $0x120] sm:$0xff]  ;;  %v310_v19 = vld [vmem:[%s1121_s7 + $0x130] sm:$0xff] }
  0x22   : > { %v312_v20 = vld [vmem:[%s1121_s7 + $0x140] sm:$0xff]  ;;  %309 = vst [vmem:[%s1126_s8 + $0x90] sm:$0xff] %v308_v18  ;;  %311 = vst [vmem:[%s1126_s8 + $0x98] sm:$0xff] %v310_v19  ;;  %v314_v21 = vld [vmem:[%s1121_s7 + $0x150] sm:$0xff] }
  0x23   : > { %313 = vst [vmem:[%s1126_s8 + $0xa0] sm:$0xff] %v312_v20  ;;  %v316_v22 = vld [vmem:[%s1121_s7 + $0x160] sm:$0xff]  ;;  %v318_v23 = vld [vmem:[%s1121_s7 + $0x170] sm:$0xff]  ;;  %315 = vst [vmem:[%s1126_s8 + $0xa8] sm:$0xff] %v314_v21 }
  0x24   : > { %317 = vst [vmem:[%s1126_s8 + $0xb0] sm:$0xff] %v316_v22  ;;  %319 = vst [vmem:[%s1126_s8 + $0xb8] sm:$0xff] %v318_v23  ;;  %v320_v24 = vld [vmem:[%s1121_s7 + $0x180] sm:$0xff]  ;;  %v322_v25 = vld [vmem:[%s1121_s7 + $0x190] sm:$0xff] }
  0x25   : > { %v324_v26 = vld [vmem:[%s1121_s7 + $0x1a0] sm:$0xff]  ;;  %321 = vst [vmem:[%s1126_s8 + $0xc0] sm:$0xff] %v320_v24  ;;  %323 = vst [vmem:[%s1126_s8 + $0xc8] sm:$0xff] %v322_v25  ;;  %v326_v27 = vld [vmem:[%s1121_s7 + $0x1b0] sm:$0xff] }
  0x26   : > { %325 = vst [vmem:[%s1126_s8 + $0xd0] sm:$0xff] %v324_v26  ;;  %v328_v28 = vld [vmem:[%s1121_s7 + $0x1c0] sm:$0xff]  ;;  %v330_v29 = vld [vmem:[%s1121_s7 + $0x1d0] sm:$0xff]  ;;  %327 = vst [vmem:[%s1126_s8 + $0xd8] sm:$0xff] %v326_v27 }
  0x27   : > { %329 = vst [vmem:[%s1126_s8 + $0xe0] sm:$0xff] %v328_v28  ;;  %331 = vst [vmem:[%s1126_s8 + $0xe8] sm:$0xff] %v330_v29  ;;  %v332_v30 = vld [vmem:[%s1121_s7 + $0x1e0] sm:$0xff]  ;;  %v334_v31 = vld [vmem:[%s1121_s7 + $0x1f0] sm:$0xff] }
  0x28   : > { %333 = vst [vmem:[%s1126_s8 + $0xf0] sm:$0xff] %v332_v30  ;;  %335 = vst [vmem:[%s1126_s8 + $0xf8] sm:$0xff] %v334_v31 }
  0x29 PF: > { %p831_p7 = scmp.ge.s32.totalorder %s1038_s18, 1  ;;  %p348_p8 = scmp.lt.s32.totalorder %s1038_s18, 37 }
  0x2b   : > { %p349_p9 = pnand %p831_p7, %p348_p8 }
  0x2c   : > { %s355_s9 = sand.u32 (!%p349_p9), 1, %s1014_s12   ;;  %s833_s10 = sshll.u32 (!%p349_p9), %s1022_s14, 1 }
  0x2d   : > { %352 = sbr.rel (%p349_p9) target bundleno = 355 (0x163), region = 66  ;;  %s832_s11 = sshll.u32 (!%p349_p9), %s355_s9, 8 }
  0x2e   : > { %p398_p10 = scmp.lt.s32.totalorder (!%p349_p9), %s833_s10, 35  ;;  %s835_s21 = sshll.u32 (!%p349_p9), %s1026_s15, 1 }
  0x2f   : > { %p408_p11 = scmp.lt.s32.totalorder (!%p349_p9), %s835_s21, 3  ;;  %s1211_s5 = scalar_lea.vmem (!%p349_p9), [#allocation3], %s832_s11 }
  0x30   : > { %p838_p12 = scmp.ne.s32.totalorder (!%p349_p9), %s1022_s14, 0 }
  0x34   : > { %s1293_s10 = smov (!%p398_p10, %s833_s10), 35  ;;  %s1295_s21 = smov (!%p408_p11, %s835_s21), 3 }
  0x35   : > { %s834_s22 = sshll.u32 %s1293_s10, 2  ;;  %s410_s12 = scalar_lea.vmem %s1278_s2, %s1295_s21  ;;  %v1040_v32 = vmov (!%p838_p12), 0.0  }
  0x36   : > { %s1197_s26 = scalar_lea.vmem %s1276_s0, %s834_s22  ;;  %s837_s29 = sshll.u32 %s1295_s21, 3  ;;  %426 = vst [vmem:[#allocation2] sm:$0xff] (!%p838_p12), %v1040_v32  ;;  %427 = vst [vmem:[#allocation2 + $0x8] sm:$0xff] (!%p838_p12), %v1040_v32 }
  0x37   : > { %s1209_s15 = scalar_lea.vmem %s1279_s3, %s837_s29  ;;  %425 = sbr.rel (%p838_p12) target bundleno = 62 (0x3e), region = 74 }
  0x3e PF: > { %v934_v33 = vld [vmem:[%s1211_s5 + $0x4] ss:$8 sps:$4 sm:$0xff]   ;;  %v936_v34 = vld [vmem:[%s1211_s5] ss:$8 sps:$4 sm:$0xff]   ;;  %v937_v35 = vld [vmem:[%s1211_s5 + $0x14] ss:$8 sps:$4 sm:$0xff]  }
  0x3f   : > { %630 = vmatprep.subr.bf16.mxu0 %v934_v33  ;;  %v939_v36 = vld [vmem:[%s1211_s5 + $0x10] ss:$8 sps:$4 sm:$0xff]   ;;  %v940_v37 = vld [vmem:[%s1211_s5 + $0x24] ss:$8 sps:$4 sm:$0xff]   ;;  %v942_v38 = vld [vmem:[%s1211_s5 + $0x20] ss:$8 sps:$4 sm:$0xff]  }
  0x40   : > { %631 = vmatpush1.bf16.msra.mxu0 %v936_v34  ;;  %v943_v39 = vld [vmem:[%s1211_s5 + $0x34] ss:$8 sps:$4 sm:$0xff]   ;;  %v945_v40 = vld [vmem:[%s1211_s5 + $0x30] ss:$8 sps:$4 sm:$0xff]   ;;  %v946_v41 = vld [vmem:[%s1211_s5 + $0x44] ss:$8 sps:$4 sm:$0xff]  }
  0x41   : > { %632 = vmatprep.subr.bf16.mxu0 %v937_v35  ;;  %v948_v42 = vld [vmem:[%s1211_s5 + $0x40] ss:$8 sps:$4 sm:$0xff]   ;;  %v949_v43 = vld [vmem:[%s1211_s5 + $0x54] ss:$8 sps:$4 sm:$0xff]   ;;  %v951_v44 = vld [vmem:[%s1211_s5 + $0x50] ss:$8 sps:$4 sm:$0xff]  }
  0x42   : > { %v952_v45 = vld [vmem:[%s1211_s5 + $0x64] ss:$8 sps:$4 sm:$0xff]   ;;  %v430_v46 = vld [vmem:[%s1197_s26] sm:$0xff]  ;;  %v954_v48 = vld [vmem:[%s1211_s5 + $0x60] ss:$8 sps:$4 sm:$0xff]   ;;  %p873_p13 = scmp.ne.s32.totalorder %s1022_s14, 17 }
  0x43   : > { %v840_v47 = vcombine.high %v430_v46, %v430_v46  ;;  %v955_v49 = vld [vmem:[%s1211_s5 + $0x74] ss:$8 sps:$4 sm:$0xff]   ;;  %v957_v50 = vld [vmem:[%s1211_s5 + $0x70] ss:$8 sps:$4 sm:$0xff]   ;;  %v958_v51 = vld [vmem:[%s1211_s5 + $0x84] ss:$8 sps:$4 sm:$0xff]   ;;  %v839_v3 = vcombine.low %v430_v46, %v430_v46  ;;  %v683_v12 = vlaneseq (!%p873_p13) }
  0x44   : > { %633 = vmatpush1.bf16.msra.mxu0 %v939_v36  ;;  %v960_v52 = vld [vmem:[%s1211_s5 + $0x80] ss:$8 sps:$4 sm:$0xff]   ;;  %v961_v53 = vld [vmem:[%s1211_s5 + $0x94] ss:$8 sps:$4 sm:$0xff]   ;;  %v963_v54 = vld [vmem:[%s1211_s5 + $0x90] ss:$8 sps:$4 sm:$0xff]  }
  0x45   : > { %634 = vmatprep.subr.bf16.mxu0 %v940_v37  ;;  %662 = vmatprep.mubr.bf16.mxu0 %v840_v47  ;;  %v964_v55 = vld [vmem:[%s1211_s5 + $0xa4] ss:$8 sps:$4 sm:$0xff]   ;;  %v966_v56 = vld [vmem:[%s1211_s5 + $0xa0] ss:$8 sps:$4 sm:$0xff]   ;;  %v967_v57 = vld [vmem:[%s1211_s5 + $0xb4] ss:$8 sps:$4 sm:$0xff]  }
  0x46   : > { %v969_v58 = vld [vmem:[%s1211_s5 + $0xb0] ss:$8 sps:$4 sm:$0xff]   ;;  %v970_v59 = vld [vmem:[%s1211_s5 + $0xc4] ss:$8 sps:$4 sm:$0xff]   ;;  %v972_v60 = vld [vmem:[%s1211_s5 + $0xc0] ss:$8 sps:$4 sm:$0xff]  }
  0x47   : > { %v973_v61 = vld [vmem:[%s1211_s5 + $0xd4] ss:$8 sps:$4 sm:$0xff]   ;;  %v975_v62 = vld [vmem:[%s1211_s5 + $0xd0] ss:$8 sps:$4 sm:$0xff]   ;;  %v976_v63 = vld [vmem:[%s1211_s5 + $0xe4] ss:$8 sps:$4 sm:$0xff]  }
  0x48   : > { %635 = vmatpush1.bf16.msra.mxu0 %v942_v38  ;;  %v978_v0 = vld [vmem:[%s1211_s5 + $0xe0] ss:$8 sps:$4 sm:$0xff]   ;;  %v979_v1 = vld [vmem:[%s1211_s5 + $0xf4] ss:$8 sps:$4 sm:$0xff]   ;;  %v981_v2 = vld [vmem:[%s1211_s5 + $0xf0] ss:$8 sps:$4 sm:$0xff]  }
  0x49   : > { %636 = vmatprep.subr.bf16.mxu0 %v943_v39  ;;  %v428_v4 = vld [vmem:[#allocation2] sm:$0xff]  ;;  %v429_v5 = vld [vmem:[#allocation2 + $0x8] sm:$0xff]  ;;  %v684_v13 = vshrl.u32 (!%p873_p13), %v683_v12, 7 }
  0x4a   : > { %v681_v14 = vld [vmem:[%s410_s12] sm:$0x3] (!%p873_p13) }
  0x4b   : > { %v685_v15 = vsub.s32 (!%p873_p13), 0, %v684_v13  ;;  %v689_v16 = vsub.s32 (!%p873_p13), 1, %v684_v13 }
  0x4c   : > { %637 = vmatpush1.bf16.msra.mxu0 %v945_v40 }
  0x4d   : > { %638 = vmatprep.subr.bf16.mxu0 %v946_v41  ;;  %v686_v19 = vrot.slane (!%p873_p13), %v681_v14, %v685_v15  ;;  %v690_v20 = vrot.slane (!%p873_p13), %v681_v14, %v689_v16 }
  0x50   : > { %639 = vmatpush1.bf16.msra.mxu0 %v948_v42 }
  0x51   : > { %640 = vmatprep.subr.bf16.mxu0 %v949_v43 }
  0x54   : > { %641 = vmatpush1.bf16.msra.mxu0 %v951_v44 }
  0x55   : > { %642 = vmatprep.subr.bf16.mxu0 %v952_v45 }
  0x58   : > { %643 = vmatpush1.bf16.msra.mxu0 %v954_v48 }
  0x59   : > { %644 = vmatprep.subr.bf16.mxu0 %v955_v49 }
  0x5c   : > { %645 = vmatpush1.bf16.msra.mxu0 %v957_v50 }
  0x5d   : > { %646 = vmatprep.subr.bf16.mxu0 %v958_v51 }
  0x60   : > { %647 = vmatpush1.bf16.msra.mxu0 %v960_v52 }
  0x61   : > { %648 = vmatprep.subr.bf16.mxu0 %v961_v53 }
  0x64   : > { %649 = vmatpush1.bf16.msra.mxu0 %v963_v54 }
  0x65   : > { %650 = vmatprep.subr.bf16.mxu0 %v964_v55 }
  0x68   : > { %651 = vmatpush1.bf16.msra.mxu0 %v966_v56 }
  0x69   : > { %652 = vmatprep.subr.bf16.mxu0 %v967_v57 }
  0x6c   : > { %653 = vmatpush1.bf16.msra.mxu0 %v969_v58 }
  0x6d   : > { %654 = vmatprep.subr.bf16.mxu0 %v970_v59 }
  0x70   : > { %655 = vmatpush1.bf16.msra.mxu0 %v972_v60 }
  0x71   : > { %656 = vmatprep.subr.bf16.mxu0 %v973_v61 }
  0x74   : > { %657 = vmatpush1.bf16.msra.mxu0 %v975_v62 }
  0x75   : > { %658 = vmatprep.subr.bf16.mxu0 %v976_v63 }
  0x78   : > { %659 = vmatpush1.bf16.msra.mxu0 %v978_v0 }
  0x79   : > { %660 = vmatprep.subr.bf16.mxu0 %v979_v1 }
  0x7c   : > { %661 = vmatpush1.bf16.msra.mxu0 %v981_v2 }
  0x7f   : > { %663 = vmatmul.mubr.bf16.vlgmr.msra.gmra.mrb[0].mxu0 %v839_v3 }
 0x150   : > { %678 = sbr.rel (%p873_p13) target bundleno = 355 (0x163), region = 78 }
 0x152   : > { %v664_v6 = vpop.f32.mrb[0].mxu0 }
 0x153   : > { %v671_v7 = vadd.f32 %v664_v6, %v428_v4  ;;  %v666_v8 = vpop.f32.mrb[1].mxu0 }
 0x154   : > { %v672_v9 = vadd.f32 %v666_v8, %v429_v5  ;;  %v668_v10 = vpop.f32.mrb[2].mxu0 }
 0x155   : > { %673 = vst [vmem:[#allocation2] sm:$0xff] %v671_v7  ;;  %v669_v11 = vpop.f32.mrb[3].mxu0 }
 0x156   : > { %674 = vst [vmem:[#allocation2 + $0x8] sm:$0xff] %v672_v9 }
 0x15c   : > { %v679_v17 = vld [vmem:[#allocation2] sm:$0xff] }
 0x15d   : > { %v680_v18 = vld [vmem:[#allocation2 + $0x8] sm:$0xff]  ;;  %v693_v21 = vadd.f32 %v686_v19, %v679_v17 }
 0x15e   : > { %v694_v22 = vadd.f32 %v690_v20, %v680_v18 }
 0x15f   : > { %v695_v23 = vmax.f32 %v693_v21, 0.0 }
 0x160   : > { %v696_v24 = vmax.f32 %v694_v22, 0.0 }
 0x161   : > { %697 = vst [vmem:[%s1209_s15] sm:$0xff] %v695_v23 }
 0x162   : > { %698 = vst [vmem:[%s1209_s15 + $0x8] sm:$0xff] %v696_v24 }
 0x163 PF: > { %s13_s18 = sadd.s32 1, %s1038_s18   ;;  %s1280_s12 = smov %s1018_s13 }
 0x164   : > { %p10_p0 = scmp.ge.s32.totalorder %s13_s18, 38   ;;  %s1281_s13 = smov %s1112_s25 }
 0x165   : > { %s1282_s14 = smov %s1030_s16  ;;  %s1283_s15 = smov %s1034_s17 }
 0x166   : > { %s1284_s16 = smov %s1287_s19  ;;  %s1285_s17 = smov %s1291_s20 }
 0x167   :  { %12 = sbr.rel (!%p10_p0) target bundleno = 4 (0x4), region = 119 }

// kernel: multicom_res50_forward.97
= control target key start
LH: loop header
LB: loop body
LE: loop exit
PB: predicated region body
PF: predicated region fallthrough
CT: control target
= control target key end

     0   :  { %s1059_s12 = smov 0   ;;  %s1061_s13 = smov 0   ;;  %s1274_s0 = inlined_call_operand.vmem [shape: bf16[8,1024], index: 0, kind: input, shape index: {}]   ;;  %s1275_s1 = inlined_call_operand.vmem [shape: bf16[1024,2048], index: 1, kind: input, shape index: {}]   ;;  %s1276_s2 = inlined_call_operand.vmem [shape: f32[1,2048], index: 2, kind: input, shape index: {}]   ;;  %s1277_s3 = inlined_call_operand.vmem [shape: f32[8,2048], index: 3, kind: output, shape index: {}]  }
   0x1   :  { %s1063_s14 = smov 0   ;;  %s1065_s15 = smov 0  }
   0x2   :  { %s1067_s16 = smov 0   ;;  %s1069_s17 = smov 0  }
   0x3   :  { %s1071_s18 = smov 0  }
   0x4 LB: > { %s25_s19 = sadd.s32 1, %s1028_s16  ;;  %s28_s20 = sadd.s32 1, %s1032_s17  ;;  %s1036_s18 = sphi %s1071_s18, %s13_s18   ;;  %s1032_s17 = sphi %s1069_s17, %s1283_s17   ;;  %s1028_s16 = sphi %s1067_s16, %s1282_s16   ;;  %s1024_s15 = sphi %s1065_s15, %s1281_s15   ;;  %s1020_s14 = sphi %s1063_s14, %s1280_s14   ;;  %s1016_s13 = sphi %s1061_s13, %s1279_s13   ;;  %s1012_s12 = sphi %s1059_s12, %s1278_s12  }
   0x5   : > { %p26_p0 = scmp.ge.s32.totalorder %s25_s19, 4  ;;  %p76_p1 = scmp.ne.s32.totalorder %s1016_s13, %s1012_s12 }
   0x6   : > { %p77_p2 = scmp.eq.s32.totalorder %s1036_s18, 0  ;;  %s69_s24 = sadd.s32 1, %s1016_s13 }
   0x7   : > { %s1285_s19 = smov (%p26_p0, %s25_s19), 0  ;;  %s1287_s20 = smov (!%p26_p0, %s28_s20), %s1032_s17 }
   0x8   : > { %p78_p3 = por %p77_p2, %p76_p1  ;;  %p30_p4 = scmp.ge.s32.totalorder %s1287_s20, 8 }
   0x9   : > { %s64_s21 = ssub.s32 %s1028_s16, %s1285_s19  ;;  %p823_p6 = scmp.ge.s32.totalorder %s1036_s18, 32 }
   0xa   : > { %s1289_s20 = smov (%p30_p4, %s1287_s20), 0 }
   0xb   : > { %s65_s22 = ssub.s32 %s1032_s17, %s1289_s20  ;;  %156 = sbr.rel (%p823_p6) target bundleno = 57 (0x39), region = 16 }
   0xc   : > { %s66_s23 = sor.u32 %s65_s22, %s64_s21 }
   0xd   : > { %p67_p5 = scmp.eq.s32.totalorder %s66_s23, 0 }
   0xf   : > { %s1110_s25 = scalar_select %p67_p5, %s1016_s13, %s69_s24  }
  0x12   : > { %172 = sbr.rel (!%p78_p3) target bundleno = 57 (0x39), region = 24  ;;  %s174_s26 = sand.u32 (%p78_p3), 1, %s1016_s13  }
  0x13   : > { %s826_s27 = sshll.u32 (%p78_p3), %s1032_s17, 1  ;;  %s824_s28 = sshll.u32 (%p78_p3), %s174_s26, 8 }
  0x14   : > { %s874_s29 = sshll.u32 (%p78_p3), %s1028_s16, 9  ;;  %s1124_s8 = scalar_lea.vmem (%p78_p3), [#allocation3], %s824_s28 }
  0x15   : > { %s180_s30 = sadd.s32 (%p78_p3), %s874_s29, %s826_s27 }
  0x16   : > { %s828_s4 = sshll.u32 (%p78_p3), %s180_s30, 2 }
  0x17   : > { %s1119_s7 = scalar_lea.vmem (%p78_p3), %s1275_s1, %s828_s4 }
  0x18   : > { %v272_v0 = vld [vmem:[%s1119_s7] sm:$0xff] (%p78_p3) }
  0x19   : > { %v274_v1 = vld [vmem:[%s1119_s7 + $0x40] sm:$0xff]  ;;  %273 = vst [vmem:[%s1124_s8] sm:$0xff] %v272_v0 }
  0x1a   : > { %v276_v2 = vld [vmem:[%s1119_s7 + $0x80] sm:$0xff]  ;;  %275 = vst [vmem:[%s1124_s8 + $0x8] sm:$0xff] %v274_v1 }
  0x1b   : > { %277 = vst [vmem:[%s1124_s8 + $0x10] sm:$0xff] %v276_v2  ;;  %v278_v3 = vld [vmem:[%s1119_s7 + $0xc0] sm:$0xff] }
  0x1c   : > { %v280_v4 = vld [vmem:[%s1119_s7 + $0x100] sm:$0xff]  ;;  %279 = vst [vmem:[%s1124_s8 + $0x18] sm:$0xff] %v278_v3 }
  0x1d   : > { %v282_v5 = vld [vmem:[%s1119_s7 + $0x140] sm:$0xff]  ;;  %281 = vst [vmem:[%s1124_s8 + $0x20] sm:$0xff] %v280_v4 }
  0x1e   : > { %283 = vst [vmem:[%s1124_s8 + $0x28] sm:$0xff] %v282_v5  ;;  %v284_v6 = vld [vmem:[%s1119_s7 + $0x180] sm:$0xff] }
  0x1f   : > { %v286_v7 = vld [vmem:[%s1119_s7 + $0x1c0] sm:$0xff]  ;;  %285 = vst [vmem:[%s1124_s8 + $0x30] sm:$0xff] %v284_v6 }
  0x20   : > { %v288_v8 = vld [vmem:[%s1119_s7 + $0x200] sm:$0xff]  ;;  %287 = vst [vmem:[%s1124_s8 + $0x38] sm:$0xff] %v286_v7 }
  0x21   : > { %289 = vst [vmem:[%s1124_s8 + $0x40] sm:$0xff] %v288_v8  ;;  %v290_v9 = vld [vmem:[%s1119_s7 + $0x240] sm:$0xff] }
  0x22   : > { %v292_v10 = vld [vmem:[%s1119_s7 + $0x280] sm:$0xff]  ;;  %291 = vst [vmem:[%s1124_s8 + $0x48] sm:$0xff] %v290_v9 }
  0x23   : > { %v294_v11 = vld [vmem:[%s1119_s7 + $0x2c0] sm:$0xff]  ;;  %293 = vst [vmem:[%s1124_s8 + $0x50] sm:$0xff] %v292_v10 }
  0x24   : > { %295 = vst [vmem:[%s1124_s8 + $0x58] sm:$0xff] %v294_v11  ;;  %v296_v12 = vld [vmem:[%s1119_s7 + $0x300] sm:$0xff] }
  0x25   : > { %v298_v13 = vld [vmem:[%s1119_s7 + $0x340] sm:$0xff]  ;;  %297 = vst [vmem:[%s1124_s8 + $0x60] sm:$0xff] %v296_v12 }
  0x26   : > { %v300_v14 = vld [vmem:[%s1119_s7 + $0x380] sm:$0xff]  ;;  %299 = vst [vmem:[%s1124_s8 + $0x68] sm:$0xff] %v298_v13 }
  0x27   : > { %301 = vst [vmem:[%s1124_s8 + $0x70] sm:$0xff] %v300_v14  ;;  %v302_v15 = vld [vmem:[%s1119_s7 + $0x3c0] sm:$0xff] }
  0x28   : > { %v304_v16 = vld [vmem:[%s1119_s7 + $0x400] sm:$0xff]  ;;  %303 = vst [vmem:[%s1124_s8 + $0x78] sm:$0xff] %v302_v15 }
  0x29   : > { %v306_v17 = vld [vmem:[%s1119_s7 + $0x440] sm:$0xff]  ;;  %305 = vst [vmem:[%s1124_s8 + $0x80] sm:$0xff] %v304_v16 }
  0x2a   : > { %307 = vst [vmem:[%s1124_s8 + $0x88] sm:$0xff] %v306_v17  ;;  %v308_v18 = vld [vmem:[%s1119_s7 + $0x480] sm:$0xff] }
  0x2b   : > { %v310_v19 = vld [vmem:[%s1119_s7 + $0x4c0] sm:$0xff]  ;;  %309 = vst [vmem:[%s1124_s8 + $0x90] sm:$0xff] %v308_v18 }
  0x2c   : > { %v312_v20 = vld [vmem:[%s1119_s7 + $0x500] sm:$0xff]  ;;  %311 = vst [vmem:[%s1124_s8 + $0x98] sm:$0xff] %v310_v19 }
  0x2d   : > { %313 = vst [vmem:[%s1124_s8 + $0xa0] sm:$0xff] %v312_v20  ;;  %v314_v21 = vld [vmem:[%s1119_s7 + $0x540] sm:$0xff] }
  0x2e   : > { %v316_v22 = vld [vmem:[%s1119_s7 + $0x580] sm:$0xff]  ;;  %315 = vst [vmem:[%s1124_s8 + $0xa8] sm:$0xff] %v314_v21 }
  0x2f   : > { %v318_v23 = vld [vmem:[%s1119_s7 + $0x5c0] sm:$0xff]  ;;  %317 = vst [vmem:[%s1124_s8 + $0xb0] sm:$0xff] %v316_v22 }
  0x30   : > { %319 = vst [vmem:[%s1124_s8 + $0xb8] sm:$0xff] %v318_v23  ;;  %v320_v24 = vld [vmem:[%s1119_s7 + $0x600] sm:$0xff] }
  0x31   : > { %v322_v25 = vld [vmem:[%s1119_s7 + $0x640] sm:$0xff]  ;;  %321 = vst [vmem:[%s1124_s8 + $0xc0] sm:$0xff] %v320_v24 }
  0x32   : > { %v324_v26 = vld [vmem:[%s1119_s7 + $0x680] sm:$0xff]  ;;  %323 = vst [vmem:[%s1124_s8 + $0xc8] sm:$0xff] %v322_v25 }
  0x33   : > { %325 = vst [vmem:[%s1124_s8 + $0xd0] sm:$0xff] %v324_v26  ;;  %v326_v27 = vld [vmem:[%s1119_s7 + $0x6c0] sm:$0xff] }
  0x34   : > { %v328_v28 = vld [vmem:[%s1119_s7 + $0x700] sm:$0xff]  ;;  %327 = vst [vmem:[%s1124_s8 + $0xd8] sm:$0xff] %v326_v27 }
  0x35   : > { %v330_v29 = vld [vmem:[%s1119_s7 + $0x740] sm:$0xff]  ;;  %329 = vst [vmem:[%s1124_s8 + $0xe0] sm:$0xff] %v328_v28 }
  0x36   : > { %331 = vst [vmem:[%s1124_s8 + $0xe8] sm:$0xff] %v330_v29  ;;  %v332_v30 = vld [vmem:[%s1119_s7 + $0x780] sm:$0xff] }
  0x37   : > { %v334_v31 = vld [vmem:[%s1119_s7 + $0x7c0] sm:$0xff]  ;;  %333 = vst [vmem:[%s1124_s8 + $0xf0] sm:$0xff] %v332_v30 }
  0x38   : > { %335 = vst [vmem:[%s1124_s8 + $0xf8] sm:$0xff] %v334_v31 }
  0x39 PF: > { %p829_p7 = scmp.ge.s32.totalorder %s1036_s18, 1  ;;  %p348_p8 = scmp.lt.s32.totalorder %s1036_s18, 33 }
  0x3b   : > { %p349_p9 = pnand %p829_p7, %p348_p8 }
  0x3c   : > { %s355_s9 = sand.u32 (!%p349_p9), 1, %s1012_s12   ;;  %s831_s10 = sshll.u32 (!%p349_p9), %s1020_s14, 1 }
  0x3d   : > { %352 = sbr.rel (%p349_p9) target bundleno = 369 (0x171), region = 66  ;;  %s830_s11 = sshll.u32 (!%p349_p9), %s355_s9, 8 }
  0x3e   : > { %p398_p10 = scmp.lt.s32.totalorder (!%p349_p9), %s831_s10, 7  ;;  %s833_s21 = sshll.u32 (!%p349_p9), %s1024_s15, 1 }
  0x3f   : > { %p408_p11 = scmp.lt.s32.totalorder (!%p349_p9), %s833_s21, 15  ;;  %s1209_s5 = scalar_lea.vmem (!%p349_p9), [#allocation3], %s830_s11 }
  0x40   : > { %p836_p12 = scmp.ne.s32.totalorder (!%p349_p9), %s1020_s14, 0 }
  0x44   : > { %s1291_s10 = smov (!%p398_p10, %s831_s10), 7  ;;  %s1293_s21 = smov (!%p408_p11, %s833_s21), 15 }
  0x45   : > { %s832_s22 = sshll.u32 %s1291_s10, 2  ;;  %s410_s12 = scalar_lea.vmem %s1276_s2, %s1293_s21  ;;  %v1038_v32 = vmov (!%p836_p12), 0.0  }
  0x46   : > { %s1195_s26 = scalar_lea.vmem %s1274_s0, %s832_s22  ;;  %s835_s29 = sshll.u32 %s1293_s21, 3  ;;  %426 = vst [vmem:[#allocation2] sm:$0xff] (!%p836_p12), %v1038_v32  ;;  %427 = vst [vmem:[#allocation2 + $0x8] sm:$0xff] (!%p836_p12), %v1038_v32 }
  0x47   : > { %s1207_s15 = scalar_lea.vmem %s1277_s3, %s835_s29  ;;  %425 = sbr.rel (%p836_p12) target bundleno = 78 (0x4e), region = 74 }
  0x4e PF: > { %v932_v33 = vld [vmem:[%s1209_s5 + $0x4] ss:$8 sps:$4 sm:$0xff]   ;;  %v934_v34 = vld [vmem:[%s1209_s5] ss:$8 sps:$4 sm:$0xff]   ;;  %v935_v35 = vld [vmem:[%s1209_s5 + $0x14] ss:$8 sps:$4 sm:$0xff]  }
  0x4f   : > { %630 = vmatprep.subr.bf16.mxu0 %v932_v33  ;;  %v937_v36 = vld [vmem:[%s1209_s5 + $0x10] ss:$8 sps:$4 sm:$0xff]   ;;  %v938_v37 = vld [vmem:[%s1209_s5 + $0x24] ss:$8 sps:$4 sm:$0xff]   ;;  %v940_v38 = vld [vmem:[%s1209_s5 + $0x20] ss:$8 sps:$4 sm:$0xff]  }
  0x50   : > { %631 = vmatpush1.bf16.msra.mxu0 %v934_v34  ;;  %v941_v39 = vld [vmem:[%s1209_s5 + $0x34] ss:$8 sps:$4 sm:$0xff]   ;;  %v943_v40 = vld [vmem:[%s1209_s5 + $0x30] ss:$8 sps:$4 sm:$0xff]   ;;  %v944_v41 = vld [vmem:[%s1209_s5 + $0x44] ss:$8 sps:$4 sm:$0xff]  }
  0x51   : > { %632 = vmatprep.subr.bf16.mxu0 %v935_v35  ;;  %v946_v42 = vld [vmem:[%s1209_s5 + $0x40] ss:$8 sps:$4 sm:$0xff]   ;;  %v947_v43 = vld [vmem:[%s1209_s5 + $0x54] ss:$8 sps:$4 sm:$0xff]   ;;  %v949_v44 = vld [vmem:[%s1209_s5 + $0x50] ss:$8 sps:$4 sm:$0xff]  }
  0x52   : > { %v950_v45 = vld [vmem:[%s1209_s5 + $0x64] ss:$8 sps:$4 sm:$0xff]   ;;  %v430_v46 = vld [vmem:[%s1195_s26] sm:$0xff]  ;;  %v952_v48 = vld [vmem:[%s1209_s5 + $0x60] ss:$8 sps:$4 sm:$0xff]   ;;  %p871_p13 = scmp.ne.s32.totalorder %s1020_s14, 3 }
  0x53   : > { %v838_v47 = vcombine.high %v430_v46, %v430_v46  ;;  %v953_v49 = vld [vmem:[%s1209_s5 + $0x74] ss:$8 sps:$4 sm:$0xff]   ;;  %v955_v50 = vld [vmem:[%s1209_s5 + $0x70] ss:$8 sps:$4 sm:$0xff]   ;;  %v956_v51 = vld [vmem:[%s1209_s5 + $0x84] ss:$8 sps:$4 sm:$0xff]   ;;  %v837_v3 = vcombine.low %v430_v46, %v430_v46  ;;  %v683_v12 = vlaneseq (!%p871_p13) }
  0x54   : > { %633 = vmatpush1.bf16.msra.mxu0 %v937_v36  ;;  %v958_v52 = vld [vmem:[%s1209_s5 + $0x80] ss:$8 sps:$4 sm:$0xff]   ;;  %v959_v53 = vld [vmem:[%s1209_s5 + $0x94] ss:$8 sps:$4 sm:$0xff]   ;;  %v961_v54 = vld [vmem:[%s1209_s5 + $0x90] ss:$8 sps:$4 sm:$0xff]  }
  0x55   : > { %634 = vmatprep.subr.bf16.mxu0 %v938_v37  ;;  %662 = vmatprep.mubr.bf16.mxu0 %v838_v47  ;;  %v962_v55 = vld [vmem:[%s1209_s5 + $0xa4] ss:$8 sps:$4 sm:$0xff]   ;;  %v964_v56 = vld [vmem:[%s1209_s5 + $0xa0] ss:$8 sps:$4 sm:$0xff]   ;;  %v965_v57 = vld [vmem:[%s1209_s5 + $0xb4] ss:$8 sps:$4 sm:$0xff]  }
  0x56   : > { %v967_v58 = vld [vmem:[%s1209_s5 + $0xb0] ss:$8 sps:$4 sm:$0xff]   ;;  %v968_v59 = vld [vmem:[%s1209_s5 + $0xc4] ss:$8 sps:$4 sm:$0xff]   ;;  %v970_v60 = vld [vmem:[%s1209_s5 + $0xc0] ss:$8 sps:$4 sm:$0xff]  }
  0x57   : > { %v971_v61 = vld [vmem:[%s1209_s5 + $0xd4] ss:$8 sps:$4 sm:$0xff]   ;;  %v973_v62 = vld [vmem:[%s1209_s5 + $0xd0] ss:$8 sps:$4 sm:$0xff]   ;;  %v974_v63 = vld [vmem:[%s1209_s5 + $0xe4] ss:$8 sps:$4 sm:$0xff]  }
  0x58   : > { %635 = vmatpush1.bf16.msra.mxu0 %v940_v38  ;;  %v976_v0 = vld [vmem:[%s1209_s5 + $0xe0] ss:$8 sps:$4 sm:$0xff]   ;;  %v977_v1 = vld [vmem:[%s1209_s5 + $0xf4] ss:$8 sps:$4 sm:$0xff]   ;;  %v979_v2 = vld [vmem:[%s1209_s5 + $0xf0] ss:$8 sps:$4 sm:$0xff]  }
  0x59   : > { %636 = vmatprep.subr.bf16.mxu0 %v941_v39  ;;  %v428_v4 = vld [vmem:[#allocation2] sm:$0xff]  ;;  %v429_v5 = vld [vmem:[#allocation2 + $0x8] sm:$0xff]  ;;  %v684_v13 = vshrl.u32 (!%p871_p13), %v683_v12, 7 }
  0x5a   : > { %v681_v14 = vld [vmem:[%s410_s12] sm:$0x3] (!%p871_p13) }
  0x5b   : > { %v685_v15 = vsub.s32 (!%p871_p13), 0, %v684_v13  ;;  %v689_v16 = vsub.s32 (!%p871_p13), 1, %v684_v13 }
  0x5c   : > { %637 = vmatpush1.bf16.msra.mxu0 %v943_v40 }
  0x5d   : > { %638 = vmatprep.subr.bf16.mxu0 %v944_v41  ;;  %v686_v19 = vrot.slane (!%p871_p13), %v681_v14, %v685_v15  ;;  %v690_v20 = vrot.slane (!%p871_p13), %v681_v14, %v689_v16 }
  0x60   : > { %639 = vmatpush1.bf16.msra.mxu0 %v946_v42 }
  0x61   : > { %640 = vmatprep.subr.bf16.mxu0 %v947_v43 }
  0x64   : > { %641 = vmatpush1.bf16.msra.mxu0 %v949_v44 }
  0x65   : > { %642 = vmatprep.subr.bf16.mxu0 %v950_v45 }
  0x68   : > { %643 = vmatpush1.bf16.msra.mxu0 %v952_v48 }
  0x69   : > { %644 = vmatprep.subr.bf16.mxu0 %v953_v49 }
  0x6c   : > { %645 = vmatpush1.bf16.msra.mxu0 %v955_v50 }
  0x6d   : > { %646 = vmatprep.subr.bf16.mxu0 %v956_v51 }
  0x70   : > { %647 = vmatpush1.bf16.msra.mxu0 %v958_v52 }
  0x71   : > { %648 = vmatprep.subr.bf16.mxu0 %v959_v53 }
  0x74   : > { %649 = vmatpush1.bf16.msra.mxu0 %v961_v54 }
  0x75   : > { %650 = vmatprep.subr.bf16.mxu0 %v962_v55 }
  0x78   : > { %651 = vmatpush1.bf16.msra.mxu0 %v964_v56 }
  0x79   : > { %652 = vmatprep.subr.bf16.mxu0 %v965_v57 }
  0x7c   : > { %653 = vmatpush1.bf16.msra.mxu0 %v967_v58 }
  0x7d   : > { %654 = vmatprep.subr.bf16.mxu0 %v968_v59 }
  0x80   : > { %655 = vmatpush1.bf16.msra.mxu0 %v970_v60 }
  0x81   : > { %656 = vmatprep.subr.bf16.mxu0 %v971_v61 }
  0x84   : > { %657 = vmatpush1.bf16.msra.mxu0 %v973_v62 }
  0x85   : > { %658 = vmatprep.subr.bf16.mxu0 %v974_v63 }
  0x88   : > { %659 = vmatpush1.bf16.msra.mxu0 %v976_v0 }
  0x89   : > { %660 = vmatprep.subr.bf16.mxu0 %v977_v1 }
  0x8c   : > { %661 = vmatpush1.bf16.msra.mxu0 %v979_v2 }
  0x8f   : > { %663 = vmatmul.mubr.bf16.vlgmr.msra.gmra.mrb[0].mxu0 %v837_v3 }
 0x160   : > { %678 = sbr.rel (%p871_p13) target bundleno = 369 (0x171), region = 78 }
 0x162   : > { %v664_v6 = vpop.f32.mrb[0].mxu0 }
 0x163   : > { %v671_v7 = vadd.f32 %v664_v6, %v428_v4  ;;  %v666_v8 = vpop.f32.mrb[1].mxu0 }
 0x164   : > { %v672_v9 = vadd.f32 %v666_v8, %v429_v5  ;;  %v668_v10 = vpop.f32.mrb[2].mxu0 }
 0x165   : > { %673 = vst [vmem:[#allocation2] sm:$0xff] %v671_v7  ;;  %v669_v11 = vpop.f32.mrb[3].mxu0 }
 0x166   : > { %674 = vst [vmem:[#allocation2 + $0x8] sm:$0xff] %v672_v9 }
 0x16c   : > { %v679_v17 = vld [vmem:[#allocation2] sm:$0xff] }
 0x16d   : > { %v680_v18 = vld [vmem:[#allocation2 + $0x8] sm:$0xff]  ;;  %v693_v21 = vadd.f32 %v686_v19, %v679_v17 }
 0x16e   : > { %v694_v22 = vadd.f32 %v690_v20, %v680_v18 }
 0x16f   : > { %695 = vst [vmem:[%s1207_s15] sm:$0xff] %v693_v21 }
 0x170   : > { %696 = vst [vmem:[%s1207_s15 + $0x8] sm:$0xff] %v694_v22 }
 0x171 PF: > { %s13_s18 = sadd.s32 1, %s1036_s18   ;;  %s1278_s12 = smov %s1016_s13 }
 0x172   : > { %p10_p0 = scmp.ge.s32.totalorder %s13_s18, 34   ;;  %s1279_s13 = smov %s1110_s25 }
 0x173   : > { %s1280_s14 = smov %s1028_s16  ;;  %s1281_s15 = smov %s1032_s17 }
 0x174   : > { %s1282_s16 = smov %s1285_s19  ;;  %s1283_s17 = smov %s1289_s20 }
 0x175   :  { %12 = sbr.rel (!%p10_p0) target bundleno = 4 (0x4), region = 119 }

// kernel: multicom_res50_forward.100
= control target key start
LH: loop header
LB: loop body
LE: loop exit
PB: predicated region body
PF: predicated region fallthrough
CT: control target
= control target key end

     0   :  { %s1153_s15 = smov 0   ;;  %s1155_s16 = smov 0   ;;  %s1375_s0 = inlined_call_operand.vmem [shape: bf16[8,512], index: 0, kind: input, shape index: {}]   ;;  %s1376_s1 = inlined_call_operand.vmem [shape: bf16[512,2048], index: 1, kind: input, shape index: {}]   ;;  %s1377_s2 = inlined_call_operand.vmem [shape: f32[1,2048], index: 2, kind: input, shape index: {}]   ;;  %s1378_s3 = inlined_call_operand.vmem [shape: f32[8,2048], index: 3, kind: input, shape index: {}]   ;;  %s1379_s4 = inlined_call_operand.vmem [shape: f32[8,2048], index: 4, kind: output, shape index: {}]  }
   0x1   :  { %s1157_s17 = smov 0   ;;  %s1159_s18 = smov 0  }
   0x2   :  { %s1161_s19 = smov 0   ;;  %s1163_s20 = smov 0  }
   0x3   :  { %s1165_s21 = smov 0  }
   0x4 LB: > { %s26_s22 = sadd.s32 1, %s1117_s19  ;;  %s29_s23 = sadd.s32 1, %s1121_s20  ;;  %s1125_s21 = sphi %s1165_s21, %s14_s21   ;;  %s1121_s20 = sphi %s1163_s20, %s1385_s20   ;;  %s1117_s19 = sphi %s1161_s19, %s1384_s19   ;;  %s1113_s18 = sphi %s1159_s18, %s1383_s18   ;;  %s1109_s17 = sphi %s1157_s17, %s1382_s17   ;;  %s1105_s16 = sphi %s1155_s16, %s1381_s16   ;;  %s1101_s15 = sphi %s1153_s15, %s1380_s15  }
   0x5   : > { %p27_p0 = scmp.ge.s32.totalorder %s26_s22, 2  ;;  %p77_p1 = scmp.ne.s32.totalorder %s1105_s16, %s1101_s15 }
   0x6   : > { %p78_p2 = scmp.eq.s32.totalorder %s1125_s21, 0  ;;  %s70_s27 = sadd.s32 1, %s1105_s16 }
   0x7   : > { %s1387_s22 = smov (%p27_p0, %s26_s22), 0  ;;  %s1389_s23 = smov (!%p27_p0, %s29_s23), %s1121_s20 }
   0x8   : > { %p79_p3 = por %p78_p2, %p77_p1  ;;  %p31_p4 = scmp.ge.s32.totalorder %s1389_s23, 8 }
   0x9   : > { %s65_s24 = ssub.s32 %s1117_s19, %s1387_s22  ;;  %p910_p6 = scmp.ge.s32.totalorder %s1125_s21, 16 }
   0xa   : > { %s1391_s23 = smov (%p31_p4, %s1389_s23), 0 }
   0xb   : > { %s66_s25 = ssub.s32 %s1121_s20, %s1391_s23  ;;  %185 = sbr.rel (%p910_p6) target bundleno = 57 (0x39), region = 16 }
   0xc   : > { %s67_s26 = sor.u32 %s66_s25, %s65_s24 }
   0xd   : > { %p68_p5 = scmp.eq.s32.totalorder %s67_s26, 0 }
   0xf   : > { %s1204_s28 = scalar_select %p68_p5, %s1105_s16, %s70_s27  }
  0x12   : > { %201 = sbr.rel (!%p79_p3) target bundleno = 57 (0x39), region = 24  ;;  %s203_s29 = sand.u32 (%p79_p3), 1, %s1105_s16  }
  0x13   : > { %s913_s30 = sshll.u32 (%p79_p3), %s1121_s20, 1  ;;  %s911_s5 = sshll.u32 (%p79_p3), %s203_s29, 8 }
  0x14   : > { %s963_s6 = sshll.u32 (%p79_p3), %s1117_s19, 9  ;;  %s1218_s12 = scalar_lea.vmem (%p79_p3), [#allocation3], %s911_s5 }
  0x15   : > { %s209_s7 = sadd.s32 (%p79_p3), %s963_s6, %s913_s30 }
  0x16   : > { %s915_s8 = sshll.u32 (%p79_p3), %s209_s7, 2 }
  0x17   : > { %s1213_s11 = scalar_lea.vmem (%p79_p3), %s1376_s1, %s915_s8 }
  0x18   : > { %v301_v0 = vld [vmem:[%s1213_s11] sm:$0xff] (%p79_p3) }
  0x19   : > { %v303_v1 = vld [vmem:[%s1213_s11 + $0x40] sm:$0xff]  ;;  %302 = vst [vmem:[%s1218_s12] sm:$0xff] %v301_v0 }
  0x1a   : > { %v305_v2 = vld [vmem:[%s1213_s11 + $0x80] sm:$0xff]  ;;  %304 = vst [vmem:[%s1218_s12 + $0x8] sm:$0xff] %v303_v1 }
  0x1b   : > { %306 = vst [vmem:[%s1218_s12 + $0x10] sm:$0xff] %v305_v2  ;;  %v307_v3 = vld [vmem:[%s1213_s11 + $0xc0] sm:$0xff] }
  0x1c   : > { %v309_v4 = vld [vmem:[%s1213_s11 + $0x100] sm:$0xff]  ;;  %308 = vst [vmem:[%s1218_s12 + $0x18] sm:$0xff] %v307_v3 }
  0x1d   : > { %v311_v5 = vld [vmem:[%s1213_s11 + $0x140] sm:$0xff]  ;;  %310 = vst [vmem:[%s1218_s12 + $0x20] sm:$0xff] %v309_v4 }
  0x1e   : > { %312 = vst [vmem:[%s1218_s12 + $0x28] sm:$0xff] %v311_v5  ;;  %v313_v6 = vld [vmem:[%s1213_s11 + $0x180] sm:$0xff] }
  0x1f   : > { %v315_v7 = vld [vmem:[%s1213_s11 + $0x1c0] sm:$0xff]  ;;  %314 = vst [vmem:[%s1218_s12 + $0x30] sm:$0xff] %v313_v6 }
  0x20   : > { %v317_v8 = vld [vmem:[%s1213_s11 + $0x200] sm:$0xff]  ;;  %316 = vst [vmem:[%s1218_s12 + $0x38] sm:$0xff] %v315_v7 }
  0x21   : > { %318 = vst [vmem:[%s1218_s12 + $0x40] sm:$0xff] %v317_v8  ;;  %v319_v9 = vld [vmem:[%s1213_s11 + $0x240] sm:$0xff] }
  0x22   : > { %v321_v10 = vld [vmem:[%s1213_s11 + $0x280] sm:$0xff]  ;;  %320 = vst [vmem:[%s1218_s12 + $0x48] sm:$0xff] %v319_v9 }
  0x23   : > { %v323_v11 = vld [vmem:[%s1213_s11 + $0x2c0] sm:$0xff]  ;;  %322 = vst [vmem:[%s1218_s12 + $0x50] sm:$0xff] %v321_v10 }
  0x24   : > { %324 = vst [vmem:[%s1218_s12 + $0x58] sm:$0xff] %v323_v11  ;;  %v325_v12 = vld [vmem:[%s1213_s11 + $0x300] sm:$0xff] }
  0x25   : > { %v327_v13 = vld [vmem:[%s1213_s11 + $0x340] sm:$0xff]  ;;  %326 = vst [vmem:[%s1218_s12 + $0x60] sm:$0xff] %v325_v12 }
  0x26   : > { %v329_v14 = vld [vmem:[%s1213_s11 + $0x380] sm:$0xff]  ;;  %328 = vst [vmem:[%s1218_s12 + $0x68] sm:$0xff] %v327_v13 }
  0x27   : > { %330 = vst [vmem:[%s1218_s12 + $0x70] sm:$0xff] %v329_v14  ;;  %v331_v15 = vld [vmem:[%s1213_s11 + $0x3c0] sm:$0xff] }
  0x28   : > { %v333_v16 = vld [vmem:[%s1213_s11 + $0x400] sm:$0xff]  ;;  %332 = vst [vmem:[%s1218_s12 + $0x78] sm:$0xff] %v331_v15 }
  0x29   : > { %v335_v17 = vld [vmem:[%s1213_s11 + $0x440] sm:$0xff]  ;;  %334 = vst [vmem:[%s1218_s12 + $0x80] sm:$0xff] %v333_v16 }
  0x2a   : > { %336 = vst [vmem:[%s1218_s12 + $0x88] sm:$0xff] %v335_v17  ;;  %v337_v18 = vld [vmem:[%s1213_s11 + $0x480] sm:$0xff] }
  0x2b   : > { %v339_v19 = vld [vmem:[%s1213_s11 + $0x4c0] sm:$0xff]  ;;  %338 = vst [vmem:[%s1218_s12 + $0x90] sm:$0xff] %v337_v18 }
  0x2c   : > { %v341_v20 = vld [vmem:[%s1213_s11 + $0x500] sm:$0xff]  ;;  %340 = vst [vmem:[%s1218_s12 + $0x98] sm:$0xff] %v339_v19 }
  0x2d   : > { %342 = vst [vmem:[%s1218_s12 + $0xa0] sm:$0xff] %v341_v20  ;;  %v343_v21 = vld [vmem:[%s1213_s11 + $0x540] sm:$0xff] }
  0x2e   : > { %v345_v22 = vld [vmem:[%s1213_s11 + $0x580] sm:$0xff]  ;;  %344 = vst [vmem:[%s1218_s12 + $0xa8] sm:$0xff] %v343_v21 }
  0x2f   : > { %v347_v23 = vld [vmem:[%s1213_s11 + $0x5c0] sm:$0xff]  ;;  %346 = vst [vmem:[%s1218_s12 + $0xb0] sm:$0xff] %v345_v22 }
  0x30   : > { %348 = vst [vmem:[%s1218_s12 + $0xb8] sm:$0xff] %v347_v23  ;;  %v349_v24 = vld [vmem:[%s1213_s11 + $0x600] sm:$0xff] }
  0x31   : > { %v351_v25 = vld [vmem:[%s1213_s11 + $0x640] sm:$0xff]  ;;  %350 = vst [vmem:[%s1218_s12 + $0xc0] sm:$0xff] %v349_v24 }
  0x32   : > { %v353_v26 = vld [vmem:[%s1213_s11 + $0x680] sm:$0xff]  ;;  %352 = vst [vmem:[%s1218_s12 + $0xc8] sm:$0xff] %v351_v25 }
  0x33   : > { %354 = vst [vmem:[%s1218_s12 + $0xd0] sm:$0xff] %v353_v26  ;;  %v355_v27 = vld [vmem:[%s1213_s11 + $0x6c0] sm:$0xff] }
  0x34   : > { %v357_v28 = vld [vmem:[%s1213_s11 + $0x700] sm:$0xff]  ;;  %356 = vst [vmem:[%s1218_s12 + $0xd8] sm:$0xff] %v355_v27 }
  0x35   : > { %v359_v29 = vld [vmem:[%s1213_s11 + $0x740] sm:$0xff]  ;;  %358 = vst [vmem:[%s1218_s12 + $0xe0] sm:$0xff] %v357_v28 }
  0x36   : > { %360 = vst [vmem:[%s1218_s12 + $0xe8] sm:$0xff] %v359_v29  ;;  %v361_v30 = vld [vmem:[%s1213_s11 + $0x780] sm:$0xff] }
  0x37   : > { %v363_v31 = vld [vmem:[%s1213_s11 + $0x7c0] sm:$0xff]  ;;  %362 = vst [vmem:[%s1218_s12 + $0xf0] sm:$0xff] %v361_v30 }
  0x38   : > { %364 = vst [vmem:[%s1218_s12 + $0xf8] sm:$0xff] %v363_v31 }
  0x39 PF: > { %p916_p7 = scmp.ge.s32.totalorder %s1125_s21, 1  ;;  %p390_p8 = scmp.lt.s32.totalorder %s1125_s21, 17 }
  0x3b   : > { %p391_p9 = pnand %p916_p7, %p390_p8 }
  0x3c   : > { %s397_s13 = sand.u32 (!%p391_p9), 1, %s1101_s15   ;;  %s918_s14 = sshll.u32 (!%p391_p9), %s1109_s17, 1 }
  0x3d   : > { %394 = sbr.rel (%p391_p9) target bundleno = 374 (0x176), region = 70  ;;  %s917_s24 = sshll.u32 (!%p391_p9), %s397_s13, 8 }
  0x3e   : > { %p451_p10 = scmp.lt.s32.totalorder (!%p391_p9), %s918_s14, 3  ;;  %s920_s25 = sshll.u32 (!%p391_p9), %s1113_s18, 1 }
  0x3f   : > { %p461_p11 = scmp.lt.s32.totalorder (!%p391_p9), %s920_s25, 15  ;;  %s1308_s13 = scalar_lea.vmem (!%p391_p9), [#allocation3], %s917_s24 }
  0x40   : > { %p925_p12 = scmp.ne.s32.totalorder (!%p391_p9), %s1109_s17, 0 }
  0x44   : > { %s1393_s14 = smov (!%p451_p10, %s918_s14), 3  ;;  %s1395_s25 = smov (!%p461_p11, %s920_s25), 15 }
  0x45   : > { %s919_s26 = sshll.u32 %s1393_s14, 2  ;;  %s463_s15 = scalar_lea.vmem %s1377_s2, %s1395_s25  ;;  %v1127_v32 = vmov (!%p925_p12), 0.0  }
  0x46   : > { %s1289_s30 = scalar_lea.vmem %s1375_s0, %s919_s26  ;;  %s922_s7 = sshll.u32 %s1395_s25, 3  ;;  %489 = vst [vmem:[#allocation2] sm:$0xff] (!%p925_p12), %v1127_v32  ;;  %490 = vst [vmem:[#allocation2 + $0x8] sm:$0xff] (!%p925_p12), %v1127_v32 }
  0x47   : > { %s1301_s18 = scalar_lea.vmem %s1378_s3, %s922_s7  ;;  %s1306_s12 = scalar_lea.vmem %s1379_s4, %s922_s7 }
  0x48   : > { %488 = sbr.rel (%p925_p12) target bundleno = 79 (0x4f), region = 78 }
  0x4f PF: > { %v1021_v33 = vld [vmem:[%s1308_s13 + $0x4] ss:$8 sps:$4 sm:$0xff]   ;;  %v1023_v34 = vld [vmem:[%s1308_s13] ss:$8 sps:$4 sm:$0xff]   ;;  %v1024_v35 = vld [vmem:[%s1308_s13 + $0x14] ss:$8 sps:$4 sm:$0xff]  }
  0x50   : > { %693 = vmatprep.subr.bf16.mxu0 %v1021_v33  ;;  %v1026_v36 = vld [vmem:[%s1308_s13 + $0x10] ss:$8 sps:$4 sm:$0xff]   ;;  %v1027_v37 = vld [vmem:[%s1308_s13 + $0x24] ss:$8 sps:$4 sm:$0xff]   ;;  %v1029_v38 = vld [vmem:[%s1308_s13 + $0x20] ss:$8 sps:$4 sm:$0xff]  }
  0x51   : > { %694 = vmatpush1.bf16.msra.mxu0 %v1023_v34  ;;  %v1030_v39 = vld [vmem:[%s1308_s13 + $0x34] ss:$8 sps:$4 sm:$0xff]   ;;  %v1032_v40 = vld [vmem:[%s1308_s13 + $0x30] ss:$8 sps:$4 sm:$0xff]   ;;  %v1033_v41 = vld [vmem:[%s1308_s13 + $0x44] ss:$8 sps:$4 sm:$0xff]  }
  0x52   : > { %695 = vmatprep.subr.bf16.mxu0 %v1024_v35  ;;  %v1035_v42 = vld [vmem:[%s1308_s13 + $0x40] ss:$8 sps:$4 sm:$0xff]   ;;  %v1036_v43 = vld [vmem:[%s1308_s13 + $0x54] ss:$8 sps:$4 sm:$0xff]   ;;  %v1038_v44 = vld [vmem:[%s1308_s13 + $0x50] ss:$8 sps:$4 sm:$0xff]  }
  0x53   : > { %v1039_v45 = vld [vmem:[%s1308_s13 + $0x64] ss:$8 sps:$4 sm:$0xff]   ;;  %v493_v46 = vld [vmem:[%s1289_s30] sm:$0xff]  ;;  %v1041_v48 = vld [vmem:[%s1308_s13 + $0x60] ss:$8 sps:$4 sm:$0xff]   ;;  %p960_p13 = scmp.ne.s32.totalorder %s1109_s17, 1 }
  0x54   : > { %v927_v47 = vcombine.high %v493_v46, %v493_v46  ;;  %v1042_v49 = vld [vmem:[%s1308_s13 + $0x74] ss:$8 sps:$4 sm:$0xff]   ;;  %v1044_v50 = vld [vmem:[%s1308_s13 + $0x70] ss:$8 sps:$4 sm:$0xff]   ;;  %v1045_v51 = vld [vmem:[%s1308_s13 + $0x84] ss:$8 sps:$4 sm:$0xff]   ;;  %v926_v3 = vcombine.low %v493_v46, %v493_v46  ;;  %v746_v12 = vlaneseq (!%p960_p13) }
  0x55   : > { %696 = vmatpush1.bf16.msra.mxu0 %v1026_v36  ;;  %v1047_v52 = vld [vmem:[%s1308_s13 + $0x80] ss:$8 sps:$4 sm:$0xff]   ;;  %v1048_v53 = vld [vmem:[%s1308_s13 + $0x94] ss:$8 sps:$4 sm:$0xff]   ;;  %v1050_v54 = vld [vmem:[%s1308_s13 + $0x90] ss:$8 sps:$4 sm:$0xff]  }
  0x56   : > { %697 = vmatprep.subr.bf16.mxu0 %v1027_v37  ;;  %725 = vmatprep.mubr.bf16.mxu0 %v927_v47  ;;  %v1051_v55 = vld [vmem:[%s1308_s13 + $0xa4] ss:$8 sps:$4 sm:$0xff]   ;;  %v1053_v56 = vld [vmem:[%s1308_s13 + $0xa0] ss:$8 sps:$4 sm:$0xff]   ;;  %v1054_v57 = vld [vmem:[%s1308_s13 + $0xb4] ss:$8 sps:$4 sm:$0xff]  }
  0x57   : > { %v1056_v58 = vld [vmem:[%s1308_s13 + $0xb0] ss:$8 sps:$4 sm:$0xff]   ;;  %v1057_v59 = vld [vmem:[%s1308_s13 + $0xc4] ss:$8 sps:$4 sm:$0xff]   ;;  %v1059_v60 = vld [vmem:[%s1308_s13 + $0xc0] ss:$8 sps:$4 sm:$0xff]  }
  0x58   : > { %v1060_v61 = vld [vmem:[%s1308_s13 + $0xd4] ss:$8 sps:$4 sm:$0xff]   ;;  %v1062_v62 = vld [vmem:[%s1308_s13 + $0xd0] ss:$8 sps:$4 sm:$0xff]   ;;  %v1063_v63 = vld [vmem:[%s1308_s13 + $0xe4] ss:$8 sps:$4 sm:$0xff]  }
  0x59   : > { %698 = vmatpush1.bf16.msra.mxu0 %v1029_v38  ;;  %v1065_v0 = vld [vmem:[%s1308_s13 + $0xe0] ss:$8 sps:$4 sm:$0xff]   ;;  %v1066_v1 = vld [vmem:[%s1308_s13 + $0xf4] ss:$8 sps:$4 sm:$0xff]   ;;  %v1068_v2 = vld [vmem:[%s1308_s13 + $0xf0] ss:$8 sps:$4 sm:$0xff]  }
  0x5a   : > { %699 = vmatprep.subr.bf16.mxu0 %v1030_v39  ;;  %v491_v4 = vld [vmem:[#allocation2] sm:$0xff]  ;;  %v492_v5 = vld [vmem:[#allocation2 + $0x8] sm:$0xff]  ;;  %v747_v13 = vshrl.u32 (!%p960_p13), %v746_v12, 7 }
  0x5b   : > { %v744_v14 = vld [vmem:[%s463_s15] sm:$0x3] (!%p960_p13)  ;;  %v759_v22 = vld [vmem:[%s1301_s18 + $0x8] sm:$0xff] (!%p960_p13) }
  0x5c   : > { %v748_v15 = vsub.s32 (!%p960_p13), 0, %v747_v13  ;;  %v752_v16 = vsub.s32 (!%p960_p13), 1, %v747_v13  ;;  %v758_v21 = vld [vmem:[%s1301_s18] sm:$0xff] (!%p960_p13) }
  0x5d   : > { %700 = vmatpush1.bf16.msra.mxu0 %v1032_v40 }
  0x5e   : > { %701 = vmatprep.subr.bf16.mxu0 %v1033_v41  ;;  %v749_v19 = vrot.slane (!%p960_p13), %v744_v14, %v748_v15  ;;  %v753_v20 = vrot.slane (!%p960_p13), %v744_v14, %v752_v16 }
  0x61   : > { %702 = vmatpush1.bf16.msra.mxu0 %v1035_v42 }
  0x62   : > { %703 = vmatprep.subr.bf16.mxu0 %v1036_v43 }
  0x65   : > { %704 = vmatpush1.bf16.msra.mxu0 %v1038_v44 }
  0x66   : > { %705 = vmatprep.subr.bf16.mxu0 %v1039_v45 }
  0x69   : > { %706 = vmatpush1.bf16.msra.mxu0 %v1041_v48 }
  0x6a   : > { %707 = vmatprep.subr.bf16.mxu0 %v1042_v49 }
  0x6d   : > { %708 = vmatpush1.bf16.msra.mxu0 %v1044_v50 }
  0x6e   : > { %709 = vmatprep.subr.bf16.mxu0 %v1045_v51 }
  0x71   : > { %710 = vmatpush1.bf16.msra.mxu0 %v1047_v52 }
  0x72   : > { %711 = vmatprep.subr.bf16.mxu0 %v1048_v53 }
  0x75   : > { %712 = vmatpush1.bf16.msra.mxu0 %v1050_v54 }
  0x76   : > { %713 = vmatprep.subr.bf16.mxu0 %v1051_v55 }
  0x79   : > { %714 = vmatpush1.bf16.msra.mxu0 %v1053_v56 }
  0x7a   : > { %715 = vmatprep.subr.bf16.mxu0 %v1054_v57 }
  0x7d   : > { %716 = vmatpush1.bf16.msra.mxu0 %v1056_v58 }
  0x7e   : > { %717 = vmatprep.subr.bf16.mxu0 %v1057_v59 }
  0x81   : > { %718 = vmatpush1.bf16.msra.mxu0 %v1059_v60 }
  0x82   : > { %719 = vmatprep.subr.bf16.mxu0 %v1060_v61 }
  0x85   : > { %720 = vmatpush1.bf16.msra.mxu0 %v1062_v62 }
  0x86   : > { %721 = vmatprep.subr.bf16.mxu0 %v1063_v63 }
  0x89   : > { %722 = vmatpush1.bf16.msra.mxu0 %v1065_v0 }
  0x8a   : > { %723 = vmatprep.subr.bf16.mxu0 %v1066_v1 }
  0x8d   : > { %724 = vmatpush1.bf16.msra.mxu0 %v1068_v2 }
  0x90   : > { %726 = vmatmul.mubr.bf16.vlgmr.msra.gmra.mrb[0].mxu0 %v926_v3 }
 0x161   : > { %741 = sbr.rel (%p960_p13) target bundleno = 374 (0x176), region = 82 }
 0x163   : > { %v727_v6 = vpop.f32.mrb[0].mxu0 }
 0x164   : > { %v734_v7 = vadd.f32 %v727_v6, %v491_v4  ;;  %v729_v8 = vpop.f32.mrb[1].mxu0 }
 0x165   : > { %v735_v9 = vadd.f32 %v729_v8, %v492_v5  ;;  %v731_v10 = vpop.f32.mrb[2].mxu0 }
 0x166   : > { %736 = vst [vmem:[#allocation2] sm:$0xff] %v734_v7  ;;  %v732_v11 = vpop.f32.mrb[3].mxu0 }
 0x167   : > { %737 = vst [vmem:[#allocation2 + $0x8] sm:$0xff] %v735_v9 }
 0x16d   : > { %v742_v17 = vld [vmem:[#allocation2] sm:$0xff] }
 0x16e   : > { %v743_v18 = vld [vmem:[#allocation2 + $0x8] sm:$0xff]  ;;  %v756_v23 = vadd.f32 %v749_v19, %v742_v17 }
 0x16f   : > { %v757_v24 = vadd.f32 %v753_v20, %v743_v18 }
 0x170   : > { %v760_v25 = vadd.f32 %v758_v21, %v756_v23 }
 0x171   : > { %v761_v26 = vadd.f32 %v759_v22, %v757_v24 }
 0x172   : > { %v762_v27 = vmax.f32 %v760_v25, 0.0 }
 0x173   : > { %v763_v28 = vmax.f32 %v761_v26, 0.0 }
 0x174   : > { %764 = vst [vmem:[%s1306_s12] sm:$0xff] %v762_v27 }
 0x175   : > { %765 = vst [vmem:[%s1306_s12 + $0x8] sm:$0xff] %v763_v28 }
 0x176 PF: > { %s14_s21 = sadd.s32 1, %s1125_s21   ;;  %s1380_s15 = smov %s1105_s16 }
 0x177   : > { %p11_p0 = scmp.ge.s32.totalorder %s14_s21, 18   ;;  %s1381_s16 = smov %s1204_s28 }
 0x178   : > { %s1382_s17 = smov %s1117_s19  ;;  %s1383_s18 = smov %s1121_s20 }
 0x179   : > { %s1384_s19 = smov %s1387_s22  ;;  %s1385_s20 = smov %s1391_s23 }
 0x17a   :  { %13 = sbr.rel (!%p11_p0) target bundleno = 4 (0x4), region = 126 }

// kernel: multicom_res50_forward.101
= control target key start
LH: loop header
LB: loop body
LE: loop exit
PB: predicated region body
PF: predicated region fallthrough
CT: control target
= control target key end

     0   :  { %s1061_s12 = smov 0   ;;  %s1063_s13 = smov 0   ;;  %s1276_s0 = inlined_call_operand.vmem [shape: bf16[8,2048], index: 0, kind: input, shape index: {}]   ;;  %s1277_s1 = inlined_call_operand.vmem [shape: bf16[2048,512], index: 1, kind: input, shape index: {}]   ;;  %s1278_s2 = inlined_call_operand.vmem [shape: f32[1,512], index: 2, kind: input, shape index: {}]   ;;  %s1279_s3 = inlined_call_operand.vmem [shape: f32[8,512], index: 3, kind: output, shape index: {}]  }
   0x1   :  { %s1065_s14 = smov 0   ;;  %s1067_s15 = smov 0  }
   0x2   :  { %s1069_s16 = smov 0   ;;  %s1071_s17 = smov 0  }
   0x3   :  { %s1073_s18 = smov 0  }
   0x4 LB: > { %s25_s19 = sadd.s32 1, %s1030_s16  ;;  %s28_s20 = sadd.s32 1, %s1034_s17  ;;  %s1038_s18 = sphi %s1073_s18, %s13_s18   ;;  %s1034_s17 = sphi %s1071_s17, %s1285_s17   ;;  %s1030_s16 = sphi %s1069_s16, %s1284_s16   ;;  %s1026_s15 = sphi %s1067_s15, %s1283_s15   ;;  %s1022_s14 = sphi %s1065_s14, %s1282_s14   ;;  %s1018_s13 = sphi %s1063_s13, %s1281_s13   ;;  %s1014_s12 = sphi %s1061_s12, %s1280_s12  }
   0x5   : > { %p26_p0 = scmp.ge.s32.totalorder %s25_s19, 8  ;;  %p76_p1 = scmp.ne.s32.totalorder %s1018_s13, %s1014_s12 }
   0x6   : > { %p77_p2 = scmp.eq.s32.totalorder %s1038_s18, 0  ;;  %s69_s24 = sadd.s32 1, %s1018_s13 }
   0x7   : > { %s1287_s19 = smov (%p26_p0, %s25_s19), 0  ;;  %s1289_s20 = smov (!%p26_p0, %s28_s20), %s1034_s17 }
   0x8   : > { %p78_p3 = por %p77_p2, %p76_p1  ;;  %p30_p4 = scmp.ge.s32.totalorder %s1289_s20, 2 }
   0x9   : > { %s64_s21 = ssub.s32 %s1030_s16, %s1287_s19  ;;  %p825_p6 = scmp.ge.s32.totalorder %s1038_s18, 16 }
   0xa   : > { %s1291_s20 = smov (%p30_p4, %s1289_s20), 0 }
   0xb   : > { %s65_s22 = ssub.s32 %s1034_s17, %s1291_s20  ;;  %156 = sbr.rel (%p825_p6) target bundleno = 41 (0x29), region = 16 }
   0xc   : > { %s66_s23 = sor.u32 %s65_s22, %s64_s21 }
   0xd   : > { %p67_p5 = scmp.eq.s32.totalorder %s66_s23, 0 }
   0xf   : > { %s1112_s25 = scalar_select %p67_p5, %s1018_s13, %s69_s24  }
  0x12   : > { %172 = sbr.rel (!%p78_p3) target bundleno = 41 (0x29), region = 24  ;;  %s174_s26 = sand.u32 (%p78_p3), 1, %s1018_s13  }
  0x13   : > { %s828_s27 = sshll.u32 (%p78_p3), %s1034_s17, 1  ;;  %s826_s28 = sshll.u32 (%p78_p3), %s174_s26, 8 }
  0x14   : > { %s876_s29 = sshll.u32 (%p78_p3), %s1030_s16, 7  ;;  %s1126_s8 = scalar_lea.vmem (%p78_p3), [#allocation3], %s826_s28 }
  0x15   : > { %s180_s30 = sadd.s32 (%p78_p3), %s876_s29, %s828_s27 }
  0x16   : > { %s830_s4 = sshll.u32 (%p78_p3), %s180_s30, 2 }
  0x17   : > { %s1121_s7 = scalar_lea.vmem (%p78_p3), %s1277_s1, %s830_s4 }
  0x18   : > { %v272_v0 = vld [vmem:[%s1121_s7] sm:$0xff] (%p78_p3)  ;;  %v274_v1 = vld [vmem:[%s1121_s7 + $0x10] sm:$0xff] (%p78_p3) }
  0x19   : > { %v276_v2 = vld [vmem:[%s1121_s7 + $0x20] sm:$0xff]  ;;  %273 = vst [vmem:[%s1126_s8] sm:$0xff] %v272_v0  ;;  %275 = vst [vmem:[%s1126_s8 + $0x8] sm:$0xff] %v274_v1  ;;  %v278_v3 = vld [vmem:[%s1121_s7 + $0x30] sm:$0xff] }
  0x1a   : > { %277 = vst [vmem:[%s1126_s8 + $0x10] sm:$0xff] %v276_v2  ;;  %v280_v4 = vld [vmem:[%s1121_s7 + $0x40] sm:$0xff]  ;;  %v282_v5 = vld [vmem:[%s1121_s7 + $0x50] sm:$0xff]  ;;  %279 = vst [vmem:[%s1126_s8 + $0x18] sm:$0xff] %v278_v3 }
  0x1b   : > { %281 = vst [vmem:[%s1126_s8 + $0x20] sm:$0xff] %v280_v4  ;;  %283 = vst [vmem:[%s1126_s8 + $0x28] sm:$0xff] %v282_v5  ;;  %v284_v6 = vld [vmem:[%s1121_s7 + $0x60] sm:$0xff]  ;;  %v286_v7 = vld [vmem:[%s1121_s7 + $0x70] sm:$0xff] }
  0x1c   : > { %v288_v8 = vld [vmem:[%s1121_s7 + $0x80] sm:$0xff]  ;;  %285 = vst [vmem:[%s1126_s8 + $0x30] sm:$0xff] %v284_v6  ;;  %287 = vst [vmem:[%s1126_s8 + $0x38] sm:$0xff] %v286_v7  ;;  %v290_v9 = vld [vmem:[%s1121_s7 + $0x90] sm:$0xff] }
  0x1d   : > { %289 = vst [vmem:[%s1126_s8 + $0x40] sm:$0xff] %v288_v8  ;;  %v292_v10 = vld [vmem:[%s1121_s7 + $0xa0] sm:$0xff]  ;;  %v294_v11 = vld [vmem:[%s1121_s7 + $0xb0] sm:$0xff]  ;;  %291 = vst [vmem:[%s1126_s8 + $0x48] sm:$0xff] %v290_v9 }
  0x1e   : > { %293 = vst [vmem:[%s1126_s8 + $0x50] sm:$0xff] %v292_v10  ;;  %295 = vst [vmem:[%s1126_s8 + $0x58] sm:$0xff] %v294_v11  ;;  %v296_v12 = vld [vmem:[%s1121_s7 + $0xc0] sm:$0xff]  ;;  %v298_v13 = vld [vmem:[%s1121_s7 + $0xd0] sm:$0xff] }
  0x1f   : > { %v300_v14 = vld [vmem:[%s1121_s7 + $0xe0] sm:$0xff]  ;;  %297 = vst [vmem:[%s1126_s8 + $0x60] sm:$0xff] %v296_v12  ;;  %299 = vst [vmem:[%s1126_s8 + $0x68] sm:$0xff] %v298_v13  ;;  %v302_v15 = vld [vmem:[%s1121_s7 + $0xf0] sm:$0xff] }
  0x20   : > { %301 = vst [vmem:[%s1126_s8 + $0x70] sm:$0xff] %v300_v14  ;;  %v304_v16 = vld [vmem:[%s1121_s7 + $0x100] sm:$0xff]  ;;  %v306_v17 = vld [vmem:[%s1121_s7 + $0x110] sm:$0xff]  ;;  %303 = vst [vmem:[%s1126_s8 + $0x78] sm:$0xff] %v302_v15 }
  0x21   : > { %305 = vst [vmem:[%s1126_s8 + $0x80] sm:$0xff] %v304_v16  ;;  %307 = vst [vmem:[%s1126_s8 + $0x88] sm:$0xff] %v306_v17  ;;  %v308_v18 = vld [vmem:[%s1121_s7 + $0x120] sm:$0xff]  ;;  %v310_v19 = vld [vmem:[%s1121_s7 + $0x130] sm:$0xff] }
  0x22   : > { %v312_v20 = vld [vmem:[%s1121_s7 + $0x140] sm:$0xff]  ;;  %309 = vst [vmem:[%s1126_s8 + $0x90] sm:$0xff] %v308_v18  ;;  %311 = vst [vmem:[%s1126_s8 + $0x98] sm:$0xff] %v310_v19  ;;  %v314_v21 = vld [vmem:[%s1121_s7 + $0x150] sm:$0xff] }
  0x23   : > { %313 = vst [vmem:[%s1126_s8 + $0xa0] sm:$0xff] %v312_v20  ;;  %v316_v22 = vld [vmem:[%s1121_s7 + $0x160] sm:$0xff]  ;;  %v318_v23 = vld [vmem:[%s1121_s7 + $0x170] sm:$0xff]  ;;  %315 = vst [vmem:[%s1126_s8 + $0xa8] sm:$0xff] %v314_v21 }
  0x24   : > { %317 = vst [vmem:[%s1126_s8 + $0xb0] sm:$0xff] %v316_v22  ;;  %319 = vst [vmem:[%s1126_s8 + $0xb8] sm:$0xff] %v318_v23  ;;  %v320_v24 = vld [vmem:[%s1121_s7 + $0x180] sm:$0xff]  ;;  %v322_v25 = vld [vmem:[%s1121_s7 + $0x190] sm:$0xff] }
  0x25   : > { %v324_v26 = vld [vmem:[%s1121_s7 + $0x1a0] sm:$0xff]  ;;  %321 = vst [vmem:[%s1126_s8 + $0xc0] sm:$0xff] %v320_v24  ;;  %323 = vst [vmem:[%s1126_s8 + $0xc8] sm:$0xff] %v322_v25  ;;  %v326_v27 = vld [vmem:[%s1121_s7 + $0x1b0] sm:$0xff] }
  0x26   : > { %325 = vst [vmem:[%s1126_s8 + $0xd0] sm:$0xff] %v324_v26  ;;  %v328_v28 = vld [vmem:[%s1121_s7 + $0x1c0] sm:$0xff]  ;;  %v330_v29 = vld [vmem:[%s1121_s7 + $0x1d0] sm:$0xff]  ;;  %327 = vst [vmem:[%s1126_s8 + $0xd8] sm:$0xff] %v326_v27 }
  0x27   : > { %329 = vst [vmem:[%s1126_s8 + $0xe0] sm:$0xff] %v328_v28  ;;  %331 = vst [vmem:[%s1126_s8 + $0xe8] sm:$0xff] %v330_v29  ;;  %v332_v30 = vld [vmem:[%s1121_s7 + $0x1e0] sm:$0xff]  ;;  %v334_v31 = vld [vmem:[%s1121_s7 + $0x1f0] sm:$0xff] }
  0x28   : > { %333 = vst [vmem:[%s1126_s8 + $0xf0] sm:$0xff] %v332_v30  ;;  %335 = vst [vmem:[%s1126_s8 + $0xf8] sm:$0xff] %v334_v31 }
  0x29 PF: > { %p831_p7 = scmp.ge.s32.totalorder %s1038_s18, 1  ;;  %p348_p8 = scmp.lt.s32.totalorder %s1038_s18, 17 }
  0x2b   : > { %p349_p9 = pnand %p831_p7, %p348_p8 }
  0x2c   : > { %s355_s9 = sand.u32 (!%p349_p9), 1, %s1014_s12   ;;  %s833_s10 = sshll.u32 (!%p349_p9), %s1022_s14, 1 }
  0x2d   : > { %352 = sbr.rel (%p349_p9) target bundleno = 355 (0x163), region = 66  ;;  %s832_s11 = sshll.u32 (!%p349_p9), %s355_s9, 8 }
  0x2e   : > { %p398_p10 = scmp.lt.s32.totalorder (!%p349_p9), %s833_s10, 15  ;;  %s835_s21 = sshll.u32 (!%p349_p9), %s1026_s15, 1 }
  0x2f   : > { %p408_p11 = scmp.lt.s32.totalorder (!%p349_p9), %s835_s21, 3  ;;  %s1211_s5 = scalar_lea.vmem (!%p349_p9), [#allocation3], %s832_s11 }
  0x30   : > { %p838_p12 = scmp.ne.s32.totalorder (!%p349_p9), %s1022_s14, 0 }
  0x34   : > { %s1293_s10 = smov (!%p398_p10, %s833_s10), 15  ;;  %s1295_s21 = smov (!%p408_p11, %s835_s21), 3 }
  0x35   : > { %s834_s22 = sshll.u32 %s1293_s10, 2  ;;  %s410_s12 = scalar_lea.vmem %s1278_s2, %s1295_s21  ;;  %v1040_v32 = vmov (!%p838_p12), 0.0  }
  0x36   : > { %s1197_s26 = scalar_lea.vmem %s1276_s0, %s834_s22  ;;  %s837_s29 = sshll.u32 %s1295_s21, 3  ;;  %426 = vst [vmem:[#allocation2] sm:$0xff] (!%p838_p12), %v1040_v32  ;;  %427 = vst [vmem:[#allocation2 + $0x8] sm:$0xff] (!%p838_p12), %v1040_v32 }
  0x37   : > { %s1209_s15 = scalar_lea.vmem %s1279_s3, %s837_s29  ;;  %425 = sbr.rel (%p838_p12) target bundleno = 62 (0x3e), region = 74 }
  0x3e PF: > { %v934_v33 = vld [vmem:[%s1211_s5 + $0x4] ss:$8 sps:$4 sm:$0xff]   ;;  %v936_v34 = vld [vmem:[%s1211_s5] ss:$8 sps:$4 sm:$0xff]   ;;  %v937_v35 = vld [vmem:[%s1211_s5 + $0x14] ss:$8 sps:$4 sm:$0xff]  }
  0x3f   : > { %630 = vmatprep.subr.bf16.mxu0 %v934_v33  ;;  %v939_v36 = vld [vmem:[%s1211_s5 + $0x10] ss:$8 sps:$4 sm:$0xff]   ;;  %v940_v37 = vld [vmem:[%s1211_s5 + $0x24] ss:$8 sps:$4 sm:$0xff]   ;;  %v942_v38 = vld [vmem:[%s1211_s5 + $0x20] ss:$8 sps:$4 sm:$0xff]  }
  0x40   : > { %631 = vmatpush1.bf16.msra.mxu0 %v936_v34  ;;  %v943_v39 = vld [vmem:[%s1211_s5 + $0x34] ss:$8 sps:$4 sm:$0xff]   ;;  %v945_v40 = vld [vmem:[%s1211_s5 + $0x30] ss:$8 sps:$4 sm:$0xff]   ;;  %v946_v41 = vld [vmem:[%s1211_s5 + $0x44] ss:$8 sps:$4 sm:$0xff]  }
  0x41   : > { %632 = vmatprep.subr.bf16.mxu0 %v937_v35  ;;  %v948_v42 = vld [vmem:[%s1211_s5 + $0x40] ss:$8 sps:$4 sm:$0xff]   ;;  %v949_v43 = vld [vmem:[%s1211_s5 + $0x54] ss:$8 sps:$4 sm:$0xff]   ;;  %v951_v44 = vld [vmem:[%s1211_s5 + $0x50] ss:$8 sps:$4 sm:$0xff]  }
  0x42   : > { %v952_v45 = vld [vmem:[%s1211_s5 + $0x64] ss:$8 sps:$4 sm:$0xff]   ;;  %v430_v46 = vld [vmem:[%s1197_s26] sm:$0xff]  ;;  %v954_v48 = vld [vmem:[%s1211_s5 + $0x60] ss:$8 sps:$4 sm:$0xff]   ;;  %p873_p13 = scmp.ne.s32.totalorder %s1022_s14, 7 }
  0x43   : > { %v840_v47 = vcombine.high %v430_v46, %v430_v46  ;;  %v955_v49 = vld [vmem:[%s1211_s5 + $0x74] ss:$8 sps:$4 sm:$0xff]   ;;  %v957_v50 = vld [vmem:[%s1211_s5 + $0x70] ss:$8 sps:$4 sm:$0xff]   ;;  %v958_v51 = vld [vmem:[%s1211_s5 + $0x84] ss:$8 sps:$4 sm:$0xff]   ;;  %v839_v3 = vcombine.low %v430_v46, %v430_v46  ;;  %v683_v12 = vlaneseq (!%p873_p13) }
  0x44   : > { %633 = vmatpush1.bf16.msra.mxu0 %v939_v36  ;;  %v960_v52 = vld [vmem:[%s1211_s5 + $0x80] ss:$8 sps:$4 sm:$0xff]   ;;  %v961_v53 = vld [vmem:[%s1211_s5 + $0x94] ss:$8 sps:$4 sm:$0xff]   ;;  %v963_v54 = vld [vmem:[%s1211_s5 + $0x90] ss:$8 sps:$4 sm:$0xff]  }
  0x45   : > { %634 = vmatprep.subr.bf16.mxu0 %v940_v37  ;;  %662 = vmatprep.mubr.bf16.mxu0 %v840_v47  ;;  %v964_v55 = vld [vmem:[%s1211_s5 + $0xa4] ss:$8 sps:$4 sm:$0xff]   ;;  %v966_v56 = vld [vmem:[%s1211_s5 + $0xa0] ss:$8 sps:$4 sm:$0xff]   ;;  %v967_v57 = vld [vmem:[%s1211_s5 + $0xb4] ss:$8 sps:$4 sm:$0xff]  }
  0x46   : > { %v969_v58 = vld [vmem:[%s1211_s5 + $0xb0] ss:$8 sps:$4 sm:$0xff]   ;;  %v970_v59 = vld [vmem:[%s1211_s5 + $0xc4] ss:$8 sps:$4 sm:$0xff]   ;;  %v972_v60 = vld [vmem:[%s1211_s5 + $0xc0] ss:$8 sps:$4 sm:$0xff]  }
  0x47   : > { %v973_v61 = vld [vmem:[%s1211_s5 + $0xd4] ss:$8 sps:$4 sm:$0xff]   ;;  %v975_v62 = vld [vmem:[%s1211_s5 + $0xd0] ss:$8 sps:$4 sm:$0xff]   ;;  %v976_v63 = vld [vmem:[%s1211_s5 + $0xe4] ss:$8 sps:$4 sm:$0xff]  }
  0x48   : > { %635 = vmatpush1.bf16.msra.mxu0 %v942_v38  ;;  %v978_v0 = vld [vmem:[%s1211_s5 + $0xe0] ss:$8 sps:$4 sm:$0xff]   ;;  %v979_v1 = vld [vmem:[%s1211_s5 + $0xf4] ss:$8 sps:$4 sm:$0xff]   ;;  %v981_v2 = vld [vmem:[%s1211_s5 + $0xf0] ss:$8 sps:$4 sm:$0xff]  }
  0x49   : > { %636 = vmatprep.subr.bf16.mxu0 %v943_v39  ;;  %v428_v4 = vld [vmem:[#allocation2] sm:$0xff]  ;;  %v429_v5 = vld [vmem:[#allocation2 + $0x8] sm:$0xff]  ;;  %v684_v13 = vshrl.u32 (!%p873_p13), %v683_v12, 7 }
  0x4a   : > { %v681_v14 = vld [vmem:[%s410_s12] sm:$0x3] (!%p873_p13) }
  0x4b   : > { %v685_v15 = vsub.s32 (!%p873_p13), 0, %v684_v13  ;;  %v689_v16 = vsub.s32 (!%p873_p13), 1, %v684_v13 }
  0x4c   : > { %637 = vmatpush1.bf16.msra.mxu0 %v945_v40 }
  0x4d   : > { %638 = vmatprep.subr.bf16.mxu0 %v946_v41  ;;  %v686_v19 = vrot.slane (!%p873_p13), %v681_v14, %v685_v15  ;;  %v690_v20 = vrot.slane (!%p873_p13), %v681_v14, %v689_v16 }
  0x50   : > { %639 = vmatpush1.bf16.msra.mxu0 %v948_v42 }
  0x51   : > { %640 = vmatprep.subr.bf16.mxu0 %v949_v43 }
  0x54   : > { %641 = vmatpush1.bf16.msra.mxu0 %v951_v44 }
  0x55   : > { %642 = vmatprep.subr.bf16.mxu0 %v952_v45 }
  0x58   : > { %643 = vmatpush1.bf16.msra.mxu0 %v954_v48 }
  0x59   : > { %644 = vmatprep.subr.bf16.mxu0 %v955_v49 }
  0x5c   : > { %645 = vmatpush1.bf16.msra.mxu0 %v957_v50 }
  0x5d   : > { %646 = vmatprep.subr.bf16.mxu0 %v958_v51 }
  0x60   : > { %647 = vmatpush1.bf16.msra.mxu0 %v960_v52 }
  0x61   : > { %648 = vmatprep.subr.bf16.mxu0 %v961_v53 }
  0x64   : > { %649 = vmatpush1.bf16.msra.mxu0 %v963_v54 }
  0x65   : > { %650 = vmatprep.subr.bf16.mxu0 %v964_v55 }
  0x68   : > { %651 = vmatpush1.bf16.msra.mxu0 %v966_v56 }
  0x69   : > { %652 = vmatprep.subr.bf16.mxu0 %v967_v57 }
  0x6c   : > { %653 = vmatpush1.bf16.msra.mxu0 %v969_v58 }
  0x6d   : > { %654 = vmatprep.subr.bf16.mxu0 %v970_v59 }
  0x70   : > { %655 = vmatpush1.bf16.msra.mxu0 %v972_v60 }
  0x71   : > { %656 = vmatprep.subr.bf16.mxu0 %v973_v61 }
  0x74   : > { %657 = vmatpush1.bf16.msra.mxu0 %v975_v62 }
  0x75   : > { %658 = vmatprep.subr.bf16.mxu0 %v976_v63 }
  0x78   : > { %659 = vmatpush1.bf16.msra.mxu0 %v978_v0 }
  0x79   : > { %660 = vmatprep.subr.bf16.mxu0 %v979_v1 }
  0x7c   : > { %661 = vmatpush1.bf16.msra.mxu0 %v981_v2 }
  0x7f   : > { %663 = vmatmul.mubr.bf16.vlgmr.msra.gmra.mrb[0].mxu0 %v839_v3 }
 0x150   : > { %678 = sbr.rel (%p873_p13) target bundleno = 355 (0x163), region = 78 }
 0x152   : > { %v664_v6 = vpop.f32.mrb[0].mxu0 }
 0x153   : > { %v671_v7 = vadd.f32 %v664_v6, %v428_v4  ;;  %v666_v8 = vpop.f32.mrb[1].mxu0 }
 0x154   : > { %v672_v9 = vadd.f32 %v666_v8, %v429_v5  ;;  %v668_v10 = vpop.f32.mrb[2].mxu0 }
 0x155   : > { %673 = vst [vmem:[#allocation2] sm:$0xff] %v671_v7  ;;  %v669_v11 = vpop.f32.mrb[3].mxu0 }
 0x156   : > { %674 = vst [vmem:[#allocation2 + $0x8] sm:$0xff] %v672_v9 }
 0x15c   : > { %v679_v17 = vld [vmem:[#allocation2] sm:$0xff] }
 0x15d   : > { %v680_v18 = vld [vmem:[#allocation2 + $0x8] sm:$0xff]  ;;  %v693_v21 = vadd.f32 %v686_v19, %v679_v17 }
 0x15e   : > { %v694_v22 = vadd.f32 %v690_v20, %v680_v18 }
 0x15f   : > { %v695_v23 = vmax.f32 %v693_v21, 0.0 }
 0x160   : > { %v696_v24 = vmax.f32 %v694_v22, 0.0 }
 0x161   : > { %697 = vst [vmem:[%s1209_s15] sm:$0xff] %v695_v23 }
 0x162   : > { %698 = vst [vmem:[%s1209_s15 + $0x8] sm:$0xff] %v696_v24 }
 0x163 PF: > { %s13_s18 = sadd.s32 1, %s1038_s18   ;;  %s1280_s12 = smov %s1018_s13 }
 0x164   : > { %p10_p0 = scmp.ge.s32.totalorder %s13_s18, 18   ;;  %s1281_s13 = smov %s1112_s25 }
 0x165   : > { %s1282_s14 = smov %s1030_s16  ;;  %s1283_s15 = smov %s1034_s17 }
 0x166   : > { %s1284_s16 = smov %s1287_s19  ;;  %s1285_s17 = smov %s1291_s20 }
 0x167   :  { %12 = sbr.rel (!%p10_p0) target bundleno = 4 (0x4), region = 119 }

// kernel: multicom_res50_forward.107
= control target key start
LH: loop header
LB: loop body
LE: loop exit
PB: predicated region body
PF: predicated region fallthrough
CT: control target
= control target key end

     0   :  { %12 = vsyncpa [#allocation3], 0  ;;  %v37_v20 = vlaneseq  ;;  %vm557_vm0 = vcmask 1041409   ;;  %s2996_s0 = inlined_call_operand.vmem [shape: f32[2,1,2048], index: 0, kind: input, shape index: {}]   ;;  %s2997_s1 = inlined_call_operand.vmem [shape: bf16[2048,128], index: 1, kind: input, shape index: {}]   ;;  %s2998_s2 = inlined_call_operand.vmem [shape: f32[1,128], index: 2, kind: input, shape index: {}]   ;;  %s2999_s3 = inlined_call_operand.vmem [shape: bf16[128,128], index: 3, kind: input, shape index: {}]   ;;  %s3000_s4 = inlined_call_operand.vmem [shape: f32[1,128], index: 4, kind: input, shape index: {}]   ;;  %s3001_s5 = inlined_call_operand.hbm [shape: f32[2,128], index: 5, kind: output, shape index: {0}]   ;;  %s3002_s6 = inlined_call_operand.hbm [shape: f32[2,128], index: 6, kind: output, shape index: {1}]  }
   0x1   :  { %v2207_v0 = vld [vmem:[%s2997_s1 + $0x40] sm:$0xff]   ;;  %v2211_v4 = vld [vmem:[%s2997_s1 + $0x48] sm:$0xff]   ;;  %v2215_v8 = vld [vmem:[%s2997_s1 + $0x50] sm:$0xff]  }
   0x2   :  { %v2208_v1 = vld [vmem:[%s2997_s1 + $0xc0] sm:$0xff]   ;;  %1998 = vmatprep.subr.bf16.mxu0 %v2207_v0  ;;  %v2212_v5 = vld [vmem:[%s2997_s1 + $0xc8] sm:$0xff]   ;;  %v2216_v9 = vld [vmem:[%s2997_s1 + $0xd0] sm:$0xff]   ;;  %v2504_v25 = vshrl.u32 %v37_v20, 7 }
   0x3   :  { %v2209_v2 = vld [vmem:[%s2997_s1] sm:$0xff]   ;;  %2020 = vmatprep.subr.bf16.mxu1 %v2208_v1  ;;  %v2213_v6 = vld [vmem:[%s2997_s1 + $0x8] sm:$0xff]   ;;  %v2217_v10 = vld [vmem:[%s2997_s1 + $0x10] sm:$0xff]  }
   0x4   :  { %v2210_v3 = vld [vmem:[%s2997_s1 + $0x80] sm:$0xff]   ;;  %1999 = vmatpush3.bf16.msra.mxu0 %v2209_v2  ;;  %v2214_v7 = vld [vmem:[%s2997_s1 + $0x88] sm:$0xff]   ;;  %v2218_v11 = vld [vmem:[%s2997_s1 + $0x90] sm:$0xff]   ;;  %v2519_v30 = vsub.s32 1, %v2504_v25  ;;  %v2525_v32 = vsub.s32 3, %v2504_v25  ;;  %v2531_v34 = vsub.s32 0, %v2504_v25 }
   0x5   :  { %2021 = vmatpush3.bf16.msra.mxu1 %v2210_v3  ;;  %2000 = vmatprep.subr.bf16.mxu0 %v2211_v4  ;;  %v2219_v12 = vld [vmem:[%s2997_s1 + $0x58] sm:$0xff]   ;;  %v2223_v16 = vld [vmem:[%s2997_s1 + $0x60] sm:$0xff]   ;;  %v2227_v21 = vld [vmem:[%s2997_s1 + $0x68] sm:$0xff]   ;;  %v2537_v36 = vsub.s32 2, %v2504_v25  ;;  %v2553_v40 = vsub.s32 5, %v2504_v25  ;;  %v2556_v41 = vsub.s32 7, %v2504_v25 }
   0x6   :  { %2022 = vmatprep.subr.bf16.mxu1 %v2212_v5  ;;  %v2220_v13 = vld [vmem:[%s2997_s1 + $0xd8] sm:$0xff]   ;;  %v2224_v17 = vld [vmem:[%s2997_s1 + $0xe0] sm:$0xff]   ;;  %v2228_v22 = vld [vmem:[%s2997_s1 + $0xe8] sm:$0xff]  }
   0x7   :  { %v2221_v14 = vld [vmem:[%s2997_s1 + $0x18] sm:$0xff]   ;;  %v2225_v18 = vld [vmem:[%s2997_s1 + $0x20] sm:$0xff]   ;;  %v2229_v23 = vld [vmem:[%s2997_s1 + $0x28] sm:$0xff]  }
   0x8   :  { %2001 = vmatpush3.bf16.msra.mxu0 %v2213_v6  ;;  %v2222_v15 = vld [vmem:[%s2997_s1 + $0x98] sm:$0xff]   ;;  %v2226_v19 = vld [vmem:[%s2997_s1 + $0xa0] sm:$0xff]   ;;  %v2230_v24 = vld [vmem:[%s2997_s1 + $0xa8] sm:$0xff]  }
   0x9   :  { %2023 = vmatpush3.bf16.msra.mxu1 %v2214_v7  ;;  %2002 = vmatprep.subr.bf16.mxu0 %v2215_v8  ;;  %v2231_v26 = vld [vmem:[%s2997_s1 + $0x70] sm:$0xff]   ;;  %v2235_v31 = vld [vmem:[%s2997_s1 + $0x78] sm:$0xff]   ;;  %v2545_v38 = vld [vmem:[%s2996_s0] sm:$0xff] }
   0xa   :  { %2024 = vmatprep.subr.bf16.mxu1 %v2216_v9  ;;  %v2232_v27 = vld [vmem:[%s2997_s1 + $0xf0] sm:$0xff]   ;;  %v2236_v33 = vld [vmem:[%s2997_s1 + $0xf8] sm:$0xff]   ;;  %v44_v42 = vrot.slane %v2545_v38, %v2519_v30  ;;  %v52_v44 = vrot.slane %v2545_v38, %v2525_v32  ;;  %v2239_v46 = vld [vmem:[%s2997_s1 + $0x140] sm:$0xff]   ;;  %v40_v47 = vrot.slane %v2545_v38, %v2531_v34  ;;  %v48_v49 = vrot.slane %v2545_v38, %v2537_v36 }
   0xb   :  { %v2233_v28 = vld [vmem:[%s2997_s1 + $0x30] sm:$0xff]   ;;  %v2237_v35 = vld [vmem:[%s2997_s1 + $0x38] sm:$0xff]   ;;  %v2240_v51 = vld [vmem:[%s2997_s1 + $0x1c0] sm:$0xff]   ;;  %v60_v6 = vrot.slane %v2545_v38, %v2553_v40 }
   0xc   :  { %2003 = vmatpush3.bf16.msra.mxu0 %v2217_v10  ;;  %v2234_v29 = vld [vmem:[%s2997_s1 + $0xb0] sm:$0xff]   ;;  %v2238_v37 = vld [vmem:[%s2997_s1 + $0xb8] sm:$0xff]   ;;  %v198_v52 = vpack.c.bf16 %v44_v42, %v44_v42  ;;  %v200_v54 = vpack.c.bf16 %v52_v44, %v52_v44  ;;  %v197_v56 = vpack.c.bf16 %v40_v47, %v40_v47  ;;  %v199_v58 = vpack.c.bf16 %v48_v49, %v48_v49  ;;  %v2241_v10 = vld [vmem:[%s2997_s1 + $0x100] sm:$0xff]  }
   0xd   :  { %2025 = vmatpush3.bf16.msra.mxu1 %v2218_v11  ;;  %2004 = vmatprep.subr.bf16.mxu0 %v2219_v12  ;;  %v2550_v39 = vld [vmem:[%s2996_s0 + $0x10] sm:$0xff]  ;;  %v68_v11 = vrot.slane %v2545_v38, %v2556_v41 }
   0xe   :  { %2026 = vmatprep.subr.bf16.mxu1 %v2220_v13  ;;  %v108_v43 = vrot.slane %v2550_v39, %v2519_v30  ;;  %v116_v45 = vrot.slane %v2550_v39, %v2525_v32  ;;  %v104_v48 = vrot.slane %v2550_v39, %v2531_v34  ;;  %v112_v50 = vrot.slane %v2550_v39, %v2537_v36  ;;  %v2247_v42 = vld [vmem:[%s2997_s1 + $0x150] sm:$0xff]  }
   0xf   :  { %v525_v60 = vunpack.c.l.b16 %v198_v52  ;;  %v527_v62 = vunpack.c.l.b16 %v200_v54  ;;  %v524_v0 = vunpack.c.l.b16 %v197_v56  ;;  %v526_v2 = vunpack.c.l.b16 %v199_v58  ;;  %v2249_v47 = vld [vmem:[%s2997_s1 + $0x110] sm:$0xff]   ;;  %v2251_v52 = vld [vmem:[%s2997_s1 + $0x158] sm:$0xff]  }
  0x10   :  { %2005 = vmatpush3.bf16.msra.mxu0 %v2221_v14  ;;  %v214_v53 = vpack.c.bf16 %v108_v43, %v108_v43  ;;  %v216_v55 = vpack.c.bf16 %v116_v45, %v116_v45  ;;  %v213_v57 = vpack.c.bf16 %v104_v48, %v104_v48  ;;  %v215_v59 = vpack.c.bf16 %v112_v50, %v112_v50  ;;  %v2248_v45 = vld [vmem:[%s2997_s1 + $0x1d0] sm:$0xff]   ;;  %v2254_v58 = vld [vmem:[%s2997_s1 + $0x198] sm:$0xff]  }
  0x11   :  { %2027 = vmatpush3.bf16.msra.mxu1 %v2222_v15  ;;  %2006 = vmatprep.subr.bf16.mxu0 %v2223_v16  ;;  %v124_v7 = vrot.slane %v2550_v39, %v2553_v40  ;;  %v132_v12 = vrot.slane %v2550_v39, %v2556_v41  ;;  %v2242_v15 = vld [vmem:[%s2997_s1 + $0x180] sm:$0xff]   ;;  %v202_v16 = vpack.c.bf16 %v60_v6, %v60_v6  ;;  %v2250_v50 = vld [vmem:[%s2997_s1 + $0x190] sm:$0xff]   ;;  %v2631_v54 = vsub.s32 6, %v2504_v25  ;;  %v2262_v6 = vld [vmem:[%s2997_s1 + $0x1a8] sm:$0xff]  }
  0x12   :  { %2028 = vmatprep.subr.bf16.mxu1 %v2224_v17  ;;  %v541_v61 = vunpack.c.l.b16 %v214_v53  ;;  %v543_v63 = vunpack.c.l.b16 %v216_v55  ;;  %v540_v1 = vunpack.c.l.b16 %v213_v57  ;;  %v542_v3 = vunpack.c.l.b16 %v215_v59  ;;  %v2252_v55 = vld [vmem:[%s2997_s1 + $0x1d8] sm:$0xff]   ;;  %v2255_v59 = vld [vmem:[%s2997_s1 + $0x160] sm:$0xff]  }
  0x13   :  { %v218_v17 = vpack.c.bf16 %v124_v7, %v124_v7  ;;  %v2253_v57 = vld [vmem:[%s2997_s1 + $0x118] sm:$0xff]  }
  0x14   :  { %2007 = vmatpush3.bf16.msra.mxu0 %v2225_v18  ;;  %v559_v4 = vrot.slane %v541_v61, 7  ;;  %v563_v5 = vrot.slane %v543_v63, 7  ;;  %v556_v8 = vrot.slane %v540_v1, 7  ;;  %v561_v9 = vrot.slane %v542_v3, 7  ;;  %v2256_v61 = vld [vmem:[%s2997_s1 + $0x1e0] sm:$0xff]  }
  0x15   :  { %2029 = vmatpush3.bf16.msra.mxu1 %v2226_v19  ;;  %2008 = vmatprep.subr.bf16.mxu0 %v2227_v21  ;;  %v2258_v63 = vld [vmem:[%s2997_s1 + $0x1a0] sm:$0xff]  }
  0x16   :  { %2030 = vmatprep.subr.bf16.mxu1 %v2228_v22  ;;  %v560_v13 = vsel %vm557_vm0, %v559_v4, %v525_v60  ;;  %v564_v14 = vsel %vm557_vm0, %v563_v5, %v527_v62  ;;  %v558_v20 = vsel %vm557_vm0, %v556_v8, %v524_v0  ;;  %v562_v21 = vsel %vm557_vm0, %v561_v9, %v526_v2  ;;  %v2243_v22 = vld [vmem:[%s2997_s1 + $0x148] sm:$0xff]   ;;  %v2257_v62 = vld [vmem:[%s2997_s1 + $0x120] sm:$0xff]  }
  0x17   :  { %v590_v18 = vpack.c.b16 %v560_v13, %v560_v13  ;;  %v592_v19 = vpack.c.b16 %v564_v14, %v564_v14  ;;  %v128_v60 = vrot.slane %v2550_v39, %v2631_v54  ;;  %v64_v2 = vrot.slane %v2545_v38, %v2631_v54  ;;  %v2260_v4 = vld [vmem:[%s2997_s1 + $0x1e8] sm:$0xff]   ;;  %v2266_v13 = vld [vmem:[%s2997_s1 + $0x1b0] sm:$0xff]  }
  0x18   :  { %2009 = vmatpush3.bf16.msra.mxu0 %v2229_v23  ;;  %v589_v23 = vpack.c.b16 %v558_v20, %v558_v20  ;;  %v2261_v5 = vld [vmem:[%s2997_s1 + $0x128] sm:$0xff]   ;;  %v2269_v20 = vld [vmem:[%s2997_s1 + $0x138] sm:$0xff]  }
  0x19   :  { %2031 = vmatpush3.bf16.msra.mxu1 %v2230_v24  ;;  %2010 = vmatprep.subr.bf16.mxu0 %v2231_v26  ;;  %v591_v24 = vpack.c.b16 %v562_v21, %v562_v21  ;;  %v2244_v26 = vld [vmem:[%s2997_s1 + $0x1c8] sm:$0xff]   ;;  %v219_v3 = vpack.c.bf16 %v128_v60, %v128_v60  ;;  %v203_v9 = vpack.c.bf16 %v64_v2, %v64_v2  ;;  %v2270_v21 = vld [vmem:[%s2997_s1 + $0x1b8] sm:$0xff]   ;;  %v2295_v60 = vld [vmem:[%s2997_s1 + $0x270] sm:$0xff]  }
  0x1a   :  { %2032 = vmatprep.subr.bf16.mxu1 %v2232_v27  ;;  %v529_v27 = vunpack.c.l.b16 %v202_v16  ;;  %1421 = vmatprep.mubr.bf16.mxu0 %v590_v18 }
  0x1b   :  { %1461 = vmatprep.mubr.bf16.mxu1 %v592_v19  ;;  %v2268_v19 = vld [vmem:[%s2997_s1 + $0x1f8] sm:$0xff]  }
  0x1c   :  { %2011 = vmatpush3.bf16.msra.mxu0 %v2233_v28  ;;  %v545_v28 = vunpack.c.l.b16 %v218_v17  ;;  %v530_v17 = vunpack.c.l.b16 %v203_v9 }
  0x1d   :  { %2033 = vmatpush3.bf16.msra.mxu1 %v2234_v29  ;;  %2012 = vmatprep.subr.bf16.mxu0 %v2235_v31  ;;  %v2245_v29 = vld [vmem:[%s2997_s1 + $0x108] sm:$0xff]   ;;  %v204_v31 = vpack.c.bf16 %v68_v11, %v68_v11  ;;  %v2264_v11 = vld [vmem:[%s2997_s1 + $0x1f0] sm:$0xff]  }
  0x1e   :  { %2034 = vmatprep.subr.bf16.mxu1 %v2236_v33  ;;  %v220_v33 = vpack.c.bf16 %v132_v12, %v132_v12  ;;  %v2265_v12 = vld [vmem:[%s2997_s1 + $0x130] sm:$0xff]  }
  0x1f   :  { %v531_v43 = vunpack.c.l.b16 %v204_v31  ;;  %v2274_v31 = vld [vmem:[%s2997_s1 + $0x280] sm:$0xff]  }
  0x20   :  { %2013 = vmatpush3.bf16.msra.mxu0 %v2237_v35  ;;  %v2246_v35 = vld [vmem:[%s2997_s1 + $0x188] sm:$0xff]   ;;  %v547_v44 = vunpack.c.l.b16 %v220_v33 }
  0x21   :  { %2035 = vmatpush3.bf16.msra.mxu1 %v2238_v37  ;;  %2042 = vmatprep.subr.bf16.mxu0 %v2239_v46  ;;  %v567_v37 = vrot.slane %v545_v28, 7  ;;  %v2275_v33 = vld [vmem:[%s2997_s1 + $0x248] sm:$0xff]  }
  0x22   :  { %2064 = vmatprep.subr.bf16.mxu1 %v2240_v51  ;;  %v571_v49 = vrot.slane %v547_v44, 7  ;;  %v2624_v51 = vsub.s32 4, %v2504_v25  ;;  %v2280_v44 = vld [vmem:[%s2997_s1 + $0x2d0] sm:$0xff]  }
  0x23   :  { %1422 = vmatmul.mubr.bf16.vlgmr.msra.gmra.mrb[0].mxu0 %v589_v23  ;;  %v568_v46 = vsel %vm557_vm0, %v567_v37, %v529_v27  ;;  %v2273_v27 = vld [vmem:[%s2997_s1 + $0x200] sm:$0xff]   ;;  %v2277_v37 = vld [vmem:[%s2997_s1 + $0x208] sm:$0xff]  }
  0x24   :  { %1462 = vmatmul.mubr.bf16.vlgmr.msra.gmra.mrb[0].mxu1 %v591_v24  ;;  %2043 = vmatpush3.bf16.msra.mxu0 %v2241_v10  ;;  %v594_v48 = vpack.c.b16 %v568_v46, %v568_v46  ;;  %v572_v53 = vsel %vm557_vm0, %v571_v49, %v531_v43  ;;  %v120_v25 = vrot.slane %v2550_v39, %v2624_v51  ;;  %v2259_v39 = vld [vmem:[%s2997_s1 + $0x168] sm:$0xff]   ;;  %v546_v10 = vunpack.c.l.b16 %v219_v3  ;;  %v2271_v24 = vld [vmem:[%s2997_s1 + $0x240] sm:$0xff]   ;;  %v2279_v43 = vld [vmem:[%s2997_s1 + $0x250] sm:$0xff]  }
  0x25   :  { %2065 = vmatpush3.bf16.msra.mxu1 %v2242_v15  ;;  %2044 = vmatprep.subr.bf16.mxu0 %v2243_v22  ;;  %v596_v56 = vpack.c.b16 %v572_v53, %v572_v53  ;;  %v56_v1 = vrot.slane %v2545_v38, %v2624_v51  ;;  %v2263_v38 = vld [vmem:[%s2997_s1 + $0x170] sm:$0xff]   ;;  %v2267_v15 = vld [vmem:[%s2997_s1 + $0x178] sm:$0xff]   ;;  %v2288_v53 = vld [vmem:[%s2997_s1 + $0x2e0] sm:$0xff]  }
  0x26   :  { %2066 = vmatprep.subr.bf16.mxu1 %v2244_v26  ;;  %1501 = vmatprep.mubr.bf16.mxu0 %v594_v48  ;;  %v217_v0 = vpack.c.bf16 %v120_v25, %v120_v25  ;;  %v569_v18 = vrot.slane %v546_v10, 7  ;;  %v2272_v26 = vld [vmem:[%s2997_s1 + $0x2c0] sm:$0xff]   ;;  %v2282_v46 = vld [vmem:[%s2997_s1 + $0x290] sm:$0xff]   ;;  %v2284_v48 = vld [vmem:[%s2997_s1 + $0x2d8] sm:$0xff]  }
  0x27   :  { %1541 = vmatprep.mubr.bf16.mxu1 %v596_v56  ;;  %v201_v8 = vpack.c.bf16 %v56_v1, %v56_v1  ;;  %v2285_v49 = vld [vmem:[%s2997_s1 + $0x218] sm:$0xff]   ;;  %v2290_v56 = vld [vmem:[%s2997_s1 + $0x2a0] sm:$0xff]   ;;  %v2293_v25 = vld [vmem:[%s2997_s1 + $0x228] sm:$0xff]  }
  0x28   :  { %2045 = vmatpush3.bf16.msra.mxu0 %v2245_v29  ;;  %v544_v7 = vunpack.c.l.b16 %v217_v0  ;;  %v570_v23 = vsel %vm557_vm0, %v569_v18, %v530_v17  ;;  %v2787_v0 = vld [vmem:[%s2996_s0 + $0x8] sm:$0xff]  ;;  %v2299_v1 = vld [vmem:[%s2997_s1 + $0x278] sm:$0xff]  }
  0x29   :  { %2067 = vmatpush3.bf16.msra.mxu1 %v2246_v35  ;;  %2046 = vmatprep.subr.bf16.mxu0 %v2247_v42  ;;  %v528_v16 = vunpack.c.l.b16 %v201_v8  ;;  %v595_v29 = vpack.c.b16 %v570_v23, %v570_v23  ;;  %v2276_v35 = vld [vmem:[%s2997_s1 + $0x2c8] sm:$0xff]   ;;  %v76_v2 = vrot.slane %v2787_v0, %v2519_v30 }
  0x2a   :  { %2068 = vmatprep.subr.bf16.mxu1 %v2248_v45  ;;  %v565_v14 = vrot.slane %v544_v7, 7  ;;  %v2278_v42 = vld [vmem:[%s2997_s1 + $0x288] sm:$0xff]   ;;  %v2281_v45 = vld [vmem:[%s2997_s1 + $0x210] sm:$0xff]   ;;  %v72_v7 = vrot.slane %v2787_v0, %v2531_v34 }
  0x2b   :  { %v206_v8 = vpack.c.bf16 %v76_v2, %v76_v2  ;;  %v2312_v2 = vld [vmem:[%s2997_s1 + $0x3d0] sm:$0xff]  }
  0x2c   :  { %2047 = vmatpush3.bf16.msra.mxu0 %v2249_v47  ;;  %v566_v22 = vsel %vm557_vm0, %v565_v14, %v528_v16  ;;  %v2283_v47 = vld [vmem:[%s2997_s1 + $0x258] sm:$0xff]  }
  0x2d   :  { %2069 = vmatpush3.bf16.msra.mxu1 %v2250_v50  ;;  %2048 = vmatprep.subr.bf16.mxu0 %v2251_v52  ;;  %v593_v28 = vpack.c.b16 %v566_v22, %v566_v22  ;;  %v2286_v50 = vld [vmem:[%s2997_s1 + $0x298] sm:$0xff]   ;;  %v2287_v52 = vld [vmem:[%s2997_s1 + $0x260] sm:$0xff]  }
  0x2e   :  { %2070 = vmatprep.subr.bf16.mxu1 %v2252_v55  ;;  %v2289_v55 = vld [vmem:[%s2997_s1 + $0x220] sm:$0xff]  }
  0x30   :  { %2049 = vmatpush3.bf16.msra.mxu0 %v2253_v57  ;;  %v2291_v57 = vld [vmem:[%s2997_s1 + $0x268] sm:$0xff]  }
  0x31   :  { %2071 = vmatpush3.bf16.msra.mxu1 %v2254_v58  ;;  %2050 = vmatprep.subr.bf16.mxu0 %v2255_v59  ;;  %v2292_v58 = vld [vmem:[%s2997_s1 + $0x2e8] sm:$0xff]  }
  0x32   :  { %2072 = vmatprep.subr.bf16.mxu1 %v2256_v61  ;;  %v2294_v59 = vld [vmem:[%s2997_s1 + $0x2a8] sm:$0xff]   ;;  %v2296_v61 = vld [vmem:[%s2997_s1 + $0x2f0] sm:$0xff]  }
  0x34   :  { %2051 = vmatpush3.bf16.msra.mxu0 %v2257_v62  ;;  %v2297_v62 = vld [vmem:[%s2997_s1 + $0x230] sm:$0xff]  }
  0x35   :  { %2073 = vmatpush3.bf16.msra.mxu1 %v2258_v63  ;;  %2052 = vmatprep.subr.bf16.mxu0 %v2259_v39  ;;  %v2298_v63 = vld [vmem:[%s2997_s1 + $0x2b0] sm:$0xff]   ;;  %v2792_v39 = vld [vmem:[%s2996_s0 + $0x18] sm:$0xff] }
  0x36   :  { %2074 = vmatprep.subr.bf16.mxu1 %v2260_v4  ;;  %v140_v3 = vrot.slane %v2792_v39, %v2519_v30  ;;  %v84_v4 = vrot.slane %v2787_v0, %v2525_v32  ;;  %v2301_v30 = vld [vmem:[%s2997_s1 + $0x238] sm:$0xff]  }
  0x38   :  { %2053 = vmatpush3.bf16.msra.mxu0 %v2261_v5  ;;  %v2300_v5 = vld [vmem:[%s2997_s1 + $0x2f8] sm:$0xff]   ;;  %v222_v9 = vpack.c.bf16 %v140_v3, %v140_v3  ;;  %v208_v10 = vpack.c.bf16 %v84_v4, %v84_v4 }
  0x39   :  { %2075 = vmatpush3.bf16.msra.mxu1 %v2262_v6  ;;  %2054 = vmatprep.subr.bf16.mxu0 %v2263_v38  ;;  %v148_v6 = vrot.slane %v2792_v39, %v2525_v32  ;;  %v136_v38 = vrot.slane %v2792_v39, %v2531_v34  ;;  %v2302_v32 = vld [vmem:[%s2997_s1 + $0x2b8] sm:$0xff]   ;;  %v144_v34 = vrot.slane %v2792_v39, %v2537_v36 }
  0x3a   :  { %2076 = vmatprep.subr.bf16.mxu1 %v2264_v11  ;;  %v80_v11 = vrot.slane %v2787_v0, %v2537_v36  ;;  %v549_v16 = vunpack.c.l.b16 %v222_v9  ;;  %v535_v17 = vunpack.c.l.b16 %v208_v10  ;;  %v2304_v36 = vld [vmem:[%s2997_s1 + $0x3c0] sm:$0xff]   ;;  %v152_v10 = vrot.slane %v2792_v39, %v2624_v51 }
  0x3b   :  { %v221_v14 = vpack.c.bf16 %v136_v38, %v136_v38  ;;  %v223_v23 = vpack.c.bf16 %v144_v34, %v144_v34 }
  0x3c   :  { %2055 = vmatpush3.bf16.msra.mxu0 %v2265_v12  ;;  %v224_v12 = vpack.c.bf16 %v148_v6, %v148_v6  ;;  %v207_v18 = vpack.c.bf16 %v80_v11, %v80_v11  ;;  %v2313_v6 = vld [vmem:[%s2997_s1 + $0x310] sm:$0xff]   ;;  %v160_v11 = vrot.slane %v2792_v39, %v2631_v54  ;;  %v225_v34 = vpack.c.bf16 %v152_v10, %v152_v10 }
  0x3d   :  { %2077 = vmatpush3.bf16.msra.mxu1 %v2266_v13  ;;  %2056 = vmatprep.subr.bf16.mxu0 %v2267_v15  ;;  %v205_v13 = vpack.c.bf16 %v72_v7, %v72_v7  ;;  %v533_v15 = vunpack.c.l.b16 %v206_v8  ;;  %v548_v22 = vunpack.c.l.b16 %v221_v14  ;;  %v2314_v7 = vld [vmem:[%s2997_s1 + $0x390] sm:$0xff]   ;;  %v2316_v8 = vld [vmem:[%s2997_s1 + $0x3d8] sm:$0xff]   ;;  %v2319_v14 = vld [vmem:[%s2997_s1 + $0x360] sm:$0xff]  }
  0x3e   :  { %2078 = vmatprep.subr.bf16.mxu1 %v2268_v19  ;;  %v2303_v19 = vld [vmem:[%s2997_s1 + $0x340] sm:$0xff]  }
  0x40   :  { %2057 = vmatpush3.bf16.msra.mxu0 %v2269_v20  ;;  %v551_v20 = vunpack.c.l.b16 %v224_v12 }
  0x41   :  { %2079 = vmatpush3.bf16.msra.mxu1 %v2270_v21  ;;  %2086 = vmatprep.subr.bf16.mxu0 %v2271_v24  ;;  %v532_v21 = vunpack.c.l.b16 %v205_v13  ;;  %v575_v24 = vrot.slane %v549_v16, 7  ;;  %v2318_v13 = vld [vmem:[%s2997_s1 + $0x398] sm:$0xff]   ;;  %v2321_v16 = vld [vmem:[%s2997_s1 + $0x320] sm:$0xff]  }
  0x42   :  { %2108 = vmatprep.subr.bf16.mxu1 %v2272_v26  ;;  %v534_v26 = vunpack.c.l.b16 %v207_v18  ;;  %v88_v18 = vrot.slane %v2787_v0, %v2624_v51  ;;  %v2325_v51 = vld [vmem:[%s2997_s1 + $0x328] sm:$0xff]  }
  0x43   :  { %1502 = vmatmul.mubr.bf16.vlgmr.msra.gmra.mrb[4].mxu0 %v593_v28  ;;  %v156_v28 = vrot.slane %v2792_v39, %v2553_v40 }
  0x44   :  { %1542 = vmatmul.mubr.bf16.vlgmr.msra.gmra.mrb[4].mxu1 %v595_v29  ;;  %2087 = vmatpush3.bf16.msra.mxu0 %v2273_v27  ;;  %v92_v27 = vrot.slane %v2787_v0, %v2553_v40  ;;  %v579_v29 = vrot.slane %v551_v20, 7  ;;  %v2324_v20 = vld [vmem:[%s2997_s1 + $0x3e8] sm:$0xff]  }
  0x45   :  { %2109 = vmatpush3.bf16.msra.mxu1 %v2274_v31  ;;  %2088 = vmatprep.subr.bf16.mxu0 %v2275_v33  ;;  %v573_v31 = vrot.slane %v548_v22, 7  ;;  %v550_v33 = vunpack.c.l.b16 %v223_v23  ;;  %v96_v22 = vrot.slane %v2787_v0, %v2631_v54  ;;  %v2328_v54 = vld [vmem:[%s2997_s1 + $0x3f0] sm:$0xff]  }
  0x46   :  { %2110 = vmatprep.subr.bf16.mxu1 %v2276_v35  ;;  %v2305_v35 = vld [vmem:[%s2997_s1 + $0x300] sm:$0xff]  }
  0x47   :  { %v574_v40 = vsel %vm557_vm0, %v573_v31, %v532_v21  ;;  %v552_v21 = vunpack.c.l.b16 %v225_v34  ;;  %v2331_v31 = vld [vmem:[%s2997_s1 + $0x378] sm:$0xff]  }
  0x48   :  { %2089 = vmatpush3.bf16.msra.mxu0 %v2277_v37  ;;  %v100_v37 = vrot.slane %v2787_v0, %v2556_v41  ;;  %v2329_v0 = vld [vmem:[%s2997_s1 + $0x330] sm:$0xff]  }
  0x49   :  { %2111 = vmatpush3.bf16.msra.mxu1 %v2278_v42  ;;  %2090 = vmatprep.subr.bf16.mxu0 %v2279_v43  ;;  %v576_v42 = vsel %vm557_vm0, %v575_v24, %v533_v15  ;;  %v210_v43 = vpack.c.bf16 %v92_v27, %v92_v27  ;;  %v227_v15 = vpack.c.bf16 %v160_v11, %v160_v11  ;;  %v581_v27 = vrot.slane %v552_v21, 7 }
  0x4a   :  { %2112 = vmatprep.subr.bf16.mxu1 %v2280_v44  ;;  %v226_v44 = vpack.c.bf16 %v156_v28, %v156_v28  ;;  %v209_v24 = vpack.c.bf16 %v88_v18, %v88_v18  ;;  %v211_v28 = vpack.c.bf16 %v96_v22, %v96_v22 }
  0x4b   :  { %v554_v23 = vunpack.c.l.b16 %v227_v15 }
  0x4c   :  { %2091 = vmatpush3.bf16.msra.mxu0 %v2281_v45  ;;  %v598_v45 = vpack.c.b16 %v576_v42, %v576_v42  ;;  %v538_v42 = vunpack.c.l.b16 %v211_v28 }
  0x4d   :  { %2113 = vmatpush3.bf16.msra.mxu1 %v2282_v46  ;;  %2092 = vmatprep.subr.bf16.mxu0 %v2283_v47  ;;  %v580_v46 = vsel %vm557_vm0, %v579_v29, %v535_v17  ;;  %v577_v47 = vrot.slane %v550_v33, 7  ;;  %v2322_v17 = vld [vmem:[%s2997_s1 + $0x3a0] sm:$0xff]   ;;  %v585_v29 = vrot.slane %v554_v23, 7  ;;  %v2330_v33 = vld [vmem:[%s2997_s1 + $0x3b0] sm:$0xff]  }
  0x4e   :  { %2114 = vmatprep.subr.bf16.mxu1 %v2284_v48  ;;  %v2306_v48 = vld [vmem:[%s2997_s1 + $0x380] sm:$0xff]   ;;  %1581 = vmatprep.mubr.bf16.mxu0 %v598_v45 }
  0x50   :  { %2093 = vmatpush3.bf16.msra.mxu0 %v2285_v49  ;;  %v600_v49 = vpack.c.b16 %v580_v46, %v580_v46 }
  0x51   :  { %2115 = vmatpush3.bf16.msra.mxu1 %v2286_v50  ;;  %2094 = vmatprep.subr.bf16.mxu0 %v2287_v52  ;;  %v597_v50 = vpack.c.b16 %v574_v40, %v574_v40  ;;  %v2307_v52 = vld [vmem:[%s2997_s1 + $0x348] sm:$0xff]  }
  0x52   :  { %2116 = vmatprep.subr.bf16.mxu1 %v2288_v53  ;;  %v537_v53 = vunpack.c.l.b16 %v210_v43  ;;  %1621 = vmatprep.mubr.bf16.mxu1 %v600_v49  ;;  %v2333_v43 = vld [vmem:[%s2997_s1 + $0x338] sm:$0xff]  }
  0x54   :  { %2095 = vmatpush3.bf16.msra.mxu0 %v2289_v55  ;;  %v553_v55 = vunpack.c.l.b16 %v226_v44 }
  0x55   :  { %2117 = vmatpush3.bf16.msra.mxu1 %v2290_v56  ;;  %2096 = vmatprep.subr.bf16.mxu0 %v2291_v57  ;;  %v578_v56 = vsel %vm557_vm0, %v577_v47, %v534_v26  ;;  %v2308_v57 = vld [vmem:[%s2997_s1 + $0x3c8] sm:$0xff]   ;;  %v2327_v26 = vld [vmem:[%s2997_s1 + $0x370] sm:$0xff]  }
  0x56   :  { %2118 = vmatprep.subr.bf16.mxu1 %v2292_v58  ;;  %v164_v58 = vrot.slane %v2792_v39, %v2556_v41  ;;  %v2311_v41 = vld [vmem:[%s2997_s1 + $0x350] sm:$0xff]   ;;  %v2320_v39 = vld [vmem:[%s2997_s1 + $0x3e0] sm:$0xff]  }
  0x58   :  { %2097 = vmatpush3.bf16.msra.mxu0 %v2293_v25  ;;  %v212_v25 = vpack.c.bf16 %v100_v37, %v100_v37  ;;  %v2332_v37 = vld [vmem:[%s2997_s1 + $0x3f8] sm:$0xff]  }
  0x59   :  { %2119 = vmatpush3.bf16.msra.mxu1 %v2294_v59  ;;  %2098 = vmatprep.subr.bf16.mxu0 %v2295_v60  ;;  %v599_v59 = vpack.c.b16 %v578_v56, %v578_v56  ;;  %v2309_v60 = vld [vmem:[%s2997_s1 + $0x308] sm:$0xff]  }
  0x5a   :  { %2120 = vmatprep.subr.bf16.mxu1 %v2296_v61  ;;  %v583_v61 = vrot.slane %v553_v55, 7  ;;  %v539_v4 = vunpack.c.l.b16 %v212_v25 }
  0x5c   :  { %2099 = vmatpush3.bf16.msra.mxu0 %v2297_v62  ;;  %v2310_v62 = vld [vmem:[%s2997_s1 + $0x388] sm:$0xff]  }
  0x5d   :  { %2121 = vmatpush3.bf16.msra.mxu1 %v2298_v63  ;;  %2100 = vmatprep.subr.bf16.mxu0 %v2299_v1  ;;  %v228_v63 = vpack.c.bf16 %v164_v58, %v164_v58  ;;  %v584_v1 = vsel %vm557_vm0, %v583_v61, %v537_v53 }
  0x5e   :  { %2122 = vmatprep.subr.bf16.mxu1 %v2300_v5  ;;  %v602_v3 = vpack.c.b16 %v584_v1, %v584_v1 }
  0x5f   :  { %v555_v5 = vunpack.c.l.b16 %v228_v63 }
  0x60   :  { %2101 = vmatpush3.bf16.msra.mxu0 %v2301_v30  ;;  %v2315_v30 = vld [vmem:[%s2997_s1 + $0x358] sm:$0xff]  }
  0x61   :  { %2123 = vmatpush3.bf16.msra.mxu1 %v2302_v32  ;;  %2130 = vmatprep.subr.bf16.mxu0 %v2303_v19  ;;  %v587_v38 = vrot.slane %v555_v5, 7  ;;  %v2317_v32 = vld [vmem:[%s2997_s1 + $0x318] sm:$0xff]   ;;  %v2323_v19 = vld [vmem:[%s2997_s1 + $0x368] sm:$0xff]  }
  0x62   :  { %2152 = vmatprep.subr.bf16.mxu1 %v2304_v36  ;;  %v2326_v36 = vld [vmem:[%s2997_s1 + $0x3a8] sm:$0xff]  }
  0x63   :  { %1582 = vmatmul.mubr.bf16.vlgmr.msra.gmra.mrb[8].mxu0 %v597_v50  ;;  %v588_v9 = vsel %vm557_vm0, %v587_v38, %v539_v4 }
  0x64   :  { %2131 = vmatpush3.bf16.msra.mxu0 %v2305_v35  ;;  %1622 = vmatmul.mubr.bf16.vlgmr.msra.gmra.mrb[8].mxu1 %v599_v59  ;;  %v604_v12 = vpack.c.b16 %v588_v9, %v588_v9  ;;  %v536_v35 = vunpack.c.l.b16 %v209_v24 }
  0x65   :  { %2132 = vmatprep.subr.bf16.mxu0 %v2307_v52  ;;  %2153 = vmatpush3.bf16.msra.mxu1 %v2306_v48 }
  0x66   :  { %2154 = vmatprep.subr.bf16.mxu1 %v2308_v57  ;;  %1661 = vmatprep.mubr.bf16.mxu0 %v602_v3  ;;  %v582_v44 = vsel %vm557_vm0, %v581_v27, %v536_v35 }
  0x67   :  { %1701 = vmatprep.mubr.bf16.mxu1 %v604_v12 }
  0x68   :  { %2133 = vmatpush3.bf16.msra.mxu0 %v2309_v60 }
  0x69   :  { %2134 = vmatprep.subr.bf16.mxu0 %v2311_v41  ;;  %2155 = vmatpush3.bf16.msra.mxu1 %v2310_v62 }
  0x6a   :  { %2156 = vmatprep.subr.bf16.mxu1 %v2312_v2 }
  0x6c   :  { %2135 = vmatpush3.bf16.msra.mxu0 %v2313_v6 }
  0x6d   :  { %2136 = vmatprep.subr.bf16.mxu0 %v2315_v30  ;;  %2157 = vmatpush3.bf16.msra.mxu1 %v2314_v7 }
  0x6e   :  { %2158 = vmatprep.subr.bf16.mxu1 %v2316_v8 }
  0x70   :  { %2137 = vmatpush3.bf16.msra.mxu0 %v2317_v32 }
  0x71   :  { %2138 = vmatprep.subr.bf16.mxu0 %v2319_v14  ;;  %2159 = vmatpush3.bf16.msra.mxu1 %v2318_v13 }
  0x72   :  { %2160 = vmatprep.subr.bf16.mxu1 %v2320_v39 }
  0x74   :  { %2139 = vmatpush3.bf16.msra.mxu0 %v2321_v16 }
  0x75   :  { %2140 = vmatprep.subr.bf16.mxu0 %v2323_v19  ;;  %2161 = vmatpush3.bf16.msra.mxu1 %v2322_v17 }
  0x76   :  { %2162 = vmatprep.subr.bf16.mxu1 %v2324_v20 }
  0x78   :  { %2141 = vmatpush3.bf16.msra.mxu0 %v2325_v51 }
  0x79   :  { %2142 = vmatprep.subr.bf16.mxu0 %v2327_v26  ;;  %2163 = vmatpush3.bf16.msra.mxu1 %v2326_v36 }
  0x7a   :  { %2164 = vmatprep.subr.bf16.mxu1 %v2328_v54 }
  0x7c   :  { %2143 = vmatpush3.bf16.msra.mxu0 %v2329_v0 }
  0x7d   :  { %13 = vsyncpa [#allocation5], 0  ;;  %2144 = vmatprep.subr.bf16.mxu0 %v2331_v31  ;;  %2165 = vmatpush3.bf16.msra.mxu1 %v2330_v33  ;;  %v2334_v45 = vld [vmem:[%s2997_s1 + $0x3b8] sm:$0xff]   ;;  %v586_v46 = vsel %vm557_vm0, %v585_v29, %v538_v42  ;;  %v601_v40 = vpack.c.b16 %v582_v44, %v582_v44  ;;  %v2335_v48 = vld [vmem:[%s2999_s3] sm:$0xff]   ;;  %v2393_v49 = vmov 0.0   ;;  %vm2394_vm1 = vmmov 0  }
  0x7e   :  { %2166 = vmatprep.subr.bf16.mxu1 %v2332_v37  ;;  %v603_v47 = vpack.c.b16 %v586_v46, %v586_v46  ;;  %v2336_v50 = vld [vmem:[%s2999_s3 + $0x8] sm:$0xff]   ;;  %v2337_v52 = vld [vmem:[%s2999_s3 + $0x10] sm:$0xff]   ;;  %v2338_v53 = vld [vmem:[%s2999_s3 + $0x18] sm:$0xff]   ;;  %vm1824_vm2 = vcmask 1041408   ;;  %s2395_s10 = smov [#allocation2]  }
  0x7f   :  { %v2339_v55 = vld [vmem:[%s2999_s3 + $0x20] sm:$0xff]   ;;  %v2340_v56 = vld [vmem:[%s2999_s3 + $0x28] sm:$0xff]   ;;  %v2341_v57 = vld [vmem:[%s2999_s3 + $0x30] sm:$0xff]   ;;  %s1838_s11 = sshll.u32 %s2395_s10, 4  ;;  %s1839_s11 = int_to_ptr.vmem [resolvable:$true] %s1838_s11 }
  0x80   :  { %2145 = vmatpush3.bf16.msra.mxu0 %v2333_v43  ;;  %v2342_v58 = vld [vmem:[%s2999_s3 + $0x38] sm:$0xff]   ;;  %v1860_v60 = vld [vmem:[%s2998_s2] ss:$0 sm:$0xff]  ;;  %s2345_s12 = scalar_lea.vmem %s1839_s11, 32  ;;  %p2350_p1 = scmp.lt.s32.totalorder %s1839_s11, %s1839_s11 }
  0x81   :  { %2167 = vmatpush3.bf16.msra.mxu1 %v2334_v45  ;;  %2183 = vmatprep.subr.bf16.mxu0 %v2393_v49  ;;  %v1989_v45 = vld [vmem:[%s3000_s4] ss:$0 sm:$0xff]  ;;  %p2346_p0 = scmp.ne.s32.totalorder %s1839_s11, %s2345_s12  ;;  %p2351_p2 = scmp.lt.s32.totalorder %s2345_s12, %s2345_s12 }
  0x83   :  { %1662 = vmatmul.mubr.bf16.vlgmr.msra.gmra.mrb[12].mxu0 %v601_v40  ;;  %p2352_p3 = por %p2351_p2, %p2350_p1 }
  0x84   :  { %1702 = vmatmul.mubr.bf16.vlgmr.msra.gmra.mrb[12].mxu1 %v603_v47  ;;  %2184 = vmatpush3.bf16.msra.mxu0 %v2335_v48 }
  0x85   :  { %2185 = vmatprep.subr.bf16.mxu0 %v2393_v49  ;;  %2199 = vmatprep.mubr.msk.bf16.mxu0 %vm2394_vm1, %v2393_v49  ;;  %p2353_p4 = pnand %p2352_p3, %p2346_p0 }
  0x88   :  { %2186 = vmatpush3.bf16.msra.mxu0 %v2336_v50 }
  0x89   :  { %2187 = vmatprep.subr.bf16.mxu0 %v2393_v49 }
  0x8c   :  { %2188 = vmatpush3.bf16.msra.mxu0 %v2337_v52 }
  0x8d   :  { %2189 = vmatprep.subr.bf16.mxu0 %v2393_v49 }
  0x90   :  { %2190 = vmatpush3.bf16.msra.mxu0 %v2338_v53 }
  0x91   :  { %2191 = vmatprep.subr.bf16.mxu0 %v2393_v49 }
  0x94   :  { %2192 = vmatpush3.bf16.msra.mxu0 %v2339_v55 }
  0x95   :  { %2193 = vmatprep.subr.bf16.mxu0 %v2393_v49 }
  0x98   :  { %2194 = vmatpush3.bf16.msra.mxu0 %v2340_v56 }
  0x99   :  { %2195 = vmatprep.subr.bf16.mxu0 %v2393_v49 }
  0x9c   :  { %2196 = vmatpush3.bf16.msra.mxu0 %v2341_v57 }
  0x9d   :  { %2197 = vmatprep.subr.bf16.mxu0 %v2393_v49 }
  0xa0   :  { %2198 = vmatpush3.bf16.msra.mxu0 %v2342_v58 }
  0xf6   :  { %v2014_v25 = vpop.f32.mrb[0].mxu0 }
  0xf7   :  { %v2036_v59 = vpop.f32.mrb[0].mxu1  ;;  %v2015_v61 = vpop.f32.mrb[1].mxu0 }
  0xf8   :  { %v2037_v62 = vpop.f32.mrb[1].mxu1  ;;  %v2016_v63 = vadd.f32 %v2015_v61, %v2014_v25  ;;  %v2017_v1 = vpop.f32.mrb[2].mxu0 }
  0xf9   :  { %v2038_v41 = vadd.f32 %v2037_v62, %v2036_v59  ;;  %v2039_v2 = vpop.f32.mrb[2].mxu1  ;;  %v2018_v3 = vpop.f32.mrb[3].mxu0 }
  0xfa   :  { %v2040_v4 = vpop.f32.mrb[3].mxu1  ;;  %v1424_v5 = vadd.f32 %v2016_v63, %v1860_v60 }
  0xfc   :  { %v1464_v6 = vadd.f32 %v2038_v41, %v1424_v5 }
 0x116   :  { %v2058_v7 = vpop.f32.mrb[4].mxu0 }
 0x117   :  { %v2080_v38 = vpop.f32.mrb[4].mxu1  ;;  %v2059_v30 = vpop.f32.mrb[5].mxu0 }
 0x118   :  { %v2081_v8 = vpop.f32.mrb[5].mxu1  ;;  %v2060_v9 = vadd.f32 %v2059_v30, %v2058_v7  ;;  %v2061_v11 = vpop.f32.mrb[6].mxu0 }
 0x119   :  { %v2082_v10 = vadd.f32 %v2081_v8, %v2080_v38  ;;  %v2083_v32 = vpop.f32.mrb[6].mxu1  ;;  %v2062_v12 = vpop.f32.mrb[7].mxu0 }
 0x11a   :  { %v2084_v13 = vpop.f32.mrb[7].mxu1  ;;  %v1504_v14 = vadd.f32 %v2060_v9, %v1464_v6 }
 0x11c   :  { %v1544_v39 = vadd.f32 %v2082_v10, %v1504_v14 }
 0x136   :  { %v2102_v34 = vpop.f32.mrb[8].mxu0 }
 0x137   :  { %v2103_v15 = vpop.f32.mrb[9].mxu0  ;;  %v2124_v16 = vpop.f32.mrb[8].mxu1 }
 0x138   :  { %v2104_v17 = vadd.f32 %v2103_v15, %v2102_v34  ;;  %v2105_v18 = vpop.f32.mrb[10].mxu0  ;;  %v2125_v19 = vpop.f32.mrb[9].mxu1 }
 0x139   :  { %v2106_v20 = vpop.f32.mrb[11].mxu0  ;;  %v2126_v22 = vadd.f32 %v2125_v19, %v2124_v16  ;;  %v2127_v23 = vpop.f32.mrb[10].mxu1 }
 0x13a   :  { %v1584_v21 = vadd.f32 %v2104_v17, %v1544_v39  ;;  %v2128_v51 = vpop.f32.mrb[11].mxu1 }
 0x13c   :  { %v1624_v36 = vadd.f32 %v2126_v22, %v1584_v21 }
 0x156   :  { %v2146_v24 = vpop.f32.mrb[12].mxu0 }
 0x157   :  { %v2147_v26 = vpop.f32.mrb[13].mxu0  ;;  %v2168_v54 = vpop.f32.mrb[12].mxu1 }
 0x158   :  { %v2148_v0 = vadd.f32 %v2147_v26, %v2146_v24  ;;  %v2149_v27 = vpop.f32.mrb[14].mxu0  ;;  %v2169_v28 = vpop.f32.mrb[13].mxu1 }
 0x159   :  { %v2150_v29 = vpop.f32.mrb[15].mxu0  ;;  %v2170_v33 = vadd.f32 %v2169_v28, %v2168_v54  ;;  %v2171_v35 = vpop.f32.mrb[14].mxu1 }
 0x15a   :  { %v1664_v31 = vadd.f32 %v2148_v0, %v1624_v36  ;;  %v2172_v37 = vpop.f32.mrb[15].mxu1 }
 0x15c   :  { %v1704_v42 = vadd.f32 %v2170_v33, %v1664_v31 }
 0x15e   :  { %v1709_v43 = vmax.f32 %v1704_v42, 0.0 }
 0x160   :  { %v1711_v44 = vpack.c.bf16 %v1709_v43, %v1709_v43  ;;  %1710 = vst [vmem:[#allocation2] sm:$0x3] %v1709_v43 }
 0x162   :  { %2200 = vmatmul.mubr.bf16.vlgmr.msra.gmra.mrb[16].mxu0 %v1711_v44 }
 0x235   :  { %v1817_v46 = vpop.f32.mrb[16].mxu0 }
 0x236   :  { %v1818_v40 = vadd.f32 %v1989_v45, %v1817_v46  ;;  %v2201_v47 = vpop.f32.mrb[17].mxu0 }
 0x237   :  { %v1820_v48 = vpop.f32.mrb[18].mxu0 }
 0x238   :  { %v2202_v49 = vpop.f32.mrb[19].mxu0  ;;  %v1823_v50 = vmul.f32 %v1818_v40, %v1818_v40 }
 0x23a   :  { %v1825_v52 = vsel %vm1824_vm2, %v1823_v50, 0.0 }
 0x23b   :  { %1826 = vadd.xlane.f32.xlu0 %v1825_v52 }
 0x23c   :  { %2356 = shalt.err (!%p2353_p4)
}
 0x23d   :  { %s2357_s14 = scalar_lea.hbm %s3001_s5, 32 }
 0x23e   :  { %p2358_p5 = scmp.ne.s32.totalorder %s3001_s5, %s2357_s14  ;;  %p2361_p6 = scmp.lt.u32.totalorder %s2357_s14, %s3001_s5 }
 0x240   :  { %p2363_p7 = pnand %p2361_p6, %p2358_p5 }
 0x242   :  { %2366 = shalt.err (!%p2363_p7)
}
 0x243   :  { %1841 = dma.vmem_to_hbm [thread:$0]  %s1839_s11, 32, %s3001_s5, [#allocation3]  }
 0x244   :  { %s2396_s21 = smov [#allocation4]  }
 0x245   :  { %s1848_s1 = sshll.u32 %s2396_s21, 4  ;;  %s1849_s1 = int_to_ptr.vmem [resolvable:$true] %s1848_s1 }
 0x246   :  { %s2367_s22 = scalar_lea.vmem %s1849_s1, 32  ;;  %p2372_p9 = scmp.lt.s32.totalorder %s1849_s1, %s1849_s1 }
 0x247   :  { %p2368_p8 = scmp.ne.s32.totalorder %s1849_s1, %s2367_s22  ;;  %p2373_p10 = scmp.lt.s32.totalorder %s2367_s22, %s2367_s22 }
 0x249   :  { %p2374_p11 = por %p2373_p10, %p2372_p9 }
 0x24b   :  { %p2375_p12 = pnand %p2374_p11, %p2368_p8 }
 0x2c8   :  { %v1827_v53 = vpop.xlane.xlu0 %1826 }
 0x2c9   :  { %v1828_v55 = vmax.f32 %v1827_v53, 1e-24 }
 0x2cb   :  { %2343 = vrsqrt.f32 %v1828_v55 }
 0x2d5   :  { %v2344_v56 = vpop.eup %2343 }
 0x2d6   :  { %v1830_v57 = vmul.f32 %v2344_v56, %v1818_v40 }
 0x2d8   :  { %1831 = vst [vmem:[#allocation4] sm:$0x3] %v1830_v57 }
 0x2d9   :  { %2378 = shalt.err (!%p2375_p12)
}
 0x2da   :  { %s2379_s5 = scalar_lea.hbm %s3002_s6, 32 }
 0x2db   :  { %p2380_p13 = scmp.ne.s32.totalorder %s3002_s6, %s2379_s5  ;;  %p2383_p0 = scmp.lt.u32.totalorder %s2379_s5, %s3002_s6 }
 0x2dd   :  { %p2385_p1 = pnand %p2383_p0, %p2380_p13 }
 0x2df   :  { %2388 = shalt.err (!%p2385_p1)
}
 0x2e0   :  { %1851 = dma.vmem_to_hbm [thread:$0]  %s1849_s1, 32, %s3002_s6, [#allocation5]  }
 0x2e1   :  { %2389 = dma.done.wait [#allocation3], 32  }
 0x2e2   :  { %2390 = vsyncadd [#allocation3], 4294967264 }
 0x2e3   :  { %2391 = dma.done.wait [#allocation5], 32  }
 0x2e4   :  { %2392 = vsyncadd [#allocation5], 4294967264 }
 0x2e5   :  { %1858 = vsyncpa [#allocation3], 1 }
 0x2e6   :  { %1859 = vsyncpa [#allocation5], 1 }

</bundles_post_ra>
